<compile_context>
chip_gen: v7x
topology: tpu7x:2x2x1
jax: 0.10.0
libtpu: 0.0.40
codegen_flags: <defaults>
</compile_context>

<pallas_src>
import functools

import jax
import jax.numpy as jnp
from jax.experimental import pallas as pl
from jax.experimental.pallas import tpu as pltpu


def _leaky_relu(x, slope=0.02):
    # max-form leaky ReLU; identical to the where-form for 0 < slope < 1.
    return jnp.maximum(x, slope * x)


def _round_up(x, m):
    return -(-x // m) * m


def _im_generator_kernel(
    pts_ref,    # (1, point_dim, tm) f32   feature-major point block
    zb_ref,     # (1, gf8, 1)        f32   z folded through layer 1 (per batch)
    w1pt_ref,   # (gf8, point_dim)   f32
    w23t_ref,   # (2, gf8, gf8)      bf16  stacked W2^T, W3^T
    w4t_ref,    # (gf4, gf8)         bf16
    w5t_ref,    # (gf2, gf4)         bf16
    w6t_ref,    # (gf1, gf2)         bf16
    cvec_ref,   # (2*gf8+gf4+gf2+2*gf1+1, 1) f32  packed b2|b3|b4|b5|b6|w7|b7
    o_ref,      # (1, 1, 1, tm)      f32   lane-dense output row
):
    gf8 = w1pt_ref.shape[0]
    gf4 = w4t_ref.shape[0]
    gf2 = w5t_ref.shape[0]
    gf1 = w6t_ref.shape[0]

    # Static offsets into the packed constant column (static slices, tiny loads).
    o_b3 = gf8
    o_b4 = o_b3 + gf8
    o_b5 = o_b4 + gf4
    o_b6 = o_b5 + gf2
    o_w7 = o_b6 + gf1
    o_b7 = o_w7 + gf1

    b2 = cvec_ref[0:o_b3, :]
    b3 = cvec_ref[o_b3:o_b4, :]
    b4 = cvec_ref[o_b4:o_b5, :]
    b5 = cvec_ref[o_b5:o_b6, :]
    b6 = cvec_ref[o_b6:o_w7, :]
    w7 = cvec_ref[o_w7:o_b7, :]
    b7 = cvec_ref[o_b7:o_b7 + 1, :]

    def act(v):
        # f32 accumulate + bias done by the caller; single cast to bf16, then
        # leaky-ReLU in bf16 (packed VALU on v6e/v7x) feeds the next dot directly.
        return _leaky_relu(v.astype(jnp.bfloat16))

    x = pts_ref[0]                                    # (point_dim, tm) f32
    zb = zb_ref[0]                                    # (gf8, 1) f32

    # layer 1: tiny-K (point_dim) matmul in f32; z contribution pre-folded into zb.
    h = jnp.dot(w1pt_ref[...], x, preferred_element_type=jnp.float32) + zb
    h = act(h)                                        # (gf8, tm) bf16

    # layers 2-3: 128x128 bf16 operands, f32 MXU accumulation.
    h = act(jnp.dot(w23t_ref[0], h, preferred_element_type=jnp.float32) + b2)
    h = act(jnp.dot(w23t_ref[1], h, preferred_element_type=jnp.float32) + b3)

    # tail layers 4-6: feature-major so the narrow outputs stay lane-dense.
    h = act(jnp.dot(w4t_ref[...], h, preferred_element_type=jnp.float32) + b4)  # (gf4, tm)
    h = act(jnp.dot(w5t_ref[...], h, preferred_element_type=jnp.float32) + b5)  # (gf2, tm)
    h = act(jnp.dot(w6t_ref[...], h, preferred_element_type=jnp.float32) + b6)  # (gf1, tm)

    # layer 7 (gf1 -> 1): VPU multiply + sublane reduce (keeps MXU free), f32,
    # producing a lane-dense (1, tm) row.
    out = jnp.sum(h.astype(jnp.float32) * w7, axis=0, keepdims=True) + b7
    o_ref[...] = out.reshape(o_ref.shape)


@functools.partial(jax.jit, static_argnames=("tm",))
def im_generator_forward(points, camera_param, z, params, tm=2048):
    """points: (B, N, point_dim); camera_param: (B, camera_dim) (unused, as in the
    torch forward); z: (B, z_dim). Returns (B, N, 1) float32."""
    del camera_param  # not used by the torch forward either
    assert tm % 128 == 0, "row tile must be a multiple of 128 (lane-dense tiles)"
    B, N, pdim = points.shape
    (w1, b1), (w2, b2), (w3, b3), (w4, b4), (w5, b5), (w6, b6), (w7, b7) = params
    gf8, gf4, gf2, gf1 = w1.shape[1], w4.shape[1], w5.shape[1], w6.shape[1]

    # Row tile: as large as requested (amortizes per-step overhead), but never
    # larger than the 128-aligned point count; keep >= 2 grid steps when the
    # shape allows it so both TensorCores stay busy on dual-core parts (v7x).
    tm_eff = min(tm, _round_up(N, 128))
    if B * pl.cdiv(N, tm_eff) < 2 and N > 128:
        tm_eff = _round_up(_round_up(N, 2) // 2, 128)
    n_tiles = pl.cdiv(N, tm_eff)
    n_pad = n_tiles * tm_eff

    # Fold z through layer 1 outside the kernel (tiny (B,z_dim)x(z_dim,gf8) matmul):
    # removes the pointz concat / per-row z broadcast from the hot path.
    hi = jax.lax.Precision.HIGHEST
    z_bias = (jnp.dot(z, w1[pdim:, :], precision=hi) + b1)[:, :, None]   # (B, gf8, 1)

    # Feature-major weights: every layer computes W^T @ X.
    bf16 = jnp.bfloat16
    w1pt = w1[:pdim, :].T                                   # (gf8, pdim) f32
    w23t = jnp.stack([w2.T, w3.T]).astype(bf16)             # (2, gf8, gf8)
    w4t = w4.T.astype(bf16)                                 # (gf4, gf8)
    w5t = w5.T.astype(bf16)                                 # (gf2, gf4)
    w6t = w6.T.astype(bf16)                                 # (gf1, gf2)
    # Packed f32 constant column: b2|b3|b4|b5|b6|w7|b7 -> a single operand.
    cvec = jnp.concatenate(
        [b2.reshape(gf8, 1), b3.reshape(gf8, 1), b4.reshape(gf4, 1),
         b5.reshape(gf2, 1), b6.reshape(gf1, 1), w7.reshape(gf1, 1),
         b7.reshape(1, 1)], axis=0).astype(jnp.float32)

    # Pad N to the tile and switch to feature-major (B, pdim, n_pad): lane-dense
    # (pdim, tm) input tiles, no in-kernel transpose.
    if n_pad != N:
        points = jnp.pad(points, ((0, 0), (0, n_pad - N), (0, 0)))
    pts_fm = jnp.transpose(points, (0, 2, 1))               # (B, pdim, n_pad)

    consts = [w1pt, w23t, w4t, w5t, w6t, cvec]

    def const_spec(arr):
        nd = arr.ndim
        return pl.BlockSpec(arr.shape, lambda b, i, nd=nd: (0,) * nd)

    in_specs = [
        pl.BlockSpec((1, pdim, tm_eff), lambda b, i: (b, 0, i)),
        pl.BlockSpec((1, gf8, 1), lambda b, i: (b, 0, 0)),
    ] + [const_spec(c) for c in consts]

    flops_per_pt = 2 * (pdim * gf8 + gf8 * gf8 + gf8 * gf8 + gf8 * gf4
                        + gf4 * gf2 + gf2 * gf1 + gf1)
    const_bytes = sum(int(c.size) * c.dtype.itemsize for c in consts)
    cost = pl.CostEstimate(
        flops=int(B * n_pad * flops_per_pt),
        transcendentals=0,
        bytes_accessed=int(B * n_pad * (pdim + 1) * 4 + B * gf8 * 4 + const_bytes),
    )

    out = pl.pallas_call(
        _im_generator_kernel,
        out_shape=jax.ShapeDtypeStruct((B, n_tiles, 1, tm_eff), jnp.float32),
        grid_spec=pltpu.PrefetchScalarGridSpec(
            num_scalar_prefetch=0,
            grid=(B, n_tiles),
            in_specs=in_specs,
            out_specs=pl.BlockSpec((1, 1, 1, tm_eff), lambda b, i: (b, i, 0, 0)),
        ),
        compiler_params=pltpu.CompilerParams(
            dimension_semantics=("parallel", "parallel"),
            vmem_limit_bytes=32 * 1024 * 1024,
        ),
        cost_estimate=cost,
    )(pts_fm, z_bias, *consts)

    out = out.reshape(B, n_pad)           # contiguous bitcast of (B, n_tiles, 1, tm)
    if n_pad != N:
        out = out[:, :N]
    return out.reshape(B, N, 1)


def init_params(key, z_dim, point_dim, gf_dim):
    """Deterministic init matching the torch module:
    weights ~ N(0, 0.02) (last layer mean 1e-5), biases = 0.
    Weights are stored transposed, i.e. (in, out), ready for x @ W."""
    gf8, gf4, gf2, gf1 = gf_dim * 8, gf_dim * 4, gf_dim * 2, gf_dim
    dims = [
        (z_dim + point_dim, gf8),
        (gf8, gf8),
        (gf8, gf8),
        (gf8, gf4),
        (gf4, gf2),
        (gf2, gf1),
        (gf1, 1),
    ]
    keys = jax.random.split(key, len(dims))
    params = []
    for idx, ((din, dout), k) in enumerate(zip(dims, keys)):
        mean = 1e-5 if idx == len(dims) - 1 else 0.0
        w = mean + 0.02 * jax.random.normal(k, (din, dout), dtype=jnp.float32)
        b = jnp.zeros((1, dout), dtype=jnp.float32)
        params.append((w, b))
    return tuple(params)


def _reference_forward(points, z, params):
    """Plain-JAX reference mirroring the kernel's precision policy
    (layer 1 & 7 f32; layers 2-6 bf16 operands + bf16 leaky-ReLU with f32
    MXU accumulation)."""
    B, N, pdim = points.shape
    (w1, b1), *mid, (w7, b7) = params
    hi = jax.lax.Precision.HIGHEST
    zb = jnp.dot(z, w1[pdim:, :], precision=hi) + b1                   # (B, gf8)
    h = jnp.dot(points, w1[:pdim, :], precision=hi) + zb[:, None, :]   # f32
    h = _leaky_relu(h.astype(jnp.bfloat16))
    for w, b in mid:
        h = jnp.dot(h, w.astype(jnp.bfloat16),
                    preferred_element_type=jnp.float32) + b
        h = _leaky_relu(h.astype(jnp.bfloat16))
    return (jnp.sum(h.astype(jnp.float32) * w7.reshape(1, 1, -1),
                    axis=-1, keepdims=True) + b7)


if __name__ == "__main__":
    # Small shapes consistent with the module's forward; N is intentionally NOT a
    # multiple of the row tile to exercise the padding path.
    B, N = 2, 2000
    z_dim, point_dim, camera_dim, gf_dim = 32, 3, 16, 16

    key = jax.random.PRNGKey(0)
    kp, kz, kc, kw = jax.random.split(key, 4)
    points = jax.random.normal(kp, (B, N, point_dim), dtype=jnp.float32)
    z = jax.random.normal(kz, (B, z_dim), dtype=jnp.float32)
    camera_param = jax.random.normal(kc, (B, camera_dim), dtype=jnp.float32)

    params = init_params(kw, z_dim, point_dim, gf_dim)

    out = im_generator_forward(points, camera_param, z, params, tm=2048)
    out = jax.block_until_ready(out)
    assert out.shape == (B, N, 1)

    # NOTE: layers 2-6 use bf16 operands (f32 accumulation); this validates against
    # a same-policy JAX reference, not bit-level parity with the torch f32 model.
    ref = _reference_forward(points, z, params)
    err = float(jnp.max(jnp.abs(out - ref)))
    scale = float(jnp.max(jnp.abs(ref)))
    assert err <= 5e-2 * scale + 1e-8, (
        f"mismatch vs reference: max abs diff {err:.3e}, ref scale {scale:.3e}")

    # NOTE: as in the torch module, the output is linear (no sigmoid/clamp on layer 7).
    print("KERNEL_OK")
</pallas_src>

<mosaic_0001>
module attributes {stable_mosaic.version = 11 : i64} {
  func.func @_im_generator_kernel(%arg0: i32, %arg1: i32, %arg2: memref<1x3x2048xf32, #tpu.memory_space<vmem>>, %arg3: memref<1x128x1xf32, #tpu.memory_space<vmem>>, %arg4: memref<128x3xf32, #tpu.memory_space<vmem>>, %arg5: memref<2x128x128xbf16, #tpu.memory_space<vmem>>, %arg6: memref<64x128xbf16, #tpu.memory_space<vmem>>, %arg7: memref<32x64xbf16, #tpu.memory_space<vmem>>, %arg8: memref<16x32xbf16, #tpu.memory_space<vmem>>, %arg9: memref<385x1xf32, #tpu.memory_space<vmem>>, %arg10: memref<1x1x1x2048xf32, #tpu.memory_space<vmem>>) attributes {dimension_semantics = [#tpu.dimension_semantics<parallel>, #tpu.dimension_semantics<parallel>], iteration_bounds = array<i64: 2, 1>, scalar_prefetch = 0 : i64, scratch_operands = 0 : i64, tpu.core_type = #tpu.core_type<tc>, window_params = [{transform_indices = @transform_0, window_bounds = array<i64: 1, 3, 2048>}, {transform_indices = @transform_1, window_bounds = array<i64: 1, 128, 1>}, {pipeline_mode = #tpu.pipeline_mode<synchronous>, transform_indices = @transform_2, window_bounds = array<i64: 128, 3>}, {pipeline_mode = #tpu.pipeline_mode<synchronous>, transform_indices = @transform_3, window_bounds = array<i64: 2, 128, 128>}, {pipeline_mode = #tpu.pipeline_mode<synchronous>, transform_indices = @transform_4, window_bounds = array<i64: 64, 128>}, {pipeline_mode = #tpu.pipeline_mode<synchronous>, transform_indices = @transform_5, window_bounds = array<i64: 32, 64>}, {pipeline_mode = #tpu.pipeline_mode<synchronous>, transform_indices = @transform_6, window_bounds = array<i64: 16, 32>}, {pipeline_mode = #tpu.pipeline_mode<synchronous>, transform_indices = @transform_7, window_bounds = array<i64: 385, 1>}, {transform_indices = @transform_8, window_bounds = array<i64: 1, 1, 1, 2048>}]} {
    %c0 = arith.constant 0 : index
    %c0_0 = arith.constant 0 : index
    %0 = vector.load %arg9[%c0, %c0_0] : memref<385x1xf32, #tpu.memory_space<vmem>>, vector<128x1xf32>
    %c128 = arith.constant 128 : index
    %c0_1 = arith.constant 0 : index
    %1 = vector.load %arg9[%c128, %c0_1] : memref<385x1xf32, #tpu.memory_space<vmem>>, vector<128x1xf32>
    %c256 = arith.constant 256 : index
    %c0_2 = arith.constant 0 : index
    %2 = vector.load %arg9[%c256, %c0_2] : memref<385x1xf32, #tpu.memory_space<vmem>>, vector<64x1xf32>
    %c320 = arith.constant 320 : index
    %c0_3 = arith.constant 0 : index
    %3 = vector.load %arg9[%c320, %c0_3] : memref<385x1xf32, #tpu.memory_space<vmem>>, vector<32x1xf32>
    %c352 = arith.constant 352 : index
    %c0_4 = arith.constant 0 : index
    %4 = vector.load %arg9[%c352, %c0_4] : memref<385x1xf32, #tpu.memory_space<vmem>>, vector<16x1xf32>
    %c368 = arith.constant 368 : index
    %c0_5 = arith.constant 0 : index
    %5 = vector.load %arg9[%c368, %c0_5] : memref<385x1xf32, #tpu.memory_space<vmem>>, vector<16x1xf32>
    %c384 = arith.constant 384 : index
    %c0_6 = arith.constant 0 : index
    %6 = vector.load %arg9[%c384, %c0_6] : memref<385x1xf32, #tpu.memory_space<vmem>>, vector<1x1xf32>
    %c0_7 = arith.constant 0 : index
    %c0_8 = arith.constant 0 : index
    %c0_9 = arith.constant 0 : index
    %7 = vector.load %arg2[%c0_7, %c0_8, %c0_9] : memref<1x3x2048xf32, #tpu.memory_space<vmem>>, vector<1x3x2048xf32>
    %8 = vector.shape_cast %7 : vector<1x3x2048xf32> to vector<3x2048xf32>
    %c0_10 = arith.constant 0 : index
    %c0_11 = arith.constant 0 : index
    %c0_12 = arith.constant 0 : index
    %9 = vector.load %arg3[%c0_10, %c0_11, %c0_12] : memref<1x128x1xf32, #tpu.memory_space<vmem>>, vector<1x128x1xf32>
    %10 = vector.shape_cast %9 : vector<1x128x1xf32> to vector<128x1xf32>
    %c0_13 = arith.constant 0 : index
    %c0_14 = arith.constant 0 : index
    %11 = vector.load %arg4[%c0_13, %c0_14] : memref<128x3xf32, #tpu.memory_space<vmem>>, vector<128x3xf32>
    %cst = arith.constant dense<0.000000e+00> : vector<128x2048xf32>
    %12 = tpu.matmul %11, %8, %cst {dimension_numbers = #tpu.dot_dimension_numbers<[1], [0], [0], [1], [0, 0, 1, 1], [], []>} : vector<128x3xf32>, vector<3x2048xf32>, vector<128x2048xf32> -> vector<128x2048xf32>
    %13 = vector.broadcast %10 : vector<128x1xf32> to vector<128x2048xf32>
    %14 = arith.addf %12, %13 : vector<128x2048xf32>
    %15 = arith.truncf %14 : vector<128x2048xf32> to vector<128x2048xbf16>
    %cst_15 = arith.constant 2.001950e-02 : bf16
    %16 = vector.broadcast %cst_15 : bf16 to vector<128x2048xbf16>
    %17 = arith.mulf %16, %15 : vector<128x2048xbf16>
    %18 = arith.maximumf %15, %17 : vector<128x2048xbf16>
    %c0_16 = arith.constant 0 : index
    %c0_17 = arith.constant 0 : index
    %c0_18 = arith.constant 0 : index
    %19 = vector.load %arg5[%c0_16, %c0_17, %c0_18] : memref<2x128x128xbf16, #tpu.memory_space<vmem>>, vector<1x128x128xbf16>
    %20 = vector.shape_cast %19 : vector<1x128x128xbf16> to vector<128x128xbf16>
    %cst_19 = arith.constant dense<0.000000e+00> : vector<128x2048xf32>
    %21 = tpu.matmul %20, %18, %cst_19 {dimension_numbers = #tpu.dot_dimension_numbers<[1], [0], [0], [1], [0, 0, 1, 1], [], []>} : vector<128x128xbf16>, vector<128x2048xbf16>, vector<128x2048xf32> -> vector<128x2048xf32>
    %22 = vector.broadcast %0 : vector<128x1xf32> to vector<128x2048xf32>
    %23 = arith.addf %21, %22 : vector<128x2048xf32>
    %24 = arith.truncf %23 : vector<128x2048xf32> to vector<128x2048xbf16>
    %cst_20 = arith.constant 2.001950e-02 : bf16
    %25 = vector.broadcast %cst_20 : bf16 to vector<128x2048xbf16>
    %26 = arith.mulf %25, %24 : vector<128x2048xbf16>
    %27 = arith.maximumf %24, %26 : vector<128x2048xbf16>
    %c1 = arith.constant 1 : index
    %c0_21 = arith.constant 0 : index
    %c0_22 = arith.constant 0 : index
    %28 = vector.load %arg5[%c1, %c0_21, %c0_22] : memref<2x128x128xbf16, #tpu.memory_space<vmem>>, vector<1x128x128xbf16>
    %29 = vector.shape_cast %28 : vector<1x128x128xbf16> to vector<128x128xbf16>
    %cst_23 = arith.constant dense<0.000000e+00> : vector<128x2048xf32>
    %30 = tpu.matmul %29, %27, %cst_23 {dimension_numbers = #tpu.dot_dimension_numbers<[1], [0], [0], [1], [0, 0, 1, 1], [], []>} : vector<128x128xbf16>, vector<128x2048xbf16>, vector<128x2048xf32> -> vector<128x2048xf32>
    %31 = vector.broadcast %1 : vector<128x1xf32> to vector<128x2048xf32>
    %32 = arith.addf %30, %31 : vector<128x2048xf32>
    %33 = arith.truncf %32 : vector<128x2048xf32> to vector<128x2048xbf16>
    %cst_24 = arith.constant 2.001950e-02 : bf16
    %34 = vector.broadcast %cst_24 : bf16 to vector<128x2048xbf16>
    %35 = arith.mulf %34, %33 : vector<128x2048xbf16>
    %36 = arith.maximumf %33, %35 : vector<128x2048xbf16>
    %c0_25 = arith.constant 0 : index
    %c0_26 = arith.constant 0 : index
    %37 = vector.load %arg6[%c0_25, %c0_26] : memref<64x128xbf16, #tpu.memory_space<vmem>>, vector<64x128xbf16>
    %cst_27 = arith.constant dense<0.000000e+00> : vector<64x2048xf32>
    %38 = tpu.matmul %37, %36, %cst_27 {dimension_numbers = #tpu.dot_dimension_numbers<[1], [0], [0], [1], [0, 0, 1, 1], [], []>} : vector<64x128xbf16>, vector<128x2048xbf16>, vector<64x2048xf32> -> vector<64x2048xf32>
    %39 = vector.broadcast %2 : vector<64x1xf32> to vector<64x2048xf32>
    %40 = arith.addf %38, %39 : vector<64x2048xf32>
    %41 = arith.truncf %40 : vector<64x2048xf32> to vector<64x2048xbf16>
    %cst_28 = arith.constant 2.001950e-02 : bf16
    %42 = vector.broadcast %cst_28 : bf16 to vector<64x2048xbf16>
    %43 = arith.mulf %42, %41 : vector<64x2048xbf16>
    %44 = arith.maximumf %41, %43 : vector<64x2048xbf16>
    %c0_29 = arith.constant 0 : index
    %c0_30 = arith.constant 0 : index
    %45 = vector.load %arg7[%c0_29, %c0_30] : memref<32x64xbf16, #tpu.memory_space<vmem>>, vector<32x64xbf16>
    %cst_31 = arith.constant dense<0.000000e+00> : vector<32x2048xf32>
    %46 = tpu.matmul %45, %44, %cst_31 {dimension_numbers = #tpu.dot_dimension_numbers<[1], [0], [0], [1], [0, 0, 1, 1], [], []>} : vector<32x64xbf16>, vector<64x2048xbf16>, vector<32x2048xf32> -> vector<32x2048xf32>
    %47 = vector.broadcast %3 : vector<32x1xf32> to vector<32x2048xf32>
    %48 = arith.addf %46, %47 : vector<32x2048xf32>
    %49 = arith.truncf %48 : vector<32x2048xf32> to vector<32x2048xbf16>
    %cst_32 = arith.constant 2.001950e-02 : bf16
    %50 = vector.broadcast %cst_32 : bf16 to vector<32x2048xbf16>
    %51 = arith.mulf %50, %49 : vector<32x2048xbf16>
    %52 = arith.maximumf %49, %51 : vector<32x2048xbf16>
    %c0_33 = arith.constant 0 : index
    %c0_34 = arith.constant 0 : index
    %53 = vector.load %arg8[%c0_33, %c0_34] : memref<16x32xbf16, #tpu.memory_space<vmem>>, vector<16x32xbf16>
    %cst_35 = arith.constant dense<0.000000e+00> : vector<16x2048xf32>
    %54 = tpu.matmul %53, %52, %cst_35 {dimension_numbers = #tpu.dot_dimension_numbers<[1], [0], [0], [1], [0, 0, 1, 1], [], []>} : vector<16x32xbf16>, vector<32x2048xbf16>, vector<16x2048xf32> -> vector<16x2048xf32>
    %55 = vector.broadcast %4 : vector<16x1xf32> to vector<16x2048xf32>
    %56 = arith.addf %54, %55 : vector<16x2048xf32>
    %57 = arith.truncf %56 : vector<16x2048xf32> to vector<16x2048xbf16>
    %cst_36 = arith.constant 2.001950e-02 : bf16
    %58 = vector.broadcast %cst_36 : bf16 to vector<16x2048xbf16>
    %59 = arith.mulf %58, %57 : vector<16x2048xbf16>
    %60 = arith.maximumf %57, %59 : vector<16x2048xbf16>
    %61 = arith.extf %60 : vector<16x2048xbf16> to vector<16x2048xf32>
    %62 = vector.broadcast %5 : vector<16x1xf32> to vector<16x2048xf32>
    %63 = arith.mulf %61, %62 : vector<16x2048xf32>
    %cst_37 = arith.constant dense<0.000000e+00> : vector<2048xf32>
    %64 = vector.multi_reduction <add>, %63, %cst_37 [0] : vector<16x2048xf32> to vector<2048xf32>
    %65 = vector.shape_cast %64 : vector<2048xf32> to vector<1x2048xf32>
    %66 = vector.broadcast %6 : vector<1x1xf32> to vector<1x2048xf32>
    %67 = arith.addf %65, %66 : vector<1x2048xf32>
    %68 = vector.shape_cast %67 : vector<1x2048xf32> to vector<1x1x1x2048xf32>
    %c0_38 = arith.constant 0 : index
    %c0_39 = arith.constant 0 : index
    %c0_40 = arith.constant 0 : index
    %c0_41 = arith.constant 0 : index
    %69 = vector.load %arg10[%c0_38, %c0_39, %c0_40, %c0_41] : memref<1x1x1x2048xf32, #tpu.memory_space<vmem>>, vector<1x1x1x2048xf32>
    tpu.vector_store %arg10[%c0_38, %c0_39, %c0_40, %c0_41], %68 {strides = array<i32>} : memref<1x1x1x2048xf32, #tpu.memory_space<vmem>>, vector<1x1x1x2048xf32>,
    return
  }
  func.func @transform_0(%arg0: i32, %arg1: i32) -> (i32, i32, i32) {
    %c0_i32 = arith.constant 0 : i32
    %c0_i32_0 = arith.constant 0 : i32
    return %arg0, %c0_i32, %arg1 : i32, i32, i32
  }
  func.func @transform_1(%arg0: i32, %arg1: i32) -> (i32, i32, i32) {
    %c0_i32 = arith.constant 0 : i32
    %c0_i32_0 = arith.constant 0 : i32
    %c0_i32_1 = arith.constant 0 : i32
    return %arg0, %c0_i32, %c0_i32_0 : i32, i32, i32
  }
  func.func @transform_2(%arg0: i32, %arg1: i32) -> (i32, i32) {
    %c0_i32 = arith.constant 0 : i32
    %c0_i32_0 = arith.constant 0 : i32
    %c0_i32_1 = arith.constant 0 : i32
    return %c0_i32, %c0_i32_0 : i32, i32
  }
  func.func @transform_3(%arg0: i32, %arg1: i32) -> (i32, i32, i32) {
    %c0_i32 = arith.constant 0 : i32
    %c0_i32_0 = arith.constant 0 : i32
    %c0_i32_1 = arith.constant 0 : i32
    %c0_i32_2 = arith.constant 0 : i32
    return %c0_i32, %c0_i32_0, %c0_i32_1 : i32, i32, i32
  }
  func.func @transform_4(%arg0: i32, %arg1: i32) -> (i32, i32) {
    %c0_i32 = arith.constant 0 : i32
    %c0_i32_0 = arith.constant 0 : i32
    %c0_i32_1 = arith.constant 0 : i32
    return %c0_i32, %c0_i32_0 : i32, i32
  }
  func.func @transform_5(%arg0: i32, %arg1: i32) -> (i32, i32) {
    %c0_i32 = arith.constant 0 : i32
    %c0_i32_0 = arith.constant 0 : i32
    %c0_i32_1 = arith.constant 0 : i32
    return %c0_i32, %c0_i32_0 : i32, i32
  }
  func.func @transform_6(%arg0: i32, %arg1: i32) -> (i32, i32) {
    %c0_i32 = arith.constant 0 : i32
    %c0_i32_0 = arith.constant 0 : i32
    %c0_i32_1 = arith.constant 0 : i32
    return %c0_i32, %c0_i32_0 : i32, i32
  }
  func.func @transform_7(%arg0: i32, %arg1: i32) -> (i32, i32) {
    %c0_i32 = arith.constant 0 : i32
    %c0_i32_0 = arith.constant 0 : i32
    %c0_i32_1 = arith.constant 0 : i32
    return %c0_i32, %c0_i32_0 : i32, i32
  }
  func.func @transform_8(%arg0: i32, %arg1: i32) -> (i32, i32, i32, i32) {
    %c0_i32 = arith.constant 0 : i32
    %c0_i32_0 = arith.constant 0 : i32
    %c0_i32_1 = arith.constant 0 : i32
    return %arg0, %arg1, %c0_i32, %c0_i32_0 : i32, i32, i32, i32
  }
}

</mosaic_0001>

<bundles_post_ra>
// kernel: im_generator_forward.1
= control target key start
LH: loop header
LB: loop body
LE: loop exit
PB: predicated region body
PF: predicated region fallthrough
CT: control target
= control target key end

     0   :  { %s7783_s27 = smov 0   ;;  %s7785_s28 = smov 0   ;;  %s10314_s0 = inlined_call_operand.vmem [shape: f32[2,3,2048], index: 0, kind: input, shape index: {}]   ;;  %s10315_s1 = inlined_call_operand.vmem [shape: f32[2,128,1], index: 1, kind: input, shape index: {}]   ;;  %s10316_s2 = inlined_call_operand.vmem [shape: f32[128,3], index: 2, kind: input, shape index: {}]   ;;  %s10317_s3 = inlined_call_operand.vmem [shape: bf16[2,128,128], index: 3, kind: input, shape index: {}]   ;;  %s10318_s4 = inlined_call_operand.vmem [shape: bf16[64,128], index: 4, kind: input, shape index: {}]   ;;  %s10319_s5 = inlined_call_operand.vmem [shape: bf16[32,64], index: 5, kind: input, shape index: {}]   ;;  %s10320_s6 = inlined_call_operand.vmem [shape: bf16[16,32], index: 6, kind: input, shape index: {}]   ;;  %s10321_s7 = inlined_call_operand.vmem [shape: f32[385,1], index: 7, kind: input, shape index: {}]   ;;  %s10322_s8 = inlined_call_operand.vmem [shape: f32[2,1,1,2048], index: 8, kind: output, shape index: {}]  }
   0x1   :  { %s7787_s29 = smov 0  }
   0x2 LB: > { %s30_s30 = sadd.s32 1, %s7729_s28  ;;  %p7414_p0 = scmp.ge.s32.totalorder %s7733_s29, 1  ;;  %s7733_s29 = sphi %s7787_s29, %s18_s29   ;;  %s7729_s28 = sphi %s7785_s28, %s10324_s28   ;;  %s7725_s27 = sphi %s7783_s27, %s10323_s27  }
   0x3   : > { %p32_p1 = scmp.ge.s32.totalorder %s30_s30, 2  ;;  %p293_p2 = scmp.lt.s32.totalorder %s7733_s29, 3 }
   0x5   : > { %s10326_s30 = smov (%p32_p1, %s30_s30), 0  ;;  %p294_p3 = pnand %p7414_p0, %p293_p2 }
   0x6   : > { %p340_p4 = scmp.lt.s32.totalorder (!%p294_p3), %s7725_s27, 1  ;;  %v7735_v0 = vmov (!%p294_p3), 0   ;;  %v7736_v1 = vmov (!%p294_p3), 0.0   ;;  %vm598_vm0 = vcmask (!%p294_p3), 1042432   ;;  %v7830_v11 = vld [vmem:[%s10316_s2] sm:$0xff] (!%p294_p3)  ;;  %vm549_vm1 = vcmask (!%p294_p3), 23552  }
   0x7   : > { %297 = sbr.rel (%p294_p3) target bundleno = 1807 (0x70f), region = 52  ;;  %7659 = vset.pattern.permute.xlu1 (!%p294_p3), %v7735_v0  ;;  %7658 = vset.pattern.permute.xlu0 (!%p294_p3), %v7735_v0  ;;  %v7846_v17 = vld [vmem:[%s10316_s2 + $0x8] sm:$0xff] (!%p294_p3)  ;;  %v7861_v20 = vld [vmem:[%s10316_s2 + $0x10] sm:$0xff] (!%p294_p3)  ;;  %v7882_v25 = vld [vmem:[%s10316_s2 + $0x18] sm:$0xff] (!%p294_p3)  ;;  %vm6050_vm2 = vcmask (!%p294_p3), 523264   ;;  %vm6594_vm3 = vcmask (!%p294_p3), 261120  }
   0x8   : > { %695 = vmatprep.mubr.f32.mxu0 (!%p294_p3), %v7736_v1  ;;  %856 = vmatprep.mubr.f32.mxu1 (!%p294_p3), %v7736_v1  ;;  %v7900_v30 = vld [vmem:[%s10316_s2 + $0x20] sm:$0xff] (!%p294_p3)  ;;  %v7914_v33 = vld [vmem:[%s10316_s2 + $0x28] sm:$0xff] (!%p294_p3)  ;;  %v7922_v36 = vld [vmem:[%s10316_s2 + $0x30] sm:$0xff] (!%p294_p3) }
   0x9   : > { %v365_v37 = vld [vmem:[%s10321_s7 + $0x8] sm:$0xff] (!%p294_p3)  ;;  %v364_v38 = vld [vmem:[%s10321_s7] sm:$0xff] (!%p294_p3)  ;;  %v7939_v39 = vld [vmem:[%s10316_s2 + $0x38] sm:$0xff] (!%p294_p3) }
   0xa   : > { %v367_v40 = vld [vmem:[%s10321_s7 + $0x18] sm:$0xff] (!%p294_p3)  ;;  %v366_v41 = vld [vmem:[%s10321_s7 + $0x10] sm:$0xff] (!%p294_p3)  ;;  %v7956_v42 = vld [vmem:[%s10316_s2 + $0x40] sm:$0xff] (!%p294_p3) }
   0xb   : > { %v369_v43 = vld [vmem:[%s10321_s7 + $0x28] sm:$0xff] (!%p294_p3)  ;;  %v368_v44 = vld [vmem:[%s10321_s7 + $0x20] sm:$0xff] (!%p294_p3)  ;;  %v371_v46 = vld [vmem:[%s10321_s7 + $0x38] sm:$0xff] (!%p294_p3) }
   0xc   : > { %v7978_v45 = vld [vmem:[%s10316_s2 + $0x48] sm:$0xff] (!%p294_p3)  ;;  %v370_v47 = vld [vmem:[%s10321_s7 + $0x30] sm:$0xff] (!%p294_p3)  ;;  %v372_v50 = vld [vmem:[%s10321_s7 + $0x40] sm:$0xff] (!%p294_p3) }
   0xd   : > { %v7995_v48 = vld [vmem:[%s10316_s2 + $0x50] sm:$0xff] (!%p294_p3)  ;;  %v373_v49 = vld [vmem:[%s10321_s7 + $0x48] sm:$0xff] (!%p294_p3)  ;;  %v8012_v51 = vld [vmem:[%s10316_s2 + $0x58] sm:$0xff] (!%p294_p3) }
   0xe   : > { %s10328_s27 = smov (!%p340_p4, %s7725_s27), 1  ;;  %v375_v52 = vld [vmem:[%s10321_s7 + $0x58] sm:$0xff]  ;;  %v374_v53 = vld [vmem:[%s10321_s7 + $0x50] sm:$0xff]  ;;  %v8029_v54 = vld [vmem:[%s10316_s2 + $0x60] sm:$0xff] }
   0xf   : > { %s7630_s9 = sshll.u32 %s10328_s27, 7  ;;  %s7629_s10 = sshll.u32 %s10328_s27, 6  ;;  %v377_v55 = vld [vmem:[%s10321_s7 + $0x68] sm:$0xff]  ;;  %v376_v56 = vld [vmem:[%s10321_s7 + $0x60] sm:$0xff]  ;;  %v379_v58 = vld [vmem:[%s10321_s7 + $0x78] sm:$0xff] }
  0x10   : > { %s7812_s13 = scalar_lea.vmem %s10315_s1, %s7630_s9  ;;  %s7817_s16 = scalar_lea.vmem %s10314_s0, %s7629_s10  ;;  %v8046_v57 = vld [vmem:[%s10316_s2 + $0x68] sm:$0xff]  ;;  %v378_v59 = vld [vmem:[%s10321_s7 + $0x70] sm:$0xff]  ;;  %v380_v62 = vld [vmem:[%s10321_s7 + $0x80] sm:$0xff] }
  0x11   : > { %v423_v2 = vld [vmem:[%s7812_s13 + $0x10] sm:$0xff]  ;;  %v421_v3 = vld [vmem:[%s7812_s13] sm:$0xff]  ;;  %v414_v6 = vld [vmem:[%s7817_s16 + $0x8] sm:$0x77]  ;;  %s7419_s21 = sshll.u32 %s10328_s27, 4 }
  0x12   : > { %v413_v4 = vld [vmem:[%s7817_s16] sm:$0x77]  ;;  %465 = vperm.xlu1 %7659, %v423_v2   ;;  %455 = vperm.xlu0 %7658, %v421_v3   ;;  %v542_v7 = vcombine.high %v414_v6, %v414_v6  ;;  %v424_v8 = vld [vmem:[%s7812_s13 + $0x18] sm:$0xff]  ;;  %v415_v9 = vld [vmem:[%s7817_s16 + $0x10] sm:$0x77]  ;;  %s10246_s24 = scalar_lea.vmem %s10322_s8, %s7419_s21 }
  0x13   : > { %v541_v5 = vcombine.high %v413_v4, %v413_v4  ;;  %v422_v10 = vld [vmem:[%s7812_s13 + $0x8] sm:$0xff]  ;;  %v416_v12 = vld [vmem:[%s7817_s16 + $0x18] sm:$0x77]  ;;  %v543_v13 = vcombine.high %v415_v9, %v415_v9  ;;  %v425_v16 = vld [vmem:[%s7812_s13 + $0x20] sm:$0xff] }
  0x14   : > { %7438 = vmatprep.subr.msk.mxu1 %vm598_vm0, %v542_v7  ;;  %v544_v14 = vcombine.high %v416_v12, %v416_v12  ;;  %v426_v15 = vld [vmem:[%s7812_s13 + $0x28] sm:$0xff]  ;;  %v428_v18 = vld [vmem:[%s7812_s13 + $0x38] sm:$0xff]  ;;  %v427_v19 = vld [vmem:[%s7812_s13 + $0x30] sm:$0xff] }
  0x15   : > { %7420 = vmatprep.subr.msk.mxu0 %vm598_vm0, %v541_v5  ;;  %7439 = vmatpush1.msk.msra.mxu1 %vm598_vm0, %v414_v6  ;;  %v430_v21 = vld [vmem:[%s7812_s13 + $0x48] sm:$0xff]  ;;  %v7870_v22 = vld [vmem:[%s7817_s16 + $0x20] sm:$0x77]  ;;  %v432_v28 = vld [vmem:[%s7812_s13 + $0x58] sm:$0xff] }
  0x16   : > { %7421 = vmatpush1.msk.msra.mxu0 %vm598_vm0, %v413_v4  ;;  %470 = vperm.xlu1 %7659, %v424_v8   ;;  %v7873_v23 = vld [vmem:[%s7817_s16 + $0x28] sm:$0x77]  ;;  %v429_v24 = vld [vmem:[%s7812_s13 + $0x40] sm:$0xff]  ;;  %v545_v26 = vcombine.high %v7870_v22, %v7870_v22  ;;  %v431_v29 = vld [vmem:[%s7812_s13 + $0x50] sm:$0xff] }
  0x17   : > { %460 = vperm.xlu0 %7658, %v422_v10   ;;  %7422 = vmatmul.mubr.msk.f32.vlgmr.msra.gmra.mrb[0].mxu0 %vm549_vm1, %v7830_v11  ;;  %v546_v27 = vcombine.high %v7873_v23, %v7873_v23  ;;  %v434_v31 = vld [vmem:[%s7812_s13 + $0x68] sm:$0xff]  ;;  %v433_v32 = vld [vmem:[%s7812_s13 + $0x60] sm:$0xff]  ;;  %v436_v34 = vld [vmem:[%s7812_s13 + $0x78] sm:$0xff] }
  0x18   : > { %7440 = vmatmul.mubr.msk.f32.vlgmr.msra.gmra.mrb[0].mxu1 %vm549_vm1, %v7830_v11  ;;  %701 = vmatprep.mubr.f32.mxu0 %v7736_v1  ;;  %v435_v35 = vld [vmem:[%s7812_s13 + $0x70] sm:$0xff]  ;;  %v381_v61 = vld [vmem:[%s10321_s7 + $0x88] sm:$0xff]  ;;  %v8080_v63 = vld [vmem:[%s10316_s2 + $0x78] sm:$0xff] }
  0x19   : > { %862 = vmatprep.mubr.f32.mxu1 %v7736_v1  ;;  %7456 = vmatprep.subr.msk.mxu0 %vm598_vm0, %v543_v13  ;;  %v8063_v60 = vld [vmem:[%s10316_s2 + $0x70] sm:$0xff]  ;;  %v383_v2 = vld [vmem:[%s10321_s7 + $0x98] sm:$0xff]  ;;  %v385_v5 = vld [vmem:[%s10321_s7 + $0xa8] sm:$0xff] }
  0x1a   : > { %480 = vperm.xlu1 %7659, %v426_v15   ;;  %7474 = vmatprep.subr.msk.mxu1 %vm598_vm0, %v544_v14  ;;  %v382_v3 = vld [vmem:[%s10321_s7 + $0x90] sm:$0xff]  ;;  %v8104_v6 = vld [vmem:[%s7817_s16 + $0x38] sm:$0x77]  ;;  %v384_v7 = vld [vmem:[%s10321_s7 + $0xa0] sm:$0xff] }
  0x1b   : > { %475 = vperm.xlu0 %7658, %v425_v16   ;;  %7423 = vmatmul.mubr.msk.f32.gmra.mrb[2].mxu0 %vm549_vm1, %v7846_v17  ;;  %v8096_v4 = vld [vmem:[%s7817_s16 + $0x30] sm:$0x77]  ;;  %v387_v10 = vld [vmem:[%s10321_s7 + $0xb8] sm:$0xff]  ;;  %v389_v13 = vld [vmem:[%s10321_s7 + $0xc8] sm:$0xff] }
  0x1c   : > { %7441 = vmatmul.mubr.msk.f32.gmra.mrb[2].mxu1 %vm549_vm1, %v7846_v17  ;;  %7457 = vmatpush1.msk.msra.mxu0 %vm598_vm0, %v415_v9  ;;  %v547_v8 = vcombine.high %v8096_v4, %v8096_v4  ;;  %v548_v9 = vcombine.high %v8104_v6, %v8104_v6  ;;  %v388_v14 = vld [vmem:[%s10321_s7 + $0xc0] sm:$0xff]  ;;  %v391_v15 = vld [vmem:[%s10321_s7 + $0xd8] sm:$0xff]  ;;  %v390_v16 = vld [vmem:[%s10321_s7 + $0xd0] sm:$0xff] }
  0x1d   : > { %7475 = vmatpush1.msk.msra.mxu1 %vm598_vm0, %v416_v12  ;;  %707 = vmatprep.mubr.f32.mxu0 %v7736_v1  ;;  %v386_v12 = vld [vmem:[%s10321_s7 + $0xb0] sm:$0xff] }
  0x1e   : > { %868 = vmatprep.mubr.f32.mxu1 %v7736_v1  ;;  %490 = vperm.xlu1 %7659, %v428_v18   ;;  %v393_v18 = vld [vmem:[%s10321_s7 + $0xe8] sm:$0xff] }
  0x1f   : > { %485 = vperm.xlu0 %7658, %v427_v19   ;;  %7424 = vmatmul.mubr.msk.f32.gmra.mrb[4].mxu0 %vm549_vm1, %v7861_v20  ;;  %v392_v19 = vld [vmem:[%s10321_s7 + $0xe0] sm:$0xff] }
  0x20   : > { %7442 = vmatmul.mubr.msk.f32.gmra.mrb[4].mxu1 %vm549_vm1, %v7861_v20  ;;  %713 = vmatprep.mubr.f32.mxu0 %v7736_v1 }
  0x21   : > { %874 = vmatprep.mubr.f32.mxu1 %v7736_v1  ;;  %7492 = vmatprep.subr.msk.mxu0 %vm598_vm0, %v545_v26  ;;  %v399_v26 = vld [vmem:[%s10321_s7 + $0x118] sm:$0xff] }
  0x22   : > { %500 = vperm.xlu1 %7659, %v430_v21   ;;  %7510 = vmatprep.subr.msk.mxu1 %vm598_vm0, %v546_v27  ;;  %v395_v21 = vld [vmem:[%s10321_s7 + $0xf8] sm:$0xff]  ;;  %v398_v27 = vld [vmem:[%s10321_s7 + $0x110] sm:$0xff] }
  0x23   : > { %495 = vperm.xlu0 %7658, %v429_v24   ;;  %7425 = vmatmul.mubr.msk.f32.gmra.mrb[6].mxu0 %vm549_vm1, %v7882_v25  ;;  %v396_v24 = vld [vmem:[%s10321_s7 + $0x100] sm:$0xff] }
  0x24   : > { %7443 = vmatmul.mubr.msk.f32.gmra.mrb[6].mxu1 %vm549_vm1, %v7882_v25  ;;  %719 = vmatprep.mubr.f32.mxu0 %v7736_v1 }
  0x25   : > { %880 = vmatprep.mubr.f32.mxu1 %v7736_v1 }
  0x26   : > { %510 = vperm.xlu1 %7659, %v432_v28   ;;  %v401_v28 = vld [vmem:[%s10321_s7 + $0x128] sm:$0xff] }
  0x27   : > { %505 = vperm.xlu0 %7658, %v431_v29   ;;  %7426 = vmatmul.mubr.msk.f32.gmra.mrb[8].mxu0 %vm549_vm1, %v7900_v30  ;;  %v400_v29 = vld [vmem:[%s10321_s7 + $0x120] sm:$0xff] }
  0x28   : > { %7444 = vmatmul.mubr.msk.f32.gmra.mrb[8].mxu1 %vm549_vm1, %v7900_v30  ;;  %725 = vmatprep.mubr.f32.mxu0 %v7736_v1 }
  0x29   : > { %886 = vmatprep.mubr.f32.mxu1 %v7736_v1 }
  0x2a   : > { %520 = vperm.xlu1 %7659, %v434_v31   ;;  %v403_v31 = vld [vmem:[%s10321_s7 + $0x138] sm:$0xff] }
  0x2b   : > { %515 = vperm.xlu0 %7658, %v433_v32   ;;  %7427 = vmatmul.mubr.msk.f32.gmra.mrb[10].mxu0 %vm549_vm1, %v7914_v33  ;;  %v402_v32 = vld [vmem:[%s10321_s7 + $0x130] sm:$0xff] }
  0x2c   : > { %7445 = vmatmul.mubr.msk.f32.gmra.mrb[10].mxu1 %vm549_vm1, %v7914_v33  ;;  %731 = vmatprep.mubr.f32.mxu0 %v7736_v1 }
  0x2d   : > { %892 = vmatprep.mubr.f32.mxu1 %v7736_v1 }
  0x2e   : > { %530 = vperm.xlu1 %7659, %v436_v34   ;;  %v405_v34 = vld [vmem:[%s10321_s7 + $0x148] sm:$0xff] }
  0x2f   : > { %525 = vperm.xlu0 %7658, %v435_v35   ;;  %7428 = vmatmul.mubr.msk.f32.gmra.mrb[12].mxu0 %vm549_vm1, %v7922_v36  ;;  %v404_v35 = vld [vmem:[%s10321_s7 + $0x140] sm:$0xff] }
  0x30   : > { %7446 = vmatmul.mubr.msk.f32.gmra.mrb[12].mxu1 %vm549_vm1, %v7922_v36  ;;  %737 = vmatprep.mubr.f32.mxu0 %v7736_v1 }
  0x31   : > { %898 = vmatprep.mubr.f32.mxu1 %v7736_v1 }
  0x32   : > { %2326 = vperm.xlu1 %7659, %v365_v37   ;;  %v407_v37 = vld [vmem:[%s10321_s7 + $0x158] sm:$0xff] }
  0x33   : > { %2321 = vperm.xlu0 %7658, %v364_v38   ;;  %7429 = vmatmul.mubr.msk.f32.gmra.mrb[14].mxu0 %vm549_vm1, %v7939_v39  ;;  %v406_v38 = vld [vmem:[%s10321_s7 + $0x150] sm:$0xff] }
  0x34   : > { %7447 = vmatmul.mubr.msk.f32.gmra.mrb[14].mxu1 %vm549_vm1, %v7939_v39  ;;  %743 = vmatprep.mubr.f32.mxu0 %v7736_v1 }
  0x35   : > { %904 = vmatprep.mubr.f32.mxu1 %v7736_v1 }
  0x36   : > { %2336 = vperm.xlu1 %7659, %v367_v40   ;;  %v409_v40 = vld [vmem:[%s10321_s7 + $0x168] sm:$0xff] }
  0x37   : > { %2331 = vperm.xlu0 %7658, %v366_v41   ;;  %7430 = vmatmul.mubr.msk.f32.gmra.mrb[16].mxu0 %vm549_vm1, %v7956_v42  ;;  %v408_v41 = vld [vmem:[%s10321_s7 + $0x160] sm:$0xff] }
  0x38   : > { %7448 = vmatmul.mubr.msk.f32.gmra.mrb[16].mxu1 %vm549_vm1, %v7956_v42  ;;  %749 = vmatprep.mubr.f32.mxu0 %v7736_v1 }
  0x39   : > { %910 = vmatprep.mubr.f32.mxu1 %v7736_v1 }
  0x3a   : > { %2346 = vperm.xlu1 %7659, %v369_v43   ;;  %v411_v43 = vld [vmem:[%s10321_s7 + $0x178] sm:$0xff] }
  0x3b   : > { %2341 = vperm.xlu0 %7658, %v368_v44   ;;  %7431 = vmatmul.mubr.msk.f32.gmra.mrb[18].mxu0 %vm549_vm1, %v7978_v45  ;;  %v410_v44 = vld [vmem:[%s10321_s7 + $0x170] sm:$0xff] }
  0x3c   : > { %7449 = vmatmul.mubr.msk.f32.gmra.mrb[18].mxu1 %vm549_vm1, %v7978_v45  ;;  %755 = vmatprep.mubr.f32.mxu0 %v7736_v1 }
  0x3d   : > { %916 = vmatprep.mubr.f32.mxu1 %v7736_v1 }
  0x3e   : > { %2356 = vperm.xlu1 %7659, %v371_v46   ;;  %v412_v46 = vld [vmem:[%s10321_s7 + $0x180] sm:$0x1] }
  0x3f   : > { %2351 = vperm.xlu0 %7658, %v370_v47   ;;  %7432 = vmatmul.mubr.msk.f32.gmra.mrb[20].mxu0 %vm549_vm1, %v7995_v48 }
  0x40   : > { %7450 = vmatmul.mubr.msk.f32.gmra.mrb[20].mxu1 %vm549_vm1, %v7995_v48  ;;  %761 = vmatprep.mubr.f32.mxu0 %v7736_v1 }
  0x41   : > { %922 = vmatprep.mubr.f32.mxu1 %v7736_v1 }
  0x42   : > { %2366 = vperm.xlu1 %7659, %v373_v49  }
  0x43   : > { %2361 = vperm.xlu0 %7658, %v372_v50   ;;  %7433 = vmatmul.mubr.msk.f32.gmra.mrb[22].mxu0 %vm549_vm1, %v8012_v51 }
  0x44   : > { %7451 = vmatmul.mubr.msk.f32.gmra.mrb[22].mxu1 %vm549_vm1, %v8012_v51  ;;  %767 = vmatprep.mubr.f32.mxu0 %v7736_v1 }
  0x45   : > { %928 = vmatprep.mubr.f32.mxu1 %v7736_v1 }
  0x46   : > { %2376 = vperm.xlu1 %7659, %v375_v52  }
  0x47   : > { %2371 = vperm.xlu0 %7658, %v374_v53   ;;  %7434 = vmatmul.mubr.msk.f32.gmra.mrb[24].mxu0 %vm549_vm1, %v8029_v54 }
  0x48   : > { %7452 = vmatmul.mubr.msk.f32.gmra.mrb[24].mxu1 %vm549_vm1, %v8029_v54  ;;  %773 = vmatprep.mubr.f32.mxu0 %v7736_v1 }
  0x49   : > { %934 = vmatprep.mubr.f32.mxu1 %v7736_v1 }
  0x4a   : > { %2386 = vperm.xlu1 %7659, %v377_v55  }
  0x4b   : > { %2381 = vperm.xlu0 %7658, %v376_v56   ;;  %7435 = vmatmul.mubr.msk.f32.gmra.mrb[26].mxu0 %vm549_vm1, %v8046_v57 }
  0x4c   : > { %7453 = vmatmul.mubr.msk.f32.gmra.mrb[26].mxu1 %vm549_vm1, %v8046_v57  ;;  %779 = vmatprep.mubr.f32.mxu0 %v7736_v1 }
  0x4d   : > { %940 = vmatprep.mubr.f32.mxu1 %v7736_v1 }
  0x4e   : > { %2396 = vperm.xlu1 %7659, %v379_v58  }
  0x4f   : > { %2391 = vperm.xlu0 %7658, %v378_v59   ;;  %7436 = vmatmul.mubr.msk.f32.gmra.mrb[28].mxu0 %vm549_vm1, %v8063_v60 }
  0x50   : > { %7454 = vmatmul.mubr.msk.f32.gmra.mrb[28].mxu1 %vm549_vm1, %v8063_v60  ;;  %785 = vmatprep.mubr.f32.mxu0 %v7736_v1 }
  0x51   : > { %946 = vmatprep.mubr.f32.mxu1 %v7736_v1 }
  0x52   : > { %3759 = vperm.xlu1 %7659, %v381_v61  }
  0x53   : > { %3754 = vperm.xlu0 %7658, %v380_v62   ;;  %7437 = vmatmul.mubr.msk.f32.gmra.mrb[30].mxu0 %vm549_vm1, %v8080_v63 }
  0x54   : > { %7455 = vmatmul.mubr.msk.f32.gmra.mrb[30].mxu1 %vm549_vm1, %v8080_v63  ;;  %1017 = vmatprep.mubr.f32.mxu0 %v7736_v1 }
  0x55   : > { %1178 = vmatprep.mubr.f32.mxu1 %v7736_v1 }
  0x56   : > { %3769 = vperm.xlu1 %7659, %v383_v2  }
  0x57   : > { %3764 = vperm.xlu0 %7658, %v382_v3   ;;  %7458 = vmatmul.mubr.msk.f32.vlgmr.msra.gmra.mrb[32].mxu0 %vm549_vm1, %v7830_v11 }
  0x58   : > { %7476 = vmatmul.mubr.msk.f32.vlgmr.msra.gmra.mrb[32].mxu1 %vm549_vm1, %v7830_v11  ;;  %1023 = vmatprep.mubr.f32.mxu0 %v7736_v1 }
  0x59   : > { %1184 = vmatprep.mubr.f32.mxu1 %v7736_v1  ;;  %7493 = vmatpush1.msk.msra.mxu0 %vm598_vm0, %v7870_v22  ;;  %v394_v22 = vld [vmem:[%s10321_s7 + $0xf0] sm:$0xff] }
  0x5a   : > { %3779 = vperm.xlu1 %7659, %v385_v5   ;;  %7511 = vmatpush1.msk.msra.mxu1 %vm598_vm0, %v7873_v23  ;;  %v397_v23 = vld [vmem:[%s10321_s7 + $0x108] sm:$0xff] }
  0x5b   : > { %3774 = vperm.xlu0 %7658, %v384_v7   ;;  %7459 = vmatmul.mubr.msk.f32.gmra.mrb[34].mxu0 %vm549_vm1, %v7846_v17 }
  0x5c   : > { %7477 = vmatmul.mubr.msk.f32.gmra.mrb[34].mxu1 %vm549_vm1, %v7846_v17  ;;  %1029 = vmatprep.mubr.f32.mxu0 %v7736_v1 }
  0x5d   : > { %1190 = vmatprep.mubr.f32.mxu1 %v7736_v1  ;;  %7528 = vmatprep.subr.msk.mxu0 %vm598_vm0, %v547_v8 }
  0x5e   : > { %3789 = vperm.xlu1 %7659, %v387_v10   ;;  %7546 = vmatprep.subr.msk.mxu1 %vm598_vm0, %v548_v9 }
  0x5f   : > { %3784 = vperm.xlu0 %7658, %v386_v12   ;;  %7460 = vmatmul.mubr.msk.f32.gmra.mrb[36].mxu0 %vm549_vm1, %v7861_v20 }
  0x60   : > { %7478 = vmatmul.mubr.msk.f32.gmra.mrb[36].mxu1 %vm549_vm1, %v7861_v20  ;;  %1035 = vmatprep.mubr.f32.mxu0 %v7736_v1 }
  0x61   : > { %1196 = vmatprep.mubr.f32.mxu1 %v7736_v1 }
  0x62   : > { %3799 = vperm.xlu1 %7659, %v389_v13  }
  0x63   : > { %3794 = vperm.xlu0 %7658, %v388_v14   ;;  %7461 = vmatmul.mubr.msk.f32.gmra.mrb[38].mxu0 %vm549_vm1, %v7882_v25 }
  0x64   : > { %7479 = vmatmul.mubr.msk.f32.gmra.mrb[38].mxu1 %vm549_vm1, %v7882_v25  ;;  %1041 = vmatprep.mubr.f32.mxu0 %v7736_v1 }
  0x65   : > { %1202 = vmatprep.mubr.f32.mxu1 %v7736_v1 }
  0x66   : > { %3809 = vperm.xlu1 %7659, %v391_v15  }
  0x67   : > { %3804 = vperm.xlu0 %7658, %v390_v16   ;;  %7462 = vmatmul.mubr.msk.f32.gmra.mrb[40].mxu0 %vm549_vm1, %v7900_v30 }
  0x68   : > { %7480 = vmatmul.mubr.msk.f32.gmra.mrb[40].mxu1 %vm549_vm1, %v7900_v30  ;;  %1047 = vmatprep.mubr.f32.mxu0 %v7736_v1 }
  0x69   : > { %1208 = vmatprep.mubr.f32.mxu1 %v7736_v1 }
  0x6a   : > { %3819 = vperm.xlu1 %7659, %v393_v18  }
  0x6b   : > { %3814 = vperm.xlu0 %7658, %v392_v19   ;;  %7463 = vmatmul.mubr.msk.f32.gmra.mrb[42].mxu0 %vm549_vm1, %v7914_v33 }
  0x6c   : > { %7481 = vmatmul.mubr.msk.f32.gmra.mrb[42].mxu1 %vm549_vm1, %v7914_v33  ;;  %1053 = vmatprep.mubr.f32.mxu0 %v7736_v1 }
  0x6d   : > { %1214 = vmatprep.mubr.f32.mxu1 %v7736_v1 }
  0x6e   : > { %3829 = vperm.xlu1 %7659, %v395_v21  }
  0x6f   : > { %3824 = vperm.xlu0 %7658, %v394_v22   ;;  %7464 = vmatmul.mubr.msk.f32.gmra.mrb[44].mxu0 %vm549_vm1, %v7922_v36 }
  0x70   : > { %7482 = vmatmul.mubr.msk.f32.gmra.mrb[44].mxu1 %vm549_vm1, %v7922_v36  ;;  %1059 = vmatprep.mubr.f32.mxu0 %v7736_v1 }
  0x71   : > { %1220 = vmatprep.mubr.f32.mxu1 %v7736_v1 }
  0x72   : > { %5183 = vperm.xlu1 %7659, %v397_v23  }
  0x73   : > { %5178 = vperm.xlu0 %7658, %v396_v24   ;;  %7465 = vmatmul.mubr.msk.f32.gmra.mrb[46].mxu0 %vm549_vm1, %v7939_v39 }
  0x74   : > { %7483 = vmatmul.mubr.msk.f32.gmra.mrb[46].mxu1 %vm549_vm1, %v7939_v39  ;;  %1065 = vmatprep.mubr.f32.mxu0 %v7736_v1 }
  0x75   : > { %1226 = vmatprep.mubr.f32.mxu1 %v7736_v1 }
  0x76   : > { %5193 = vperm.xlu1 %7659, %v399_v26  }
  0x77   : > { %5188 = vperm.xlu0 %7658, %v398_v27   ;;  %7466 = vmatmul.mubr.msk.f32.gmra.mrb[48].mxu0 %vm549_vm1, %v7956_v42 }
  0x78   : > { %7484 = vmatmul.mubr.msk.f32.gmra.mrb[48].mxu1 %vm549_vm1, %v7956_v42  ;;  %1071 = vmatprep.mubr.f32.mxu0 %v7736_v1 }
  0x79   : > { %1232 = vmatprep.mubr.f32.mxu1 %v7736_v1 }
  0x7a   : > { %5203 = vperm.xlu1 %7659, %v401_v28  }
  0x7b   : > { %5198 = vperm.xlu0 %7658, %v400_v29   ;;  %7467 = vmatmul.mubr.msk.f32.gmra.mrb[50].mxu0 %vm549_vm1, %v7978_v45 }
  0x7c   : > { %7485 = vmatmul.mubr.msk.f32.gmra.mrb[50].mxu1 %vm549_vm1, %v7978_v45  ;;  %1077 = vmatprep.mubr.f32.mxu0 %v7736_v1 }
  0x7d   : > { %1238 = vmatprep.mubr.f32.mxu1 %v7736_v1 }
  0x7e   : > { %5213 = vperm.xlu1 %7659, %v403_v31  }
  0x7f   : > { %5208 = vperm.xlu0 %7658, %v402_v32   ;;  %7468 = vmatmul.mubr.msk.f32.gmra.mrb[52].mxu0 %vm549_vm1, %v7995_v48 }
  0x80   : > { %7486 = vmatmul.mubr.msk.f32.gmra.mrb[52].mxu1 %vm549_vm1, %v7995_v48  ;;  %1083 = vmatprep.mubr.f32.mxu0 %v7736_v1 }
  0x81   : > { %1244 = vmatprep.mubr.f32.mxu1 %v7736_v1 }
  0x82   : > { %6027 = vperm.xlu1 %7659, %v405_v34  }
  0x83   : > { %6022 = vperm.xlu0 %7658, %v404_v35   ;;  %7469 = vmatmul.mubr.msk.f32.gmra.mrb[54].mxu0 %vm549_vm1, %v8012_v51 }
  0x84   : > { %7487 = vmatmul.mubr.msk.f32.gmra.mrb[54].mxu1 %vm549_vm1, %v8012_v51  ;;  %1089 = vmatprep.mubr.f32.mxu0 %v7736_v1 }
  0x85   : > { %1250 = vmatprep.mubr.f32.mxu1 %v7736_v1 }
  0x86   : > { %6037 = vperm.xlu1 %7659, %v407_v37  }
  0x87   : > { %6032 = vperm.xlu0 %7658, %v406_v38   ;;  %7470 = vmatmul.mubr.msk.f32.gmra.mrb[56].mxu0 %vm549_vm1, %v8029_v54 }
  0x88   : > { %7488 = vmatmul.mubr.msk.f32.gmra.mrb[56].mxu1 %vm549_vm1, %v8029_v54  ;;  %1095 = vmatprep.mubr.f32.mxu0 %v7736_v1 }
  0x89   : > { %1256 = vmatprep.mubr.f32.mxu1 %v7736_v1 }
  0x8a   : > { %6586 = vperm.xlu1 %7659, %v409_v40  }
  0x8b   : > { %6581 = vperm.xlu0 %7658, %v408_v41   ;;  %7471 = vmatmul.mubr.msk.f32.gmra.mrb[58].mxu0 %vm549_vm1, %v8046_v57 }
  0x8c   : > { %7489 = vmatmul.mubr.msk.f32.gmra.mrb[58].mxu1 %vm549_vm1, %v8046_v57  ;;  %1101 = vmatprep.mubr.f32.mxu0 %v7736_v1 }
  0x8d   : > { %1262 = vmatprep.mubr.f32.mxu1 %v7736_v1 }
  0x8e   : > { %7029 = vperm.xlu1 %7659, %v411_v43  }
  0x8f   : > { %7024 = vperm.xlu0 %7658, %v410_v44   ;;  %7472 = vmatmul.mubr.msk.f32.gmra.mrb[60].mxu0 %vm549_vm1, %v8063_v60 }
  0x90   : > { %7490 = vmatmul.mubr.msk.f32.gmra.mrb[60].mxu1 %vm549_vm1, %v8063_v60  ;;  %1107 = vmatprep.mubr.f32.mxu0 %v7736_v1 }
  0x91   : > { %1268 = vmatprep.mubr.f32.mxu1 %v7736_v1  ;;  %v8439_v58 = vpop.permute.xlu1 %465 }
  0x93   : > { %7178 = vperm.xlu0 %7658, %v412_v46   ;;  %7473 = vmatmul.mubr.msk.f32.gmra.mrb[62].mxu0 %vm549_vm1, %v8080_v63 }
  0x94   : > { %7491 = vmatmul.mubr.msk.f32.gmra.mrb[62].mxu1 %vm549_vm1, %v8080_v63  ;;  %1339 = vmatprep.mubr.f32.mxu0 %v7736_v1 }
  0x95   : > { %1500 = vmatprep.mubr.f32.mxu1 %v7736_v1  ;;  %v8456_v16 = vpop.permute.xlu1 %470 }
  0x97   : > { %7494 = vmatmul.mubr.msk.f32.vlgmr.msra.gmra.mrb[64].mxu0 %vm549_vm1, %v7830_v11 }
  0x98   : > { %7512 = vmatmul.mubr.msk.f32.vlgmr.msra.gmra.mrb[64].mxu1 %vm549_vm1, %v7830_v11  ;;  %1345 = vmatprep.mubr.f32.mxu0 %v7736_v1 }
  0x99   : > { %1506 = vmatprep.mubr.f32.mxu1 %v7736_v1  ;;  %7529 = vmatpush1.msk.msra.mxu0 %vm598_vm0, %v8096_v4 }
  0x9a   : > { %7547 = vmatpush1.msk.msra.mxu1 %vm598_vm0, %v8104_v6 }
  0x9b   : > { %7495 = vmatmul.mubr.msk.f32.gmra.mrb[66].mxu0 %vm549_vm1, %v7846_v17 }
  0x9c   : > { %7513 = vmatmul.mubr.msk.f32.gmra.mrb[66].mxu1 %vm549_vm1, %v7846_v17  ;;  %1351 = vmatprep.mubr.f32.mxu0 %v7736_v1 }
  0x9d   : > { %1512 = vmatprep.mubr.f32.mxu1 %v7736_v1 }
  0x9f   : > { %7496 = vmatmul.mubr.msk.f32.gmra.mrb[68].mxu0 %vm549_vm1, %v7861_v20 }
  0xa0   : > { %7514 = vmatmul.mubr.msk.f32.gmra.mrb[68].mxu1 %vm549_vm1, %v7861_v20  ;;  %1357 = vmatprep.mubr.f32.mxu0 %v7736_v1 }
  0xa1   : > { %1518 = vmatprep.mubr.f32.mxu1 %v7736_v1 }
  0xa3   : > { %7497 = vmatmul.mubr.msk.f32.gmra.mrb[70].mxu0 %vm549_vm1, %v7882_v25 }
  0xa4   : > { %7515 = vmatmul.mubr.msk.f32.gmra.mrb[70].mxu1 %vm549_vm1, %v7882_v25  ;;  %1363 = vmatprep.mubr.f32.mxu0 %v7736_v1 }
  0xa5   : > { %1524 = vmatprep.mubr.f32.mxu1 %v7736_v1 }
  0xa7   : > { %7498 = vmatmul.mubr.msk.f32.gmra.mrb[72].mxu0 %vm549_vm1, %v7900_v30 }
  0xa8   : > { %7516 = vmatmul.mubr.msk.f32.gmra.mrb[72].mxu1 %vm549_vm1, %v7900_v30  ;;  %1369 = vmatprep.mubr.f32.mxu0 %v7736_v1 }
  0xa9   : > { %1530 = vmatprep.mubr.f32.mxu1 %v7736_v1 }
  0xab   : > { %7499 = vmatmul.mubr.msk.f32.gmra.mrb[74].mxu0 %vm549_vm1, %v7914_v33 }
  0xac   : > { %7517 = vmatmul.mubr.msk.f32.gmra.mrb[74].mxu1 %vm549_vm1, %v7914_v33  ;;  %1375 = vmatprep.mubr.f32.mxu0 %v7736_v1 }
  0xad   : > { %1536 = vmatprep.mubr.f32.mxu1 %v7736_v1 }
  0xaf   : > { %7500 = vmatmul.mubr.msk.f32.gmra.mrb[76].mxu0 %vm549_vm1, %v7922_v36 }
  0xb0   : > { %7518 = vmatmul.mubr.msk.f32.gmra.mrb[76].mxu1 %vm549_vm1, %v7922_v36  ;;  %1381 = vmatprep.mubr.f32.mxu0 %v7736_v1 }
  0xb1   : > { %1542 = vmatprep.mubr.f32.mxu1 %v7736_v1 }
  0xb3   : > { %7501 = vmatmul.mubr.msk.f32.gmra.mrb[78].mxu0 %vm549_vm1, %v7939_v39 }
  0xb4   : > { %7519 = vmatmul.mubr.msk.f32.gmra.mrb[78].mxu1 %vm549_vm1, %v7939_v39  ;;  %1387 = vmatprep.mubr.f32.mxu0 %v7736_v1 }
  0xb5   : > { %1548 = vmatprep.mubr.f32.mxu1 %v7736_v1 }
  0xb7   : > { %7502 = vmatmul.mubr.msk.f32.gmra.mrb[80].mxu0 %vm549_vm1, %v7956_v42 }
  0xb8   : > { %7520 = vmatmul.mubr.msk.f32.gmra.mrb[80].mxu1 %vm549_vm1, %v7956_v42  ;;  %1393 = vmatprep.mubr.f32.mxu0 %v7736_v1 }
  0xb9   : > { %1554 = vmatprep.mubr.f32.mxu1 %v7736_v1 }
  0xbb   : > { %7503 = vmatmul.mubr.msk.f32.gmra.mrb[82].mxu0 %vm549_vm1, %v7978_v45 }
  0xbc   : > { %7521 = vmatmul.mubr.msk.f32.gmra.mrb[82].mxu1 %vm549_vm1, %v7978_v45  ;;  %1399 = vmatprep.mubr.f32.mxu0 %v7736_v1 }
  0xbd   : > { %1560 = vmatprep.mubr.f32.mxu1 %v7736_v1 }
  0xbf   : > { %7504 = vmatmul.mubr.msk.f32.gmra.mrb[84].mxu0 %vm549_vm1, %v7995_v48 }
  0xc0   : > { %7522 = vmatmul.mubr.msk.f32.gmra.mrb[84].mxu1 %vm549_vm1, %v7995_v48  ;;  %1405 = vmatprep.mubr.f32.mxu0 %v7736_v1 }
  0xc1   : > { %1566 = vmatprep.mubr.f32.mxu1 %v7736_v1 }
  0xc3   : > { %7505 = vmatmul.mubr.msk.f32.gmra.mrb[86].mxu0 %vm549_vm1, %v8012_v51 }
  0xc4   : > { %7523 = vmatmul.mubr.msk.f32.gmra.mrb[86].mxu1 %vm549_vm1, %v8012_v51  ;;  %1411 = vmatprep.mubr.f32.mxu0 %v7736_v1 }
  0xc5   : > { %1572 = vmatprep.mubr.f32.mxu1 %v7736_v1 }
  0xc7   : > { %7506 = vmatmul.mubr.msk.f32.gmra.mrb[88].mxu0 %vm549_vm1, %v8029_v54 }
  0xc8   : > { %7524 = vmatmul.mubr.msk.f32.gmra.mrb[88].mxu1 %vm549_vm1, %v8029_v54  ;;  %1417 = vmatprep.mubr.f32.mxu0 %v7736_v1 }
  0xc9   : > { %1578 = vmatprep.mubr.f32.mxu1 %v7736_v1 }
  0xcb   : > { %7507 = vmatmul.mubr.msk.f32.gmra.mrb[90].mxu0 %vm549_vm1, %v8046_v57 }
  0xcc   : > { %7525 = vmatmul.mubr.msk.f32.gmra.mrb[90].mxu1 %vm549_vm1, %v8046_v57  ;;  %1423 = vmatprep.mubr.f32.mxu0 %v7736_v1 }
  0xcd   : > { %1584 = vmatprep.mubr.f32.mxu1 %v7736_v1 }
  0xcf   : > { %7508 = vmatmul.mubr.msk.f32.gmra.mrb[92].mxu0 %vm549_vm1, %v8063_v60 }
  0xd0   : > { %7526 = vmatmul.mubr.msk.f32.gmra.mrb[92].mxu1 %vm549_vm1, %v8063_v60  ;;  %1429 = vmatprep.mubr.f32.mxu0 %v7736_v1 }
  0xd1   : > { %1590 = vmatprep.mubr.f32.mxu1 %v7736_v1 }
  0xd3   : > { %7509 = vmatmul.mubr.msk.f32.gmra.mrb[94].mxu0 %vm549_vm1, %v8080_v63 }
  0xd4   : > { %7527 = vmatmul.mubr.msk.f32.gmra.mrb[94].mxu1 %vm549_vm1, %v8080_v63  ;;  %1661 = vmatprep.mubr.f32.mxu0 %v7736_v1 }
  0xd5   : > { %1822 = vmatprep.mubr.f32.mxu1 %v7736_v1 }
  0xd7   : > { %7530 = vmatmul.mubr.msk.f32.vlgmr.msra.gmra.mrb[96].mxu0 %vm549_vm1, %v7830_v11 }
  0xd8   : > { %7548 = vmatmul.mubr.msk.f32.vlgmr.msra.gmra.mrb[96].mxu1 %vm549_vm1, %v7830_v11  ;;  %1667 = vmatprep.mubr.f32.mxu0 %v7736_v1  ;;  %v8420_v11 = vpop.permute.xlu0 %455 }
  0xd9   : > { %1828 = vmatprep.mubr.f32.mxu1 %v7736_v1 }
  0xdb   : > { %7531 = vmatmul.mubr.msk.f32.gmra.mrb[98].mxu0 %vm549_vm1, %v7846_v17 }
  0xdc   : > { %7549 = vmatmul.mubr.msk.f32.gmra.mrb[98].mxu1 %vm549_vm1, %v7846_v17  ;;  %1673 = vmatprep.mubr.f32.mxu0 %v7736_v1  ;;  %v8432_v49 = vpop.permute.xlu0 %460 }
  0xdd   : > { %1834 = vmatprep.mubr.f32.mxu1 %v7736_v1 }
  0xdf   : > { %7532 = vmatmul.mubr.msk.f32.gmra.mrb[100].mxu0 %vm549_vm1, %v7861_v20 }
  0xe0   : > { %7550 = vmatmul.mubr.msk.f32.gmra.mrb[100].mxu1 %vm549_vm1, %v7861_v20  ;;  %1679 = vmatprep.mubr.f32.mxu0 %v7736_v1 }
  0xe1   : > { %1840 = vmatprep.mubr.f32.mxu1 %v7736_v1 }
  0xe3   : > { %7533 = vmatmul.mubr.msk.f32.gmra.mrb[102].mxu0 %vm549_vm1, %v7882_v25 }
  0xe4   : > { %7551 = vmatmul.mubr.msk.f32.gmra.mrb[102].mxu1 %vm549_vm1, %v7882_v25  ;;  %1685 = vmatprep.mubr.f32.mxu0 %v7736_v1 }
  0xe5   : > { %1846 = vmatprep.mubr.f32.mxu1 %v7736_v1 }
  0xe7   : > { %7534 = vmatmul.mubr.msk.f32.gmra.mrb[104].mxu0 %vm549_vm1, %v7900_v30 }
  0xe8   : > { %7552 = vmatmul.mubr.msk.f32.gmra.mrb[104].mxu1 %vm549_vm1, %v7900_v30  ;;  %1691 = vmatprep.mubr.f32.mxu0 %v7736_v1 }
  0xe9   : > { %1852 = vmatprep.mubr.f32.mxu1 %v7736_v1 }
  0xea   : > { %v697_v17 = vpop.f32.mrb[0].mxu0 }
  0xeb   : > { %v858_v20 = vpop.f32.mrb[0].mxu1  ;;  %v699_v47 = vpop.f32.mrb[1].mxu0  ;;  %7535 = vmatmul.mubr.msk.f32.gmra.mrb[106].mxu0 %vm549_vm1, %v7914_v33  ;;  %v698_v50 = vadd.f32 %v697_v17, %v8420_v11 }
  0xec   : > { %v860_v25 = vpop.f32.mrb[1].mxu1  ;;  %7553 = vmatmul.mubr.msk.f32.gmra.mrb[106].mxu1 %vm549_vm1, %v7914_v33  ;;  %1697 = vmatprep.mubr.f32.mxu0 %v7736_v1  ;;  %v859_v52 = vadd.f32 %v858_v20, %v8420_v11  ;;  %v700_v33 = vadd.f32 %v699_v47, %v8420_v11 }
  0xed   : > { %1858 = vmatprep.mubr.f32.mxu1 %v7736_v1  ;;  %v861_v2 = vadd.f32 %v860_v25, %v8420_v11 }
  0xee   : > { %v703_v30 = vpop.f32.mrb[2].mxu0 }
  0xef   : > { %v704_v53 = vadd.f32 %v703_v30, %v8432_v49  ;;  %v864_v55 = vpop.f32.mrb[2].mxu1  ;;  %v705_v56 = vpop.f32.mrb[3].mxu0  ;;  %7536 = vmatmul.mubr.msk.f32.gmra.mrb[108].mxu0 %vm549_vm1, %v7922_v36 }
  0xf0   : > { %v865_v59 = vadd.f32 %v864_v55, %v8432_v49  ;;  %v706_v61 = vadd.f32 %v705_v56, %v8432_v49  ;;  %v866_v62 = vpop.f32.mrb[3].mxu1  ;;  %7554 = vmatmul.mubr.msk.f32.gmra.mrb[108].mxu1 %vm549_vm1, %v7922_v36  ;;  %1703 = vmatprep.mubr.f32.mxu0 %v7736_v1  ;;  %v8477_v30 = vpop.permute.xlu0 %475 }
  0xf1   : > { %v1919_v3 = vpack.c.bf16 %v704_v53, %v698_v50  ;;  %v867_v4 = vadd.f32 %v866_v62, %v8432_v49  ;;  %1864 = vmatprep.mubr.f32.mxu1 %v7736_v1 }
  0xf2   : > { %v1921_v5 = vpack.c.bf16 %v865_v59, %v859_v52  ;;  %v1920_v6 = vpack.c.bf16 %v706_v61, %v700_v33  ;;  %v709_v7 = vpop.f32.mrb[4].mxu0  ;;  %v8480_v52 = vpop.permute.xlu1 %480 }
  0xf3   : > { %v2047_v8 = vmul.bf16 1017396388, %v1919_v3  ;;  %v1922_v9 = vpack.c.bf16 %v867_v4, %v861_v2  ;;  %v870_v10 = vpop.f32.mrb[4].mxu1  ;;  %v711_v12 = vpop.f32.mrb[5].mxu0  ;;  %7537 = vmatmul.mubr.msk.f32.gmra.mrb[110].mxu0 %vm549_vm1, %v7939_v39  ;;  %v710_v18 = vadd.f32 %v709_v7, %v8439_v58 }
  0xf4   : > { %v2049_v36 = vmul.bf16 1017396388, %v1921_v5  ;;  %v872_v13 = vpop.f32.mrb[5].mxu1  ;;  %7555 = vmatmul.mubr.msk.f32.gmra.mrb[110].mxu1 %vm549_vm1, %v7939_v39  ;;  %1709 = vmatprep.mubr.f32.mxu0 %v7736_v1  ;;  %v2048_v14 = vmul.bf16 1017396388, %v1920_v6  ;;  %v871_v19 = vadd.f32 %v870_v10, %v8439_v58  ;;  %v712_v23 = vadd.f32 %v711_v12, %v8439_v58 }
  0xf5   : > { %1870 = vmatprep.mubr.f32.mxu1 %v7736_v1  ;;  %v2050_v15 = vmul.bf16 1017396388, %v1922_v9  ;;  %v2175_v28 = vmax.bf16 %v2047_v8, %v1919_v3  ;;  %v873_v35 = vadd.f32 %v872_v13, %v8439_v58 }
  0xf6   : > { %v715_v21 = vpop.f32.mrb[6].mxu0  ;;  %v2176_v22 = vmax.bf16 %v2048_v14, %v1920_v6  ;;  %v2177_v34 = vmax.bf16 %v2049_v36, %v1921_v5 }
  0xf7   : > { %v716_v24 = vadd.f32 %v715_v21, %v8456_v16  ;;  %v876_v26 = vpop.f32.mrb[6].mxu1  ;;  %v717_v39 = vpop.f32.mrb[7].mxu0  ;;  %7538 = vmatmul.mubr.msk.f32.gmra.mrb[112].mxu0 %vm549_vm1, %v7956_v42  ;;  %v2178_v27 = vmax.bf16 %v2050_v15, %v1922_v9 }
  0xf8   : > { %v877_v29 = vadd.f32 %v876_v26, %v8456_v16  ;;  %v718_v31 = vadd.f32 %v717_v39, %v8456_v16  ;;  %v878_v32 = vpop.f32.mrb[7].mxu1  ;;  %7556 = vmatmul.mubr.msk.f32.gmra.mrb[112].mxu1 %vm549_vm1, %v7956_v42  ;;  %2447 = vmatprep.subr.bf16.mxu0 %v2176_v22  ;;  %v8504_v26 = vpop.permute.xlu1 %490 }
  0xf9   : > { %v1935_v37 = vpack.c.bf16 %v716_v24, %v710_v18  ;;  %v879_v38 = vadd.f32 %v878_v32, %v8456_v16  ;;  %2560 = vmatprep.subr.bf16.mxu1 %v2178_v27  ;;  %2448 = vmatpush1.bf16.msra.mxu0 %v2175_v28 }
  0xfa   : > { %v1937_v40 = vpack.c.bf16 %v877_v29, %v871_v19  ;;  %v1936_v41 = vpack.c.bf16 %v718_v31, %v712_v23  ;;  %2561 = vmatpush1.bf16.msra.mxu1 %v2177_v34  ;;  %v721_v43 = vpop.f32.mrb[8].mxu0  ;;  %1715 = vmatprep.mubr.f32.mxu0 %v7736_v1  ;;  %v8501_v23 = vpop.permute.xlu0 %485 }
  0xfb   : > { %v2063_v44 = vmul.bf16 1017396388, %v1935_v37  ;;  %v1938_v46 = vpack.c.bf16 %v879_v38, %v873_v35  ;;  %v882_v17 = vpop.f32.mrb[8].mxu1  ;;  %1876 = vmatprep.mubr.f32.mxu1 %v7736_v1  ;;  %v723_v42 = vpop.f32.mrb[9].mxu0  ;;  %7539 = vmatmul.mubr.msk.f32.gmra.mrb[114].mxu0 %vm549_vm1, %v7978_v45  ;;  %v722_v53 = vadd.f32 %v721_v43, %v8477_v30 }
  0xfc   : > { %v2065_v20 = vmul.bf16 1017396388, %v1937_v40  ;;  %v884_v47 = vpop.f32.mrb[9].mxu1  ;;  %7557 = vmatmul.mubr.msk.f32.gmra.mrb[114].mxu1 %vm549_vm1, %v7978_v45  ;;  %1721 = vmatprep.mubr.f32.mxu0 %v7736_v1  ;;  %v2064_v25 = vmul.bf16 1017396388, %v1936_v41  ;;  %v883_v55 = vadd.f32 %v882_v17, %v8477_v30  ;;  %v724_v59 = vadd.f32 %v723_v42, %v8477_v30 }
  0xfd   : > { %1882 = vmatprep.mubr.f32.mxu1 %v7736_v1  ;;  %v2066_v50 = vmul.bf16 1017396388, %v1938_v46  ;;  %v2191_v3 = vmax.bf16 %v2063_v44, %v1935_v37  ;;  %v885_v8 = vadd.f32 %v884_v47, %v8477_v30 }
  0xfe   : > { %v727_v56 = vpop.f32.mrb[10].mxu0  ;;  %v2192_v33 = vmax.bf16 %v2064_v25, %v1936_v41  ;;  %v2193_v7 = vmax.bf16 %v2065_v20, %v1937_v40 }
  0xff   : > { %v728_v45 = vadd.f32 %v727_v56, %v8480_v52  ;;  %v888_v61 = vpop.f32.mrb[10].mxu1  ;;  %v729_v62 = vpop.f32.mrb[11].mxu0  ;;  %7540 = vmatmul.mubr.msk.f32.gmra.mrb[116].mxu0 %vm549_vm1, %v7995_v48  ;;  %v2194_v2 = vmax.bf16 %v2066_v50, %v1938_v46 }
 0x100   : > { %v889_v4 = vadd.f32 %v888_v61, %v8480_v52  ;;  %v730_v5 = vadd.f32 %v729_v62, %v8480_v52  ;;  %v890_v6 = vpop.f32.mrb[11].mxu1  ;;  %7558 = vmatmul.mubr.msk.f32.gmra.mrb[116].mxu1 %vm549_vm1, %v7995_v48  ;;  %2449 = vmatprep.subr.bf16.mxu0 %v2192_v33  ;;  %v8528_v61 = vpop.permute.xlu1 %500 }
 0x101   : > { %v1951_v9 = vpack.c.bf16 %v728_v45, %v722_v53  ;;  %v891_v10 = vadd.f32 %v890_v6, %v8480_v52  ;;  %2562 = vmatprep.subr.bf16.mxu1 %v2194_v2  ;;  %2450 = vmatpush1.bf16.msra.mxu0 %v2191_v3 }
 0x102   : > { %v1953_v12 = vpack.c.bf16 %v889_v4, %v883_v55  ;;  %v1952_v36 = vpack.c.bf16 %v730_v5, %v724_v59  ;;  %2563 = vmatpush1.bf16.msra.mxu1 %v2193_v7  ;;  %v733_v13 = vpop.f32.mrb[12].mxu0  ;;  %1727 = vmatprep.mubr.f32.mxu0 %v7736_v1  ;;  %v8525_v59 = vpop.permute.xlu0 %495 }
 0x103   : > { %v2079_v14 = vmul.bf16 1017396388, %v1951_v9  ;;  %v1954_v15 = vpack.c.bf16 %v891_v10, %v885_v8  ;;  %v894_v18 = vpop.f32.mrb[12].mxu1  ;;  %1888 = vmatprep.mubr.f32.mxu1 %v7736_v1  ;;  %v735_v48 = vpop.f32.mrb[13].mxu0  ;;  %7541 = vmatmul.mubr.msk.f32.gmra.mrb[118].mxu0 %vm549_vm1, %v8012_v51  ;;  %v734_v39 = vadd.f32 %v733_v13, %v8501_v23 }
 0x104   : > { %v2081_v19 = vmul.bf16 1017396388, %v1953_v12  ;;  %v896_v21 = vpop.f32.mrb[13].mxu1  ;;  %7559 = vmatmul.mubr.msk.f32.gmra.mrb[118].mxu1 %vm549_vm1, %v8012_v51  ;;  %1733 = vmatprep.mubr.f32.mxu0 %v7736_v1  ;;  %v2080_v22 = vmul.bf16 1017396388, %v1952_v36  ;;  %v895_v27 = vadd.f32 %v894_v18, %v8501_v23  ;;  %v736_v31 = vadd.f32 %v735_v48, %v8501_v23 }
 0x105   : > { %1894 = vmatprep.mubr.f32.mxu1 %v7736_v1  ;;  %v2082_v24 = vmul.bf16 1017396388, %v1954_v15  ;;  %v2207_v37 = vmax.bf16 %v2079_v14, %v1951_v9  ;;  %v897_v44 = vadd.f32 %v896_v21, %v8501_v23 }
 0x106   : > { %v739_v28 = vpop.f32.mrb[14].mxu0  ;;  %v2208_v29 = vmax.bf16 %v2080_v22, %v1952_v36  ;;  %v2209_v43 = vmax.bf16 %v2081_v19, %v1953_v12 }
 0x107   : > { %v740_v51 = vadd.f32 %v739_v28, %v8504_v26  ;;  %v900_v32 = vpop.f32.mrb[14].mxu1  ;;  %v741_v34 = vpop.f32.mrb[15].mxu0  ;;  %7542 = vmatmul.mubr.msk.f32.gmra.mrb[120].mxu0 %vm549_vm1, %v8029_v54  ;;  %v2210_v35 = vmax.bf16 %v2082_v24, %v1954_v15 }
 0x108   : > { %v901_v38 = vadd.f32 %v900_v32, %v8504_v26  ;;  %v742_v40 = vadd.f32 %v741_v34, %v8504_v26  ;;  %v902_v41 = vpop.f32.mrb[15].mxu1  ;;  %7560 = vmatmul.mubr.msk.f32.gmra.mrb[120].mxu1 %vm549_vm1, %v8029_v54  ;;  %2451 = vmatprep.subr.bf16.mxu0 %v2208_v29  ;;  %v8552_v32 = vpop.permute.xlu1 %510 }
 0x109   : > { %v1967_v46 = vpack.c.bf16 %v740_v51, %v734_v39  ;;  %v903_v17 = vadd.f32 %v902_v41, %v8504_v26  ;;  %2564 = vmatprep.subr.bf16.mxu1 %v2210_v35  ;;  %2452 = vmatpush1.bf16.msra.mxu0 %v2207_v37 }
 0x10a   : > { %v1969_v42 = vpack.c.bf16 %v901_v38, %v895_v27  ;;  %v1968_v20 = vpack.c.bf16 %v742_v40, %v736_v31  ;;  %2565 = vmatpush1.bf16.msra.mxu1 %v2209_v43  ;;  %v745_v47 = vpop.f32.mrb[16].mxu0  ;;  %1739 = vmatprep.mubr.f32.mxu0 %v7736_v1  ;;  %v8549_v31 = vpop.permute.xlu0 %505 }
 0x10b   : > { %v2095_v25 = vmul.bf16 1017396388, %v1967_v46  ;;  %v1970_v50 = vpack.c.bf16 %v903_v17, %v897_v44  ;;  %v906_v53 = vpop.f32.mrb[16].mxu1  ;;  %1900 = vmatprep.mubr.f32.mxu1 %v7736_v1  ;;  %v747_v54 = vpop.f32.mrb[17].mxu0  ;;  %7543 = vmatmul.mubr.msk.f32.gmra.mrb[122].mxu0 %vm549_vm1, %v8046_v57  ;;  %v746_v62 = vadd.f32 %v745_v47, %v8525_v59 }
 0x10c   : > { %v2097_v55 = vmul.bf16 1017396388, %v1969_v42  ;;  %v908_v56 = vpop.f32.mrb[17].mxu1  ;;  %7561 = vmatmul.mubr.msk.f32.gmra.mrb[122].mxu1 %vm549_vm1, %v8046_v57  ;;  %1745 = vmatprep.mubr.f32.mxu0 %v7736_v1  ;;  %v2096_v33 = vmul.bf16 1017396388, %v1968_v20  ;;  %v907_v2 = vadd.f32 %v906_v53, %v8525_v59  ;;  %v748_v5 = vadd.f32 %v747_v54, %v8525_v59 }
 0x10d   : > { %1906 = vmatprep.mubr.f32.mxu1 %v7736_v1  ;;  %v2098_v45 = vmul.bf16 1017396388, %v1970_v50  ;;  %v2223_v9 = vmax.bf16 %v2095_v25, %v1967_v46  ;;  %v909_v14 = vadd.f32 %v908_v56, %v8525_v59 }
 0x10e   : > { %v751_v3 = vpop.f32.mrb[18].mxu0  ;;  %v2224_v4 = vmax.bf16 %v2096_v33, %v1968_v20  ;;  %v2225_v13 = vmax.bf16 %v2097_v55, %v1969_v42 }
 0x10f   : > { %v752_v57 = vadd.f32 %v751_v3, %v8528_v61  ;;  %v912_v6 = vpop.f32.mrb[18].mxu1  ;;  %v753_v7 = vpop.f32.mrb[19].mxu0  ;;  %7544 = vmatmul.mubr.msk.f32.gmra.mrb[124].mxu0 %vm549_vm1, %v8063_v60  ;;  %v2226_v8 = vmax.bf16 %v2098_v45, %v1970_v50 }
 0x110   : > { %v913_v10 = vadd.f32 %v912_v6, %v8528_v61  ;;  %v754_v12 = vadd.f32 %v753_v7, %v8528_v61  ;;  %v914_v36 = vpop.f32.mrb[19].mxu1  ;;  %7562 = vmatmul.mubr.msk.f32.gmra.mrb[124].mxu1 %vm549_vm1, %v8063_v60  ;;  %2453 = vmatprep.subr.bf16.mxu0 %v2224_v4  ;;  %v8564_v6 = vpop.permute.xlu1 %520 }
 0x111   : > { %v1983_v15 = vpack.c.bf16 %v752_v57, %v746_v62  ;;  %v915_v18 = vadd.f32 %v914_v36, %v8528_v61  ;;  %2566 = vmatprep.subr.bf16.mxu1 %v2226_v8  ;;  %2454 = vmatpush1.bf16.msra.mxu0 %v2223_v9 }
 0x112   : > { %v1985_v48 = vpack.c.bf16 %v913_v10, %v907_v2  ;;  %v1984_v19 = vpack.c.bf16 %v754_v12, %v748_v5  ;;  %2567 = vmatpush1.bf16.msra.mxu1 %v2225_v13  ;;  %v757_v21 = vpop.f32.mrb[20].mxu0  ;;  %1751 = vmatprep.mubr.f32.mxu0 %v7736_v1  ;;  %v8562_v5 = vpop.permute.xlu0 %515 }
 0x113   : > { %v2111_v22 = vmul.bf16 1017396388, %v1983_v15  ;;  %v1986_v24 = vpack.c.bf16 %v915_v18, %v909_v14  ;;  %v918_v39 = vpop.f32.mrb[20].mxu1  ;;  %1912 = vmatprep.mubr.f32.mxu1 %v7736_v1  ;;  %v759_v60 = vpop.f32.mrb[21].mxu0  ;;  %7545 = vmatmul.mubr.msk.f32.gmra.mrb[126].mxu0 %vm549_vm1, %v8080_v63  ;;  %v758_v1 = vadd.f32 %v757_v21, %v8549_v31 }
 0x114   : > { %v2113_v27 = vmul.bf16 1017396388, %v1985_v48  ;;  %v920_v28 = vpop.f32.mrb[21].mxu1  ;;  %7563 = vmatmul.mubr.msk.f32.gmra.mrb[126].mxu1 %vm549_vm1, %v8080_v63  ;;  %v2112_v29 = vmul.bf16 1017396388, %v1984_v19  ;;  %2479 = vmatprep.mubr.bf16.mxu0 %v7735_v0  ;;  %v919_v37 = vadd.f32 %v918_v39, %v8549_v31  ;;  %v760_v44 = vadd.f32 %v759_v60, %v8549_v31 }
 0x115   : > { %v2114_v51 = vmul.bf16 1017396388, %v1986_v24  ;;  %2592 = vmatprep.mubr.bf16.mxu1 %v7735_v0  ;;  %v2239_v43 = vmax.bf16 %v2111_v22, %v1983_v15  ;;  %v921_v47 = vadd.f32 %v920_v28, %v8549_v31 }
 0x116   : > { %v763_v34 = vpop.f32.mrb[22].mxu0  ;;  %v2240_v35 = vmax.bf16 %v2112_v29, %v1984_v19  ;;  %v2241_v20 = vmax.bf16 %v2113_v27, %v1985_v48 }
 0x117   : > { %v764_v38 = vadd.f32 %v763_v34, %v8552_v32  ;;  %v924_v40 = vpop.f32.mrb[22].mxu1  ;;  %v765_v63 = vpop.f32.mrb[23].mxu0  ;;  %v2242_v41 = vmax.bf16 %v2114_v51, %v1986_v24 }
 0x118   : > { %v925_v46 = vadd.f32 %v924_v40, %v8552_v32  ;;  %v766_v17 = vadd.f32 %v765_v63, %v8552_v32  ;;  %v926_v42 = vpop.f32.mrb[23].mxu1  ;;  %2455 = vmatprep.subr.bf16.mxu0 %v2240_v35  ;;  %v8574_v63 = vpop.permute.xlu0 %525 }
 0x119   : > { %v1999_v25 = vpack.c.bf16 %v764_v38, %v758_v1  ;;  %v927_v50 = vadd.f32 %v926_v42, %v8552_v32  ;;  %2568 = vmatprep.subr.bf16.mxu1 %v2242_v41  ;;  %2456 = vmatpush1.bf16.msra.mxu0 %v2239_v43  ;;  %v8576_v43 = vpop.permute.xlu1 %530 }
 0x11a   : > { %v2001_v53 = vpack.c.bf16 %v925_v46, %v919_v37  ;;  %v2000_v54 = vpack.c.bf16 %v766_v17, %v760_v44  ;;  %2569 = vmatpush1.bf16.msra.mxu1 %v2241_v20  ;;  %v769_v55 = vpop.f32.mrb[24].mxu0 }
 0x11b   : > { %v2127_v56 = vmul.bf16 1017396388, %v1999_v25  ;;  %v2002_v33 = vpack.c.bf16 %v927_v50, %v921_v47  ;;  %v930_v45 = vpop.f32.mrb[24].mxu1  ;;  %v771_v62 = vpop.f32.mrb[25].mxu0  ;;  %v770_v7 = vadd.f32 %v769_v55, %v8562_v5 }
 0x11c   : > { %v2129_v2 = vmul.bf16 1017396388, %v2001_v53  ;;  %v932_v3 = vpop.f32.mrb[25].mxu1  ;;  %v2128_v4 = vmul.bf16 1017396388, %v2000_v54  ;;  %v931_v10 = vadd.f32 %v930_v45, %v8562_v5  ;;  %v772_v18 = vadd.f32 %v771_v62, %v8562_v5 }
 0x11d   : > { %v2130_v57 = vmul.bf16 1017396388, %v2002_v33  ;;  %v2255_v15 = vmax.bf16 %v2127_v56, %v1999_v25  ;;  %v933_v24 = vadd.f32 %v932_v3, %v8562_v5 }
 0x11e   : > { %v775_v8 = vpop.f32.mrb[26].mxu0  ;;  %v2256_v9 = vmax.bf16 %v2128_v4, %v2000_v54  ;;  %v2257_v22 = vmax.bf16 %v2129_v2, %v2001_v53 }
 0x11f   : > { %v776_v12 = vadd.f32 %v775_v8, %v8564_v6  ;;  %v936_v36 = vpop.f32.mrb[26].mxu1  ;;  %v777_v13 = vpop.f32.mrb[27].mxu0  ;;  %v2258_v14 = vmax.bf16 %v2130_v57, %v2002_v33 }
 0x120   : > { %v937_v48 = vadd.f32 %v936_v36, %v8564_v6  ;;  %v778_v19 = vadd.f32 %v777_v13, %v8564_v6  ;;  %v938_v21 = vpop.f32.mrb[27].mxu1  ;;  %2457 = vmatprep.subr.bf16.mxu0 %v2256_v9 }
 0x121   : > { %v2015_v39 = vpack.c.bf16 %v776_v12, %v770_v7  ;;  %v939_v60 = vadd.f32 %v938_v21, %v8564_v6  ;;  %2570 = vmatprep.subr.bf16.mxu1 %v2258_v14  ;;  %2458 = vmatpush1.bf16.msra.mxu0 %v2255_v15 }
 0x122   : > { %v2017_v27 = vpack.c.bf16 %v937_v48, %v931_v10  ;;  %v2016_v28 = vpack.c.bf16 %v778_v19, %v772_v18  ;;  %2571 = vmatpush1.bf16.msra.mxu1 %v2257_v22  ;;  %v781_v29 = vpop.f32.mrb[28].mxu0 }
 0x123   : > { %v2143_v51 = vmul.bf16 1017396388, %v2015_v39  ;;  %v2018_v1 = vpack.c.bf16 %v939_v60, %v933_v24  ;;  %v942_v34 = vpop.f32.mrb[28].mxu1  ;;  %v783_v35 = vpop.f32.mrb[29].mxu0  ;;  %v782_v44 = vadd.f32 %v781_v29, %v8574_v63 }
 0x124   : > { %v2145_v37 = vmul.bf16 1017396388, %v2017_v27  ;;  %v944_v38 = vpop.f32.mrb[29].mxu1  ;;  %v2144_v40 = vmul.bf16 1017396388, %v2016_v28  ;;  %v943_v42 = vadd.f32 %v942_v34, %v8574_v63  ;;  %v784_v54 = vadd.f32 %v783_v35, %v8574_v63  ;;  %v8595_v35 = vld [vmem:[%s10317_s3] sm:$0xff]  }
 0x125   : > { %v2146_v41 = vmul.bf16 1017396388, %v2018_v1  ;;  %v2271_v53 = vmax.bf16 %v2143_v51, %v2015_v39  ;;  %v945_v62 = vadd.f32 %v944_v38, %v8574_v63 }
 0x126   : > { %v787_v46 = vpop.f32.mrb[30].mxu0  ;;  %v2272_v17 = vmax.bf16 %v2144_v40, %v2016_v28  ;;  %v2273_v45 = vmax.bf16 %v2145_v37, %v2017_v27 }
 0x127   : > { %v788_v20 = vadd.f32 %v787_v46, %v8576_v43  ;;  %v948_v47 = vpop.f32.mrb[30].mxu1  ;;  %v789_v25 = vpop.f32.mrb[31].mxu0  ;;  %v2274_v50 = vmax.bf16 %v2146_v41, %v2018_v1 }
 0x128   : > { %v949_v55 = vadd.f32 %v948_v47, %v8576_v43  ;;  %v790_v56 = vadd.f32 %v789_v25, %v8576_v43  ;;  %v950_v33 = vpop.f32.mrb[31].mxu1  ;;  %2459 = vmatprep.subr.bf16.mxu0 %v2272_v17 }
 0x129   : > { %v2031_v2 = vpack.c.bf16 %v788_v20, %v782_v44  ;;  %v951_v3 = vadd.f32 %v950_v33, %v8576_v43  ;;  %2572 = vmatprep.subr.bf16.mxu1 %v2274_v50  ;;  %2460 = vmatpush1.bf16.msra.mxu0 %v2271_v53 }
 0x12a   : > { %v2033_v4 = vpack.c.bf16 %v949_v55, %v943_v42  ;;  %v2032_v57 = vpack.c.bf16 %v790_v56, %v784_v54  ;;  %2573 = vmatpush1.bf16.msra.mxu1 %v2273_v45  ;;  %v1019_v7 = vpop.f32.mrb[32].mxu0 }
 0x12b   : > { %v2159_v8 = vmul.bf16 1017396388, %v2031_v2  ;;  %v2034_v9 = vpack.c.bf16 %v951_v3, %v945_v62  ;;  %v1180_v10 = vpop.f32.mrb[32].mxu1  ;;  %v1021_v12 = vpop.f32.mrb[33].mxu0  ;;  %v1020_v18 = vadd.f32 %v1019_v7, %v8420_v11 }
 0x12c   : > { %v2161_v36 = vmul.bf16 1017396388, %v2033_v4  ;;  %v1182_v13 = vpop.f32.mrb[33].mxu1  ;;  %v2160_v14 = vmul.bf16 1017396388, %v2032_v57  ;;  %v1181_v21 = vadd.f32 %v1180_v10, %v8420_v11  ;;  %v1022_v28 = vadd.f32 %v1021_v12, %v8420_v11 }
 0x12d   : > { %v2162_v15 = vmul.bf16 1017396388, %v2034_v9  ;;  %v2287_v27 = vmax.bf16 %v2159_v8, %v2031_v2  ;;  %v1183_v37 = vadd.f32 %v1182_v13, %v8420_v11 }
 0x12e   : > { %v1025_v48 = vpop.f32.mrb[34].mxu0  ;;  %v2288_v19 = vmax.bf16 %v2160_v14, %v2032_v57  ;;  %v2289_v34 = vmax.bf16 %v2161_v36, %v2033_v4  ;;  %v8612_v36 = vld [vmem:[%s10317_s3 + $0x8] sm:$0xff]  }
 0x12f   : > { %v1026_v22 = vadd.f32 %v1025_v48, %v8432_v49  ;;  %v1186_v24 = vpop.f32.mrb[34].mxu1  ;;  %v1027_v39 = vpop.f32.mrb[35].mxu0  ;;  %v2290_v60 = vmax.bf16 %v2162_v15, %v2034_v9 }
 0x130   : > { %v1187_v29 = vadd.f32 %v1186_v24, %v8432_v49  ;;  %v1028_v51 = vadd.f32 %v1027_v39, %v8432_v49  ;;  %v1188_v1 = vpop.f32.mrb[35].mxu1  ;;  %2461 = vmatprep.subr.bf16.mxu0 %v2288_v19 }
 0x131   : > { %v1923_v38 = vpack.c.bf16 %v1026_v22, %v1020_v18  ;;  %v1189_v40 = vadd.f32 %v1188_v1, %v8432_v49  ;;  %2574 = vmatprep.subr.bf16.mxu1 %v2290_v60  ;;  %2462 = vmatpush1.bf16.msra.mxu0 %v2287_v27 }
 0x132   : > { %v1925_v41 = vpack.c.bf16 %v1187_v29, %v1181_v21  ;;  %v1924_v44 = vpack.c.bf16 %v1028_v51, %v1022_v28  ;;  %2575 = vmatpush1.bf16.msra.mxu1 %v2289_v34  ;;  %v1031_v46 = vpop.f32.mrb[36].mxu0 }
 0x133   : > { %v2051_v17 = vmul.bf16 1017396388, %v1923_v38  ;;  %v1926_v42 = vpack.c.bf16 %v1189_v40, %v1183_v37  ;;  %v1192_v20 = vpop.f32.mrb[36].mxu1  ;;  %v1033_v47 = vpop.f32.mrb[37].mxu0  ;;  %v1032_v55 = vadd.f32 %v1031_v46, %v8439_v58 }
 0x134   : > { %v2053_v25 = vmul.bf16 1017396388, %v1925_v41  ;;  %v1194_v50 = vpop.f32.mrb[37].mxu1  ;;  %2480 = vmatmul.mubr.bf16.vlgmr.msra.gmra.mrb[128].mxu0 %v8595_v35  ;;  %v2052_v53 = vmul.bf16 1017396388, %v1924_v44  ;;  %v1193_v45 = vadd.f32 %v1192_v20, %v8439_v58  ;;  %v1034_v7 = vadd.f32 %v1033_v47, %v8439_v58 }
 0x135   : > { %2593 = vmatmul.mubr.bf16.vlgmr.msra.gmra.mrb[128].mxu1 %v8595_v35  ;;  %v2054_v54 = vmul.bf16 1017396388, %v1926_v42  ;;  %2489 = vmatprep.mubr.bf16.mxu0 %v7735_v0  ;;  %v2179_v57 = vmax.bf16 %v2051_v17, %v1923_v38  ;;  %v1195_v13 = vadd.f32 %v1194_v50, %v8439_v58  ;;  %v8629_v50 = vld [vmem:[%s10317_s3 + $0x10] sm:$0xff]  }
 0x136   : > { %v1037_v56 = vpop.f32.mrb[38].mxu0  ;;  %v2180_v33 = vmax.bf16 %v2052_v53, %v1924_v44  ;;  %2602 = vmatprep.mubr.bf16.mxu1 %v7735_v0  ;;  %v2181_v12 = vmax.bf16 %v2053_v25, %v1925_v41 }
 0x137   : > { %v1038_v62 = vadd.f32 %v1037_v56, %v8456_v16  ;;  %v1198_v2 = vpop.f32.mrb[38].mxu1  ;;  %v1039_v3 = vpop.f32.mrb[39].mxu0  ;;  %v2182_v4 = vmax.bf16 %v2054_v54, %v1926_v42 }
 0x138   : > { %v1199_v8 = vadd.f32 %v1198_v2, %v8456_v16  ;;  %v1040_v9 = vadd.f32 %v1039_v3, %v8456_v16  ;;  %v1200_v10 = vpop.f32.mrb[39].mxu1  ;;  %2673 = vmatprep.subr.bf16.mxu0 %v2180_v33 }
 0x139   : > { %v1939_v14 = vpack.c.bf16 %v1038_v62, %v1032_v55  ;;  %v1201_v15 = vadd.f32 %v1200_v10, %v8456_v16  ;;  %2786 = vmatprep.subr.bf16.mxu1 %v2182_v4  ;;  %2674 = vmatpush1.bf16.msra.mxu0 %v2179_v57 }
 0x13a   : > { %v1941_v18 = vpack.c.bf16 %v1199_v8, %v1193_v45  ;;  %v1940_v48 = vpack.c.bf16 %v1040_v9, %v1034_v7  ;;  %2787 = vmatpush1.bf16.msra.mxu1 %v2181_v12  ;;  %v1043_v19 = vpop.f32.mrb[40].mxu0 }
 0x13b   : > { %v2067_v21 = vmul.bf16 1017396388, %v1939_v14  ;;  %v1942_v22 = vpack.c.bf16 %v1201_v15, %v1195_v13  ;;  %v1204_v24 = vpop.f32.mrb[40].mxu1  ;;  %v1045_v39 = vpop.f32.mrb[41].mxu0  ;;  %v1044_v51 = vadd.f32 %v1043_v19, %v8477_v30 }
 0x13c   : > { %v2069_v60 = vmul.bf16 1017396388, %v1941_v18  ;;  %v1206_v27 = vpop.f32.mrb[41].mxu1  ;;  %2490 = vmatmul.mubr.bf16.gmra.mrb[132].mxu0 %v8612_v36  ;;  %v2068_v28 = vmul.bf16 1017396388, %v1940_v48  ;;  %v1205_v37 = vadd.f32 %v1204_v24, %v8477_v30  ;;  %v1046_v17 = vadd.f32 %v1045_v39, %v8477_v30 }
 0x13d   : > { %2603 = vmatmul.mubr.bf16.gmra.mrb[132].mxu1 %v8612_v36  ;;  %v2070_v29 = vmul.bf16 1017396388, %v1942_v22  ;;  %2499 = vmatprep.mubr.bf16.mxu0 %v7735_v0  ;;  %v2195_v46 = vmax.bf16 %v2067_v21, %v1939_v14  ;;  %v1207_v53 = vadd.f32 %v1206_v27, %v8477_v30 }
 0x13e   : > { %v1049_v1 = vpop.f32.mrb[42].mxu0  ;;  %v2196_v34 = vmax.bf16 %v2068_v28, %v1940_v48  ;;  %2612 = vmatprep.mubr.bf16.mxu1 %v7735_v0  ;;  %v2197_v25 = vmax.bf16 %v2069_v60, %v1941_v18  ;;  %v8646_v28 = vld [vmem:[%s10317_s3 + $0x18] sm:$0xff]  }
 0x13f   : > { %v1050_v38 = vadd.f32 %v1049_v1, %v8480_v52  ;;  %v1210_v40 = vpop.f32.mrb[42].mxu1  ;;  %v1051_v41 = vpop.f32.mrb[43].mxu0  ;;  %v2198_v44 = vmax.bf16 %v2070_v29, %v1942_v22 }
 0x140   : > { %v1211_v42 = vadd.f32 %v1210_v40, %v8480_v52  ;;  %v1052_v20 = vadd.f32 %v1051_v41, %v8480_v52  ;;  %v1212_v47 = vpop.f32.mrb[43].mxu1  ;;  %2675 = vmatprep.subr.bf16.mxu0 %v2196_v34 }
 0x141   : > { %v1955_v54 = vpack.c.bf16 %v1050_v38, %v1044_v51  ;;  %v1213_v55 = vadd.f32 %v1212_v47, %v8480_v52  ;;  %2788 = vmatprep.subr.bf16.mxu1 %v2198_v44  ;;  %2676 = vmatpush1.bf16.msra.mxu0 %v2195_v46 }
 0x142   : > { %v1957_v56 = vpack.c.bf16 %v1211_v42, %v1205_v37  ;;  %v1956_v33 = vpack.c.bf16 %v1052_v20, %v1046_v17  ;;  %2789 = vmatpush1.bf16.msra.mxu1 %v2197_v25  ;;  %v1055_v45 = vpop.f32.mrb[44].mxu0 }
 0x143   : > { %v2083_v62 = vmul.bf16 1017396388, %v1955_v54  ;;  %v1958_v2 = vpack.c.bf16 %v1213_v55, %v1207_v53  ;;  %v1216_v3 = vpop.f32.mrb[44].mxu1  ;;  %v1057_v4 = vpop.f32.mrb[45].mxu0  ;;  %v1056_v10 = vadd.f32 %v1055_v45, %v8501_v23 }
 0x144   : > { %v2085_v57 = vmul.bf16 1017396388, %v1957_v56  ;;  %v1218_v7 = vpop.f32.mrb[45].mxu1  ;;  %2500 = vmatmul.mubr.bf16.gmra.mrb[136].mxu0 %v8629_v50  ;;  %v2084_v8 = vmul.bf16 1017396388, %v1956_v33  ;;  %v1217_v14 = vadd.f32 %v1216_v3, %v8501_v23  ;;  %v1058_v22 = vadd.f32 %v1057_v4, %v8501_v23 }
 0x145   : > { %2613 = vmatmul.mubr.bf16.gmra.mrb[136].mxu1 %v8629_v50  ;;  %v2086_v9 = vmul.bf16 1017396388, %v1958_v2  ;;  %2509 = vmatprep.mubr.bf16.mxu0 %v7735_v0  ;;  %v2211_v21 = vmax.bf16 %v2083_v62, %v1955_v54  ;;  %v1219_v29 = vadd.f32 %v1218_v7, %v8501_v23 }
 0x146   : > { %v1061_v12 = vpop.f32.mrb[46].mxu0  ;;  %v2212_v13 = vmax.bf16 %v2084_v8, %v1956_v33  ;;  %2622 = vmatprep.mubr.bf16.mxu1 %v7735_v0  ;;  %v2213_v27 = vmax.bf16 %v2085_v57, %v1957_v56 }
 0x147   : > { %v1062_v15 = vadd.f32 %v1061_v12, %v8504_v26  ;;  %v1222_v18 = vpop.f32.mrb[46].mxu1  ;;  %v1063_v48 = vpop.f32.mrb[47].mxu0  ;;  %v2214_v19 = vmax.bf16 %v2086_v9, %v1958_v2  ;;  %v8663_v9 = vld [vmem:[%s10317_s3 + $0x20] sm:$0xff]  }
 0x148   : > { %v1223_v24 = vadd.f32 %v1222_v18, %v8504_v26  ;;  %v1064_v39 = vadd.f32 %v1063_v48, %v8504_v26  ;;  %v1224_v60 = vpop.f32.mrb[47].mxu1  ;;  %2677 = vmatprep.subr.bf16.mxu0 %v2212_v13 }
 0x149   : > { %v1971_v51 = vpack.c.bf16 %v1062_v15, %v1056_v10  ;;  %v1225_v1 = vadd.f32 %v1224_v60, %v8504_v26  ;;  %2790 = vmatprep.subr.bf16.mxu1 %v2214_v19  ;;  %2678 = vmatpush1.bf16.msra.mxu0 %v2211_v21 }
 0x14a   : > { %v1973_v34 = vpack.c.bf16 %v1223_v24, %v1217_v14  ;;  %v1972_v37 = vpack.c.bf16 %v1064_v39, %v1058_v22  ;;  %2791 = vmatpush1.bf16.msra.mxu1 %v2213_v27  ;;  %v1067_v38 = vpop.f32.mrb[48].mxu0 }
 0x14b   : > { %v2099_v40 = vmul.bf16 1017396388, %v1971_v51  ;;  %v1974_v41 = vpack.c.bf16 %v1225_v1, %v1219_v29  ;;  %v1228_v44 = vpop.f32.mrb[48].mxu1  ;;  %v1069_v46 = vpop.f32.mrb[49].mxu0  ;;  %v1068_v25 = vadd.f32 %v1067_v38, %v8525_v59 }
 0x14c   : > { %v2101_v17 = vmul.bf16 1017396388, %v1973_v34  ;;  %v1230_v42 = vpop.f32.mrb[49].mxu1  ;;  %2510 = vmatmul.mubr.bf16.gmra.mrb[140].mxu0 %v8646_v28  ;;  %v2100_v20 = vmul.bf16 1017396388, %v1972_v37  ;;  %v1229_v55 = vadd.f32 %v1228_v44, %v8525_v59  ;;  %v1070_v3 = vadd.f32 %v1069_v46, %v8525_v59 }
 0x14d   : > { %2623 = vmatmul.mubr.bf16.gmra.mrb[140].mxu1 %v8646_v28  ;;  %v2102_v47 = vmul.bf16 1017396388, %v1974_v41  ;;  %2519 = vmatprep.mubr.bf16.mxu0 %v7735_v0  ;;  %v2227_v2 = vmax.bf16 %v2099_v40, %v1971_v51  ;;  %v1231_v10 = vadd.f32 %v1230_v42, %v8525_v59 }
 0x14e   : > { %v1073_v53 = vpop.f32.mrb[50].mxu0  ;;  %v2228_v54 = vmax.bf16 %v2100_v20, %v1972_v37  ;;  %2632 = vmatprep.mubr.bf16.mxu1 %v7735_v0  ;;  %v2229_v8 = vmax.bf16 %v2101_v17, %v1973_v34 }
 0x14f   : > { %v1074_v56 = vadd.f32 %v1073_v53, %v8528_v61  ;;  %v1234_v33 = vpop.f32.mrb[50].mxu1  ;;  %v1075_v45 = vpop.f32.mrb[51].mxu0  ;;  %v2230_v62 = vmax.bf16 %v2102_v47, %v1974_v41 }
 0x150   : > { %v1235_v4 = vadd.f32 %v1234_v33, %v8528_v61  ;;  %v1076_v57 = vadd.f32 %v1075_v45, %v8528_v61  ;;  %v1236_v7 = vpop.f32.mrb[51].mxu1  ;;  %2679 = vmatprep.subr.bf16.mxu0 %v2228_v54 }
 0x151   : > { %v1987_v12 = vpack.c.bf16 %v1074_v56, %v1068_v25  ;;  %v1237_v13 = vadd.f32 %v1236_v7, %v8528_v61  ;;  %2792 = vmatprep.subr.bf16.mxu1 %v2230_v62  ;;  %2680 = vmatpush1.bf16.msra.mxu0 %v2227_v2  ;;  %v8680_v25 = vld [vmem:[%s10317_s3 + $0x28] sm:$0xff]  }
 0x152   : > { %v1989_v14 = vpack.c.bf16 %v1235_v4, %v1229_v55  ;;  %v1988_v15 = vpack.c.bf16 %v1076_v57, %v1070_v3  ;;  %2793 = vmatpush1.bf16.msra.mxu1 %v2229_v8  ;;  %v1079_v18 = vpop.f32.mrb[52].mxu0 }
 0x153   : > { %v2115_v48 = vmul.bf16 1017396388, %v1987_v12  ;;  %v1990_v19 = vpack.c.bf16 %v1237_v13, %v1231_v10  ;;  %v1240_v21 = vpop.f32.mrb[52].mxu1  ;;  %v1081_v22 = vpop.f32.mrb[53].mxu0  ;;  %v1080_v29 = vadd.f32 %v1079_v18, %v8549_v31 }
 0x154   : > { %v2117_v24 = vmul.bf16 1017396388, %v1989_v14  ;;  %v1242_v39 = vpop.f32.mrb[53].mxu1  ;;  %2520 = vmatmul.mubr.bf16.gmra.mrb[144].mxu0 %v8663_v9  ;;  %v2116_v60 = vmul.bf16 1017396388, %v1988_v15  ;;  %v1241_v34 = vadd.f32 %v1240_v21, %v8549_v31  ;;  %v1082_v46 = vadd.f32 %v1081_v22, %v8549_v31 }
 0x155   : > { %2633 = vmatmul.mubr.bf16.gmra.mrb[144].mxu1 %v8663_v9  ;;  %v2118_v27 = vmul.bf16 1017396388, %v1990_v19  ;;  %2529 = vmatprep.mubr.bf16.mxu0 %v7735_v0  ;;  %v2243_v44 = vmax.bf16 %v2115_v48, %v1987_v12  ;;  %v1243_v53 = vadd.f32 %v1242_v39, %v8549_v31 }
 0x156   : > { %v1085_v51 = vpop.f32.mrb[54].mxu0  ;;  %v2244_v1 = vmax.bf16 %v2116_v60, %v1988_v15  ;;  %2642 = vmatprep.mubr.bf16.mxu1 %v7735_v0  ;;  %v2245_v47 = vmax.bf16 %v2117_v24, %v1989_v14 }
 0x157   : > { %v1086_v37 = vadd.f32 %v1085_v51, %v8552_v32  ;;  %v1246_v38 = vpop.f32.mrb[54].mxu1  ;;  %v1087_v40 = vpop.f32.mrb[55].mxu0  ;;  %v2246_v41 = vmax.bf16 %v2118_v27, %v1990_v19  ;;  %v8697_v51 = vld [vmem:[%s10317_s3 + $0x30] sm:$0xff]  }
 0x158   : > { %v1247_v17 = vadd.f32 %v1246_v38, %v8552_v32  ;;  %v1088_v42 = vadd.f32 %v1087_v40, %v8552_v32  ;;  %v1248_v20 = vpop.f32.mrb[55].mxu1  ;;  %2681 = vmatprep.subr.bf16.mxu0 %v2244_v1 }
 0x159   : > { %v2003_v54 = vpack.c.bf16 %v1086_v37, %v1080_v29  ;;  %v1249_v55 = vadd.f32 %v1248_v20, %v8552_v32  ;;  %2794 = vmatprep.subr.bf16.mxu1 %v2246_v41  ;;  %2682 = vmatpush1.bf16.msra.mxu0 %v2243_v44 }
 0x15a   : > { %v2005_v56 = vpack.c.bf16 %v1247_v17, %v1241_v34  ;;  %v2004_v33 = vpack.c.bf16 %v1088_v42, %v1082_v46  ;;  %2795 = vmatpush1.bf16.msra.mxu1 %v2245_v47  ;;  %v1091_v45 = vpop.f32.mrb[56].mxu0 }
 0x15b   : > { %v2131_v62 = vmul.bf16 1017396388, %v2003_v54  ;;  %v2006_v2 = vpack.c.bf16 %v1249_v55, %v1243_v53  ;;  %v1252_v3 = vpop.f32.mrb[56].mxu1  ;;  %v1093_v4 = vpop.f32.mrb[57].mxu0  ;;  %v1092_v12 = vadd.f32 %v1091_v45, %v8562_v5 }
 0x15c   : > { %v2133_v57 = vmul.bf16 1017396388, %v2005_v56  ;;  %v1254_v7 = vpop.f32.mrb[57].mxu1  ;;  %2530 = vmatmul.mubr.bf16.gmra.mrb[148].mxu0 %v8680_v25  ;;  %v2132_v8 = vmul.bf16 1017396388, %v2004_v33  ;;  %v1253_v15 = vadd.f32 %v1252_v3, %v8562_v5  ;;  %v1094_v24 = vadd.f32 %v1093_v4, %v8562_v5 }
 0x15d   : > { %2643 = vmatmul.mubr.bf16.gmra.mrb[148].mxu1 %v8680_v25  ;;  %v2134_v10 = vmul.bf16 1017396388, %v2006_v2  ;;  %2539 = vmatprep.mubr.bf16.mxu0 %v7735_v0  ;;  %v2259_v22 = vmax.bf16 %v2131_v62, %v2003_v54  ;;  %v1255_v1 = vadd.f32 %v1254_v7, %v8562_v5 }
 0x15e   : > { %v1097_v13 = vpop.f32.mrb[58].mxu0  ;;  %v2260_v14 = vmax.bf16 %v2132_v8, %v2004_v33  ;;  %2652 = vmatprep.mubr.bf16.mxu1 %v7735_v0  ;;  %v2261_v29 = vmax.bf16 %v2133_v57, %v2005_v56 }
 0x15f   : > { %v1098_v18 = vadd.f32 %v1097_v13, %v8564_v6  ;;  %v1258_v48 = vpop.f32.mrb[58].mxu1  ;;  %v1099_v19 = vpop.f32.mrb[59].mxu0  ;;  %v2262_v21 = vmax.bf16 %v2134_v10, %v2006_v2 }
 0x160   : > { %v1259_v39 = vadd.f32 %v1258_v48, %v8564_v6  ;;  %v1100_v60 = vadd.f32 %v1099_v19, %v8564_v6  ;;  %v1260_v27 = vpop.f32.mrb[59].mxu1  ;;  %2683 = vmatprep.subr.bf16.mxu0 %v2260_v14  ;;  %v8714_v14 = vld [vmem:[%s10317_s3 + $0x38] sm:$0xff]  }
 0x161   : > { %v2019_v34 = vpack.c.bf16 %v1098_v18, %v1092_v12  ;;  %v1261_v37 = vadd.f32 %v1260_v27, %v8564_v6  ;;  %2796 = vmatprep.subr.bf16.mxu1 %v2262_v21  ;;  %2684 = vmatpush1.bf16.msra.mxu0 %v2259_v22 }
 0x162   : > { %v2021_v38 = vpack.c.bf16 %v1259_v39, %v1253_v15  ;;  %v2020_v40 = vpack.c.bf16 %v1100_v60, %v1094_v24  ;;  %2797 = vmatpush1.bf16.msra.mxu1 %v2261_v29  ;;  %v1103_v41 = vpop.f32.mrb[60].mxu0 }
 0x163   : > { %v2147_v44 = vmul.bf16 1017396388, %v2019_v34  ;;  %v2022_v46 = vpack.c.bf16 %v1261_v37, %v1255_v1  ;;  %v1264_v17 = vpop.f32.mrb[60].mxu1  ;;  %v1105_v42 = vpop.f32.mrb[61].mxu0  ;;  %v1104_v55 = vadd.f32 %v1103_v41, %v8574_v63 }
 0x164   : > { %v2149_v20 = vmul.bf16 1017396388, %v2021_v38  ;;  %v1266_v47 = vpop.f32.mrb[61].mxu1  ;;  %2540 = vmatmul.mubr.bf16.gmra.mrb[152].mxu0 %v8697_v51  ;;  %v2148_v53 = vmul.bf16 1017396388, %v2020_v40  ;;  %v1265_v45 = vadd.f32 %v1264_v17, %v8574_v63  ;;  %v1106_v7 = vadd.f32 %v1105_v42, %v8574_v63 }
 0x165   : > { %2653 = vmatmul.mubr.bf16.gmra.mrb[152].mxu1 %v8697_v51  ;;  %v2150_v54 = vmul.bf16 1017396388, %v2022_v46  ;;  %2549 = vmatprep.mubr.bf16.mxu0 %v7735_v0  ;;  %v2275_v57 = vmax.bf16 %v2147_v44, %v2019_v34  ;;  %v1267_v15 = vadd.f32 %v1266_v47, %v8574_v63 }
 0x166   : > { %v1109_v56 = vpop.f32.mrb[62].mxu0  ;;  %v2276_v33 = vmax.bf16 %v2148_v53, %v2020_v40  ;;  %2662 = vmatprep.mubr.bf16.mxu1 %v7735_v0  ;;  %v2277_v13 = vmax.bf16 %v2149_v20, %v2021_v38 }
 0x167   : > { %v1110_v62 = vadd.f32 %v1109_v56, %v8576_v43  ;;  %v1270_v2 = vpop.f32.mrb[62].mxu1  ;;  %v1111_v3 = vpop.f32.mrb[63].mxu0  ;;  %v2278_v4 = vmax.bf16 %v2150_v54, %v2022_v46 }
 0x168   : > { %v1271_v8 = vadd.f32 %v1270_v2, %v8576_v43  ;;  %v1112_v10 = vadd.f32 %v1111_v3, %v8576_v43  ;;  %v1272_v12 = vpop.f32.mrb[63].mxu1  ;;  %2685 = vmatprep.subr.bf16.mxu0 %v2276_v33 }
 0x169   : > { %v2035_v18 = vpack.c.bf16 %v1110_v62, %v1104_v55  ;;  %v1273_v48 = vadd.f32 %v1272_v12, %v8576_v43  ;;  %2798 = vmatprep.subr.bf16.mxu1 %v2278_v4  ;;  %2686 = vmatpush1.bf16.msra.mxu0 %v2275_v57 }
 0x16a   : > { %v2037_v19 = vpack.c.bf16 %v1271_v8, %v1265_v45  ;;  %v2036_v21 = vpack.c.bf16 %v1112_v10, %v1106_v7  ;;  %2799 = vmatpush1.bf16.msra.mxu1 %v2277_v13  ;;  %v1341_v22 = vpop.f32.mrb[64].mxu0 }
 0x16b   : > { %v2163_v24 = vmul.bf16 1017396388, %v2035_v18  ;;  %v2038_v39 = vpack.c.bf16 %v1273_v48, %v1267_v15  ;;  %v1502_v60 = vpop.f32.mrb[64].mxu1  ;;  %v1343_v27 = vpop.f32.mrb[65].mxu0  ;;  %v1342_v38 = vadd.f32 %v1341_v22, %v8420_v11 }
 0x16c   : > { %v2165_v29 = vmul.bf16 1017396388, %v2037_v19  ;;  %v1504_v1 = vpop.f32.mrb[65].mxu1  ;;  %2550 = vmatmul.mubr.bf16.gmra.mrb[156].mxu0 %v8714_v14  ;;  %v2164_v34 = vmul.bf16 1017396388, %v2036_v21  ;;  %v1503_v44 = vadd.f32 %v1502_v60, %v8420_v11  ;;  %v1344_v53 = vadd.f32 %v1343_v27, %v8420_v11 }
 0x16d   : > { %2663 = vmatmul.mubr.bf16.gmra.mrb[156].mxu1 %v8714_v14  ;;  %v2166_v37 = vmul.bf16 1017396388, %v2038_v39  ;;  %2705 = vmatprep.mubr.bf16.mxu0 %v7735_v0  ;;  %v2291_v47 = vmax.bf16 %v2163_v24, %v2035_v18  ;;  %v1505_v45 = vadd.f32 %v1504_v1, %v8420_v11 }
 0x16e   : > { %v1347_v40 = vpop.f32.mrb[66].mxu0  ;;  %v2292_v41 = vmax.bf16 %v2164_v34, %v2036_v21  ;;  %2818 = vmatprep.mubr.bf16.mxu1 %v7735_v0  ;;  %v2293_v33 = vmax.bf16 %v2165_v29, %v2037_v19 }
 0x16f   : > { %v1348_v46 = vadd.f32 %v1347_v40, %v8432_v49  ;;  %v1508_v17 = vpop.f32.mrb[66].mxu1  ;;  %v1349_v42 = vpop.f32.mrb[67].mxu0  ;;  %v2294_v20 = vmax.bf16 %v2166_v37, %v2038_v39 }
 0x170   : > { %v1509_v54 = vadd.f32 %v1508_v17, %v8432_v49  ;;  %v1350_v55 = vadd.f32 %v1349_v42, %v8432_v49  ;;  %v1510_v56 = vpop.f32.mrb[67].mxu1  ;;  %2687 = vmatprep.subr.bf16.mxu0 %v2292_v41 }
 0x171   : > { %v1927_v62 = vpack.c.bf16 %v1348_v46, %v1342_v38  ;;  %v1511_v2 = vadd.f32 %v1510_v56, %v8432_v49  ;;  %2800 = vmatprep.subr.bf16.mxu1 %v2294_v20  ;;  %2688 = vmatpush1.bf16.msra.mxu0 %v2291_v47 }
 0x172   : > { %v1929_v3 = vpack.c.bf16 %v1509_v54, %v1503_v44  ;;  %v1928_v4 = vpack.c.bf16 %v1350_v55, %v1344_v53  ;;  %2801 = vmatpush1.bf16.msra.mxu1 %v2293_v33  ;;  %v1353_v57 = vpop.f32.mrb[68].mxu0 }
 0x173   : > { %v2055_v7 = vmul.bf16 1017396388, %v1927_v62  ;;  %v1930_v8 = vpack.c.bf16 %v1511_v2, %v1505_v45  ;;  %v1514_v10 = vpop.f32.mrb[68].mxu1  ;;  %v1355_v12 = vpop.f32.mrb[69].mxu0  ;;  %v1354_v19 = vadd.f32 %v1353_v57, %v8439_v58 }
 0x174   : > { %v2057_v13 = vmul.bf16 1017396388, %v1929_v3  ;;  %v1516_v15 = vpop.f32.mrb[69].mxu1  ;;  %2706 = vmatmul.mubr.bf16.vlgmr.msra.gmra.mrb[160].mxu0 %v8595_v35  ;;  %v2056_v18 = vmul.bf16 1017396388, %v1928_v4  ;;  %v1515_v24 = vadd.f32 %v1514_v10, %v8439_v58  ;;  %v1356_v34 = vadd.f32 %v1355_v12, %v8439_v58 }
 0x175   : > { %2819 = vmatmul.mubr.bf16.vlgmr.msra.gmra.mrb[160].mxu1 %v8595_v35  ;;  %v2058_v48 = vmul.bf16 1017396388, %v1930_v8  ;;  %2715 = vmatprep.mubr.bf16.mxu0 %v7735_v0  ;;  %v2183_v1 = vmax.bf16 %v2055_v7, %v1927_v62  ;;  %v1517_v41 = vadd.f32 %v1516_v15, %v8439_v58 }
 0x176   : > { %v1359_v21 = vpop.f32.mrb[70].mxu0  ;;  %v2184_v22 = vmax.bf16 %v2056_v18, %v1928_v4  ;;  %2828 = vmatprep.mubr.bf16.mxu1 %v7735_v0  ;;  %v2185_v40 = vmax.bf16 %v2057_v13, %v1929_v3 }
 0x177   : > { %v1360_v39 = vadd.f32 %v1359_v21, %v8456_v16  ;;  %v1520_v60 = vpop.f32.mrb[70].mxu1  ;;  %v1361_v27 = vpop.f32.mrb[71].mxu0  ;;  %v2186_v29 = vmax.bf16 %v2058_v48, %v1930_v8 }
 0x178   : > { %v1521_v35 = vadd.f32 %v1520_v60, %v8456_v16  ;;  %v1362_v37 = vadd.f32 %v1361_v27, %v8456_v16  ;;  %v1522_v38 = vpop.f32.mrb[71].mxu1  ;;  %2899 = vmatprep.subr.bf16.mxu0 %v2184_v22 }
 0x179   : > { %v1943_v44 = vpack.c.bf16 %v1360_v39, %v1354_v19  ;;  %v1523_v46 = vadd.f32 %v1522_v38, %v8456_v16  ;;  %3012 = vmatprep.subr.bf16.mxu1 %v2186_v29  ;;  %2900 = vmatpush1.bf16.msra.mxu0 %v2183_v1 }
 0x17a   : > { %v1945_v17 = vpack.c.bf16 %v1521_v35, %v1515_v24  ;;  %v1944_v42 = vpack.c.bf16 %v1362_v37, %v1356_v34  ;;  %3013 = vmatpush1.bf16.msra.mxu1 %v2185_v40  ;;  %v1365_v20 = vpop.f32.mrb[72].mxu0 }
 0x17b   : > { %v2071_v47 = vmul.bf16 1017396388, %v1943_v44  ;;  %v1946_v53 = vpack.c.bf16 %v1523_v46, %v1517_v41  ;;  %v1526_v54 = vpop.f32.mrb[72].mxu1  ;;  %v1367_v55 = vpop.f32.mrb[73].mxu0  ;;  %v1366_v2 = vadd.f32 %v1365_v20, %v8477_v30 }
 0x17c   : > { %v2073_v56 = vmul.bf16 1017396388, %v1945_v17  ;;  %v1528_v33 = vpop.f32.mrb[73].mxu1  ;;  %2716 = vmatmul.mubr.bf16.gmra.mrb[164].mxu0 %v8612_v36  ;;  %v2072_v45 = vmul.bf16 1017396388, %v1944_v42  ;;  %v1527_v57 = vadd.f32 %v1526_v54, %v8477_v30  ;;  %v1368_v15 = vadd.f32 %v1367_v55, %v8477_v30 }
 0x17d   : > { %2829 = vmatmul.mubr.bf16.gmra.mrb[164].mxu1 %v8612_v36  ;;  %v2074_v62 = vmul.bf16 1017396388, %v1946_v53  ;;  %2725 = vmatprep.mubr.bf16.mxu0 %v7735_v0  ;;  %v2199_v13 = vmax.bf16 %v2071_v47, %v1943_v44  ;;  %v1529_v21 = vadd.f32 %v1528_v33, %v8477_v30 }
 0x17e   : > { %v1371_v3 = vpop.f32.mrb[74].mxu0  ;;  %v2200_v4 = vmax.bf16 %v2072_v45, %v1944_v42  ;;  %2838 = vmatprep.mubr.bf16.mxu1 %v7735_v0  ;;  %v2201_v19 = vmax.bf16 %v2073_v56, %v1945_v17 }
 0x17f   : > { %v1372_v7 = vadd.f32 %v1371_v3, %v8480_v52  ;;  %v1532_v8 = vpop.f32.mrb[74].mxu1  ;;  %v1373_v10 = vpop.f32.mrb[75].mxu0  ;;  %v2202_v12 = vmax.bf16 %v2074_v62, %v1946_v53 }
 0x180   : > { %v1533_v36 = vadd.f32 %v1532_v8, %v8480_v52  ;;  %v1374_v18 = vadd.f32 %v1373_v10, %v8480_v52  ;;  %v1534_v48 = vpop.f32.mrb[75].mxu1  ;;  %2901 = vmatprep.subr.bf16.mxu0 %v2200_v4 }
 0x181   : > { %v1959_v22 = vpack.c.bf16 %v1372_v7, %v1366_v2  ;;  %v1535_v24 = vadd.f32 %v1534_v48, %v8480_v52  ;;  %3014 = vmatprep.subr.bf16.mxu1 %v2202_v12  ;;  %2902 = vmatpush1.bf16.msra.mxu0 %v2199_v13 }
 0x182   : > { %v1961_v39 = vpack.c.bf16 %v1533_v36, %v1527_v57  ;;  %v1960_v60 = vpack.c.bf16 %v1374_v18, %v1368_v15  ;;  %3015 = vmatpush1.bf16.msra.mxu1 %v2201_v19  ;;  %v1377_v27 = vpop.f32.mrb[76].mxu0 }
 0x183   : > { %v2087_v29 = vmul.bf16 1017396388, %v1959_v22  ;;  %v1962_v1 = vpack.c.bf16 %v1535_v24, %v1529_v21  ;;  %v1538_v34 = vpop.f32.mrb[76].mxu1  ;;  %v1379_v35 = vpop.f32.mrb[77].mxu0  ;;  %v1378_v44 = vadd.f32 %v1377_v27, %v8501_v23 }
 0x184   : > { %v2089_v37 = vmul.bf16 1017396388, %v1961_v39  ;;  %v1540_v38 = vpop.f32.mrb[77].mxu1  ;;  %2726 = vmatmul.mubr.bf16.gmra.mrb[168].mxu0 %v8629_v50  ;;  %v2088_v40 = vmul.bf16 1017396388, %v1960_v60  ;;  %v1539_v42 = vadd.f32 %v1538_v34, %v8501_v23  ;;  %v1380_v56 = vadd.f32 %v1379_v35, %v8501_v23 }
 0x185   : > { %2839 = vmatmul.mubr.bf16.gmra.mrb[168].mxu1 %v8629_v50  ;;  %v2090_v41 = vmul.bf16 1017396388, %v1962_v1  ;;  %2735 = vmatprep.mubr.bf16.mxu0 %v7735_v0  ;;  %v2215_v55 = vmax.bf16 %v2087_v29, %v1959_v22  ;;  %v1541_v2 = vadd.f32 %v1540_v38, %v8501_v23 }
 0x186   : > { %v1383_v46 = vpop.f32.mrb[78].mxu0  ;;  %v2216_v17 = vmax.bf16 %v2088_v40, %v1960_v60  ;;  %2848 = vmatprep.mubr.bf16.mxu1 %v7735_v0  ;;  %v2217_v62 = vmax.bf16 %v2089_v37, %v1961_v39 }
 0x187   : > { %v1384_v20 = vadd.f32 %v1383_v46, %v8504_v26  ;;  %v1544_v47 = vpop.f32.mrb[78].mxu1  ;;  %v1385_v53 = vpop.f32.mrb[79].mxu0  ;;  %v2218_v54 = vmax.bf16 %v2090_v41, %v1962_v1 }
 0x188   : > { %v1545_v50 = vadd.f32 %v1544_v47, %v8504_v26  ;;  %v1386_v33 = vadd.f32 %v1385_v53, %v8504_v26  ;;  %v1546_v45 = vpop.f32.mrb[79].mxu1  ;;  %2903 = vmatprep.subr.bf16.mxu0 %v2216_v17 }
 0x189   : > { %v1975_v3 = vpack.c.bf16 %v1384_v20, %v1378_v44  ;;  %v1547_v4 = vadd.f32 %v1546_v45, %v8504_v26  ;;  %3016 = vmatprep.subr.bf16.mxu1 %v2218_v54  ;;  %2904 = vmatpush1.bf16.msra.mxu0 %v2215_v55 }
 0x18a   : > { %v1977_v57 = vpack.c.bf16 %v1545_v50, %v1539_v42  ;;  %v1976_v7 = vpack.c.bf16 %v1386_v33, %v1380_v56  ;;  %3017 = vmatpush1.bf16.msra.mxu1 %v2217_v62  ;;  %v1389_v8 = vpop.f32.mrb[80].mxu0 }
 0x18b   : > { %v2103_v10 = vmul.bf16 1017396388, %v1975_v3  ;;  %v1978_v12 = vpack.c.bf16 %v1547_v4, %v1541_v2  ;;  %v1550_v13 = vpop.f32.mrb[80].mxu1  ;;  %v1391_v15 = vpop.f32.mrb[81].mxu0  ;;  %v1390_v21 = vadd.f32 %v1389_v8, %v8525_v59 }
 0x18c   : > { %v2105_v36 = vmul.bf16 1017396388, %v1977_v57  ;;  %v1552_v18 = vpop.f32.mrb[81].mxu1  ;;  %2736 = vmatmul.mubr.bf16.gmra.mrb[172].mxu0 %v8646_v28  ;;  %v2104_v48 = vmul.bf16 1017396388, %v1976_v7  ;;  %v1551_v39 = vadd.f32 %v1550_v13, %v8525_v59  ;;  %v1392_v35 = vadd.f32 %v1391_v15, %v8525_v59 }
 0x18d   : > { %2849 = vmatmul.mubr.bf16.gmra.mrb[172].mxu1 %v8646_v28  ;;  %v2106_v19 = vmul.bf16 1017396388, %v1978_v12  ;;  %2745 = vmatprep.mubr.bf16.mxu0 %v7735_v0  ;;  %v2231_v34 = vmax.bf16 %v2103_v10, %v1975_v3  ;;  %v1553_v41 = vadd.f32 %v1552_v18, %v8525_v59 }
 0x18e   : > { %v1395_v22 = vpop.f32.mrb[82].mxu0  ;;  %v2232_v24 = vmax.bf16 %v2104_v48, %v1976_v7  ;;  %2858 = vmatprep.mubr.bf16.mxu1 %v7735_v0  ;;  %v2233_v40 = vmax.bf16 %v2105_v36, %v1977_v57 }
 0x18f   : > { %v1396_v60 = vadd.f32 %v1395_v22, %v8528_v61  ;;  %v1556_v27 = vpop.f32.mrb[82].mxu1  ;;  %v1397_v29 = vpop.f32.mrb[83].mxu0  ;;  %v2234_v1 = vmax.bf16 %v2106_v19, %v1978_v12 }
 0x190   : > { %v1557_v28 = vadd.f32 %v1556_v27, %v8528_v61  ;;  %v1398_v37 = vadd.f32 %v1397_v29, %v8528_v61  ;;  %v1558_v38 = vpop.f32.mrb[83].mxu1  ;;  %2905 = vmatprep.subr.bf16.mxu0 %v2232_v24 }
 0x191   : > { %v1991_v44 = vpack.c.bf16 %v1396_v60, %v1390_v21  ;;  %v1559_v46 = vadd.f32 %v1558_v38, %v8528_v61  ;;  %3018 = vmatprep.subr.bf16.mxu1 %v2234_v1  ;;  %2906 = vmatpush1.bf16.msra.mxu0 %v2231_v34 }
 0x192   : > { %v1993_v17 = vpack.c.bf16 %v1557_v28, %v1551_v39  ;;  %v1992_v42 = vpack.c.bf16 %v1398_v37, %v1392_v35  ;;  %3019 = vmatpush1.bf16.msra.mxu1 %v2233_v40  ;;  %v1401_v20 = vpop.f32.mrb[84].mxu0 }
 0x193   : > { %v2119_v47 = vmul.bf16 1017396388, %v1991_v44  ;;  %v1994_v53 = vpack.c.bf16 %v1559_v46, %v1553_v41  ;;  %v1562_v54 = vpop.f32.mrb[84].mxu1  ;;  %v1403_v55 = vpop.f32.mrb[85].mxu0  ;;  %v1402_v62 = vadd.f32 %v1401_v20, %v8549_v31 }
 0x194   : > { %v2121_v56 = vmul.bf16 1017396388, %v1993_v17  ;;  %v1564_v50 = vpop.f32.mrb[85].mxu1  ;;  %2746 = vmatmul.mubr.bf16.gmra.mrb[176].mxu0 %v8663_v9  ;;  %v2120_v33 = vmul.bf16 1017396388, %v1992_v42  ;;  %v1563_v4 = vadd.f32 %v1562_v54, %v8549_v31  ;;  %v1404_v13 = vadd.f32 %v1403_v55, %v8549_v31 }
 0x195   : > { %2859 = vmatmul.mubr.bf16.gmra.mrb[176].mxu1 %v8663_v9  ;;  %v2122_v45 = vmul.bf16 1017396388, %v1994_v53  ;;  %2755 = vmatprep.mubr.bf16.mxu0 %v7735_v0  ;;  %v2247_v12 = vmax.bf16 %v2119_v47, %v1991_v44  ;;  %v1565_v48 = vadd.f32 %v1564_v50, %v8549_v31 }
 0x196   : > { %v1407_v2 = vpop.f32.mrb[86].mxu0  ;;  %v2248_v3 = vmax.bf16 %v2120_v33, %v1992_v42  ;;  %2868 = vmatprep.mubr.bf16.mxu1 %v7735_v0  ;;  %v2249_v18 = vmax.bf16 %v2121_v56, %v1993_v17 }
 0x197   : > { %v1408_v57 = vadd.f32 %v1407_v2, %v8552_v32  ;;  %v1568_v7 = vpop.f32.mrb[86].mxu1  ;;  %v1409_v8 = vpop.f32.mrb[87].mxu0  ;;  %v2250_v10 = vmax.bf16 %v2122_v45, %v1994_v53 }
 0x198   : > { %v1569_v9 = vadd.f32 %v1568_v7, %v8552_v32  ;;  %v1410_v15 = vadd.f32 %v1409_v8, %v8552_v32  ;;  %v1570_v36 = vpop.f32.mrb[87].mxu1  ;;  %2907 = vmatprep.subr.bf16.mxu0 %v2248_v3 }
 0x199   : > { %v2007_v19 = vpack.c.bf16 %v1408_v57, %v1402_v62  ;;  %v1571_v21 = vadd.f32 %v1570_v36, %v8552_v32  ;;  %3020 = vmatprep.subr.bf16.mxu1 %v2250_v10  ;;  %2908 = vmatpush1.bf16.msra.mxu0 %v2247_v12 }
 0x19a   : > { %v2009_v22 = vpack.c.bf16 %v1569_v9, %v1563_v4  ;;  %v2008_v24 = vpack.c.bf16 %v1410_v15, %v1404_v13  ;;  %3021 = vmatpush1.bf16.msra.mxu1 %v2249_v18  ;;  %v1413_v39 = vpop.f32.mrb[88].mxu0 }
 0x19b   : > { %v2135_v60 = vmul.bf16 1017396388, %v2007_v19  ;;  %v2010_v27 = vpack.c.bf16 %v1571_v21, %v1565_v48  ;;  %v1574_v29 = vpop.f32.mrb[88].mxu1  ;;  %v1415_v1 = vpop.f32.mrb[89].mxu0  ;;  %v1414_v38 = vadd.f32 %v1413_v39, %v8562_v5 }
 0x19c   : > { %v2137_v34 = vmul.bf16 1017396388, %v2009_v22  ;;  %v1576_v35 = vpop.f32.mrb[89].mxu1  ;;  %2756 = vmatmul.mubr.bf16.gmra.mrb[180].mxu0 %v8680_v25  ;;  %v2136_v28 = vmul.bf16 1017396388, %v2008_v24  ;;  %v1575_v44 = vadd.f32 %v1574_v29, %v8562_v5  ;;  %v1416_v53 = vadd.f32 %v1415_v1, %v8562_v5 }
 0x19d   : > { %2869 = vmatmul.mubr.bf16.gmra.mrb[180].mxu1 %v8680_v25  ;;  %v2138_v37 = vmul.bf16 1017396388, %v2010_v27  ;;  %2765 = vmatprep.mubr.bf16.mxu0 %v7735_v0  ;;  %v2263_v47 = vmax.bf16 %v2135_v60, %v2007_v19  ;;  %v1577_v50 = vadd.f32 %v1576_v35, %v8562_v5 }
 0x19e   : > { %v1419_v40 = vpop.f32.mrb[90].mxu0  ;;  %v2264_v41 = vmax.bf16 %v2136_v28, %v2008_v24  ;;  %2878 = vmatprep.mubr.bf16.mxu1 %v7735_v0  ;;  %v2265_v56 = vmax.bf16 %v2137_v34, %v2009_v22 }
 0x19f   : > { %v1420_v46 = vadd.f32 %v1419_v40, %v8564_v6  ;;  %v1580_v17 = vpop.f32.mrb[90].mxu1  ;;  %v1421_v42 = vpop.f32.mrb[91].mxu0  ;;  %v2266_v20 = vmax.bf16 %v2138_v37, %v2010_v27 }
 0x1a0   : > { %v1581_v25 = vadd.f32 %v1580_v17, %v8564_v6  ;;  %v1422_v54 = vadd.f32 %v1421_v42, %v8564_v6  ;;  %v1582_v55 = vpop.f32.mrb[91].mxu1  ;;  %2909 = vmatprep.subr.bf16.mxu0 %v2264_v41 }
 0x1a1   : > { %v2023_v33 = vpack.c.bf16 %v1420_v46, %v1414_v38  ;;  %v1583_v45 = vadd.f32 %v1582_v55, %v8564_v6  ;;  %3022 = vmatprep.subr.bf16.mxu1 %v2266_v20  ;;  %2910 = vmatpush1.bf16.msra.mxu0 %v2263_v47 }
 0x1a2   : > { %v2025_v62 = vpack.c.bf16 %v1581_v25, %v1575_v44  ;;  %v2024_v2 = vpack.c.bf16 %v1422_v54, %v1416_v53  ;;  %3023 = vmatpush1.bf16.msra.mxu1 %v2265_v56  ;;  %v1425_v3 = vpop.f32.mrb[92].mxu0 }
 0x1a3   : > { %v2151_v4 = vmul.bf16 1017396388, %v2023_v33  ;;  %v2026_v57 = vpack.c.bf16 %v1583_v45, %v1577_v50  ;;  %v1586_v7 = vpop.f32.mrb[92].mxu1  ;;  %v1427_v8 = vpop.f32.mrb[93].mxu0  ;;  %v1426_v15 = vadd.f32 %v1425_v3, %v8574_v63 }
 0x1a4   : > { %v2153_v10 = vmul.bf16 1017396388, %v2025_v62  ;;  %v1588_v12 = vpop.f32.mrb[93].mxu1  ;;  %2766 = vmatmul.mubr.bf16.gmra.mrb[184].mxu0 %v8697_v51  ;;  %v2152_v13 = vmul.bf16 1017396388, %v2024_v2  ;;  %v1587_v48 = vadd.f32 %v1586_v7, %v8574_v63  ;;  %v1428_v60 = vadd.f32 %v1427_v8, %v8574_v63 }
 0x1a5   : > { %2879 = vmatmul.mubr.bf16.gmra.mrb[184].mxu1 %v8697_v51  ;;  %v2154_v9 = vmul.bf16 1017396388, %v2026_v57  ;;  %2775 = vmatprep.mubr.bf16.mxu0 %v7735_v0  ;;  %v2279_v39 = vmax.bf16 %v2151_v4, %v2023_v33  ;;  %v1589_v34 = vadd.f32 %v1588_v12, %v8574_v63 }
 0x1a6   : > { %v1431_v36 = vpop.f32.mrb[94].mxu0  ;;  %v2280_v18 = vmax.bf16 %v2152_v13, %v2024_v2  ;;  %2888 = vmatprep.mubr.bf16.mxu1 %v7735_v0  ;;  %v2281_v1 = vmax.bf16 %v2153_v10, %v2025_v62 }
 0x1a7   : > { %v1432_v19 = vadd.f32 %v1431_v36, %v8576_v43  ;;  %v1592_v21 = vpop.f32.mrb[94].mxu1  ;;  %v1433_v22 = vpop.f32.mrb[95].mxu0  ;;  %v2282_v24 = vmax.bf16 %v2154_v9, %v2026_v57 }
 0x1a8   : > { %v1593_v51 = vadd.f32 %v1592_v21, %v8576_v43  ;;  %v1434_v27 = vadd.f32 %v1433_v22, %v8576_v43  ;;  %v1594_v29 = vpop.f32.mrb[95].mxu1  ;;  %2911 = vmatprep.subr.bf16.mxu0 %v2280_v18 }
 0x1a9   : > { %v2039_v35 = vpack.c.bf16 %v1432_v19, %v1426_v15  ;;  %v1595_v28 = vadd.f32 %v1594_v29, %v8576_v43  ;;  %3024 = vmatprep.subr.bf16.mxu1 %v2282_v24  ;;  %2912 = vmatpush1.bf16.msra.mxu0 %v2279_v39  ;;  %v8829_v24 = vld [vmem:[%s10317_s3] sm:$0xff]  }
 0x1aa   : > { %v2041_v37 = vpack.c.bf16 %v1593_v51, %v1587_v48  ;;  %v2040_v38 = vpack.c.bf16 %v1434_v27, %v1428_v60  ;;  %3025 = vmatpush1.bf16.msra.mxu1 %v2281_v1  ;;  %v1663_v40 = vpop.f32.mrb[96].mxu0 }
 0x1ab   : > { %v2167_v41 = vmul.bf16 1017396388, %v2039_v35  ;;  %v2042_v44 = vpack.c.bf16 %v1595_v28, %v1589_v34  ;;  %v1824_v46 = vpop.f32.mrb[96].mxu1  ;;  %v1665_v17 = vpop.f32.mrb[97].mxu0  ;;  %v1664_v25 = vadd.f32 %v1663_v40, %v8420_v11 }
 0x1ac   : > { %v2169_v42 = vmul.bf16 1017396388, %v2041_v37  ;;  %v1826_v20 = vpop.f32.mrb[97].mxu1  ;;  %2776 = vmatmul.mubr.bf16.gmra.mrb[188].mxu0 %v8714_v14  ;;  %v2168_v47 = vmul.bf16 1017396388, %v2040_v38  ;;  %v1825_v56 = vadd.f32 %v1824_v46, %v8420_v11  ;;  %v1666_v3 = vadd.f32 %v1665_v17, %v8420_v11 }
 0x1ad   : > { %2889 = vmatmul.mubr.bf16.gmra.mrb[188].mxu1 %v8714_v14  ;;  %v2170_v53 = vmul.bf16 1017396388, %v2042_v44  ;;  %2931 = vmatprep.mubr.bf16.mxu0 %v7735_v0  ;;  %v2295_v2 = vmax.bf16 %v2167_v41, %v2039_v35  ;;  %v1827_v8 = vadd.f32 %v1826_v20, %v8420_v11 }
 0x1ae   : > { %v1669_v54 = vpop.f32.mrb[98].mxu0  ;;  %v2296_v55 = vmax.bf16 %v2168_v47, %v2040_v38  ;;  %3044 = vmatprep.mubr.bf16.mxu1 %v7735_v0  ;;  %v2297_v7 = vmax.bf16 %v2169_v42, %v2041_v37 }
 0x1af   : > { %v1670_v50 = vadd.f32 %v1669_v54, %v8432_v49  ;;  %v1830_v33 = vpop.f32.mrb[98].mxu1  ;;  %v1671_v45 = vpop.f32.mrb[99].mxu0  ;;  %v2298_v62 = vmax.bf16 %v2170_v53, %v2042_v44 }
 0x1b0   : > { %v1831_v14 = vadd.f32 %v1830_v33, %v8432_v49  ;;  %v1672_v4 = vadd.f32 %v1671_v45, %v8432_v49  ;;  %v1832_v57 = vpop.f32.mrb[99].mxu1  ;;  %2913 = vmatprep.subr.bf16.mxu0 %v2296_v55  ;;  %v8846_v45 = vld [vmem:[%s10317_s3 + $0x8] sm:$0xff]  }
 0x1b1   : > { %v1931_v10 = vpack.c.bf16 %v1670_v50, %v1664_v25  ;;  %v1833_v12 = vadd.f32 %v1832_v57, %v8432_v49  ;;  %3026 = vmatprep.subr.bf16.mxu1 %v2298_v62  ;;  %2914 = vmatpush1.bf16.msra.mxu0 %v2295_v2 }
 0x1b2   : > { %v1933_v13 = vpack.c.bf16 %v1831_v14, %v1825_v56  ;;  %v1932_v9 = vpack.c.bf16 %v1672_v4, %v1666_v3  ;;  %3027 = vmatpush1.bf16.msra.mxu1 %v2297_v7  ;;  %v1675_v15 = vpop.f32.mrb[100].mxu0 }
 0x1b3   : > { %v2059_v36 = vmul.bf16 1017396388, %v1931_v10  ;;  %v1934_v18 = vpack.c.bf16 %v1833_v12, %v1827_v8  ;;  %v1836_v48 = vpop.f32.mrb[100].mxu1  ;;  %v1677_v19 = vpop.f32.mrb[101].mxu0  ;;  %v1676_v39 = vadd.f32 %v1675_v15, %v8439_v58 }
 0x1b4   : > { %v2061_v21 = vmul.bf16 1017396388, %v1933_v13  ;;  %v1838_v22 = vpop.f32.mrb[101].mxu1  ;;  %2932 = vmatmul.mubr.bf16.vlgmr.msra.gmra.mrb[192].mxu0 %v8829_v24  ;;  %v2060_v11 = vmul.bf16 1017396388, %v1932_v9  ;;  %v1837_v27 = vadd.f32 %v1836_v48, %v8439_v58  ;;  %v1678_v37 = vadd.f32 %v1677_v19, %v8439_v58 }
 0x1b5   : > { %3045 = vmatmul.mubr.bf16.vlgmr.msra.gmra.mrb[192].mxu1 %v8829_v24  ;;  %v2062_v49 = vmul.bf16 1017396388, %v1934_v18  ;;  %2941 = vmatprep.mubr.bf16.mxu0 %v7735_v0  ;;  %v2187_v28 = vmax.bf16 %v2059_v36, %v1931_v10  ;;  %v1839_v46 = vadd.f32 %v1838_v22, %v8439_v58 }
 0x1b6   : > { %v1681_v60 = vpop.f32.mrb[102].mxu0  ;;  %v2188_v51 = vmax.bf16 %v2060_v11, %v1932_v9  ;;  %3054 = vmatprep.mubr.bf16.mxu1 %v7735_v0  ;;  %v2189_v44 = vmax.bf16 %v2061_v21, %v1933_v13 }
 0x1b7   : > { %v1682_v29 = vadd.f32 %v1681_v60, %v8456_v16  ;;  %v1842_v1 = vpop.f32.mrb[102].mxu1  ;;  %v1683_v34 = vpop.f32.mrb[103].mxu0  ;;  %v2190_v35 = vmax.bf16 %v2062_v49, %v1934_v18 }
 0x1b8   : > { %v1843_v38 = vadd.f32 %v1842_v1, %v8456_v16  ;;  %v1684_v40 = vadd.f32 %v1683_v34, %v8456_v16  ;;  %v1844_v41 = vpop.f32.mrb[103].mxu1  ;;  %3125 = vmatprep.subr.bf16.mxu0 %v2188_v51  ;;  %v8863_v1 = vld [vmem:[%s10317_s3 + $0x10] sm:$0xff]  }
 0x1b9   : > { %v1947_v17 = vpack.c.bf16 %v1682_v29, %v1676_v39  ;;  %v1845_v42 = vadd.f32 %v1844_v41, %v8456_v16  ;;  %3238 = vmatprep.subr.bf16.mxu1 %v2190_v35  ;;  %3126 = vmatpush1.bf16.msra.mxu0 %v2187_v28 }
 0x1ba   : > { %v1949_v20 = vpack.c.bf16 %v1843_v38, %v1837_v27  ;;  %v1948_v47 = vpack.c.bf16 %v1684_v40, %v1678_v37  ;;  %3239 = vmatpush1.bf16.msra.mxu1 %v2189_v44  ;;  %v1687_v53 = vpop.f32.mrb[104].mxu0 }
 0x1bb   : > { %v2075_v25 = vmul.bf16 1017396388, %v1947_v17  ;;  %v1950_v54 = vpack.c.bf16 %v1845_v42, %v1839_v46  ;;  %v1848_v55 = vpop.f32.mrb[104].mxu1  ;;  %v1689_v56 = vpop.f32.mrb[105].mxu0  ;;  %v1688_v62 = vadd.f32 %v1687_v53, %v8477_v30 }
 0x1bc   : > { %v2077_v50 = vmul.bf16 1017396388, %v1949_v20  ;;  %v1850_v33 = vpop.f32.mrb[105].mxu1  ;;  %2942 = vmatmul.mubr.bf16.gmra.mrb[196].mxu0 %v8846_v45  ;;  %v2076_v58 = vmul.bf16 1017396388, %v1948_v47  ;;  %v1849_v14 = vadd.f32 %v1848_v55, %v8477_v30  ;;  %v1690_v12 = vadd.f32 %v1689_v56, %v8477_v30 }
 0x1bd   : > { %3055 = vmatmul.mubr.bf16.gmra.mrb[196].mxu1 %v8846_v45  ;;  %v2078_v16 = vmul.bf16 1017396388, %v1950_v54  ;;  %2951 = vmatprep.mubr.bf16.mxu0 %v7735_v0  ;;  %v2203_v10 = vmax.bf16 %v2075_v25, %v1947_v17  ;;  %v1851_v18 = vadd.f32 %v1850_v33, %v8477_v30 }
 0x1be   : > { %v1693_v2 = vpop.f32.mrb[106].mxu0  ;;  %v2204_v3 = vmax.bf16 %v2076_v58, %v1948_v47  ;;  %3064 = vmatprep.mubr.bf16.mxu1 %v7735_v0  ;;  %v2205_v36 = vmax.bf16 %v2077_v50, %v1949_v20 }
 0x1bf   : > { %v1694_v4 = vadd.f32 %v1693_v2, %v8480_v52  ;;  %v1854_v57 = vpop.f32.mrb[106].mxu1  ;;  %v1695_v7 = vpop.f32.mrb[107].mxu0  ;;  %v2206_v8 = vmax.bf16 %v2078_v16, %v1950_v54 }
 0x1c0   : > { %v1855_v13 = vadd.f32 %v1854_v57, %v8480_v52  ;;  %v1696_v9 = vadd.f32 %v1695_v7, %v8480_v52  ;;  %v1856_v15 = vpop.f32.mrb[107].mxu1  ;;  %3127 = vmatprep.subr.bf16.mxu0 %v2204_v3 }
 0x1c1   : > { %v1963_v48 = vpack.c.bf16 %v1694_v4, %v1688_v62  ;;  %v1857_v19 = vadd.f32 %v1856_v15, %v8480_v52  ;;  %3240 = vmatprep.subr.bf16.mxu1 %v2206_v8  ;;  %3128 = vmatpush1.bf16.msra.mxu0 %v2203_v10  ;;  %v8880_v4 = vld [vmem:[%s10317_s3 + $0x18] sm:$0xff]  }
 0x1c2   : > { %v1965_v21 = vpack.c.bf16 %v1855_v13, %v1849_v14  ;;  %v1964_v22 = vpack.c.bf16 %v1696_v9, %v1690_v12  ;;  %3241 = vmatpush1.bf16.msra.mxu1 %v2205_v36  ;;  %v1699_v11 = vpop.f32.mrb[108].mxu0 }
 0x1c3   : > { %v2091_v49 = vmul.bf16 1017396388, %v1963_v48  ;;  %v1966_v39 = vpack.c.bf16 %v1857_v19, %v1851_v18  ;;  %v1860_v60 = vpop.f32.mrb[108].mxu1  ;;  %v1701_v51 = vpop.f32.mrb[109].mxu0  ;;  %v1700_v34 = vadd.f32 %v1699_v11, %v8501_v23 }
 0x1c4   : > { %v2093_v27 = vmul.bf16 1017396388, %v1965_v21  ;;  %v1862_v29 = vpop.f32.mrb[109].mxu1  ;;  %2952 = vmatmul.mubr.bf16.gmra.mrb[200].mxu0 %v8863_v1  ;;  %v2092_v30 = vmul.bf16 1017396388, %v1964_v22  ;;  %v1861_v37 = vadd.f32 %v1860_v60, %v8501_v23  ;;  %v1702_v17 = vadd.f32 %v1701_v51, %v8501_v23 }
 0x1c5   : > { %3065 = vmatmul.mubr.bf16.gmra.mrb[200].mxu1 %v8863_v1  ;;  %v2094_v52 = vmul.bf16 1017396388, %v1966_v39  ;;  %2961 = vmatprep.mubr.bf16.mxu0 %v7735_v0  ;;  %v2219_v46 = vmax.bf16 %v2091_v49, %v1963_v48  ;;  %v1863_v25 = vadd.f32 %v1862_v29, %v8501_v23 }
 0x1c6   : > { %v1705_v35 = vpop.f32.mrb[110].mxu0  ;;  %v2220_v28 = vmax.bf16 %v2092_v30, %v1964_v22  ;;  %3074 = vmatprep.mubr.bf16.mxu1 %v7735_v0  ;;  %v2221_v53 = vmax.bf16 %v2093_v27, %v1965_v21 }
 0x1c7   : > { %v1706_v38 = vadd.f32 %v1705_v35, %v8504_v26  ;;  %v1866_v40 = vpop.f32.mrb[110].mxu1  ;;  %v1707_v41 = vpop.f32.mrb[111].mxu0  ;;  %v2222_v44 = vmax.bf16 %v2094_v52, %v1966_v39 }
 0x1c8   : > { %v1867_v42 = vadd.f32 %v1866_v40, %v8504_v26  ;;  %v1708_v20 = vadd.f32 %v1707_v41, %v8504_v26  ;;  %v1868_v47 = vpop.f32.mrb[111].mxu1  ;;  %3129 = vmatprep.subr.bf16.mxu0 %v2220_v28 }
 0x1c9   : > { %v1979_v54 = vpack.c.bf16 %v1706_v38, %v1700_v34  ;;  %v1869_v55 = vadd.f32 %v1868_v47, %v8504_v26  ;;  %3242 = vmatprep.subr.bf16.mxu1 %v2222_v44  ;;  %3130 = vmatpush1.bf16.msra.mxu0 %v2219_v46 }
 0x1ca   : > { %v1981_v56 = vpack.c.bf16 %v1867_v42, %v1861_v37  ;;  %v1980_v50 = vpack.c.bf16 %v1708_v20, %v1702_v17  ;;  %3243 = vmatpush1.bf16.msra.mxu1 %v2221_v53  ;;  %v1711_v33 = vpop.f32.mrb[112].mxu0  ;;  %v8897_v37 = vld [vmem:[%s10317_s3 + $0x20] sm:$0xff]  }
 0x1cb   : > { %v2107_v58 = vmul.bf16 1017396388, %v1979_v54  ;;  %v1982_v16 = vpack.c.bf16 %v1869_v55, %v1863_v25  ;;  %v1872_v62 = vpop.f32.mrb[112].mxu1  ;;  %v1713_v2 = vpop.f32.mrb[113].mxu0  ;;  %v1712_v57 = vadd.f32 %v1711_v33, %v8525_v59 }
 0x1cc   : > { %v2109_v3 = vmul.bf16 1017396388, %v1981_v56  ;;  %v1874_v14 = vpop.f32.mrb[113].mxu1  ;;  %2962 = vmatmul.mubr.bf16.gmra.mrb[204].mxu0 %v8880_v4  ;;  %v2108_v23 = vmul.bf16 1017396388, %v1980_v50  ;;  %v1873_v10 = vadd.f32 %v1872_v62, %v8525_v59  ;;  %v1714_v18 = vadd.f32 %v1713_v2, %v8525_v59 }
 0x1cd   : > { %3075 = vmatmul.mubr.bf16.gmra.mrb[204].mxu1 %v8880_v4  ;;  %v2110_v26 = vmul.bf16 1017396388, %v1982_v16  ;;  %2971 = vmatprep.mubr.bf16.mxu0 %v7735_v0  ;;  %v2235_v36 = vmax.bf16 %v2107_v58, %v1979_v54  ;;  %v1875_v11 = vadd.f32 %v1874_v14, %v8525_v59 }
 0x1ce   : > { %v1717_v7 = vpop.f32.mrb[114].mxu0  ;;  %v2236_v8 = vmax.bf16 %v2108_v23, %v1980_v50  ;;  %3084 = vmatprep.mubr.bf16.mxu1 %v7735_v0  ;;  %v2237_v22 = vmax.bf16 %v2109_v3, %v1981_v56 }
 0x1cf   : > { %v1718_v12 = vadd.f32 %v1717_v7, %v8528_v61  ;;  %v1878_v13 = vpop.f32.mrb[114].mxu1  ;;  %v1719_v9 = vpop.f32.mrb[115].mxu0  ;;  %v2238_v15 = vmax.bf16 %v2110_v26, %v1982_v16 }
 0x1d0   : > { %v1879_v48 = vadd.f32 %v1878_v13, %v8528_v61  ;;  %v1720_v19 = vadd.f32 %v1719_v9, %v8528_v61  ;;  %v1880_v21 = vpop.f32.mrb[115].mxu1  ;;  %3131 = vmatprep.subr.bf16.mxu0 %v2236_v8  ;;  %v8914_v8 = vld [vmem:[%s10317_s3 + $0x28] sm:$0xff]  }
 0x1d1   : > { %v1995_v49 = vpack.c.bf16 %v1718_v12, %v1712_v57  ;;  %v1881_v39 = vadd.f32 %v1880_v21, %v8528_v61  ;;  %3244 = vmatprep.subr.bf16.mxu1 %v2238_v15  ;;  %3132 = vmatpush1.bf16.msra.mxu0 %v2235_v36 }
 0x1d2   : > { %v1997_v60 = vpack.c.bf16 %v1879_v48, %v1873_v10  ;;  %v1996_v51 = vpack.c.bf16 %v1720_v19, %v1714_v18  ;;  %3245 = vmatpush1.bf16.msra.mxu1 %v2237_v22  ;;  %v1723_v27 = vpop.f32.mrb[116].mxu0 }
 0x1d3   : > { %v2123_v29 = vmul.bf16 1017396388, %v1995_v49  ;;  %v1998_v30 = vpack.c.bf16 %v1881_v39, %v1875_v11  ;;  %v1884_v52 = vpop.f32.mrb[116].mxu1  ;;  %v1725_v34 = vpop.f32.mrb[117].mxu0  ;;  %v1724_v38 = vadd.f32 %v1723_v27, %v8549_v31 }
 0x1d4   : > { %v2125_v35 = vmul.bf16 1017396388, %v1997_v60  ;;  %v1886_v28 = vpop.f32.mrb[117].mxu1  ;;  %2972 = vmatmul.mubr.bf16.gmra.mrb[208].mxu0 %v8897_v37  ;;  %v2124_v59 = vmul.bf16 1017396388, %v1996_v51  ;;  %v1885_v44 = vadd.f32 %v1884_v52, %v8549_v31  ;;  %v1726_v53 = vadd.f32 %v1725_v34, %v8549_v31 }
 0x1d5   : > { %3085 = vmatmul.mubr.bf16.gmra.mrb[208].mxu1 %v8897_v37  ;;  %v2126_v61 = vmul.bf16 1017396388, %v1998_v30  ;;  %2981 = vmatprep.mubr.bf16.mxu0 %v7735_v0  ;;  %v2251_v47 = vmax.bf16 %v2123_v29, %v1995_v49  ;;  %v1887_v50 = vadd.f32 %v1886_v28, %v8549_v31 }
 0x1d6   : > { %v1729_v40 = vpop.f32.mrb[118].mxu0  ;;  %v2252_v41 = vmax.bf16 %v2124_v59, %v1996_v51  ;;  %3094 = vmatprep.mubr.bf16.mxu1 %v7735_v0  ;;  %v2253_v56 = vmax.bf16 %v2125_v35, %v1997_v60 }
 0x1d7   : > { %v1730_v46 = vadd.f32 %v1729_v40, %v8552_v32  ;;  %v1890_v17 = vpop.f32.mrb[118].mxu1  ;;  %v1731_v42 = vpop.f32.mrb[119].mxu0  ;;  %v2254_v20 = vmax.bf16 %v2126_v61, %v1998_v30  ;;  %v8931_v40 = vld [vmem:[%s10317_s3 + $0x30] sm:$0xff]  }
 0x1d8   : > { %v1891_v25 = vadd.f32 %v1890_v17, %v8552_v32  ;;  %v1732_v54 = vadd.f32 %v1731_v42, %v8552_v32  ;;  %v1892_v55 = vpop.f32.mrb[119].mxu1  ;;  %3133 = vmatprep.subr.bf16.mxu0 %v2252_v41 }
 0x1d9   : > { %v2011_v33 = vpack.c.bf16 %v1730_v46, %v1724_v38  ;;  %v1893_v58 = vadd.f32 %v1892_v55, %v8552_v32  ;;  %3246 = vmatprep.subr.bf16.mxu1 %v2254_v20  ;;  %3134 = vmatpush1.bf16.msra.mxu0 %v2251_v47 }
 0x1da   : > { %v2013_v16 = vpack.c.bf16 %v1891_v25, %v1885_v44  ;;  %v2012_v62 = vpack.c.bf16 %v1732_v54, %v1726_v53  ;;  %3247 = vmatpush1.bf16.msra.mxu1 %v2253_v56  ;;  %v1735_v2 = vpop.f32.mrb[120].mxu0 }
 0x1db   : > { %v2139_v3 = vmul.bf16 1017396388, %v2011_v33  ;;  %v2014_v14 = vpack.c.bf16 %v1893_v58, %v1887_v50  ;;  %v1896_v23 = vpop.f32.mrb[120].mxu1  ;;  %v1737_v26 = vpop.f32.mrb[121].mxu0  ;;  %v1736_v10 = vadd.f32 %v1735_v2, %v8562_v5 }
 0x1dc   : > { %v2141_v57 = vmul.bf16 1017396388, %v2013_v16  ;;  %v1898_v7 = vpop.f32.mrb[121].mxu1  ;;  %2982 = vmatmul.mubr.bf16.gmra.mrb[212].mxu0 %v8914_v8  ;;  %v2140_v31 = vmul.bf16 1017396388, %v2012_v62  ;;  %v1897_v9 = vadd.f32 %v1896_v23, %v8562_v5  ;;  %v1738_v21 = vadd.f32 %v1737_v26, %v8562_v5 }
 0x1dd   : > { %3095 = vmatmul.mubr.bf16.gmra.mrb[212].mxu1 %v8914_v8  ;;  %v2142_v32 = vmul.bf16 1017396388, %v2014_v14  ;;  %2991 = vmatprep.mubr.bf16.mxu0 %v7735_v0  ;;  %v2267_v19 = vmax.bf16 %v2139_v3, %v2011_v33  ;;  %v1899_v60 = vadd.f32 %v1898_v7, %v8562_v5 }
 0x1de   : > { %v1741_v12 = vpop.f32.mrb[122].mxu0  ;;  %v2268_v13 = vmax.bf16 %v2140_v31, %v2012_v62  ;;  %3104 = vmatprep.mubr.bf16.mxu1 %v7735_v0  ;;  %v2269_v39 = vmax.bf16 %v2141_v57, %v2013_v16  ;;  %v8948_v57 = vld [vmem:[%s10317_s3 + $0x38] sm:$0xff]  }
 0x1df   : > { %v1742_v15 = vadd.f32 %v1741_v12, %v8564_v6  ;;  %v1902_v36 = vpop.f32.mrb[122].mxu1  ;;  %v1743_v18 = vpop.f32.mrb[123].mxu0  ;;  %v2270_v48 = vmax.bf16 %v2142_v32, %v2014_v14 }
 0x1e0   : > { %v1903_v22 = vadd.f32 %v1902_v36, %v8564_v6  ;;  %v1744_v11 = vadd.f32 %v1743_v18, %v8564_v6  ;;  %v1904_v49 = vpop.f32.mrb[123].mxu1  ;;  %3135 = vmatprep.subr.bf16.mxu0 %v2268_v13  ;;  %v8965_v12 = vpop.permute.xlu1 %2326 }
 0x1e1   : > { %v2027_v51 = vpack.c.bf16 %v1742_v15, %v1736_v10  ;;  %v1905_v27 = vadd.f32 %v1904_v49, %v8564_v6  ;;  %3248 = vmatprep.subr.bf16.mxu1 %v2270_v48  ;;  %3136 = vmatpush1.bf16.msra.mxu0 %v2267_v19 }
 0x1e2   : > { %v2029_v29 = vpack.c.bf16 %v1903_v22, %v1897_v9  ;;  %v2028_v30 = vpack.c.bf16 %v1744_v11, %v1738_v21  ;;  %3249 = vmatpush1.bf16.msra.mxu1 %v2269_v39  ;;  %v1747_v52 = vpop.f32.mrb[124].mxu0 }
 0x1e3   : > { %v2155_v34 = vmul.bf16 1017396388, %v2027_v51  ;;  %v2030_v35 = vpack.c.bf16 %v1905_v27, %v1899_v60  ;;  %v1908_v28 = vpop.f32.mrb[124].mxu1  ;;  %v1749_v59 = vpop.f32.mrb[125].mxu0  ;;  %v1748_v41 = vadd.f32 %v1747_v52, %v8574_v63 }
 0x1e4   : > { %v2157_v61 = vmul.bf16 1017396388, %v2029_v29  ;;  %v1910_v38 = vpop.f32.mrb[125].mxu1  ;;  %2992 = vmatmul.mubr.bf16.gmra.mrb[216].mxu0 %v8931_v40  ;;  %v2156_v5 = vmul.bf16 1017396388, %v2028_v30  ;;  %v1909_v17 = vadd.f32 %v1908_v28, %v8574_v63  ;;  %v1750_v54 = vadd.f32 %v1749_v59, %v8574_v63  ;;  %v8981_v52 = vpop.permute.xlu1 %2336 }
 0x1e5   : > { %3105 = vmatmul.mubr.bf16.gmra.mrb[216].mxu1 %v8931_v40  ;;  %v2158_v6 = vmul.bf16 1017396388, %v2030_v35  ;;  %3001 = vmatprep.mubr.bf16.mxu0 %v7735_v0  ;;  %v2283_v25 = vmax.bf16 %v2155_v34, %v2027_v51  ;;  %v1911_v58 = vadd.f32 %v1910_v38, %v8574_v63 }
 0x1e6   : > { %v1753_v44 = vpop.f32.mrb[126].mxu0  ;;  %v2284_v46 = vmax.bf16 %v2156_v5, %v2028_v30  ;;  %3114 = vmatprep.mubr.bf16.mxu1 %v7735_v0  ;;  %v2285_v33 = vmax.bf16 %v2157_v61, %v2029_v29 }
 0x1e7   : > { %v1754_v42 = vadd.f32 %v1753_v44, %v8576_v43  ;;  %v1914_v20 = vpop.f32.mrb[126].mxu1  ;;  %v1755_v47 = vpop.f32.mrb[127].mxu0  ;;  %v2286_v53 = vmax.bf16 %v2158_v6, %v2030_v35 }
 0x1e8   : > { %v1915_v55 = vadd.f32 %v1914_v20, %v8576_v43  ;;  %v1756_v56 = vadd.f32 %v1755_v47, %v8576_v43  ;;  %v1916_v50 = vpop.f32.mrb[127].mxu1  ;;  %3137 = vmatprep.subr.bf16.mxu0 %v2284_v46 }
 0x1e9   : > { %v2043_v16 = vpack.c.bf16 %v1754_v42, %v1748_v41  ;;  %v1917_v62 = vadd.f32 %v1916_v50, %v8576_v43  ;;  %3250 = vmatprep.subr.bf16.mxu1 %v2286_v53  ;;  %3138 = vmatpush1.bf16.msra.mxu0 %v2283_v25 }
 0x1ea   : > { %v2045_v2 = vpack.c.bf16 %v1915_v55, %v1909_v17  ;;  %v2044_v3 = vpack.c.bf16 %v1756_v56, %v1750_v54  ;;  %3251 = vmatpush1.bf16.msra.mxu1 %v2285_v33 }
 0x1eb   : > { %v2171_v14 = vmul.bf16 1017396388, %v2043_v16  ;;  %v2046_v23 = vpack.c.bf16 %v1917_v62, %v1911_v58 }
 0x1ec   : > { %v2173_v26 = vmul.bf16 1017396388, %v2045_v2  ;;  %3002 = vmatmul.mubr.bf16.gmra.mrb[220].mxu0 %v8948_v57  ;;  %v2172_v7 = vmul.bf16 1017396388, %v2044_v3 }
 0x1ed   : > { %3115 = vmatmul.mubr.bf16.gmra.mrb[220].mxu1 %v8948_v57  ;;  %v2174_v63 = vmul.bf16 1017396388, %v2046_v23  ;;  %3157 = vmatprep.mubr.bf16.mxu0 %v7735_v0  ;;  %v2299_v32 = vmax.bf16 %v2171_v14, %v2043_v16 }
 0x1ee   : > { %v2300_v43 = vmax.bf16 %v2172_v7, %v2044_v3  ;;  %3270 = vmatprep.mubr.bf16.mxu1 %v7735_v0  ;;  %v2301_v10 = vmax.bf16 %v2173_v26, %v2045_v2 }
 0x1ef   : > { %v2302_v31 = vmax.bf16 %v2174_v63, %v2046_v23  ;;  %v8996_v23 = vpop.permute.xlu1 %2346 }
 0x1f0   : > { %3139 = vmatprep.subr.bf16.mxu0 %v2300_v43 }
 0x1f1   : > { %3252 = vmatprep.subr.bf16.mxu1 %v2302_v31  ;;  %3140 = vmatpush1.bf16.msra.mxu0 %v2299_v32 }
 0x1f2   : > { %3253 = vmatpush1.bf16.msra.mxu1 %v2301_v10 }
 0x1f4   : > { %3158 = vmatmul.mubr.bf16.vlgmr.msra.gmra.mrb[224].mxu0 %v8829_v24 }
 0x1f5   : > { %3271 = vmatmul.mubr.bf16.vlgmr.msra.gmra.mrb[224].mxu1 %v8829_v24  ;;  %3167 = vmatprep.mubr.bf16.mxu0 %v7735_v0  ;;  %v8968_v24 = vpop.permute.xlu0 %2321 }
 0x1f6   : > { %3280 = vmatprep.mubr.bf16.mxu1 %v7735_v0 }
 0x1f9   : > { %v8984_v28 = vpop.permute.xlu0 %2331 }
 0x1fc   : > { %3168 = vmatmul.mubr.bf16.gmra.mrb[228].mxu0 %v8846_v45 }
 0x1fd   : > { %3281 = vmatmul.mubr.bf16.gmra.mrb[228].mxu1 %v8846_v45  ;;  %3177 = vmatprep.mubr.bf16.mxu0 %v7735_v0  ;;  %v8999_v63 = vpop.permute.xlu0 %2341 }
 0x1fe   : > { %3290 = vmatprep.mubr.bf16.mxu1 %v7735_v0 }
 0x204   : > { %3178 = vmatmul.mubr.bf16.gmra.mrb[232].mxu0 %v8863_v1 }
 0x205   : > { %3291 = vmatmul.mubr.bf16.gmra.mrb[232].mxu1 %v8863_v1  ;;  %3187 = vmatprep.mubr.bf16.mxu0 %v7735_v0 }
 0x206   : > { %3300 = vmatprep.mubr.bf16.mxu1 %v7735_v0 }
 0x207   : > { %v2481_v13 = vpop.f32.mrb[128].mxu0 }
 0x208   : > { %v2594_v9 = vpop.f32.mrb[128].mxu1  ;;  %v2483_v15 = vpop.f32.mrb[129].mxu0  ;;  %v2482_v18 = vadd.f32 %v2481_v13, %v8968_v24 }
 0x209   : > { %v2596_v45 = vpop.f32.mrb[129].mxu1  ;;  %v2485_v36 = vpop.f32.mrb[130].mxu0  ;;  %v2595_v1 = vadd.f32 %v2594_v9, %v8968_v24  ;;  %v2484_v22 = vadd.f32 %v2483_v15, %v8968_v24 }
 0x20a   : > { %v2486_v48 = vadd.f32 %v2485_v36, %v8965_v12  ;;  %v2598_v19 = vpop.f32.mrb[130].mxu1  ;;  %v2487_v21 = vpop.f32.mrb[131].mxu0  ;;  %v2597_v60 = vadd.f32 %v2596_v45, %v8968_v24 }
 0x20b   : > { %v2599_v11 = vadd.f32 %v2598_v19, %v8965_v12  ;;  %v2488_v49 = vadd.f32 %v2487_v21, %v8965_v12  ;;  %v2600_v39 = vpop.f32.mrb[131].mxu1 }
 0x20c   : > { %v3351_v51 = vpack.c.bf16 %v2486_v48, %v2482_v18  ;;  %v2601_v27 = vadd.f32 %v2600_v39, %v8965_v12  ;;  %3188 = vmatmul.mubr.bf16.gmra.mrb[236].mxu0 %v8880_v4 }
 0x20d   : > { %v3353_v29 = vpack.c.bf16 %v2599_v11, %v2595_v1  ;;  %v3352_v30 = vpack.c.bf16 %v2488_v49, %v2484_v22  ;;  %3301 = vmatmul.mubr.bf16.gmra.mrb[236].mxu1 %v8880_v4  ;;  %3197 = vmatprep.mubr.bf16.mxu0 %v7735_v0 }
 0x20e   : > { %v3479_v34 = vmul.bf16 1017396388, %v3351_v51  ;;  %v3354_v35 = vpack.c.bf16 %v2601_v27, %v2597_v60  ;;  %3310 = vmatprep.mubr.bf16.mxu1 %v7735_v0 }
 0x20f   : > { %v3481_v59 = vmul.bf16 1017396388, %v3353_v29  ;;  %v2491_v61 = vpop.f32.mrb[132].mxu0  ;;  %v3480_v38 = vmul.bf16 1017396388, %v3352_v30 }
 0x210   : > { %v2604_v5 = vpop.f32.mrb[132].mxu1  ;;  %v2493_v6 = vpop.f32.mrb[133].mxu0  ;;  %v3482_v41 = vmul.bf16 1017396388, %v3354_v35  ;;  %v2492_v44 = vadd.f32 %v2491_v61, %v8984_v28  ;;  %v3607_v54 = vmax.bf16 %v3479_v34, %v3351_v51 }
 0x211   : > { %v2606_v46 = vpop.f32.mrb[133].mxu1  ;;  %v2495_v4 = vpop.f32.mrb[134].mxu0  ;;  %v3608_v17 = vmax.bf16 %v3480_v38, %v3352_v30  ;;  %v2605_v42 = vadd.f32 %v2604_v5, %v8984_v28  ;;  %v2494_v55 = vadd.f32 %v2493_v6, %v8984_v28  ;;  %v3609_v58 = vmax.bf16 %v3481_v59, %v3353_v29 }
 0x212   : > { %v2496_v20 = vadd.f32 %v2495_v4, %v8981_v52  ;;  %v2608_v47 = vpop.f32.mrb[134].mxu1  ;;  %v2497_v53 = vpop.f32.mrb[135].mxu0  ;;  %v3610_v25 = vmax.bf16 %v3482_v41, %v3354_v35  ;;  %v2607_v16 = vadd.f32 %v2606_v46, %v8984_v28 }
 0x213   : > { %v2609_v56 = vadd.f32 %v2608_v47, %v8981_v52  ;;  %v2498_v50 = vadd.f32 %v2497_v53, %v8981_v52  ;;  %v2610_v33 = vpop.f32.mrb[135].mxu1  ;;  %3880 = vmatprep.subr.bf16.mxu0 %v3608_v17  ;;  %v9012_v59 = vpop.permute.xlu1 %2356 }
 0x214   : > { %v3367_v62 = vpack.c.bf16 %v2496_v20, %v2492_v44  ;;  %v2611_v2 = vadd.f32 %v2610_v33, %v8981_v52  ;;  %3993 = vmatprep.subr.bf16.mxu1 %v3610_v25  ;;  %3198 = vmatmul.mubr.bf16.gmra.mrb[240].mxu0 %v8897_v37  ;;  %v9015_v5 = vpop.permute.xlu0 %2351 }
 0x215   : > { %v3369_v3 = vpack.c.bf16 %v2609_v56, %v2605_v42  ;;  %v3368_v14 = vpack.c.bf16 %v2498_v50, %v2494_v55  ;;  %3311 = vmatmul.mubr.bf16.gmra.mrb[240].mxu1 %v8897_v37  ;;  %3881 = vmatpush1.bf16.msra.mxu0 %v3607_v54 }
 0x216   : > { %v3495_v26 = vmul.bf16 1017396388, %v3367_v62  ;;  %v3370_v7 = vpack.c.bf16 %v2611_v2, %v2607_v16  ;;  %3994 = vmatpush1.bf16.msra.mxu1 %v3609_v58  ;;  %3207 = vmatprep.mubr.bf16.mxu0 %v7735_v0 }
 0x217   : > { %v3497_v43 = vmul.bf16 1017396388, %v3369_v3  ;;  %v2501_v31 = vpop.f32.mrb[136].mxu0  ;;  %3320 = vmatprep.mubr.bf16.mxu1 %v7735_v0  ;;  %v3496_v32 = vmul.bf16 1017396388, %v3368_v14 }
 0x218   : > { %v2614_v10 = vpop.f32.mrb[136].mxu1  ;;  %v2503_v13 = vpop.f32.mrb[137].mxu0  ;;  %v3498_v9 = vmul.bf16 1017396388, %v3370_v7  ;;  %v2502_v37 = vadd.f32 %v2501_v31, %v8999_v63  ;;  %v3623_v22 = vmax.bf16 %v3495_v26, %v3367_v62 }
 0x219   : > { %v2616_v15 = vpop.f32.mrb[137].mxu1  ;;  %v2505_v45 = vpop.f32.mrb[138].mxu0  ;;  %v3624_v36 = vmax.bf16 %v3496_v32, %v3368_v14  ;;  %v2615_v18 = vadd.f32 %v2614_v10, %v8999_v63  ;;  %v2504_v11 = vadd.f32 %v2503_v13, %v8999_v63  ;;  %v3625_v51 = vmax.bf16 %v3497_v43, %v3369_v3 }
 0x21a   : > { %v2506_v48 = vadd.f32 %v2505_v45, %v8996_v23  ;;  %v2618_v19 = vpop.f32.mrb[138].mxu1  ;;  %v2507_v21 = vpop.f32.mrb[139].mxu0  ;;  %v3626_v1 = vmax.bf16 %v3498_v9, %v3370_v7  ;;  %v2617_v27 = vadd.f32 %v2616_v15, %v8999_v63 }
 0x21b   : > { %v2619_v49 = vadd.f32 %v2618_v19, %v8996_v23  ;;  %v2508_v39 = vadd.f32 %v2507_v21, %v8996_v23  ;;  %v2620_v60 = vpop.f32.mrb[139].mxu1  ;;  %3882 = vmatprep.subr.bf16.mxu0 %v3624_v36  ;;  %v9028_v31 = vpop.permute.xlu1 %2366 }
 0x21c   : > { %v3383_v29 = vpack.c.bf16 %v2506_v48, %v2502_v37  ;;  %v2621_v30 = vadd.f32 %v2620_v60, %v8996_v23  ;;  %3995 = vmatprep.subr.bf16.mxu1 %v3626_v1  ;;  %3208 = vmatmul.mubr.bf16.gmra.mrb[244].mxu0 %v8914_v8  ;;  %v9031_v13 = vpop.permute.xlu0 %2361 }
 0x21d   : > { %v3385_v34 = vpack.c.bf16 %v2619_v49, %v2615_v18  ;;  %v3384_v35 = vpack.c.bf16 %v2508_v39, %v2504_v11  ;;  %3321 = vmatmul.mubr.bf16.gmra.mrb[244].mxu1 %v8914_v8  ;;  %3883 = vmatpush1.bf16.msra.mxu0 %v3623_v22 }
 0x21e   : > { %v3511_v61 = vmul.bf16 1017396388, %v3383_v29  ;;  %v3386_v38 = vpack.c.bf16 %v2621_v30, %v2617_v27  ;;  %3996 = vmatpush1.bf16.msra.mxu1 %v3625_v51  ;;  %3217 = vmatprep.mubr.bf16.mxu0 %v7735_v0 }
 0x21f   : > { %v3513_v6 = vmul.bf16 1017396388, %v3385_v34  ;;  %v2511_v41 = vpop.f32.mrb[140].mxu0  ;;  %3330 = vmatprep.mubr.bf16.mxu1 %v7735_v0  ;;  %v3512_v44 = vmul.bf16 1017396388, %v3384_v35 }
 0x220   : > { %v2624_v46 = vpop.f32.mrb[140].mxu1  ;;  %v2513_v4 = vpop.f32.mrb[141].mxu0  ;;  %v3514_v17 = vmul.bf16 1017396388, %v3386_v38  ;;  %v2512_v8 = vadd.f32 %v2511_v41, %v9015_v5  ;;  %v3639_v50 = vmax.bf16 %v3511_v61, %v3383_v29 }
 0x221   : > { %v2626_v42 = vpop.f32.mrb[141].mxu1  ;;  %v2515_v20 = vpop.f32.mrb[142].mxu0  ;;  %v3640_v47 = vmax.bf16 %v3512_v44, %v3384_v35  ;;  %v2625_v53 = vadd.f32 %v2624_v46, %v9015_v5  ;;  %v2514_v33 = vadd.f32 %v2513_v4, %v9015_v5  ;;  %v3641_v2 = vmax.bf16 %v3513_v6, %v3385_v34 }
 0x222   : > { %v2516_v25 = vadd.f32 %v2515_v20, %v9012_v59  ;;  %v2628_v54 = vpop.f32.mrb[142].mxu1  ;;  %v2517_v55 = vpop.f32.mrb[143].mxu0  ;;  %v3642_v56 = vmax.bf16 %v3514_v17, %v3386_v38  ;;  %v2627_v3 = vadd.f32 %v2626_v42, %v9015_v5 }
 0x223   : > { %v2629_v58 = vadd.f32 %v2628_v54, %v9012_v59  ;;  %v2518_v16 = vadd.f32 %v2517_v55, %v9012_v59  ;;  %v2630_v62 = vpop.f32.mrb[143].mxu1  ;;  %3884 = vmatprep.subr.bf16.mxu0 %v3640_v47  ;;  %v9044_v44 = vpop.permute.xlu1 %2376 }
 0x224   : > { %v3399_v14 = vpack.c.bf16 %v2516_v25, %v2512_v8  ;;  %v2631_v26 = vadd.f32 %v2630_v62, %v9012_v59  ;;  %3997 = vmatprep.subr.bf16.mxu1 %v3642_v56  ;;  %3218 = vmatmul.mubr.bf16.gmra.mrb[248].mxu0 %v8931_v40  ;;  %v9047_v17 = vpop.permute.xlu0 %2371 }
 0x225   : > { %v3401_v7 = vpack.c.bf16 %v2629_v58, %v2625_v53  ;;  %v3400_v43 = vpack.c.bf16 %v2518_v16, %v2514_v33  ;;  %3331 = vmatmul.mubr.bf16.gmra.mrb[248].mxu1 %v8931_v40  ;;  %3885 = vmatpush1.bf16.msra.mxu0 %v3639_v50 }
 0x226   : > { %v3527_v32 = vmul.bf16 1017396388, %v3399_v14  ;;  %v3402_v10 = vpack.c.bf16 %v2631_v26, %v2627_v3  ;;  %3998 = vmatpush1.bf16.msra.mxu1 %v3641_v2  ;;  %3227 = vmatprep.mubr.bf16.mxu0 %v7735_v0 }
 0x227   : > { %v3529_v9 = vmul.bf16 1017396388, %v3401_v7  ;;  %v2521_v37 = vpop.f32.mrb[144].mxu0  ;;  %3340 = vmatprep.mubr.bf16.mxu1 %v7735_v0  ;;  %v3528_v15 = vmul.bf16 1017396388, %v3400_v43 }
 0x228   : > { %v2634_v45 = vpop.f32.mrb[144].mxu1  ;;  %v2523_v36 = vpop.f32.mrb[145].mxu0  ;;  %v3530_v18 = vmul.bf16 1017396388, %v3402_v10  ;;  %v2522_v40 = vadd.f32 %v2521_v37, %v9031_v13  ;;  %v3655_v60 = vmax.bf16 %v3527_v32, %v3399_v14 }
 0x229   : > { %v2636_v48 = vpop.f32.mrb[145].mxu1  ;;  %v2525_v19 = vpop.f32.mrb[146].mxu0  ;;  %v3656_v21 = vmax.bf16 %v3528_v15, %v3400_v43  ;;  %v2635_v1 = vadd.f32 %v2634_v45, %v9031_v13  ;;  %v2524_v51 = vadd.f32 %v2523_v36, %v9031_v13  ;;  %v3657_v34 = vmax.bf16 %v3529_v9, %v3401_v7 }
 0x22a   : > { %v2526_v22 = vadd.f32 %v2525_v19, %v9028_v31  ;;  %v2638_v11 = vpop.f32.mrb[146].mxu1  ;;  %v2527_v49 = vpop.f32.mrb[147].mxu0  ;;  %v3658_v39 = vmax.bf16 %v3530_v18, %v3402_v10  ;;  %v2637_v35 = vadd.f32 %v2636_v48, %v9031_v13 }
 0x22b   : > { %v2639_v27 = vadd.f32 %v2638_v11, %v9028_v31  ;;  %v2528_v29 = vadd.f32 %v2527_v49, %v9028_v31  ;;  %v2640_v30 = vpop.f32.mrb[147].mxu1  ;;  %3886 = vmatprep.subr.bf16.mxu0 %v3656_v21  ;;  %v9058_v45 = vpop.permute.xlu1 %2386 }
 0x22c   : > { %v3415_v61 = vpack.c.bf16 %v2526_v22, %v2522_v40  ;;  %v2641_v38 = vadd.f32 %v2640_v30, %v9028_v31  ;;  %3999 = vmatprep.subr.bf16.mxu1 %v3658_v39  ;;  %3228 = vmatmul.mubr.bf16.gmra.mrb[252].mxu0 %v8948_v57  ;;  %v9060_v40 = vpop.permute.xlu0 %2381 }
 0x22d   : > { %v3417_v6 = vpack.c.bf16 %v2639_v27, %v2635_v1  ;;  %v3416_v41 = vpack.c.bf16 %v2528_v29, %v2524_v51  ;;  %3341 = vmatmul.mubr.bf16.gmra.mrb[252].mxu1 %v8948_v57  ;;  %3887 = vmatpush1.bf16.msra.mxu0 %v3655_v60 }
 0x22e   : > { %v3543_v46 = vmul.bf16 1017396388, %v3415_v61  ;;  %v3418_v4 = vpack.c.bf16 %v2641_v38, %v2637_v35  ;;  %4000 = vmatpush1.bf16.msra.mxu1 %v3657_v34  ;;  %3912 = vmatprep.mubr.bf16.mxu0 %v7735_v0 }
 0x22f   : > { %v3545_v8 = vmul.bf16 1017396388, %v3417_v6  ;;  %v2531_v42 = vpop.f32.mrb[148].mxu0  ;;  %v3544_v20 = vmul.bf16 1017396388, %v3416_v41  ;;  %4025 = vmatprep.mubr.bf16.mxu1 %v7735_v0 }
 0x230   : > { %v2644_v47 = vpop.f32.mrb[148].mxu1  ;;  %v2533_v53 = vpop.f32.mrb[149].mxu0  ;;  %v3546_v25 = vmul.bf16 1017396388, %v3418_v4  ;;  %v2532_v57 = vadd.f32 %v2531_v42, %v9047_v17  ;;  %v3671_v2 = vmax.bf16 %v3543_v46, %v3415_v61 }
 0x231   : > { %v2646_v54 = vpop.f32.mrb[149].mxu1  ;;  %v2535_v55 = vpop.f32.mrb[150].mxu0  ;;  %v3672_v56 = vmax.bf16 %v3544_v20, %v3416_v41  ;;  %v2645_v50 = vadd.f32 %v2644_v47, %v9047_v17  ;;  %v2534_v3 = vadd.f32 %v2533_v53, %v9047_v17  ;;  %v3673_v43 = vmax.bf16 %v3545_v8, %v3417_v6 }
 0x232   : > { %v2536_v33 = vadd.f32 %v2535_v55, %v9044_v44  ;;  %v2648_v58 = vpop.f32.mrb[150].mxu1  ;;  %v2537_v16 = vpop.f32.mrb[151].mxu0  ;;  %v3674_v62 = vmax.bf16 %v3546_v25, %v3418_v4  ;;  %v2647_v32 = vadd.f32 %v2646_v54, %v9047_v17 }
 0x233   : > { %v2649_v14 = vadd.f32 %v2648_v58, %v9044_v44  ;;  %v2538_v26 = vadd.f32 %v2537_v16, %v9044_v44  ;;  %v2650_v7 = vpop.f32.mrb[151].mxu1  ;;  %3888 = vmatprep.subr.bf16.mxu0 %v3672_v56  ;;  %v9070_v25 = vpop.permute.xlu1 %2396 }
 0x234   : > { %v3431_v10 = vpack.c.bf16 %v2536_v33, %v2532_v57  ;;  %v2651_v9 = vadd.f32 %v2650_v7, %v9044_v44  ;;  %4001 = vmatprep.subr.bf16.mxu1 %v3674_v62  ;;  %3889 = vmatpush1.bf16.msra.mxu0 %v3671_v2  ;;  %v9072_v55 = vpop.permute.xlu0 %2391 }
 0x235   : > { %v3433_v37 = vpack.c.bf16 %v2649_v14, %v2645_v50  ;;  %v3432_v15 = vpack.c.bf16 %v2538_v26, %v2534_v3  ;;  %4002 = vmatpush1.bf16.msra.mxu1 %v3673_v43 }
 0x236   : > { %v3559_v36 = vmul.bf16 1017396388, %v3431_v10  ;;  %v3434_v18 = vpack.c.bf16 %v2651_v9, %v2647_v32 }
 0x237   : > { %v3561_v48 = vmul.bf16 1017396388, %v3433_v37  ;;  %v2541_v19 = vpop.f32.mrb[152].mxu0  ;;  %v3560_v21 = vmul.bf16 1017396388, %v3432_v15 }
 0x238   : > { %v2654_v1 = vpop.f32.mrb[152].mxu1  ;;  %v2543_v22 = vpop.f32.mrb[153].mxu0  ;;  %v3562_v11 = vmul.bf16 1017396388, %v3434_v18  ;;  %v2542_v49 = vadd.f32 %v2541_v19, %v9060_v40  ;;  %v3687_v61 = vmax.bf16 %v3559_v36, %v3431_v10 }
 0x239   : > { %v2656_v39 = vpop.f32.mrb[153].mxu1  ;;  %v2545_v60 = vpop.f32.mrb[154].mxu0  ;;  %v3688_v51 = vmax.bf16 %v3560_v21, %v3432_v15  ;;  %v2655_v27 = vadd.f32 %v2654_v1, %v9060_v40  ;;  %v2544_v38 = vadd.f32 %v2543_v22, %v9060_v40  ;;  %v3689_v4 = vmax.bf16 %v3561_v48, %v3433_v37 }
 0x23a   : > { %v2546_v29 = vadd.f32 %v2545_v60, %v9058_v45  ;;  %v2658_v30 = vpop.f32.mrb[154].mxu1  ;;  %v2547_v34 = vpop.f32.mrb[155].mxu0  ;;  %v3690_v35 = vmax.bf16 %v3562_v11, %v3434_v18  ;;  %v2657_v8 = vadd.f32 %v2656_v39, %v9060_v40 }
 0x23b   : > { %v2659_v6 = vadd.f32 %v2658_v30, %v9058_v45  ;;  %v2548_v41 = vadd.f32 %v2547_v34, %v9058_v45  ;;  %v2660_v46 = vpop.f32.mrb[155].mxu1  ;;  %3890 = vmatprep.subr.bf16.mxu0 %v3688_v51 }
 0x23c   : > { %v3447_v42 = vpack.c.bf16 %v2546_v29, %v2542_v49  ;;  %v2661_v20 = vadd.f32 %v2660_v46, %v9058_v45  ;;  %4003 = vmatprep.subr.bf16.mxu1 %v3690_v35  ;;  %3891 = vmatpush1.bf16.msra.mxu0 %v3687_v61 }
 0x23d   : > { %v3449_v47 = vpack.c.bf16 %v2659_v6, %v2655_v27  ;;  %v3448_v53 = vpack.c.bf16 %v2548_v41, %v2544_v38  ;;  %4004 = vmatpush1.bf16.msra.mxu1 %v3689_v4 }
 0x23e   : > { %v3575_v57 = vmul.bf16 1017396388, %v3447_v42  ;;  %v3450_v54 = vpack.c.bf16 %v2661_v20, %v2657_v8 }
 0x23f   : > { %v3577_v56 = vmul.bf16 1017396388, %v3449_v47  ;;  %v2551_v50 = vpop.f32.mrb[156].mxu0  ;;  %v3576_v33 = vmul.bf16 1017396388, %v3448_v53 }
 0x240   : > { %v2664_v58 = vpop.f32.mrb[156].mxu1  ;;  %v2553_v16 = vpop.f32.mrb[157].mxu0  ;;  %v3578_v62 = vmul.bf16 1017396388, %v3450_v54  ;;  %v2552_v2 = vadd.f32 %v2551_v50, %v9072_v55  ;;  %v3703_v37 = vmax.bf16 %v3575_v57, %v3447_v42 }
 0x241   : > { %v2666_v3 = vpop.f32.mrb[157].mxu1  ;;  %v2555_v14 = vpop.f32.mrb[158].mxu0  ;;  %v3704_v26 = vmax.bf16 %v3576_v33, %v3448_v53  ;;  %v2665_v7 = vadd.f32 %v2664_v58, %v9072_v55  ;;  %v2554_v15 = vadd.f32 %v2553_v16, %v9072_v55  ;;  %v3705_v19 = vmax.bf16 %v3577_v56, %v3449_v47  ;;  %v9091_v33 = vld [vmem:[%s10317_s3 + $0x40] sm:$0xff]  }
 0x242   : > { %v2556_v43 = vadd.f32 %v2555_v14, %v9070_v25  ;;  %v2668_v32 = vpop.f32.mrb[158].mxu1  ;;  %v2557_v10 = vpop.f32.mrb[159].mxu0  ;;  %v3706_v9 = vmax.bf16 %v3578_v62, %v3450_v54  ;;  %v2667_v21 = vadd.f32 %v2666_v3, %v9072_v55 }
 0x243   : > { %v2669_v36 = vadd.f32 %v2668_v32, %v9070_v25  ;;  %v2558_v18 = vadd.f32 %v2557_v10, %v9070_v25  ;;  %v2670_v48 = vpop.f32.mrb[159].mxu1  ;;  %3892 = vmatprep.subr.bf16.mxu0 %v3704_v26 }
 0x244   : > { %v3463_v1 = vpack.c.bf16 %v2556_v43, %v2552_v2  ;;  %v2671_v22 = vadd.f32 %v2670_v48, %v9070_v25  ;;  %4005 = vmatprep.subr.bf16.mxu1 %v3706_v9  ;;  %3893 = vmatpush1.bf16.msra.mxu0 %v3703_v37 }
 0x245   : > { %v3465_v11 = vpack.c.bf16 %v2669_v36, %v2665_v7  ;;  %v3464_v49 = vpack.c.bf16 %v2558_v18, %v2554_v15  ;;  %4006 = vmatpush1.bf16.msra.mxu1 %v3705_v19 }
 0x246   : > { %v3591_v39 = vmul.bf16 1017396388, %v3463_v1  ;;  %v3466_v60 = vpack.c.bf16 %v2671_v22, %v2667_v21 }
 0x247   : > { %v3593_v51 = vmul.bf16 1017396388, %v3465_v11  ;;  %v2707_v27 = vpop.f32.mrb[160].mxu0  ;;  %v3592_v29 = vmul.bf16 1017396388, %v3464_v49 }
 0x248   : > { %v2820_v30 = vpop.f32.mrb[160].mxu1  ;;  %v2709_v34 = vpop.f32.mrb[161].mxu0  ;;  %v3594_v35 = vmul.bf16 1017396388, %v3466_v60  ;;  %v2708_v61 = vadd.f32 %v2707_v27, %v8968_v24  ;;  %v3719_v47 = vmax.bf16 %v3591_v39, %v3463_v1 }
 0x249   : > { %v2822_v38 = vpop.f32.mrb[161].mxu1  ;;  %v2711_v6 = vpop.f32.mrb[162].mxu0  ;;  %v3720_v41 = vmax.bf16 %v3592_v29, %v3464_v49  ;;  %v2821_v46 = vadd.f32 %v2820_v30, %v8968_v24  ;;  %v2710_v53 = vadd.f32 %v2709_v34, %v8968_v24  ;;  %v3721_v50 = vmax.bf16 %v3593_v51, %v3465_v11  ;;  %v9108_v30 = vld [vmem:[%s10317_s3 + $0x48] sm:$0xff]  }
 0x24a   : > { %v2712_v4 = vadd.f32 %v2711_v6, %v8965_v12  ;;  %v2824_v8 = vpop.f32.mrb[162].mxu1  ;;  %v2713_v42 = vpop.f32.mrb[163].mxu0  ;;  %v3722_v20 = vmax.bf16 %v3594_v35, %v3466_v60  ;;  %v2823_v58 = vadd.f32 %v2822_v38, %v8968_v24 }
 0x24b   : > { %v2825_v57 = vadd.f32 %v2824_v8, %v8965_v12  ;;  %v2714_v54 = vadd.f32 %v2713_v42, %v8965_v12  ;;  %v2826_v56 = vpop.f32.mrb[163].mxu1  ;;  %3894 = vmatprep.subr.bf16.mxu0 %v3720_v41 }
 0x24c   : > { %v3355_v16 = vpack.c.bf16 %v2712_v4, %v2708_v61  ;;  %v2827_v62 = vadd.f32 %v2826_v56, %v8965_v12  ;;  %4007 = vmatprep.subr.bf16.mxu1 %v3722_v20  ;;  %3895 = vmatpush1.bf16.msra.mxu0 %v3719_v47 }
 0x24d   : > { %v3357_v2 = vpack.c.bf16 %v2825_v57, %v2821_v46  ;;  %v3356_v3 = vpack.c.bf16 %v2714_v54, %v2710_v53  ;;  %4008 = vmatpush1.bf16.msra.mxu1 %v3721_v50 }
 0x24e   : > { %v3483_v14 = vmul.bf16 1017396388, %v3355_v16  ;;  %v3358_v26 = vpack.c.bf16 %v2827_v62, %v2823_v58 }
 0x24f   : > { %v3485_v7 = vmul.bf16 1017396388, %v3357_v2  ;;  %v2717_v43 = vpop.f32.mrb[164].mxu0  ;;  %3913 = vmatmul.mubr.bf16.vlgmr.msra.gmra.mrb[0].mxu0 %v9091_v33  ;;  %v3484_v32 = vmul.bf16 1017396388, %v3356_v3 }
 0x250   : > { %v2830_v10 = vpop.f32.mrb[164].mxu1  ;;  %4026 = vmatmul.mubr.bf16.vlgmr.msra.gmra.mrb[0].mxu1 %v9091_v33  ;;  %v2719_v9 = vpop.f32.mrb[165].mxu0  ;;  %v3486_v37 = vmul.bf16 1017396388, %v3358_v26  ;;  %3922 = vmatprep.mubr.bf16.mxu0 %v7735_v0  ;;  %v2718_v15 = vadd.f32 %v2717_v43, %v8984_v28  ;;  %v3611_v49 = vmax.bf16 %v3483_v14, %v3355_v16 }
 0x251   : > { %v2832_v36 = vpop.f32.mrb[165].mxu1  ;;  %v2721_v18 = vpop.f32.mrb[166].mxu0  ;;  %v3612_v48 = vmax.bf16 %v3484_v32, %v3356_v3  ;;  %4035 = vmatprep.mubr.bf16.mxu1 %v7735_v0  ;;  %v2831_v19 = vadd.f32 %v2830_v10, %v8984_v28  ;;  %v2720_v39 = vadd.f32 %v2719_v9, %v8984_v28  ;;  %v3613_v29 = vmax.bf16 %v3485_v7, %v3357_v2  ;;  %v9125_v9 = vld [vmem:[%s10317_s3 + $0x50] sm:$0xff]  }
 0x252   : > { %v2722_v21 = vadd.f32 %v2721_v18, %v8981_v52  ;;  %v2834_v1 = vpop.f32.mrb[166].mxu1  ;;  %v2723_v22 = vpop.f32.mrb[167].mxu0  ;;  %v3614_v11 = vmax.bf16 %v3486_v37, %v3358_v26  ;;  %v2833_v34 = vadd.f32 %v2832_v36, %v8984_v28 }
 0x253   : > { %v2835_v60 = vadd.f32 %v2834_v1, %v8981_v52  ;;  %v2724_v51 = vadd.f32 %v2723_v22, %v8981_v52  ;;  %v2836_v27 = vpop.f32.mrb[167].mxu1  ;;  %4106 = vmatprep.subr.bf16.mxu0 %v3612_v48 }
 0x254   : > { %v3371_v35 = vpack.c.bf16 %v2722_v21, %v2718_v15  ;;  %v2837_v61 = vadd.f32 %v2836_v27, %v8981_v52  ;;  %4219 = vmatprep.subr.bf16.mxu1 %v3614_v11  ;;  %4107 = vmatpush1.bf16.msra.mxu0 %v3611_v49 }
 0x255   : > { %v3373_v38 = vpack.c.bf16 %v2835_v60, %v2831_v19  ;;  %v3372_v6 = vpack.c.bf16 %v2724_v51, %v2720_v39  ;;  %4220 = vmatpush1.bf16.msra.mxu1 %v3613_v29 }
 0x256   : > { %v3499_v41 = vmul.bf16 1017396388, %v3371_v35  ;;  %v3374_v46 = vpack.c.bf16 %v2837_v61, %v2833_v34 }
 0x257   : > { %v3501_v4 = vmul.bf16 1017396388, %v3373_v38  ;;  %v2727_v8 = vpop.f32.mrb[168].mxu0  ;;  %3923 = vmatmul.mubr.bf16.gmra.mrb[4].mxu0 %v9108_v30  ;;  %v3500_v42 = vmul.bf16 1017396388, %v3372_v6 }
 0x258   : > { %v2840_v20 = vpop.f32.mrb[168].mxu1  ;;  %4036 = vmatmul.mubr.bf16.gmra.mrb[4].mxu1 %v9108_v30  ;;  %v2729_v47 = vpop.f32.mrb[169].mxu0  ;;  %v3502_v53 = vmul.bf16 1017396388, %v3374_v46  ;;  %3932 = vmatprep.mubr.bf16.mxu0 %v7735_v0  ;;  %v2728_v57 = vadd.f32 %v2727_v8, %v8999_v63  ;;  %v3627_v14 = vmax.bf16 %v3499_v41, %v3371_v35 }
 0x259   : > { %v2842_v54 = vpop.f32.mrb[169].mxu1  ;;  %v2731_v56 = vpop.f32.mrb[170].mxu0  ;;  %v3628_v50 = vmax.bf16 %v3500_v42, %v3372_v6  ;;  %4045 = vmatprep.mubr.bf16.mxu1 %v7735_v0  ;;  %v2841_v58 = vadd.f32 %v2840_v20, %v8999_v63  ;;  %v2730_v26 = vadd.f32 %v2729_v47, %v8999_v63  ;;  %v3629_v10 = vmax.bf16 %v3501_v4, %v3373_v38 }
 0x25a   : > { %v2732_v16 = vadd.f32 %v2731_v56, %v8996_v23  ;;  %v2844_v62 = vpop.f32.mrb[170].mxu1  ;;  %v2733_v2 = vpop.f32.mrb[171].mxu0  ;;  %v3630_v3 = vmax.bf16 %v3502_v53, %v3374_v46  ;;  %v2843_v37 = vadd.f32 %v2842_v54, %v8999_v63  ;;  %v9142_v53 = vld [vmem:[%s10317_s3 + $0x58] sm:$0xff]  }
 0x25b   : > { %v2845_v7 = vadd.f32 %v2844_v62, %v8996_v23  ;;  %v2734_v43 = vadd.f32 %v2733_v2, %v8996_v23  ;;  %v2846_v32 = vpop.f32.mrb[171].mxu1  ;;  %4108 = vmatprep.subr.bf16.mxu0 %v3628_v50 }
 0x25c   : > { %v3387_v15 = vpack.c.bf16 %v2732_v16, %v2728_v57  ;;  %v2847_v36 = vadd.f32 %v2846_v32, %v8996_v23  ;;  %4221 = vmatprep.subr.bf16.mxu1 %v3630_v3  ;;  %4109 = vmatpush1.bf16.msra.mxu0 %v3627_v14 }
 0x25d   : > { %v3389_v18 = vpack.c.bf16 %v2845_v7, %v2841_v58  ;;  %v3388_v48 = vpack.c.bf16 %v2734_v43, %v2730_v26  ;;  %4222 = vmatpush1.bf16.msra.mxu1 %v3629_v10 }
 0x25e   : > { %v3515_v19 = vmul.bf16 1017396388, %v3387_v15  ;;  %v3390_v21 = vpack.c.bf16 %v2847_v36, %v2843_v37 }
 0x25f   : > { %v3517_v1 = vmul.bf16 1017396388, %v3389_v18  ;;  %v2737_v22 = vpop.f32.mrb[172].mxu0  ;;  %3933 = vmatmul.mubr.bf16.gmra.mrb[8].mxu0 %v9125_v9  ;;  %v3516_v11 = vmul.bf16 1017396388, %v3388_v48 }
 0x260   : > { %v2850_v49 = vpop.f32.mrb[172].mxu1  ;;  %4046 = vmatmul.mubr.bf16.gmra.mrb[8].mxu1 %v9125_v9  ;;  %v2739_v39 = vpop.f32.mrb[173].mxu0  ;;  %v3518_v60 = vmul.bf16 1017396388, %v3390_v21  ;;  %3942 = vmatprep.mubr.bf16.mxu0 %v7735_v0  ;;  %v2738_v51 = vadd.f32 %v2737_v22, %v9015_v5  ;;  %v3643_v46 = vmax.bf16 %v3515_v19, %v3387_v15 }
 0x261   : > { %v2852_v27 = vpop.f32.mrb[173].mxu1  ;;  %v2741_v29 = vpop.f32.mrb[174].mxu0  ;;  %v3644_v34 = vmax.bf16 %v3516_v11, %v3388_v48  ;;  %4055 = vmatprep.mubr.bf16.mxu1 %v7735_v0  ;;  %v2851_v35 = vadd.f32 %v2850_v49, %v9015_v5  ;;  %v2740_v4 = vadd.f32 %v2739_v39, %v9015_v5  ;;  %v3645_v47 = vmax.bf16 %v3517_v1, %v3389_v18 }
 0x262   : > { %v2742_v61 = vadd.f32 %v2741_v29, %v9012_v59  ;;  %v2854_v38 = vpop.f32.mrb[174].mxu1  ;;  %v2743_v6 = vpop.f32.mrb[175].mxu0  ;;  %v3646_v41 = vmax.bf16 %v3518_v60, %v3390_v21  ;;  %v2853_v57 = vadd.f32 %v2852_v27, %v9015_v5 }
 0x263   : > { %v2855_v8 = vadd.f32 %v2854_v38, %v9012_v59  ;;  %v2744_v42 = vadd.f32 %v2743_v6, %v9012_v59  ;;  %v2856_v20 = vpop.f32.mrb[175].mxu1  ;;  %4110 = vmatprep.subr.bf16.mxu0 %v3644_v34 }
 0x264   : > { %v3403_v54 = vpack.c.bf16 %v2742_v61, %v2738_v51  ;;  %v2857_v56 = vadd.f32 %v2856_v20, %v9012_v59  ;;  %4223 = vmatprep.subr.bf16.mxu1 %v3646_v41  ;;  %4111 = vmatpush1.bf16.msra.mxu0 %v3643_v46  ;;  %v9159_v51 = vld [vmem:[%s10317_s3 + $0x60] sm:$0xff]  }
 0x265   : > { %v3405_v50 = vpack.c.bf16 %v2855_v8, %v2851_v35  ;;  %v3404_v58 = vpack.c.bf16 %v2744_v42, %v2740_v4  ;;  %4224 = vmatpush1.bf16.msra.mxu1 %v3645_v47 }
 0x266   : > { %v3531_v16 = vmul.bf16 1017396388, %v3403_v54  ;;  %v3406_v62 = vpack.c.bf16 %v2857_v56, %v2853_v57 }
 0x267   : > { %v3533_v2 = vmul.bf16 1017396388, %v3405_v50  ;;  %v2747_v3 = vpop.f32.mrb[176].mxu0  ;;  %3943 = vmatmul.mubr.bf16.gmra.mrb[12].mxu0 %v9142_v53  ;;  %v3532_v14 = vmul.bf16 1017396388, %v3404_v58 }
 0x268   : > { %v2860_v26 = vpop.f32.mrb[176].mxu1  ;;  %4056 = vmatmul.mubr.bf16.gmra.mrb[12].mxu1 %v9142_v53  ;;  %v2749_v7 = vpop.f32.mrb[177].mxu0  ;;  %v3534_v43 = vmul.bf16 1017396388, %v3406_v62  ;;  %3952 = vmatprep.mubr.bf16.mxu0 %v7735_v0  ;;  %v2748_v32 = vadd.f32 %v2747_v3, %v9031_v13  ;;  %v3659_v1 = vmax.bf16 %v3531_v16, %v3403_v54 }
 0x269   : > { %v2862_v10 = vpop.f32.mrb[177].mxu1  ;;  %v2751_v37 = vpop.f32.mrb[178].mxu0  ;;  %v3660_v15 = vmax.bf16 %v3532_v14, %v3404_v58  ;;  %4065 = vmatprep.mubr.bf16.mxu1 %v7735_v0  ;;  %v2861_v36 = vadd.f32 %v2860_v26, %v9031_v13  ;;  %v2750_v22 = vadd.f32 %v2749_v7, %v9031_v13  ;;  %v3661_v60 = vmax.bf16 %v3533_v2, %v3405_v50 }
 0x26a   : > { %v2752_v18 = vadd.f32 %v2751_v37, %v9028_v31  ;;  %v2864_v48 = vpop.f32.mrb[178].mxu1  ;;  %v2753_v19 = vpop.f32.mrb[179].mxu0  ;;  %v3662_v21 = vmax.bf16 %v3534_v43, %v3406_v62  ;;  %v2863_v27 = vadd.f32 %v2862_v10, %v9031_v13  ;;  %v9176_v10 = vld [vmem:[%s10317_s3 + $0x68] sm:$0xff]  }
 0x26b   : > { %v2865_v11 = vadd.f32 %v2864_v48, %v9028_v31  ;;  %v2754_v49 = vadd.f32 %v2753_v19, %v9028_v31  ;;  %v2866_v39 = vpop.f32.mrb[179].mxu1  ;;  %4112 = vmatprep.subr.bf16.mxu0 %v3660_v15 }
 0x26c   : > { %v3419_v29 = vpack.c.bf16 %v2752_v18, %v2748_v32  ;;  %v2867_v34 = vadd.f32 %v2866_v39, %v9028_v31  ;;  %4225 = vmatprep.subr.bf16.mxu1 %v3662_v21  ;;  %4113 = vmatpush1.bf16.msra.mxu0 %v3659_v1 }
 0x26d   : > { %v3421_v35 = vpack.c.bf16 %v2865_v11, %v2861_v36  ;;  %v3420_v61 = vpack.c.bf16 %v2754_v49, %v2750_v22  ;;  %4226 = vmatpush1.bf16.msra.mxu1 %v3661_v60 }
 0x26e   : > { %v3547_v38 = vmul.bf16 1017396388, %v3419_v29  ;;  %v3422_v6 = vpack.c.bf16 %v2867_v34, %v2863_v27 }
 0x26f   : > { %v3549_v41 = vmul.bf16 1017396388, %v3421_v35  ;;  %v2757_v46 = vpop.f32.mrb[180].mxu0  ;;  %3953 = vmatmul.mubr.bf16.gmra.mrb[16].mxu0 %v9159_v51  ;;  %v3548_v4 = vmul.bf16 1017396388, %v3420_v61 }
 0x270   : > { %v2870_v8 = vpop.f32.mrb[180].mxu1  ;;  %4066 = vmatmul.mubr.bf16.gmra.mrb[16].mxu1 %v9159_v51  ;;  %v2759_v42 = vpop.f32.mrb[181].mxu0  ;;  %v3550_v20 = vmul.bf16 1017396388, %v3422_v6  ;;  %3962 = vmatprep.mubr.bf16.mxu0 %v7735_v0  ;;  %v2758_v47 = vadd.f32 %v2757_v46, %v9047_v17  ;;  %v3675_v3 = vmax.bf16 %v3547_v38, %v3419_v29 }
 0x271   : > { %v2872_v57 = vpop.f32.mrb[181].mxu1  ;;  %v2761_v54 = vpop.f32.mrb[182].mxu0  ;;  %v3676_v56 = vmax.bf16 %v3548_v4, %v3420_v61  ;;  %4075 = vmatprep.mubr.bf16.mxu1 %v7735_v0  ;;  %v2871_v50 = vadd.f32 %v2870_v8, %v9047_v17  ;;  %v2760_v14 = vadd.f32 %v2759_v42, %v9047_v17  ;;  %v3677_v32 = vmax.bf16 %v3549_v41, %v3421_v35 }
 0x272   : > { %v2762_v58 = vadd.f32 %v2761_v54, %v9044_v44  ;;  %v2874_v16 = vpop.f32.mrb[182].mxu1  ;;  %v2763_v62 = vpop.f32.mrb[183].mxu0  ;;  %v3678_v2 = vmax.bf16 %v3550_v20, %v3422_v6  ;;  %v2873_v37 = vadd.f32 %v2872_v57, %v9047_v17  ;;  %v9193_v54 = vld [vmem:[%s10317_s3 + $0x70] sm:$0xff]  }
 0x273   : > { %v2875_v26 = vadd.f32 %v2874_v16, %v9044_v44  ;;  %v2764_v7 = vadd.f32 %v2763_v62, %v9044_v44  ;;  %v2876_v43 = vpop.f32.mrb[183].mxu1  ;;  %4114 = vmatprep.subr.bf16.mxu0 %v3676_v56 }
 0x274   : > { %v3435_v15 = vpack.c.bf16 %v2762_v58, %v2758_v47  ;;  %v2877_v36 = vadd.f32 %v2876_v43, %v9044_v44  ;;  %4227 = vmatprep.subr.bf16.mxu1 %v3678_v2  ;;  %4115 = vmatpush1.bf16.msra.mxu0 %v3675_v3 }
 0x275   : > { %v3437_v18 = vpack.c.bf16 %v2875_v26, %v2871_v50  ;;  %v3436_v48 = vpack.c.bf16 %v2764_v7, %v2760_v14  ;;  %4228 = vmatpush1.bf16.msra.mxu1 %v3677_v32 }
 0x276   : > { %v3563_v19 = vmul.bf16 1017396388, %v3435_v15  ;;  %v3438_v21 = vpack.c.bf16 %v2877_v36, %v2873_v37 }
 0x277   : > { %v3565_v1 = vmul.bf16 1017396388, %v3437_v18  ;;  %v2767_v22 = vpop.f32.mrb[184].mxu0  ;;  %3963 = vmatmul.mubr.bf16.gmra.mrb[20].mxu0 %v9176_v10  ;;  %v3564_v11 = vmul.bf16 1017396388, %v3436_v48 }
 0x278   : > { %v2880_v49 = vpop.f32.mrb[184].mxu1  ;;  %4076 = vmatmul.mubr.bf16.gmra.mrb[20].mxu1 %v9176_v10  ;;  %v2769_v39 = vpop.f32.mrb[185].mxu0  ;;  %v3566_v60 = vmul.bf16 1017396388, %v3438_v21  ;;  %3972 = vmatprep.mubr.bf16.mxu0 %v7735_v0  ;;  %v2768_v27 = vadd.f32 %v2767_v22, %v9060_v40  ;;  %v3691_v4 = vmax.bf16 %v3563_v19, %v3435_v15 }
 0x279   : > { %v2882_v29 = vpop.f32.mrb[185].mxu1  ;;  %v2771_v34 = vpop.f32.mrb[186].mxu0  ;;  %v3692_v35 = vmax.bf16 %v3564_v11, %v3436_v48  ;;  %4085 = vmatprep.mubr.bf16.mxu1 %v7735_v0  ;;  %v2881_v61 = vadd.f32 %v2880_v49, %v9060_v40  ;;  %v2770_v8 = vadd.f32 %v2769_v39, %v9060_v40  ;;  %v3693_v57 = vmax.bf16 %v3565_v1, %v3437_v18 }
 0x27a   : > { %v2772_v38 = vadd.f32 %v2771_v34, %v9058_v45  ;;  %v2884_v6 = vpop.f32.mrb[186].mxu1  ;;  %v2773_v41 = vpop.f32.mrb[187].mxu0  ;;  %v3694_v46 = vmax.bf16 %v3566_v60, %v3438_v21  ;;  %v2883_v56 = vadd.f32 %v2882_v29, %v9060_v40 }
 0x27b   : > { %v2885_v42 = vadd.f32 %v2884_v6, %v9058_v45  ;;  %v2774_v20 = vadd.f32 %v2773_v41, %v9058_v45  ;;  %v2886_v47 = vpop.f32.mrb[187].mxu1  ;;  %4116 = vmatprep.subr.bf16.mxu0 %v3692_v35  ;;  %v9210_v35 = vld [vmem:[%s10317_s3 + $0x78] sm:$0xff]  }
 0x27c   : > { %v3451_v50 = vpack.c.bf16 %v2772_v38, %v2768_v27  ;;  %v2887_v58 = vadd.f32 %v2886_v47, %v9058_v45  ;;  %4229 = vmatprep.subr.bf16.mxu1 %v3694_v46  ;;  %4117 = vmatpush1.bf16.msra.mxu0 %v3691_v4 }
 0x27d   : > { %v3453_v16 = vpack.c.bf16 %v2885_v42, %v2881_v61  ;;  %v3452_v62 = vpack.c.bf16 %v2774_v20, %v2770_v8  ;;  %4230 = vmatpush1.bf16.msra.mxu1 %v3693_v57 }
 0x27e   : > { %v3579_v2 = vmul.bf16 1017396388, %v3451_v50  ;;  %v3454_v3 = vpack.c.bf16 %v2887_v58, %v2883_v56 }
 0x27f   : > { %v3581_v14 = vmul.bf16 1017396388, %v3453_v16  ;;  %v2777_v26 = vpop.f32.mrb[188].mxu0  ;;  %3973 = vmatmul.mubr.bf16.gmra.mrb[24].mxu0 %v9193_v54  ;;  %v3580_v7 = vmul.bf16 1017396388, %v3452_v62 }
 0x280   : > { %v2890_v43 = vpop.f32.mrb[188].mxu1  ;;  %4086 = vmatmul.mubr.bf16.gmra.mrb[24].mxu1 %v9193_v54  ;;  %v2779_v32 = vpop.f32.mrb[189].mxu0  ;;  %v3582_v37 = vmul.bf16 1017396388, %v3454_v3  ;;  %3982 = vmatprep.mubr.bf16.mxu0 %v7735_v0  ;;  %v2778_v15 = vadd.f32 %v2777_v26, %v9072_v55  ;;  %v3707_v49 = vmax.bf16 %v3579_v2, %v3451_v50 }
 0x281   : > { %v2892_v36 = vpop.f32.mrb[189].mxu1  ;;  %v2781_v18 = vpop.f32.mrb[190].mxu0  ;;  %v3708_v48 = vmax.bf16 %v3580_v7, %v3452_v62  ;;  %4095 = vmatprep.mubr.bf16.mxu1 %v7735_v0  ;;  %v2891_v19 = vadd.f32 %v2890_v43, %v9072_v55  ;;  %v2780_v39 = vadd.f32 %v2779_v32, %v9072_v55  ;;  %v3709_v34 = vmax.bf16 %v3581_v14, %v3453_v16 }
 0x282   : > { %v2782_v21 = vadd.f32 %v2781_v18, %v9070_v25  ;;  %v2894_v1 = vpop.f32.mrb[190].mxu1  ;;  %v2783_v22 = vpop.f32.mrb[191].mxu0  ;;  %v3710_v11 = vmax.bf16 %v3582_v37, %v3454_v3  ;;  %v2893_v61 = vadd.f32 %v2892_v36, %v9072_v55 }
 0x283   : > { %v2895_v60 = vadd.f32 %v2894_v1, %v9070_v25  ;;  %v2784_v27 = vadd.f32 %v2783_v22, %v9070_v25  ;;  %v2896_v29 = vpop.f32.mrb[191].mxu1  ;;  %4118 = vmatprep.subr.bf16.mxu0 %v3708_v48 }
 0x284   : > { %v3467_v38 = vpack.c.bf16 %v2782_v21, %v2778_v15  ;;  %v2897_v6 = vadd.f32 %v2896_v29, %v9070_v25  ;;  %4231 = vmatprep.subr.bf16.mxu1 %v3710_v11  ;;  %4119 = vmatpush1.bf16.msra.mxu0 %v3707_v49 }
 0x285   : > { %v3469_v41 = vpack.c.bf16 %v2895_v60, %v2891_v19  ;;  %v3468_v46 = vpack.c.bf16 %v2784_v27, %v2780_v39  ;;  %4232 = vmatpush1.bf16.msra.mxu1 %v3709_v34 }
 0x286   : > { %v3595_v4 = vmul.bf16 1017396388, %v3467_v38  ;;  %v3470_v8 = vpack.c.bf16 %v2897_v6, %v2893_v61 }
 0x287   : > { %v3597_v42 = vmul.bf16 1017396388, %v3469_v41  ;;  %v2933_v20 = vpop.f32.mrb[192].mxu0  ;;  %3983 = vmatmul.mubr.bf16.gmra.mrb[28].mxu0 %v9210_v35  ;;  %v3596_v47 = vmul.bf16 1017396388, %v3468_v46 }
 0x288   : > { %v3046_v57 = vpop.f32.mrb[192].mxu1  ;;  %4096 = vmatmul.mubr.bf16.gmra.mrb[28].mxu1 %v9210_v35  ;;  %v2935_v56 = vpop.f32.mrb[193].mxu0  ;;  %v3598_v50 = vmul.bf16 1017396388, %v3470_v8  ;;  %4138 = vmatprep.mubr.bf16.mxu0 %v7735_v0  ;;  %v2934_v58 = vadd.f32 %v2933_v20, %v8968_v24  ;;  %v3723_v32 = vmax.bf16 %v3595_v4, %v3467_v38 }
 0x289   : > { %v3048_v16 = vpop.f32.mrb[193].mxu1  ;;  %v2937_v62 = vpop.f32.mrb[194].mxu0  ;;  %v3724_v2 = vmax.bf16 %v3596_v47, %v3468_v46  ;;  %4251 = vmatprep.mubr.bf16.mxu1 %v7735_v0  ;;  %v3047_v3 = vadd.f32 %v3046_v57, %v8968_v24  ;;  %v2936_v37 = vadd.f32 %v2935_v56, %v8968_v24  ;;  %v3725_v48 = vmax.bf16 %v3597_v42, %v3469_v41 }
 0x28a   : > { %v2938_v14 = vadd.f32 %v2937_v62, %v8965_v12  ;;  %v3050_v26 = vpop.f32.mrb[194].mxu1  ;;  %v2939_v7 = vpop.f32.mrb[195].mxu0  ;;  %v3726_v43 = vmax.bf16 %v3598_v50, %v3470_v8  ;;  %v3049_v19 = vadd.f32 %v3048_v16, %v8968_v24 }
 0x28b   : > { %v3051_v15 = vadd.f32 %v3050_v26, %v8965_v12  ;;  %v2940_v36 = vadd.f32 %v2939_v7, %v8965_v12  ;;  %v3052_v18 = vpop.f32.mrb[195].mxu1  ;;  %4120 = vmatprep.subr.bf16.mxu0 %v3724_v2 }
 0x28c   : > { %v3359_v21 = vpack.c.bf16 %v2938_v14, %v2934_v58  ;;  %v3053_v1 = vadd.f32 %v3052_v18, %v8965_v12  ;;  %4233 = vmatprep.subr.bf16.mxu1 %v3726_v43  ;;  %4121 = vmatpush1.bf16.msra.mxu0 %v3723_v32 }
 0x28d   : > { %v3361_v22 = vpack.c.bf16 %v3051_v15, %v3047_v3  ;;  %v3360_v11 = vpack.c.bf16 %v2940_v36, %v2936_v37  ;;  %4234 = vmatpush1.bf16.msra.mxu1 %v3725_v48 }
 0x28e   : > { %v3487_v49 = vmul.bf16 1017396388, %v3359_v21  ;;  %v3362_v39 = vpack.c.bf16 %v3053_v1, %v3049_v19 }
 0x28f   : > { %v3489_v60 = vmul.bf16 1017396388, %v3361_v22  ;;  %v2943_v27 = vpop.f32.mrb[196].mxu0  ;;  %4139 = vmatmul.mubr.bf16.vlgmr.msra.gmra.mrb[32].mxu0 %v9091_v33  ;;  %v3488_v29 = vmul.bf16 1017396388, %v3360_v11 }
 0x290   : > { %v3056_v34 = vpop.f32.mrb[196].mxu1  ;;  %4252 = vmatmul.mubr.bf16.vlgmr.msra.gmra.mrb[32].mxu1 %v9091_v33  ;;  %v2945_v61 = vpop.f32.mrb[197].mxu0  ;;  %v3490_v38 = vmul.bf16 1017396388, %v3362_v39  ;;  %4148 = vmatprep.mubr.bf16.mxu0 %v7735_v0  ;;  %v2944_v6 = vadd.f32 %v2943_v27, %v8984_v28  ;;  %v3615_v56 = vmax.bf16 %v3487_v49, %v3359_v21 }
 0x291   : > { %v3058_v41 = vpop.f32.mrb[197].mxu1  ;;  %v2947_v46 = vpop.f32.mrb[198].mxu0  ;;  %v3616_v4 = vmax.bf16 %v3488_v29, %v3360_v11  ;;  %4261 = vmatprep.mubr.bf16.mxu1 %v7735_v0  ;;  %v3057_v8 = vadd.f32 %v3056_v34, %v8984_v28  ;;  %v2946_v33 = vadd.f32 %v2945_v61, %v8984_v28  ;;  %v3617_v62 = vmax.bf16 %v3489_v60, %v3361_v22 }
 0x292   : > { %v2948_v42 = vadd.f32 %v2947_v46, %v8981_v52  ;;  %v3060_v20 = vpop.f32.mrb[198].mxu1  ;;  %v2949_v47 = vpop.f32.mrb[199].mxu0  ;;  %v3618_v57 = vmax.bf16 %v3490_v38, %v3362_v39  ;;  %v3059_v2 = vadd.f32 %v3058_v41, %v8984_v28 }
 0x293   : > { %v3061_v50 = vadd.f32 %v3060_v20, %v8981_v52  ;;  %v2950_v58 = vadd.f32 %v2949_v47, %v8981_v52  ;;  %v3062_v16 = vpop.f32.mrb[199].mxu1  ;;  %4332 = vmatprep.subr.bf16.mxu0 %v3616_v4 }
 0x294   : > { %v3375_v3 = vpack.c.bf16 %v2948_v42, %v2944_v6  ;;  %v3063_v14 = vadd.f32 %v3062_v16, %v8981_v52  ;;  %4445 = vmatprep.subr.bf16.mxu1 %v3618_v57  ;;  %4333 = vmatpush1.bf16.msra.mxu0 %v3615_v56 }
 0x295   : > { %v3377_v26 = vpack.c.bf16 %v3061_v50, %v3057_v8  ;;  %v3376_v7 = vpack.c.bf16 %v2950_v58, %v2946_v33  ;;  %4446 = vmatpush1.bf16.msra.mxu1 %v3617_v62 }
 0x296   : > { %v3503_v43 = vmul.bf16 1017396388, %v3375_v3  ;;  %v3378_v32 = vpack.c.bf16 %v3063_v14, %v3059_v2 }
 0x297   : > { %v3505_v37 = vmul.bf16 1017396388, %v3377_v26  ;;  %v2953_v15 = vpop.f32.mrb[200].mxu0  ;;  %4149 = vmatmul.mubr.bf16.gmra.mrb[36].mxu0 %v9108_v30  ;;  %v3504_v36 = vmul.bf16 1017396388, %v3376_v7 }
 0x298   : > { %v3066_v18 = vpop.f32.mrb[200].mxu1  ;;  %4262 = vmatmul.mubr.bf16.gmra.mrb[36].mxu1 %v9108_v30  ;;  %v2955_v48 = vpop.f32.mrb[201].mxu0  ;;  %v3506_v19 = vmul.bf16 1017396388, %v3378_v32  ;;  %4158 = vmatprep.mubr.bf16.mxu0 %v7735_v0  ;;  %v2954_v21 = vadd.f32 %v2953_v15, %v8999_v63  ;;  %v3631_v34 = vmax.bf16 %v3503_v43, %v3375_v3 }
 0x299   : > { %v3068_v1 = vpop.f32.mrb[201].mxu1  ;;  %v2957_v22 = vpop.f32.mrb[202].mxu0  ;;  %v3632_v11 = vmax.bf16 %v3504_v36, %v3376_v7  ;;  %4271 = vmatprep.mubr.bf16.mxu1 %v7735_v0  ;;  %v3067_v49 = vadd.f32 %v3066_v18, %v8999_v63  ;;  %v2956_v30 = vadd.f32 %v2955_v48, %v8999_v63  ;;  %v3633_v41 = vmax.bf16 %v3505_v37, %v3377_v26 }
 0x29a   : > { %v2958_v39 = vadd.f32 %v2957_v22, %v8996_v23  ;;  %v3070_v60 = vpop.f32.mrb[202].mxu1  ;;  %v2959_v27 = vpop.f32.mrb[203].mxu0  ;;  %v3634_v29 = vmax.bf16 %v3506_v19, %v3378_v32  ;;  %v3069_v46 = vadd.f32 %v3068_v1, %v8999_v63 }
 0x29b   : > { %v3071_v61 = vadd.f32 %v3070_v60, %v8996_v23  ;;  %v2960_v38 = vadd.f32 %v2959_v27, %v8996_v23  ;;  %v3072_v6 = vpop.f32.mrb[203].mxu1  ;;  %4334 = vmatprep.subr.bf16.mxu0 %v3632_v11 }
 0x29c   : > { %v3391_v4 = vpack.c.bf16 %v2958_v39, %v2954_v21  ;;  %v3073_v8 = vadd.f32 %v3072_v6, %v8996_v23  ;;  %4447 = vmatprep.subr.bf16.mxu1 %v3634_v29  ;;  %4335 = vmatpush1.bf16.msra.mxu0 %v3631_v34 }
 0x29d   : > { %v3393_v42 = vpack.c.bf16 %v3071_v61, %v3067_v49  ;;  %v3392_v20 = vpack.c.bf16 %v2960_v38, %v2956_v30  ;;  %4448 = vmatpush1.bf16.msra.mxu1 %v3633_v41 }
 0x29e   : > { %v3519_v47 = vmul.bf16 1017396388, %v3391_v4  ;;  %v3394_v57 = vpack.c.bf16 %v3073_v8, %v3069_v46 }
 0x29f   : > { %v3521_v56 = vmul.bf16 1017396388, %v3393_v42  ;;  %v2963_v33 = vpop.f32.mrb[204].mxu0  ;;  %4159 = vmatmul.mubr.bf16.gmra.mrb[40].mxu0 %v9125_v9  ;;  %v3520_v50 = vmul.bf16 1017396388, %v3392_v20 }
 0x2a0   : > { %v3076_v58 = vpop.f32.mrb[204].mxu1  ;;  %4272 = vmatmul.mubr.bf16.gmra.mrb[40].mxu1 %v9125_v9  ;;  %v2965_v16 = vpop.f32.mrb[205].mxu0  ;;  %v3522_v62 = vmul.bf16 1017396388, %v3394_v57  ;;  %4168 = vmatprep.mubr.bf16.mxu0 %v7735_v0  ;;  %v2964_v2 = vadd.f32 %v2963_v33, %v9015_v5  ;;  %v3647_v36 = vmax.bf16 %v3519_v47, %v3391_v4 }
 0x2a1   : > { %v3078_v3 = vpop.f32.mrb[205].mxu1  ;;  %v2967_v14 = vpop.f32.mrb[206].mxu0  ;;  %v3648_v26 = vmax.bf16 %v3520_v50, %v3392_v20  ;;  %4281 = vmatprep.mubr.bf16.mxu1 %v7735_v0  ;;  %v3077_v7 = vadd.f32 %v3076_v58, %v9015_v5  ;;  %v2966_v9 = vadd.f32 %v2965_v16, %v9015_v5  ;;  %v3649_v21 = vmax.bf16 %v3521_v56, %v3393_v42 }
 0x2a2   : > { %v2968_v43 = vadd.f32 %v2967_v14, %v9012_v59  ;;  %v3080_v32 = vpop.f32.mrb[206].mxu1  ;;  %v2969_v37 = vpop.f32.mrb[207].mxu0  ;;  %v3650_v15 = vmax.bf16 %v3522_v62, %v3394_v57  ;;  %v3079_v1 = vadd.f32 %v3078_v3, %v9015_v5 }
 0x2a3   : > { %v3081_v18 = vadd.f32 %v3080_v32, %v9012_v59  ;;  %v2970_v48 = vadd.f32 %v2969_v37, %v9012_v59  ;;  %v3082_v19 = vpop.f32.mrb[207].mxu1  ;;  %4336 = vmatprep.subr.bf16.mxu0 %v3648_v26 }
 0x2a4   : > { %v3407_v22 = vpack.c.bf16 %v2968_v43, %v2964_v2  ;;  %v3083_v11 = vadd.f32 %v3082_v19, %v9012_v59  ;;  %4449 = vmatprep.subr.bf16.mxu1 %v3650_v15  ;;  %4337 = vmatpush1.bf16.msra.mxu0 %v3647_v36 }
 0x2a5   : > { %v3409_v49 = vpack.c.bf16 %v3081_v18, %v3077_v7  ;;  %v3408_v39 = vpack.c.bf16 %v2970_v48, %v2966_v9  ;;  %4450 = vmatpush1.bf16.msra.mxu1 %v3649_v21 }
 0x2a6   : > { %v3535_v60 = vmul.bf16 1017396388, %v3407_v22  ;;  %v3410_v27 = vpack.c.bf16 %v3083_v11, %v3079_v1 }
 0x2a7   : > { %v3537_v29 = vmul.bf16 1017396388, %v3409_v49  ;;  %v2973_v34 = vpop.f32.mrb[208].mxu0  ;;  %4169 = vmatmul.mubr.bf16.gmra.mrb[44].mxu0 %v9142_v53  ;;  %v3536_v30 = vmul.bf16 1017396388, %v3408_v39 }
 0x2a8   : > { %v3086_v61 = vpop.f32.mrb[208].mxu1  ;;  %4282 = vmatmul.mubr.bf16.gmra.mrb[44].mxu1 %v9142_v53  ;;  %v2975_v38 = vpop.f32.mrb[209].mxu0  ;;  %v3538_v6 = vmul.bf16 1017396388, %v3410_v27  ;;  %4178 = vmatprep.mubr.bf16.mxu0 %v7735_v0  ;;  %v2974_v41 = vadd.f32 %v2973_v34, %v9031_v13  ;;  %v3663_v33 = vmax.bf16 %v3535_v60, %v3407_v22 }
 0x2a9   : > { %v3088_v46 = vpop.f32.mrb[209].mxu1  ;;  %v2977_v4 = vpop.f32.mrb[210].mxu0  ;;  %v3664_v8 = vmax.bf16 %v3536_v30, %v3408_v39  ;;  %4291 = vmatprep.mubr.bf16.mxu1 %v7735_v0  ;;  %v3087_v42 = vadd.f32 %v3086_v61, %v9031_v13  ;;  %v2976_v53 = vadd.f32 %v2975_v38, %v9031_v13  ;;  %v3665_v62 = vmax.bf16 %v3537_v29, %v3409_v49 }
 0x2aa   : > { %v2978_v20 = vadd.f32 %v2977_v4, %v9028_v31  ;;  %v3090_v47 = vpop.f32.mrb[210].mxu1  ;;  %v2979_v57 = vpop.f32.mrb[211].mxu0  ;;  %v3666_v56 = vmax.bf16 %v3538_v6, %v3410_v27  ;;  %v3089_v2 = vadd.f32 %v3088_v46, %v9031_v13 }
 0x2ab   : > { %v3091_v50 = vadd.f32 %v3090_v47, %v9028_v31  ;;  %v2980_v58 = vadd.f32 %v2979_v57, %v9028_v31  ;;  %v3092_v16 = vpop.f32.mrb[211].mxu1  ;;  %4338 = vmatprep.subr.bf16.mxu0 %v3664_v8 }
 0x2ac   : > { %v3423_v3 = vpack.c.bf16 %v2978_v20, %v2974_v41  ;;  %v3093_v14 = vadd.f32 %v3092_v16, %v9028_v31  ;;  %4451 = vmatprep.subr.bf16.mxu1 %v3666_v56  ;;  %4339 = vmatpush1.bf16.msra.mxu0 %v3663_v33 }
 0x2ad   : > { %v3425_v26 = vpack.c.bf16 %v3091_v50, %v3087_v42  ;;  %v3424_v7 = vpack.c.bf16 %v2980_v58, %v2976_v53  ;;  %4452 = vmatpush1.bf16.msra.mxu1 %v3665_v62 }
 0x2ae   : > { %v3551_v43 = vmul.bf16 1017396388, %v3423_v3  ;;  %v3426_v32 = vpack.c.bf16 %v3093_v14, %v3089_v2 }
 0x2af   : > { %v3553_v37 = vmul.bf16 1017396388, %v3425_v26  ;;  %v2983_v15 = vpop.f32.mrb[212].mxu0  ;;  %4179 = vmatmul.mubr.bf16.gmra.mrb[48].mxu0 %v9159_v51  ;;  %v3552_v36 = vmul.bf16 1017396388, %v3424_v7 }
 0x2b0   : > { %v3096_v9 = vpop.f32.mrb[212].mxu1  ;;  %4292 = vmatmul.mubr.bf16.gmra.mrb[48].mxu1 %v9159_v51  ;;  %v2985_v18 = vpop.f32.mrb[213].mxu0  ;;  %v3554_v48 = vmul.bf16 1017396388, %v3426_v32  ;;  %4188 = vmatprep.mubr.bf16.mxu0 %v7735_v0  ;;  %v2984_v19 = vadd.f32 %v2983_v15, %v9047_v17  ;;  %v3679_v29 = vmax.bf16 %v3551_v43, %v3423_v3 }
 0x2b1   : > { %v3098_v21 = vpop.f32.mrb[213].mxu1  ;;  %v2987_v1 = vpop.f32.mrb[214].mxu0  ;;  %v3680_v22 = vmax.bf16 %v3552_v36, %v3424_v7  ;;  %4301 = vmatprep.mubr.bf16.mxu1 %v7735_v0  ;;  %v3097_v11 = vadd.f32 %v3096_v9, %v9047_v17  ;;  %v2986_v51 = vadd.f32 %v2985_v18, %v9047_v17  ;;  %v3681_v38 = vmax.bf16 %v3553_v37, %v3425_v26 }
 0x2b2   : > { %v2988_v49 = vadd.f32 %v2987_v1, %v9044_v44  ;;  %v3100_v39 = vpop.f32.mrb[214].mxu1  ;;  %v2989_v60 = vpop.f32.mrb[215].mxu0  ;;  %v3682_v27 = vmax.bf16 %v3554_v48, %v3426_v32  ;;  %v3099_v6 = vadd.f32 %v3098_v21, %v9047_v17 }
 0x2b3   : > { %v3101_v34 = vadd.f32 %v3100_v39, %v9044_v44  ;;  %v2990_v30 = vadd.f32 %v2989_v60, %v9044_v44  ;;  %v3102_v61 = vpop.f32.mrb[215].mxu1  ;;  %4340 = vmatprep.subr.bf16.mxu0 %v3680_v22 }
 0x2b4   : > { %v3439_v41 = vpack.c.bf16 %v2988_v49, %v2984_v19  ;;  %v3103_v46 = vadd.f32 %v3102_v61, %v9044_v44  ;;  %4453 = vmatprep.subr.bf16.mxu1 %v3682_v27  ;;  %4341 = vmatpush1.bf16.msra.mxu0 %v3679_v29 }
 0x2b5   : > { %v3441_v4 = vpack.c.bf16 %v3101_v34, %v3097_v11  ;;  %v3440_v8 = vpack.c.bf16 %v2990_v30, %v2986_v51  ;;  %4454 = vmatpush1.bf16.msra.mxu1 %v3681_v38 }
 0x2b6   : > { %v3567_v42 = vmul.bf16 1017396388, %v3439_v41  ;;  %v3442_v20 = vpack.c.bf16 %v3103_v46, %v3099_v6 }
 0x2b7   : > { %v3569_v47 = vmul.bf16 1017396388, %v3441_v4  ;;  %v2993_v57 = vpop.f32.mrb[216].mxu0  ;;  %4189 = vmatmul.mubr.bf16.gmra.mrb[52].mxu0 %v9176_v10  ;;  %v3568_v56 = vmul.bf16 1017396388, %v3440_v8 }
 0x2b8   : > { %v3106_v33 = vpop.f32.mrb[216].mxu1  ;;  %4302 = vmatmul.mubr.bf16.gmra.mrb[52].mxu1 %v9176_v10  ;;  %v2995_v53 = vpop.f32.mrb[217].mxu0  ;;  %v3570_v50 = vmul.bf16 1017396388, %v3442_v20  ;;  %4198 = vmatprep.mubr.bf16.mxu0 %v7735_v0  ;;  %v2994_v58 = vadd.f32 %v2993_v57, %v9060_v40  ;;  %v3695_v32 = vmax.bf16 %v3567_v42, %v3439_v41 }
 0x2b9   : > { %v3108_v16 = vpop.f32.mrb[217].mxu1  ;;  %v2997_v62 = vpop.f32.mrb[218].mxu0  ;;  %v3696_v2 = vmax.bf16 %v3568_v56, %v3440_v8  ;;  %4311 = vmatprep.mubr.bf16.mxu1 %v7735_v0  ;;  %v3107_v3 = vadd.f32 %v3106_v33, %v9060_v40  ;;  %v2996_v10 = vadd.f32 %v2995_v53, %v9060_v40  ;;  %v3697_v9 = vmax.bf16 %v3569_v47, %v3441_v4 }
 0x2ba   : > { %v2998_v14 = vadd.f32 %v2997_v62, %v9058_v45  ;;  %v3110_v26 = vpop.f32.mrb[218].mxu1  ;;  %v2999_v7 = vpop.f32.mrb[219].mxu0  ;;  %v3698_v43 = vmax.bf16 %v3570_v50, %v3442_v20  ;;  %v3109_v18 = vadd.f32 %v3108_v16, %v9060_v40 }
 0x2bb   : > { %v3111_v37 = vadd.f32 %v3110_v26, %v9058_v45  ;;  %v3000_v15 = vadd.f32 %v2999_v7, %v9058_v45  ;;  %v3112_v36 = vpop.f32.mrb[219].mxu1  ;;  %4342 = vmatprep.subr.bf16.mxu0 %v3696_v2 }
 0x2bc   : > { %v3455_v48 = vpack.c.bf16 %v2998_v14, %v2994_v58  ;;  %v3113_v19 = vadd.f32 %v3112_v36, %v9058_v45  ;;  %4455 = vmatprep.subr.bf16.mxu1 %v3698_v43  ;;  %4343 = vmatpush1.bf16.msra.mxu0 %v3695_v32 }
 0x2bd   : > { %v3457_v21 = vpack.c.bf16 %v3111_v37, %v3107_v3  ;;  %v3456_v1 = vpack.c.bf16 %v3000_v15, %v2996_v10  ;;  %4456 = vmatpush1.bf16.msra.mxu1 %v3697_v9 }
 0x2be   : > { %v3583_v22 = vmul.bf16 1017396388, %v3455_v48  ;;  %v3458_v11 = vpack.c.bf16 %v3113_v19, %v3109_v18 }
 0x2bf   : > { %v3585_v49 = vmul.bf16 1017396388, %v3457_v21  ;;  %v3003_v39 = vpop.f32.mrb[220].mxu0  ;;  %4199 = vmatmul.mubr.bf16.gmra.mrb[56].mxu0 %v9193_v54  ;;  %v3584_v60 = vmul.bf16 1017396388, %v3456_v1 }
 0x2c0   : > { %v3116_v27 = vpop.f32.mrb[220].mxu1  ;;  %4312 = vmatmul.mubr.bf16.gmra.mrb[56].mxu1 %v9193_v54  ;;  %v3005_v29 = vpop.f32.mrb[221].mxu0  ;;  %v3586_v51 = vmul.bf16 1017396388, %v3458_v11  ;;  %4208 = vmatprep.mubr.bf16.mxu0 %v7735_v0  ;;  %v3004_v34 = vadd.f32 %v3003_v39, %v9072_v55  ;;  %v3711_v42 = vmax.bf16 %v3583_v22, %v3455_v48 }
 0x2c1   : > { %v3118_v30 = vpop.f32.mrb[221].mxu1  ;;  %v3007_v61 = vpop.f32.mrb[222].mxu0  ;;  %v3712_v38 = vmax.bf16 %v3584_v60, %v3456_v1  ;;  %4321 = vmatprep.mubr.bf16.mxu1 %v7735_v0  ;;  %v3117_v6 = vadd.f32 %v3116_v27, %v9072_v55  ;;  %v3006_v54 = vadd.f32 %v3005_v29, %v9072_v55  ;;  %v3713_v56 = vmax.bf16 %v3585_v49, %v3457_v21 }
 0x2c2   : > { %v3008_v41 = vadd.f32 %v3007_v61, %v9070_v25  ;;  %v3120_v46 = vpop.f32.mrb[222].mxu1  ;;  %v3009_v4 = vpop.f32.mrb[223].mxu0  ;;  %v3714_v8 = vmax.bf16 %v3586_v51, %v3458_v11  ;;  %v3119_v33 = vadd.f32 %v3118_v30, %v9072_v55 }
 0x2c3   : > { %v3121_v20 = vadd.f32 %v3120_v46, %v9070_v25  ;;  %v3010_v47 = vadd.f32 %v3009_v4, %v9070_v25  ;;  %v3122_v57 = vpop.f32.mrb[223].mxu1  ;;  %4344 = vmatprep.subr.bf16.mxu0 %v3712_v38 }
 0x2c4   : > { %v3471_v53 = vpack.c.bf16 %v3008_v41, %v3004_v34  ;;  %v3123_v50 = vadd.f32 %v3122_v57, %v9070_v25  ;;  %4457 = vmatprep.subr.bf16.mxu1 %v3714_v8  ;;  %4345 = vmatpush1.bf16.msra.mxu0 %v3711_v42  ;;  %v9325_v41 = vld [vmem:[%s10317_s3 + $0x40] sm:$0xff]  }
 0x2c5   : > { %v3473_v58 = vpack.c.bf16 %v3121_v20, %v3117_v6  ;;  %v3472_v16 = vpack.c.bf16 %v3010_v47, %v3006_v54  ;;  %4458 = vmatpush1.bf16.msra.mxu1 %v3713_v56 }
 0x2c6   : > { %v3599_v62 = vmul.bf16 1017396388, %v3471_v53  ;;  %v3474_v2 = vpack.c.bf16 %v3123_v50, %v3119_v33 }
 0x2c7   : > { %v3601_v3 = vmul.bf16 1017396388, %v3473_v58  ;;  %v3159_v14 = vpop.f32.mrb[224].mxu0  ;;  %4209 = vmatmul.mubr.bf16.gmra.mrb[60].mxu0 %v9210_v35  ;;  %v3600_v26 = vmul.bf16 1017396388, %v3472_v16 }
 0x2c8   : > { %v3272_v7 = vpop.f32.mrb[224].mxu1  ;;  %4322 = vmatmul.mubr.bf16.gmra.mrb[60].mxu1 %v9210_v35  ;;  %v3161_v43 = vpop.f32.mrb[225].mxu0  ;;  %v3602_v32 = vmul.bf16 1017396388, %v3474_v2  ;;  %4364 = vmatprep.mubr.bf16.mxu0 %v7735_v0  ;;  %v3160_v10 = vadd.f32 %v3159_v14, %v8968_v24  ;;  %v3727_v1 = vmax.bf16 %v3599_v62, %v3471_v53 }
 0x2c9   : > { %v3274_v37 = vpop.f32.mrb[225].mxu1  ;;  %v3163_v15 = vpop.f32.mrb[226].mxu0  ;;  %v3728_v36 = vmax.bf16 %v3600_v26, %v3472_v16  ;;  %4477 = vmatprep.mubr.bf16.mxu1 %v7735_v0  ;;  %v3273_v9 = vadd.f32 %v3272_v7, %v8968_v24  ;;  %v3162_v35 = vadd.f32 %v3161_v43, %v8968_v24  ;;  %v3729_v39 = vmax.bf16 %v3601_v3, %v3473_v58 }
 0x2ca   : > { %v3164_v18 = vadd.f32 %v3163_v15, %v8965_v12  ;;  %v3276_v48 = vpop.f32.mrb[226].mxu1  ;;  %v3165_v19 = vpop.f32.mrb[227].mxu0  ;;  %v3730_v21 = vmax.bf16 %v3602_v32, %v3474_v2  ;;  %v3275_v60 = vadd.f32 %v3274_v37, %v8968_v24 }
 0x2cb   : > { %v3277_v22 = vadd.f32 %v3276_v48, %v8965_v12  ;;  %v3166_v11 = vadd.f32 %v3165_v19, %v8965_v12  ;;  %v3278_v49 = vpop.f32.mrb[227].mxu1  ;;  %4346 = vmatprep.subr.bf16.mxu0 %v3728_v36 }
 0x2cc   : > { %v3363_v27 = vpack.c.bf16 %v3164_v18, %v3160_v10  ;;  %v3279_v29 = vadd.f32 %v3278_v49, %v8965_v12  ;;  %4459 = vmatprep.subr.bf16.mxu1 %v3730_v21  ;;  %4347 = vmatpush1.bf16.msra.mxu0 %v3727_v1 }
 0x2cd   : > { %v3365_v51 = vpack.c.bf16 %v3277_v22, %v3273_v9  ;;  %v3364_v34 = vpack.c.bf16 %v3166_v11, %v3162_v35  ;;  %4460 = vmatpush1.bf16.msra.mxu1 %v3729_v39  ;;  %v9342_v9 = vld [vmem:[%s10317_s3 + $0x48] sm:$0xff]  }
 0x2ce   : > { %v3491_v30 = vmul.bf16 1017396388, %v3363_v27  ;;  %v3366_v61 = vpack.c.bf16 %v3279_v29, %v3275_v60 }
 0x2cf   : > { %v3493_v38 = vmul.bf16 1017396388, %v3365_v51  ;;  %v3169_v6 = vpop.f32.mrb[228].mxu0  ;;  %4365 = vmatmul.mubr.bf16.vlgmr.msra.gmra.mrb[64].mxu0 %v9325_v41  ;;  %v3492_v24 = vmul.bf16 1017396388, %v3364_v34 }
 0x2d0   : > { %v3282_v46 = vpop.f32.mrb[228].mxu1  ;;  %4478 = vmatmul.mubr.bf16.vlgmr.msra.gmra.mrb[64].mxu1 %v9325_v41  ;;  %v3171_v12 = vpop.f32.mrb[229].mxu0  ;;  %v3494_v4 = vmul.bf16 1017396388, %v3366_v61  ;;  %4374 = vmatprep.mubr.bf16.mxu0 %v7735_v0  ;;  %v3170_v8 = vadd.f32 %v3169_v6, %v8984_v28  ;;  %v3619_v50 = vmax.bf16 %v3491_v30, %v3363_v27 }
 0x2d1   : > { %v3284_v42 = vpop.f32.mrb[229].mxu1  ;;  %v3173_v54 = vpop.f32.mrb[230].mxu0  ;;  %v3620_v20 = vmax.bf16 %v3492_v24, %v3364_v34  ;;  %4487 = vmatprep.mubr.bf16.mxu1 %v7735_v0  ;;  %v3283_v47 = vadd.f32 %v3282_v46, %v8984_v28  ;;  %v3172_v58 = vadd.f32 %v3171_v12, %v8984_v28  ;;  %v3621_v3 = vmax.bf16 %v3493_v38, %v3365_v51 }
 0x2d2   : > { %v3174_v57 = vadd.f32 %v3173_v54, %v8981_v52  ;;  %v3286_v56 = vpop.f32.mrb[230].mxu1  ;;  %v3175_v33 = vpop.f32.mrb[231].mxu0  ;;  %v3622_v53 = vmax.bf16 %v3494_v4, %v3366_v61  ;;  %v3285_v14 = vadd.f32 %v3284_v42, %v8984_v28 }
 0x2d3   : > { %v3287_v16 = vadd.f32 %v3286_v56, %v8981_v52  ;;  %v3176_v62 = vadd.f32 %v3175_v33, %v8981_v52  ;;  %v3288_v2 = vpop.f32.mrb[231].mxu1  ;;  %4558 = vmatprep.subr.bf16.mxu0 %v3620_v20  ;;  %v9359_v20 = vld [vmem:[%s10317_s3 + $0x50] sm:$0xff]  }
 0x2d4   : > { %v3379_v26 = vpack.c.bf16 %v3174_v57, %v3170_v8  ;;  %v3289_v7 = vadd.f32 %v3288_v2, %v8981_v52  ;;  %4671 = vmatprep.subr.bf16.mxu1 %v3622_v53  ;;  %4559 = vmatpush1.bf16.msra.mxu0 %v3619_v50 }
 0x2d5   : > { %v3381_v43 = vpack.c.bf16 %v3287_v16, %v3283_v47  ;;  %v3380_v32 = vpack.c.bf16 %v3176_v62, %v3172_v58  ;;  %4672 = vmatpush1.bf16.msra.mxu1 %v3621_v3 }
 0x2d6   : > { %v3507_v10 = vmul.bf16 1017396388, %v3379_v26  ;;  %v3382_v37 = vpack.c.bf16 %v3289_v7, %v3285_v14 }
 0x2d7   : > { %v3509_v15 = vmul.bf16 1017396388, %v3381_v43  ;;  %v3179_v36 = vpop.f32.mrb[232].mxu0  ;;  %4375 = vmatmul.mubr.bf16.gmra.mrb[68].mxu0 %v9342_v9  ;;  %v3508_v28 = vmul.bf16 1017396388, %v3380_v32 }
 0x2d8   : > { %v3292_v18 = vpop.f32.mrb[232].mxu1  ;;  %4488 = vmatmul.mubr.bf16.gmra.mrb[68].mxu1 %v9342_v9  ;;  %v3181_v52 = vpop.f32.mrb[233].mxu0  ;;  %v3510_v48 = vmul.bf16 1017396388, %v3382_v37  ;;  %4384 = vmatprep.mubr.bf16.mxu0 %v7735_v0  ;;  %v3180_v19 = vadd.f32 %v3179_v36, %v8999_v63  ;;  %v3635_v27 = vmax.bf16 %v3507_v10, %v3379_v26 }
 0x2d9   : > { %v3294_v21 = vpop.f32.mrb[233].mxu1  ;;  %v3183_v1 = vpop.f32.mrb[234].mxu0  ;;  %v3636_v35 = vmax.bf16 %v3508_v28, %v3380_v32  ;;  %4497 = vmatprep.mubr.bf16.mxu1 %v7735_v0  ;;  %v3293_v22 = vadd.f32 %v3292_v18, %v8999_v63  ;;  %v3182_v29 = vadd.f32 %v3181_v52, %v8999_v63  ;;  %v3637_v61 = vmax.bf16 %v3509_v15, %v3381_v43 }
 0x2da   : > { %v3184_v11 = vadd.f32 %v3183_v1, %v8996_v23  ;;  %v3296_v49 = vpop.f32.mrb[234].mxu1  ;;  %v3185_v39 = vpop.f32.mrb[235].mxu0  ;;  %v3638_v60 = vmax.bf16 %v3510_v48, %v3382_v37  ;;  %v3295_v38 = vadd.f32 %v3294_v21, %v8999_v63  ;;  %v9376_v1 = vld [vmem:[%s10317_s3 + $0x58] sm:$0xff]  }
 0x2db   : > { %v3297_v51 = vadd.f32 %v3296_v49, %v8996_v23  ;;  %v3186_v34 = vadd.f32 %v3185_v39, %v8996_v23  ;;  %v3298_v30 = vpop.f32.mrb[235].mxu1  ;;  %4560 = vmatprep.subr.bf16.mxu0 %v3636_v35 }
 0x2dc   : > { %v3395_v6 = vpack.c.bf16 %v3184_v11, %v3180_v19  ;;  %v3299_v24 = vadd.f32 %v3298_v30, %v8996_v23  ;;  %4673 = vmatprep.subr.bf16.mxu1 %v3638_v60  ;;  %4561 = vmatpush1.bf16.msra.mxu0 %v3635_v27 }
 0x2dd   : > { %v3397_v46 = vpack.c.bf16 %v3297_v51, %v3293_v22  ;;  %v3396_v12 = vpack.c.bf16 %v3186_v34, %v3182_v29  ;;  %4674 = vmatpush1.bf16.msra.mxu1 %v3637_v61 }
 0x2de   : > { %v3523_v4 = vmul.bf16 1017396388, %v3395_v6  ;;  %v3398_v8 = vpack.c.bf16 %v3299_v24, %v3295_v38 }
 0x2df   : > { %v3525_v42 = vmul.bf16 1017396388, %v3397_v46  ;;  %v3189_v54 = vpop.f32.mrb[236].mxu0  ;;  %4385 = vmatmul.mubr.bf16.gmra.mrb[72].mxu0 %v9359_v20  ;;  %v3524_v63 = vmul.bf16 1017396388, %v3396_v12 }
 0x2e0   : > { %v3302_v47 = vpop.f32.mrb[236].mxu1  ;;  %4498 = vmatmul.mubr.bf16.gmra.mrb[72].mxu1 %v9359_v20  ;;  %v3191_v23 = vpop.f32.mrb[237].mxu0  ;;  %v3526_v57 = vmul.bf16 1017396388, %v3398_v8  ;;  %4394 = vmatprep.mubr.bf16.mxu0 %v7735_v0  ;;  %v3190_v56 = vadd.f32 %v3189_v54, %v9015_v5  ;;  %v3651_v14 = vmax.bf16 %v3523_v4, %v3395_v6 }
 0x2e1   : > { %v3304_v33 = vpop.f32.mrb[237].mxu1  ;;  %v3193_v53 = vpop.f32.mrb[238].mxu0  ;;  %v3652_v50 = vmax.bf16 %v3524_v63, %v3396_v12  ;;  %4507 = vmatprep.mubr.bf16.mxu1 %v7735_v0  ;;  %v3303_v58 = vadd.f32 %v3302_v47, %v9015_v5  ;;  %v3192_v26 = vadd.f32 %v3191_v23, %v9015_v5  ;;  %v3653_v10 = vmax.bf16 %v3525_v42, %v3397_v46 }
 0x2e2   : > { %v3194_v16 = vadd.f32 %v3193_v53, %v9012_v59  ;;  %v3306_v62 = vpop.f32.mrb[238].mxu1  ;;  %v3195_v2 = vpop.f32.mrb[239].mxu0  ;;  %v3654_v3 = vmax.bf16 %v3526_v57, %v3398_v8  ;;  %v3305_v37 = vadd.f32 %v3304_v33, %v9015_v5  ;;  %v9393_v53 = vld [vmem:[%s10317_s3 + $0x60] sm:$0xff]  }
 0x2e3   : > { %v3307_v7 = vadd.f32 %v3306_v62, %v9012_v59  ;;  %v3196_v43 = vadd.f32 %v3195_v2, %v9012_v59  ;;  %v3308_v32 = vpop.f32.mrb[239].mxu1  ;;  %4562 = vmatprep.subr.bf16.mxu0 %v3652_v50 }
 0x2e4   : > { %v3411_v15 = vpack.c.bf16 %v3194_v16, %v3190_v56  ;;  %v3309_v36 = vadd.f32 %v3308_v32, %v9012_v59  ;;  %4675 = vmatprep.subr.bf16.mxu1 %v3654_v3  ;;  %4563 = vmatpush1.bf16.msra.mxu0 %v3651_v14 }
 0x2e5   : > { %v3413_v28 = vpack.c.bf16 %v3307_v7, %v3303_v58  ;;  %v3412_v18 = vpack.c.bf16 %v3196_v43, %v3192_v26  ;;  %4676 = vmatpush1.bf16.msra.mxu1 %v3653_v10 }
 0x2e6   : > { %v3539_v52 = vmul.bf16 1017396388, %v3411_v15  ;;  %v3414_v48 = vpack.c.bf16 %v3309_v36, %v3305_v37 }
 0x2e7   : > { %v3541_v19 = vmul.bf16 1017396388, %v3413_v28  ;;  %v3199_v21 = vpop.f32.mrb[240].mxu0  ;;  %4395 = vmatmul.mubr.bf16.gmra.mrb[76].mxu0 %v9376_v1  ;;  %v3540_v5 = vmul.bf16 1017396388, %v3412_v18 }
 0x2e8   : > { %v3312_v35 = vpop.f32.mrb[240].mxu1  ;;  %4508 = vmatmul.mubr.bf16.gmra.mrb[76].mxu1 %v9376_v1  ;;  %v3201_v59 = vpop.f32.mrb[241].mxu0  ;;  %v3542_v22 = vmul.bf16 1017396388, %v3414_v48  ;;  %4404 = vmatprep.mubr.bf16.mxu0 %v7735_v0  ;;  %v3200_v11 = vadd.f32 %v3199_v21, %v9031_v13  ;;  %v3667_v61 = vmax.bf16 %v3539_v52, %v3411_v15 }
 0x2e9   : > { %v3314_v49 = vpop.f32.mrb[241].mxu1  ;;  %v3203_v39 = vpop.f32.mrb[242].mxu0  ;;  %v3668_v60 = vmax.bf16 %v3540_v5, %v3412_v18  ;;  %4517 = vmatprep.mubr.bf16.mxu1 %v7735_v0  ;;  %v3313_v27 = vadd.f32 %v3312_v35, %v9031_v13  ;;  %v3202_v38 = vadd.f32 %v3201_v59, %v9031_v13  ;;  %v3669_v12 = vmax.bf16 %v3541_v19, %v3413_v28 }
 0x2ea   : > { %v3204_v29 = vadd.f32 %v3203_v39, %v9028_v31  ;;  %v3316_v51 = vpop.f32.mrb[242].mxu1  ;;  %v3205_v34 = vpop.f32.mrb[243].mxu0  ;;  %v3670_v30 = vmax.bf16 %v3542_v22, %v3414_v48  ;;  %v3315_v4 = vadd.f32 %v3314_v49, %v9031_v13  ;;  %v9410_v49 = vld [vmem:[%s10317_s3 + $0x68] sm:$0xff]  }
 0x2eb   : > { %v3317_v6 = vadd.f32 %v3316_v51, %v9028_v31  ;;  %v3206_v24 = vadd.f32 %v3205_v34, %v9028_v31  ;;  %v3318_v46 = vpop.f32.mrb[243].mxu1  ;;  %4564 = vmatprep.subr.bf16.mxu0 %v3668_v60 }
 0x2ec   : > { %v3427_v8 = vpack.c.bf16 %v3204_v29, %v3200_v11  ;;  %v3319_v42 = vadd.f32 %v3318_v46, %v9028_v31  ;;  %4677 = vmatprep.subr.bf16.mxu1 %v3670_v30  ;;  %4565 = vmatpush1.bf16.msra.mxu0 %v3667_v61 }
 0x2ed   : > { %v3429_v54 = vpack.c.bf16 %v3317_v6, %v3313_v27  ;;  %v3428_v63 = vpack.c.bf16 %v3206_v24, %v3202_v38  ;;  %4678 = vmatpush1.bf16.msra.mxu1 %v3669_v12 }
 0x2ee   : > { %v3555_v47 = vmul.bf16 1017396388, %v3427_v8  ;;  %v3430_v23 = vpack.c.bf16 %v3319_v42, %v3315_v4 }
 0x2ef   : > { %v3557_v57 = vmul.bf16 1017396388, %v3429_v54  ;;  %v3556_v56 = vmul.bf16 1017396388, %v3428_v63  ;;  %v3209_v33 = vpop.f32.mrb[244].mxu0  ;;  %4405 = vmatmul.mubr.bf16.gmra.mrb[80].mxu0 %v9393_v53 }
 0x2f0   : > { %v3558_v13 = vmul.bf16 1017396388, %v3430_v23  ;;  %v3322_v50 = vpop.f32.mrb[244].mxu1  ;;  %4518 = vmatmul.mubr.bf16.gmra.mrb[80].mxu1 %v9393_v53  ;;  %v3211_v31 = vpop.f32.mrb[245].mxu0  ;;  %4414 = vmatprep.mubr.bf16.mxu0 %v7735_v0  ;;  %v3683_v58 = vmax.bf16 %v3555_v47, %v3427_v8  ;;  %v3210_v14 = vadd.f32 %v3209_v33, %v9047_v17 }
 0x2f1   : > { %v3324_v16 = vpop.f32.mrb[245].mxu1  ;;  %v3213_v62 = vpop.f32.mrb[246].mxu0  ;;  %v3684_v2 = vmax.bf16 %v3556_v56, %v3428_v63  ;;  %4527 = vmatprep.mubr.bf16.mxu1 %v7735_v0  ;;  %v3685_v3 = vmax.bf16 %v3557_v57, %v3429_v54  ;;  %v3323_v10 = vadd.f32 %v3322_v50, %v9047_v17  ;;  %v3212_v37 = vadd.f32 %v3211_v31, %v9047_v17 }
 0x2f2   : > { %v3214_v26 = vadd.f32 %v3213_v62, %v9044_v44  ;;  %v3326_v7 = vpop.f32.mrb[246].mxu1  ;;  %v3215_v43 = vpop.f32.mrb[247].mxu0  ;;  %v3686_v32 = vmax.bf16 %v3558_v13, %v3430_v23  ;;  %v3325_v18 = vadd.f32 %v3324_v16, %v9047_v17 }
 0x2f3   : > { %v3327_v15 = vadd.f32 %v3326_v7, %v9044_v44  ;;  %v3216_v36 = vadd.f32 %v3215_v43, %v9044_v44  ;;  %v3328_v28 = vpop.f32.mrb[247].mxu1  ;;  %4566 = vmatprep.subr.bf16.mxu0 %v3684_v2 }
 0x2f4   : > { %v3443_v52 = vpack.c.bf16 %v3214_v26, %v3210_v14  ;;  %v3329_v48 = vadd.f32 %v3328_v28, %v9044_v44  ;;  %4679 = vmatprep.subr.bf16.mxu1 %v3686_v32  ;;  %4567 = vmatpush1.bf16.msra.mxu0 %v3683_v58  ;;  %v9427_v58 = vld [vmem:[%s10317_s3 + $0x70] sm:$0xff]  }
 0x2f5   : > { %v3445_v19 = vpack.c.bf16 %v3327_v15, %v3323_v10  ;;  %v3444_v21 = vpack.c.bf16 %v3216_v36, %v3212_v37  ;;  %4680 = vmatpush1.bf16.msra.mxu1 %v3685_v3 }
 0x2f6   : > { %v3571_v5 = vmul.bf16 1017396388, %v3443_v52  ;;  %v3446_v35 = vpack.c.bf16 %v3329_v48, %v3325_v18 }
 0x2f7   : > { %v3573_v59 = vmul.bf16 1017396388, %v3445_v19  ;;  %v3572_v22 = vmul.bf16 1017396388, %v3444_v21  ;;  %v3219_v11 = vpop.f32.mrb[248].mxu0  ;;  %4415 = vmatmul.mubr.bf16.gmra.mrb[84].mxu0 %v9410_v49 }
 0x2f8   : > { %v3574_v17 = vmul.bf16 1017396388, %v3446_v35  ;;  %v3332_v39 = vpop.f32.mrb[248].mxu1  ;;  %4528 = vmatmul.mubr.bf16.gmra.mrb[84].mxu1 %v9410_v49  ;;  %v3221_v44 = vpop.f32.mrb[249].mxu0  ;;  %4424 = vmatprep.mubr.bf16.mxu0 %v7735_v0  ;;  %v3699_v60 = vmax.bf16 %v3571_v5, %v3443_v52  ;;  %v3220_v30 = vadd.f32 %v3219_v11, %v9060_v40 }
 0x2f9   : > { %v3334_v27 = vpop.f32.mrb[249].mxu1  ;;  %v3223_v29 = vpop.f32.mrb[250].mxu0  ;;  %v3700_v51 = vmax.bf16 %v3572_v22, %v3444_v21  ;;  %4537 = vmatprep.mubr.bf16.mxu1 %v7735_v0  ;;  %v3701_v34 = vmax.bf16 %v3573_v59, %v3445_v19  ;;  %v3333_v46 = vadd.f32 %v3332_v39, %v9060_v40  ;;  %v3222_v12 = vadd.f32 %v3221_v44, %v9060_v40  ;;  %v9444_v39 = vld [vmem:[%s10317_s3 + $0x78] sm:$0xff]  }
 0x2fa   : > { %v3224_v61 = vadd.f32 %v3223_v29, %v9058_v45  ;;  %v3336_v38 = vpop.f32.mrb[250].mxu1  ;;  %v3225_v6 = vpop.f32.mrb[251].mxu0  ;;  %v3702_v24 = vmax.bf16 %v3574_v17, %v3446_v35  ;;  %v3335_v54 = vadd.f32 %v3334_v27, %v9060_v40 }
 0x2fb   : > { %v3337_v4 = vadd.f32 %v3336_v38, %v9058_v45  ;;  %v3226_v8 = vadd.f32 %v3225_v6, %v9058_v45  ;;  %v3338_v42 = vpop.f32.mrb[251].mxu1  ;;  %4568 = vmatprep.subr.bf16.mxu0 %v3700_v51  ;;  %v9461_v29 = vpop.permute.xlu1 %3759 }
 0x2fc   : > { %v3459_v63 = vpack.c.bf16 %v3224_v61, %v3220_v30  ;;  %v3339_v47 = vadd.f32 %v3338_v42, %v9058_v45  ;;  %4681 = vmatprep.subr.bf16.mxu1 %v3702_v24  ;;  %4569 = vmatpush1.bf16.msra.mxu0 %v3699_v60 }
 0x2fd   : > { %v3461_v23 = vpack.c.bf16 %v3337_v4, %v3333_v46  ;;  %v3460_v57 = vpack.c.bf16 %v3226_v8, %v3222_v12  ;;  %4682 = vmatpush1.bf16.msra.mxu1 %v3701_v34 }
 0x2fe   : > { %v3587_v56 = vmul.bf16 1017396388, %v3459_v63  ;;  %v3462_v33 = vpack.c.bf16 %v3339_v47, %v3335_v54 }
 0x2ff   : > { %v3589_v13 = vmul.bf16 1017396388, %v3461_v23  ;;  %v3588_v50 = vmul.bf16 1017396388, %v3460_v57  ;;  %v3229_v31 = vpop.f32.mrb[252].mxu0  ;;  %4425 = vmatmul.mubr.bf16.gmra.mrb[88].mxu0 %v9427_v58 }
 0x300   : > { %v3590_v40 = vmul.bf16 1017396388, %v3462_v33  ;;  %v3342_v16 = vpop.f32.mrb[252].mxu1  ;;  %4538 = vmatmul.mubr.bf16.gmra.mrb[88].mxu1 %v9427_v58  ;;  %v3231_v45 = vpop.f32.mrb[253].mxu0  ;;  %4434 = vmatprep.mubr.bf16.mxu0 %v7735_v0  ;;  %v3715_v62 = vmax.bf16 %v3587_v56, %v3459_v63  ;;  %v3230_v7 = vadd.f32 %v3229_v31, %v9072_v55 }
 0x301   : > { %v3344_v2 = vpop.f32.mrb[253].mxu1  ;;  %v3233_v3 = vpop.f32.mrb[254].mxu0  ;;  %v3716_v14 = vmax.bf16 %v3588_v50, %v3460_v57  ;;  %4547 = vmatprep.mubr.bf16.mxu1 %v7735_v0  ;;  %v3717_v26 = vmax.bf16 %v3589_v13, %v3461_v23  ;;  %v3343_v15 = vadd.f32 %v3342_v16, %v9072_v55  ;;  %v3232_v36 = vadd.f32 %v3231_v45, %v9072_v55 }
 0x302   : > { %v3234_v43 = vadd.f32 %v3233_v3, %v9070_v25  ;;  %v3346_v32 = vpop.f32.mrb[254].mxu1  ;;  %v3235_v10 = vpop.f32.mrb[255].mxu0  ;;  %v3718_v37 = vmax.bf16 %v3590_v40, %v3462_v33  ;;  %v3345_v48 = vadd.f32 %v3344_v2, %v9072_v55 }
 0x303   : > { %v3347_v28 = vadd.f32 %v3346_v32, %v9070_v25  ;;  %v3236_v18 = vadd.f32 %v3235_v10, %v9070_v25  ;;  %v3348_v52 = vpop.f32.mrb[255].mxu1  ;;  %4570 = vmatprep.subr.bf16.mxu0 %v3716_v14  ;;  %v9477_v56 = vpop.permute.xlu1 %3769 }
 0x304   : > { %v3475_v19 = vpack.c.bf16 %v3234_v43, %v3230_v7  ;;  %v3349_v21 = vadd.f32 %v3348_v52, %v9070_v25  ;;  %4683 = vmatprep.subr.bf16.mxu1 %v3718_v37  ;;  %4571 = vmatpush1.bf16.msra.mxu0 %v3715_v62 }
 0x305   : > { %v3477_v5 = vpack.c.bf16 %v3347_v28, %v3343_v15  ;;  %v3476_v35 = vpack.c.bf16 %v3236_v18, %v3232_v36  ;;  %4684 = vmatpush1.bf16.msra.mxu1 %v3717_v26 }
 0x306   : > { %v3603_v59 = vmul.bf16 1017396388, %v3475_v19  ;;  %v3478_v22 = vpack.c.bf16 %v3349_v21, %v3345_v48 }
 0x307   : > { %v3605_v11 = vmul.bf16 1017396388, %v3477_v5  ;;  %v3604_v17 = vmul.bf16 1017396388, %v3476_v35  ;;  %4435 = vmatmul.mubr.bf16.gmra.mrb[92].mxu0 %v9444_v39 }
 0x308   : > { %v3606_v55 = vmul.bf16 1017396388, %v3478_v22  ;;  %4548 = vmatmul.mubr.bf16.gmra.mrb[92].mxu1 %v9444_v39  ;;  %4590 = vmatprep.mubr.bf16.mxu0 %v7735_v0  ;;  %v3731_v44 = vmax.bf16 %v3603_v59, %v3475_v19 }
 0x309   : > { %v3732_v25 = vmax.bf16 %v3604_v17, %v3476_v35  ;;  %4703 = vmatprep.mubr.bf16.mxu1 %v7735_v0  ;;  %v3733_v27 = vmax.bf16 %v3605_v11, %v3477_v5 }
 0x30a   : > { %v3734_v60 = vmax.bf16 %v3606_v55, %v3478_v22  ;;  %v9492_v22 = vpop.permute.xlu1 %3779 }
 0x30b   : > { %4572 = vmatprep.subr.bf16.mxu0 %v3732_v25 }
 0x30c   : > { %4685 = vmatprep.subr.bf16.mxu1 %v3734_v60  ;;  %4573 = vmatpush1.bf16.msra.mxu0 %v3731_v44 }
 0x30d   : > { %4686 = vmatpush1.bf16.msra.mxu1 %v3733_v27 }
 0x30f   : > { %4591 = vmatmul.mubr.bf16.vlgmr.msra.gmra.mrb[96].mxu0 %v9325_v41 }
 0x310   : > { %4704 = vmatmul.mubr.bf16.vlgmr.msra.gmra.mrb[96].mxu1 %v9325_v41  ;;  %4600 = vmatprep.mubr.bf16.mxu0 %v7735_v0  ;;  %v9464_v41 = vpop.permute.xlu0 %3754 }
 0x311   : > { %4713 = vmatprep.mubr.bf16.mxu1 %v7735_v0 }
 0x314   : > { %v9480_v50 = vpop.permute.xlu0 %3764 }
 0x317   : > { %4601 = vmatmul.mubr.bf16.gmra.mrb[100].mxu0 %v9342_v9 }
 0x318   : > { %4714 = vmatmul.mubr.bf16.gmra.mrb[100].mxu1 %v9342_v9  ;;  %4610 = vmatprep.mubr.bf16.mxu0 %v7735_v0  ;;  %v9495_v55 = vpop.permute.xlu0 %3774 }
 0x319   : > { %4723 = vmatprep.mubr.bf16.mxu1 %v7735_v0 }
 0x31f   : > { %4611 = vmatmul.mubr.bf16.gmra.mrb[104].mxu0 %v9359_v20 }
 0x320   : > { %4724 = vmatmul.mubr.bf16.gmra.mrb[104].mxu1 %v9359_v20  ;;  %4620 = vmatprep.mubr.bf16.mxu0 %v7735_v0 }
 0x321   : > { %4733 = vmatprep.mubr.bf16.mxu1 %v7735_v0 }
 0x322   : > { %v3914_v51 = vpop.f32.mrb[0].mxu0 }
 0x323   : > { %v4027_v34 = vpop.f32.mrb[0].mxu1  ;;  %v3916_v30 = vpop.f32.mrb[1].mxu0  ;;  %v3915_v38 = vadd.f32 %v3914_v51, %v9464_v41 }
 0x324   : > { %v4029_v9 = vpop.f32.mrb[1].mxu1  ;;  %v3918_v61 = vpop.f32.mrb[2].mxu0  ;;  %v4028_v20 = vadd.f32 %v4027_v34, %v9464_v41  ;;  %v3917_v12 = vadd.f32 %v3916_v30, %v9464_v41 }
 0x325   : > { %v3919_v6 = vadd.f32 %v3918_v61, %v9461_v29  ;;  %v4031_v24 = vpop.f32.mrb[2].mxu1  ;;  %v3920_v46 = vpop.f32.mrb[3].mxu0  ;;  %v4030_v54 = vadd.f32 %v4029_v9, %v9464_v41 }
 0x326   : > { %v4032_v4 = vadd.f32 %v4031_v24, %v9461_v29  ;;  %v3921_v8 = vadd.f32 %v3920_v46, %v9461_v29  ;;  %v4033_v42 = vpop.f32.mrb[3].mxu1 }
 0x327   : > { %v4784_v63 = vpack.c.bf16 %v3919_v6, %v3915_v38  ;;  %v4034_v47 = vadd.f32 %v4033_v42, %v9461_v29  ;;  %4621 = vmatmul.mubr.bf16.gmra.mrb[108].mxu0 %v9376_v1 }
 0x328   : > { %v4786_v23 = vpack.c.bf16 %v4032_v4, %v4028_v20  ;;  %v4785_v57 = vpack.c.bf16 %v3921_v8, %v3917_v12  ;;  %4734 = vmatmul.mubr.bf16.gmra.mrb[108].mxu1 %v9376_v1  ;;  %4630 = vmatprep.mubr.bf16.mxu0 %v7735_v0 }
 0x329   : > { %v4912_v33 = vmul.bf16 1017396388, %v4784_v63  ;;  %v4787_v13 = vpack.c.bf16 %v4034_v47, %v4030_v54  ;;  %4743 = vmatprep.mubr.bf16.mxu1 %v7735_v0 }
 0x32a   : > { %v4914_v31 = vmul.bf16 1017396388, %v4786_v23  ;;  %v4913_v40 = vmul.bf16 1017396388, %v4785_v57  ;;  %v3924_v16 = vpop.f32.mrb[4].mxu0 }
 0x32b   : > { %v4915_v45 = vmul.bf16 1017396388, %v4787_v13  ;;  %v4037_v62 = vpop.f32.mrb[4].mxu1  ;;  %v3926_v2 = vpop.f32.mrb[5].mxu0  ;;  %v5040_v3 = vmax.bf16 %v4912_v33, %v4784_v63  ;;  %v3925_v43 = vadd.f32 %v3924_v16, %v9480_v50 }
 0x32c   : > { %v4039_v14 = vpop.f32.mrb[5].mxu1  ;;  %v3928_v26 = vpop.f32.mrb[6].mxu0  ;;  %v5041_v1 = vmax.bf16 %v4913_v40, %v4785_v57  ;;  %v5042_v7 = vmax.bf16 %v4914_v31, %v4786_v23  ;;  %v4038_v36 = vadd.f32 %v4037_v62, %v9480_v50  ;;  %v3927_v28 = vadd.f32 %v3926_v2, %v9480_v50 }
 0x32d   : > { %v3929_v32 = vadd.f32 %v3928_v26, %v9477_v56  ;;  %v4041_v10 = vpop.f32.mrb[6].mxu1  ;;  %v3930_v37 = vpop.f32.mrb[7].mxu0  ;;  %v5043_v15 = vmax.bf16 %v4915_v45, %v4787_v13  ;;  %v4040_v19 = vadd.f32 %v4039_v14, %v9480_v50 }
 0x32e   : > { %v4042_v18 = vadd.f32 %v4041_v10, %v9477_v56  ;;  %v3931_v52 = vadd.f32 %v3930_v37, %v9477_v56  ;;  %v4043_v48 = vpop.f32.mrb[7].mxu1  ;;  %5240 = vmatprep.subr.bf16.mxu0 %v5041_v1  ;;  %v9508_v31 = vpop.permute.xlu1 %3789 }
 0x32f   : > { %v4800_v21 = vpack.c.bf16 %v3929_v32, %v3925_v43  ;;  %v4044_v5 = vadd.f32 %v4043_v48, %v9477_v56  ;;  %5313 = vmatprep.subr.bf16.mxu1 %v5043_v15  ;;  %4631 = vmatmul.mubr.bf16.gmra.mrb[112].mxu0 %v9393_v53  ;;  %v9511_v45 = vpop.permute.xlu0 %3784 }
 0x330   : > { %v4802_v35 = vpack.c.bf16 %v4042_v18, %v4038_v36  ;;  %v4801_v59 = vpack.c.bf16 %v3931_v52, %v3927_v28  ;;  %4744 = vmatmul.mubr.bf16.gmra.mrb[112].mxu1 %v9393_v53  ;;  %5241 = vmatpush1.bf16.msra.mxu0 %v5040_v3 }
 0x331   : > { %v4928_v11 = vmul.bf16 1017396388, %v4800_v21  ;;  %v4803_v17 = vpack.c.bf16 %v4044_v5, %v4040_v19  ;;  %5314 = vmatpush1.bf16.msra.mxu1 %v5042_v7  ;;  %4640 = vmatprep.mubr.bf16.mxu0 %v7735_v0 }
 0x332   : > { %v4930_v25 = vmul.bf16 1017396388, %v4802_v35  ;;  %v4929_v44 = vmul.bf16 1017396388, %v4801_v59  ;;  %v3934_v60 = vpop.f32.mrb[8].mxu0  ;;  %4753 = vmatprep.mubr.bf16.mxu1 %v7735_v0 }
 0x333   : > { %v4931_v27 = vmul.bf16 1017396388, %v4803_v17  ;;  %v4047_v51 = vpop.f32.mrb[8].mxu1  ;;  %v3936_v34 = vpop.f32.mrb[9].mxu0  ;;  %v5056_v30 = vmax.bf16 %v4928_v11, %v4800_v21  ;;  %v3935_v6 = vadd.f32 %v3934_v60, %v9495_v55 }
 0x334   : > { %v4049_v53 = vpop.f32.mrb[9].mxu1  ;;  %v3938_v9 = vpop.f32.mrb[10].mxu0  ;;  %v5057_v61 = vmax.bf16 %v4929_v44, %v4801_v59  ;;  %v5058_v38 = vmax.bf16 %v4930_v25, %v4802_v35  ;;  %v4048_v4 = vadd.f32 %v4047_v51, %v9495_v55  ;;  %v3937_v8 = vadd.f32 %v3936_v34, %v9495_v55 }
 0x335   : > { %v3939_v24 = vadd.f32 %v3938_v9, %v9492_v22  ;;  %v4051_v46 = vpop.f32.mrb[10].mxu1  ;;  %v3940_v20 = vpop.f32.mrb[11].mxu0  ;;  %v5059_v12 = vmax.bf16 %v4931_v27, %v4803_v17  ;;  %v4050_v47 = vadd.f32 %v4049_v53, %v9495_v55 }
 0x336   : > { %v4052_v42 = vadd.f32 %v4051_v46, %v9492_v22  ;;  %v3941_v54 = vadd.f32 %v3940_v20, %v9492_v22  ;;  %v4053_v63 = vpop.f32.mrb[11].mxu1  ;;  %5242 = vmatprep.subr.bf16.mxu0 %v5057_v61  ;;  %v9524_v44 = vpop.permute.xlu1 %3799 }
 0x337   : > { %v4816_v23 = vpack.c.bf16 %v3939_v24, %v3935_v6  ;;  %v4054_v57 = vadd.f32 %v4053_v63, %v9492_v22  ;;  %5315 = vmatprep.subr.bf16.mxu1 %v5059_v12  ;;  %4641 = vmatmul.mubr.bf16.gmra.mrb[116].mxu0 %v9410_v49  ;;  %v9527_v51 = vpop.permute.xlu0 %3794 }
 0x338   : > { %v4818_v33 = vpack.c.bf16 %v4052_v42, %v4048_v4  ;;  %v4817_v13 = vpack.c.bf16 %v3941_v54, %v3937_v8  ;;  %4754 = vmatmul.mubr.bf16.gmra.mrb[116].mxu1 %v9410_v49  ;;  %5243 = vmatpush1.bf16.msra.mxu0 %v5056_v30 }
 0x339   : > { %v4944_v40 = vmul.bf16 1017396388, %v4816_v23  ;;  %v4819_v16 = vpack.c.bf16 %v4054_v57, %v4050_v47  ;;  %5316 = vmatpush1.bf16.msra.mxu1 %v5058_v38  ;;  %4650 = vmatprep.mubr.bf16.mxu0 %v7735_v0 }
 0x33a   : > { %v4946_v62 = vmul.bf16 1017396388, %v4818_v33  ;;  %v4945_v2 = vmul.bf16 1017396388, %v4817_v13  ;;  %v3944_v3 = vpop.f32.mrb[12].mxu0  ;;  %4763 = vmatprep.mubr.bf16.mxu1 %v7735_v0 }
 0x33b   : > { %v4947_v14 = vmul.bf16 1017396388, %v4819_v16  ;;  %v4057_v26 = vpop.f32.mrb[12].mxu1  ;;  %v3946_v1 = vpop.f32.mrb[13].mxu0  ;;  %v5072_v7 = vmax.bf16 %v4944_v40, %v4816_v23  ;;  %v3945_v37 = vadd.f32 %v3944_v3, %v9511_v45 }
 0x33c   : > { %v4059_v49 = vpop.f32.mrb[13].mxu1  ;;  %v3948_v43 = vpop.f32.mrb[14].mxu0  ;;  %v5073_v32 = vmax.bf16 %v4945_v2, %v4817_v13  ;;  %v5074_v10 = vmax.bf16 %v4946_v62, %v4818_v33  ;;  %v4058_v52 = vadd.f32 %v4057_v26, %v9511_v45  ;;  %v3947_v48 = vadd.f32 %v3946_v1, %v9511_v45 }
 0x33d   : > { %v3949_v15 = vadd.f32 %v3948_v43, %v9508_v31  ;;  %v4061_v36 = vpop.f32.mrb[14].mxu1  ;;  %v3950_v28 = vpop.f32.mrb[15].mxu0  ;;  %v5075_v18 = vmax.bf16 %v4947_v14, %v4819_v16  ;;  %v4060_v35 = vadd.f32 %v4059_v49, %v9511_v45 }
 0x33e   : > { %v4062_v19 = vadd.f32 %v4061_v36, %v9508_v31  ;;  %v3951_v21 = vadd.f32 %v3950_v28, %v9508_v31  ;;  %v4063_v5 = vpop.f32.mrb[15].mxu1  ;;  %5244 = vmatprep.subr.bf16.mxu0 %v5073_v32  ;;  %v9540_v3 = vpop.permute.xlu1 %3809 }
 0x33f   : > { %v4832_v59 = vpack.c.bf16 %v3949_v15, %v3945_v37  ;;  %v4064_v11 = vadd.f32 %v4063_v5, %v9508_v31  ;;  %5317 = vmatprep.subr.bf16.mxu1 %v5075_v18  ;;  %4651 = vmatmul.mubr.bf16.gmra.mrb[120].mxu0 %v9427_v58  ;;  %v9543_v1 = vpop.permute.xlu0 %3804 }
 0x340   : > { %v4834_v17 = vpack.c.bf16 %v4062_v19, %v4058_v52  ;;  %v4833_v25 = vpack.c.bf16 %v3951_v21, %v3947_v48  ;;  %4764 = vmatmul.mubr.bf16.gmra.mrb[120].mxu1 %v9427_v58  ;;  %5245 = vmatpush1.bf16.msra.mxu0 %v5072_v7 }
 0x341   : > { %v4960_v60 = vmul.bf16 1017396388, %v4832_v59  ;;  %v4835_v27 = vpack.c.bf16 %v4064_v11, %v4060_v35  ;;  %5318 = vmatpush1.bf16.msra.mxu1 %v5074_v10  ;;  %4660 = vmatprep.mubr.bf16.mxu0 %v7735_v0 }
 0x342   : > { %v4962_v34 = vmul.bf16 1017396388, %v4834_v17  ;;  %v4961_v30 = vmul.bf16 1017396388, %v4833_v25  ;;  %v3954_v53 = vpop.f32.mrb[16].mxu0  ;;  %4773 = vmatprep.mubr.bf16.mxu1 %v7735_v0 }
 0x343   : > { %v4963_v9 = vmul.bf16 1017396388, %v4835_v27  ;;  %v4067_v61 = vpop.f32.mrb[16].mxu1  ;;  %v3956_v38 = vpop.f32.mrb[17].mxu0  ;;  %v5088_v6 = vmax.bf16 %v4960_v60, %v4832_v59  ;;  %v3955_v12 = vadd.f32 %v3954_v53, %v9527_v51 }
 0x344   : > { %v4069_v58 = vpop.f32.mrb[17].mxu1  ;;  %v3958_v24 = vpop.f32.mrb[18].mxu0  ;;  %v5089_v46 = vmax.bf16 %v4961_v30, %v4833_v25  ;;  %v5090_v20 = vmax.bf16 %v4962_v34, %v4834_v17  ;;  %v4068_v63 = vadd.f32 %v4067_v61, %v9527_v51  ;;  %v3957_v47 = vadd.f32 %v3956_v38, %v9527_v51 }
 0x345   : > { %v3959_v4 = vadd.f32 %v3958_v24, %v9524_v44  ;;  %v4071_v8 = vpop.f32.mrb[18].mxu1  ;;  %v3960_v42 = vpop.f32.mrb[19].mxu0  ;;  %v5091_v54 = vmax.bf16 %v4963_v9, %v4835_v27  ;;  %v4070_v13 = vadd.f32 %v4069_v58, %v9527_v51 }
 0x346   : > { %v4072_v23 = vadd.f32 %v4071_v8, %v9524_v44  ;;  %v3961_v57 = vadd.f32 %v3960_v42, %v9524_v44  ;;  %v4073_v33 = vpop.f32.mrb[19].mxu1  ;;  %5246 = vmatprep.subr.bf16.mxu0 %v5089_v46  ;;  %v9554_v9 = vpop.permute.xlu1 %3819 }
 0x347   : > { %v4848_v40 = vpack.c.bf16 %v3959_v4, %v3955_v12  ;;  %v4074_v16 = vadd.f32 %v4073_v33, %v9524_v44  ;;  %5319 = vmatprep.subr.bf16.mxu1 %v5091_v54  ;;  %4661 = vmatmul.mubr.bf16.gmra.mrb[124].mxu0 %v9444_v39 }
 0x348   : > { %v4850_v62 = vpack.c.bf16 %v4072_v23, %v4068_v63  ;;  %v4849_v2 = vpack.c.bf16 %v3961_v57, %v3957_v47  ;;  %4774 = vmatmul.mubr.bf16.gmra.mrb[124].mxu1 %v9444_v39  ;;  %5247 = vmatpush1.bf16.msra.mxu0 %v5088_v6  ;;  %v9556_v6 = vpop.permute.xlu0 %3814 }
 0x349   : > { %v4976_v14 = vmul.bf16 1017396388, %v4848_v40  ;;  %v4851_v26 = vpack.c.bf16 %v4074_v16, %v4070_v13  ;;  %5320 = vmatpush1.bf16.msra.mxu1 %v5090_v20  ;;  %5272 = vmatprep.mubr.bf16.mxu0 %v7735_v0 }
 0x34a   : > { %v4978_v7 = vmul.bf16 1017396388, %v4850_v62  ;;  %v4977_v49 = vmul.bf16 1017396388, %v4849_v2  ;;  %v3964_v43 = vpop.f32.mrb[20].mxu0  ;;  %5345 = vmatprep.mubr.bf16.mxu1 %v7735_v0 }
 0x34b   : > { %v4979_v32 = vmul.bf16 1017396388, %v4851_v26  ;;  %v4077_v10 = vpop.f32.mrb[20].mxu1  ;;  %v3966_v37 = vpop.f32.mrb[21].mxu0  ;;  %v5104_v15 = vmax.bf16 %v4976_v14, %v4848_v40  ;;  %v3965_v52 = vadd.f32 %v3964_v43, %v9543_v1 }
 0x34c   : > { %v4079_v39 = vpop.f32.mrb[21].mxu1  ;;  %v3968_v36 = vpop.f32.mrb[22].mxu0  ;;  %v5105_v28 = vmax.bf16 %v4977_v49, %v4849_v2  ;;  %v5106_v18 = vmax.bf16 %v4978_v7, %v4850_v62  ;;  %v4078_v35 = vadd.f32 %v4077_v10, %v9543_v1  ;;  %v3967_v59 = vadd.f32 %v3966_v37, %v9543_v1 }
 0x34d   : > { %v3969_v48 = vadd.f32 %v3968_v36, %v9540_v3  ;;  %v4081_v19 = vpop.f32.mrb[22].mxu1  ;;  %v3970_v21 = vpop.f32.mrb[23].mxu0  ;;  %v5107_v5 = vmax.bf16 %v4979_v32, %v4851_v26  ;;  %v4080_v60 = vadd.f32 %v4079_v39, %v9543_v1 }
 0x34e   : > { %v4082_v11 = vadd.f32 %v4081_v19, %v9540_v3  ;;  %v3971_v17 = vadd.f32 %v3970_v21, %v9540_v3  ;;  %v4083_v25 = vpop.f32.mrb[23].mxu1  ;;  %5248 = vmatprep.subr.bf16.mxu0 %v5105_v28  ;;  %v9566_v37 = vpop.permute.xlu1 %3829 }
 0x34f   : > { %v4864_v27 = vpack.c.bf16 %v3969_v48, %v3965_v52  ;;  %v4084_v34 = vadd.f32 %v4083_v25, %v9540_v3  ;;  %5321 = vmatprep.subr.bf16.mxu1 %v5107_v5  ;;  %5249 = vmatpush1.bf16.msra.mxu0 %v5104_v15  ;;  %v9568_v36 = vpop.permute.xlu0 %3824 }
 0x350   : > { %v4866_v30 = vpack.c.bf16 %v4082_v11, %v4078_v35  ;;  %v4865_v53 = vpack.c.bf16 %v3971_v17, %v3967_v59  ;;  %5322 = vmatpush1.bf16.msra.mxu1 %v5106_v18 }
 0x351   : > { %v4992_v61 = vmul.bf16 1017396388, %v4864_v27  ;;  %v4867_v38 = vpack.c.bf16 %v4084_v34, %v4080_v60 }
 0x352   : > { %v4994_v58 = vmul.bf16 1017396388, %v4866_v30  ;;  %v4993_v24 = vmul.bf16 1017396388, %v4865_v53  ;;  %v3974_v46 = vpop.f32.mrb[24].mxu0 }
 0x353   : > { %v4995_v20 = vmul.bf16 1017396388, %v4867_v38  ;;  %v4087_v12 = vpop.f32.mrb[24].mxu1  ;;  %v3976_v4 = vpop.f32.mrb[25].mxu0  ;;  %v5120_v8 = vmax.bf16 %v4992_v61, %v4864_v27  ;;  %v3975_v23 = vadd.f32 %v3974_v46, %v9556_v6 }
 0x354   : > { %v4089_v42 = vpop.f32.mrb[25].mxu1  ;;  %v3978_v54 = vpop.f32.mrb[26].mxu0  ;;  %v5121_v63 = vmax.bf16 %v4993_v24, %v4865_v53  ;;  %v5122_v47 = vmax.bf16 %v4994_v58, %v4866_v30  ;;  %v4088_v16 = vadd.f32 %v4087_v12, %v9556_v6  ;;  %v3977_v62 = vadd.f32 %v3976_v4, %v9556_v6 }
 0x355   : > { %v3979_v57 = vadd.f32 %v3978_v54, %v9554_v9  ;;  %v4091_v33 = vpop.f32.mrb[26].mxu1  ;;  %v3980_v13 = vpop.f32.mrb[27].mxu0  ;;  %v5123_v40 = vmax.bf16 %v4995_v20, %v4867_v38  ;;  %v4090_v7 = vadd.f32 %v4089_v42, %v9556_v6 }
 0x356   : > { %v4092_v2 = vadd.f32 %v4091_v33, %v9554_v9  ;;  %v3981_v14 = vadd.f32 %v3980_v13, %v9554_v9  ;;  %v4093_v26 = vpop.f32.mrb[27].mxu1  ;;  %5250 = vmatprep.subr.bf16.mxu0 %v5121_v63 }
 0x357   : > { %v4880_v49 = vpack.c.bf16 %v3979_v57, %v3975_v23  ;;  %v4094_v43 = vadd.f32 %v4093_v26, %v9554_v9  ;;  %5323 = vmatprep.subr.bf16.mxu1 %v5123_v40  ;;  %5251 = vmatpush1.bf16.msra.mxu0 %v5120_v8 }
 0x358   : > { %v4882_v32 = vpack.c.bf16 %v4092_v2, %v4088_v16  ;;  %v4881_v10 = vpack.c.bf16 %v3981_v14, %v3977_v62  ;;  %5324 = vmatpush1.bf16.msra.mxu1 %v5122_v47 }
 0x359   : > { %v5008_v15 = vmul.bf16 1017396388, %v4880_v49  ;;  %v4883_v39 = vpack.c.bf16 %v4094_v43, %v4090_v7 }
 0x35a   : > { %v5010_v28 = vmul.bf16 1017396388, %v4882_v32  ;;  %v5009_v18 = vmul.bf16 1017396388, %v4881_v10  ;;  %v3984_v52 = vpop.f32.mrb[28].mxu0 }
 0x35b   : > { %v5011_v48 = vmul.bf16 1017396388, %v4883_v39  ;;  %v4097_v19 = vpop.f32.mrb[28].mxu1  ;;  %v3986_v21 = vpop.f32.mrb[29].mxu0  ;;  %v5136_v5 = vmax.bf16 %v5008_v15, %v4880_v49  ;;  %v3985_v25 = vadd.f32 %v3984_v52, %v9568_v36  ;;  %v9587_v52 = vld [vmem:[%s10318_s4] sm:$0xff]  }
 0x35c   : > { %v4099_v35 = vpop.f32.mrb[29].mxu1  ;;  %v3988_v59 = vpop.f32.mrb[30].mxu0  ;;  %v5137_v11 = vmax.bf16 %v5009_v18, %v4881_v10  ;;  %v5138_v17 = vmax.bf16 %v5010_v28, %v4882_v32  ;;  %v4098_v53 = vadd.f32 %v4097_v19, %v9568_v36  ;;  %v3987_v61 = vadd.f32 %v3986_v21, %v9568_v36 }
 0x35d   : > { %v3989_v60 = vadd.f32 %v3988_v59, %v9566_v37  ;;  %v4101_v27 = vpop.f32.mrb[30].mxu1  ;;  %v3990_v34 = vpop.f32.mrb[31].mxu0  ;;  %v5139_v30 = vmax.bf16 %v5011_v48, %v4883_v39  ;;  %v4100_v46 = vadd.f32 %v4099_v35, %v9568_v36 }
 0x35e   : > { %v4102_v38 = vadd.f32 %v4101_v27, %v9566_v37  ;;  %v3991_v58 = vadd.f32 %v3990_v34, %v9566_v37  ;;  %v4103_v24 = vpop.f32.mrb[31].mxu1  ;;  %5252 = vmatprep.subr.bf16.mxu0 %v5137_v11 }
 0x35f   : > { %v4896_v20 = vpack.c.bf16 %v3989_v60, %v3985_v25  ;;  %v4104_v12 = vadd.f32 %v4103_v24, %v9566_v37  ;;  %5325 = vmatprep.subr.bf16.mxu1 %v5139_v30  ;;  %5253 = vmatpush1.bf16.msra.mxu0 %v5136_v5 }
 0x360   : > { %v4898_v4 = vpack.c.bf16 %v4102_v38, %v4098_v53  ;;  %v4897_v8 = vpack.c.bf16 %v3991_v58, %v3987_v61  ;;  %5326 = vmatpush1.bf16.msra.mxu1 %v5138_v17 }
 0x361   : > { %v5024_v42 = vmul.bf16 1017396388, %v4896_v20  ;;  %v4899_v54 = vpack.c.bf16 %v4104_v12, %v4100_v46 }
 0x362   : > { %v5026_v63 = vmul.bf16 1017396388, %v4898_v4  ;;  %v5025_v47 = vmul.bf16 1017396388, %v4897_v8  ;;  %v4140_v23 = vpop.f32.mrb[32].mxu0 }
 0x363   : > { %v5027_v57 = vmul.bf16 1017396388, %v4899_v54  ;;  %v4253_v33 = vpop.f32.mrb[32].mxu1  ;;  %v4142_v13 = vpop.f32.mrb[33].mxu0  ;;  %v5152_v40 = vmax.bf16 %v5024_v42, %v4896_v20  ;;  %v4141_v26 = vadd.f32 %v4140_v23, %v9464_v41 }
 0x364   : > { %v4255_v16 = vpop.f32.mrb[33].mxu1  ;;  %v4144_v62 = vpop.f32.mrb[34].mxu0  ;;  %v5153_v2 = vmax.bf16 %v5025_v47, %v4897_v8  ;;  %v5154_v14 = vmax.bf16 %v5026_v63, %v4898_v4  ;;  %v4254_v10 = vadd.f32 %v4253_v33, %v9464_v41  ;;  %v4143_v15 = vadd.f32 %v4142_v13, %v9464_v41 }
 0x365   : > { %v4145_v7 = vadd.f32 %v4144_v62, %v9461_v29  ;;  %v4257_v49 = vpop.f32.mrb[34].mxu1  ;;  %v4146_v43 = vpop.f32.mrb[35].mxu0  ;;  %v5155_v32 = vmax.bf16 %v5027_v57, %v4899_v54  ;;  %v4256_v48 = vadd.f32 %v4255_v16, %v9464_v41  ;;  %v9604_v57 = vld [vmem:[%s10318_s4 + $0x8] sm:$0xff]  }
 0x366   : > { %v4258_v39 = vadd.f32 %v4257_v49, %v9461_v29  ;;  %v4147_v28 = vadd.f32 %v4146_v43, %v9461_v29  ;;  %v4259_v18 = vpop.f32.mrb[35].mxu1  ;;  %5254 = vmatprep.subr.bf16.mxu0 %v5153_v2 }
 0x367   : > { %v4788_v19 = vpack.c.bf16 %v4145_v7, %v4141_v26  ;;  %v4260_v21 = vadd.f32 %v4259_v18, %v9461_v29  ;;  %5327 = vmatprep.subr.bf16.mxu1 %v5155_v32  ;;  %5255 = vmatpush1.bf16.msra.mxu0 %v5152_v40 }
 0x368   : > { %v4790_v5 = vpack.c.bf16 %v4258_v39, %v4254_v10  ;;  %v4789_v35 = vpack.c.bf16 %v4147_v28, %v4143_v15  ;;  %5328 = vmatpush1.bf16.msra.mxu1 %v5154_v14 }
 0x369   : > { %v4916_v59 = vmul.bf16 1017396388, %v4788_v19  ;;  %v4791_v11 = vpack.c.bf16 %v4260_v21, %v4256_v48 }
 0x36a   : > { %v4918_v17 = vmul.bf16 1017396388, %v4790_v5  ;;  %v4917_v25 = vmul.bf16 1017396388, %v4789_v35  ;;  %v4150_v60 = vpop.f32.mrb[36].mxu0  ;;  %5273 = vmatmul.mubr.bf16.vlgmr.msra.gmra.mrb[128].mxu0 %v9587_v52 }
 0x36b   : > { %v4919_v27 = vmul.bf16 1017396388, %v4791_v11  ;;  %v4263_v34 = vpop.f32.mrb[36].mxu1  ;;  %5346 = vmatmul.mubr.bf16.vlgmr.msra.gmra.mrb[128].mxu1 %v9587_v52  ;;  %v4152_v30 = vpop.f32.mrb[37].mxu0  ;;  %5282 = vmatprep.mubr.bf16.mxu0 %v7735_v0  ;;  %v5044_v53 = vmax.bf16 %v4916_v59, %v4788_v19  ;;  %v4151_v46 = vadd.f32 %v4150_v60, %v9480_v50 }
 0x36c   : > { %v4265_v61 = vpop.f32.mrb[37].mxu1  ;;  %v4154_v38 = vpop.f32.mrb[38].mxu0  ;;  %v5045_v58 = vmax.bf16 %v4917_v25, %v4789_v35  ;;  %5355 = vmatprep.mubr.bf16.mxu1 %v7735_v0  ;;  %v5046_v24 = vmax.bf16 %v4918_v17, %v4790_v5  ;;  %v4264_v42 = vadd.f32 %v4263_v34, %v9480_v50  ;;  %v4153_v54 = vadd.f32 %v4152_v30, %v9480_v50  ;;  %v9621_v34 = vld [vmem:[%s10318_s4 + $0x10] sm:$0xff]  }
 0x36d   : > { %v4155_v20 = vadd.f32 %v4154_v38, %v9477_v56  ;;  %v4267_v12 = vpop.f32.mrb[38].mxu1  ;;  %v4156_v4 = vpop.f32.mrb[39].mxu0  ;;  %v5047_v8 = vmax.bf16 %v4919_v27, %v4791_v11  ;;  %v4266_v33 = vadd.f32 %v4265_v61, %v9480_v50 }
 0x36e   : > { %v4268_v63 = vadd.f32 %v4267_v12, %v9477_v56  ;;  %v4157_v47 = vadd.f32 %v4156_v4, %v9477_v56  ;;  %v4269_v23 = vpop.f32.mrb[39].mxu1  ;;  %5386 = vmatprep.subr.bf16.mxu0 %v5045_v58 }
 0x36f   : > { %v4804_v13 = vpack.c.bf16 %v4155_v20, %v4151_v46  ;;  %v4270_v40 = vadd.f32 %v4269_v23, %v9477_v56  ;;  %5459 = vmatprep.subr.bf16.mxu1 %v5047_v8  ;;  %5387 = vmatpush1.bf16.msra.mxu0 %v5044_v53 }
 0x370   : > { %v4806_v16 = vpack.c.bf16 %v4268_v63, %v4264_v42  ;;  %v4805_v62 = vpack.c.bf16 %v4157_v47, %v4153_v54  ;;  %5460 = vmatpush1.bf16.msra.mxu1 %v5046_v24 }
 0x371   : > { %v4932_v2 = vmul.bf16 1017396388, %v4804_v13  ;;  %v4807_v14 = vpack.c.bf16 %v4270_v40, %v4266_v33 }
 0x372   : > { %v4934_v26 = vmul.bf16 1017396388, %v4806_v16  ;;  %v4933_v7 = vmul.bf16 1017396388, %v4805_v62  ;;  %v4160_v49 = vpop.f32.mrb[40].mxu0  ;;  %5283 = vmatmul.mubr.bf16.gmra.mrb[132].mxu0 %v9604_v57 }
 0x373   : > { %v4935_v43 = vmul.bf16 1017396388, %v4807_v14  ;;  %v4273_v32 = vpop.f32.mrb[40].mxu1  ;;  %5356 = vmatmul.mubr.bf16.gmra.mrb[132].mxu1 %v9604_v57  ;;  %v4162_v10 = vpop.f32.mrb[41].mxu0  ;;  %5292 = vmatprep.mubr.bf16.mxu0 %v7735_v0  ;;  %v5060_v15 = vmax.bf16 %v4932_v2, %v4804_v13  ;;  %v4161_v19 = vadd.f32 %v4160_v49, %v9495_v55 }
 0x374   : > { %v4275_v39 = vpop.f32.mrb[41].mxu1  ;;  %v4164_v28 = vpop.f32.mrb[42].mxu0  ;;  %v5061_v18 = vmax.bf16 %v4933_v7, %v4805_v62  ;;  %5365 = vmatprep.mubr.bf16.mxu1 %v7735_v0  ;;  %v5062_v48 = vmax.bf16 %v4934_v26, %v4806_v16  ;;  %v4274_v11 = vadd.f32 %v4273_v32, %v9495_v55  ;;  %v4163_v17 = vadd.f32 %v4162_v10, %v9495_v55  ;;  %v9638_v10 = vld [vmem:[%s10318_s4 + $0x18] sm:$0xff]  }
 0x375   : > { %v4165_v21 = vadd.f32 %v4164_v28, %v9492_v22  ;;  %v4277_v5 = vpop.f32.mrb[42].mxu1  ;;  %v4166_v35 = vpop.f32.mrb[43].mxu0  ;;  %v5063_v59 = vmax.bf16 %v4935_v43, %v4807_v14  ;;  %v4276_v30 = vadd.f32 %v4275_v39, %v9495_v55 }
 0x376   : > { %v4278_v25 = vadd.f32 %v4277_v5, %v9492_v22  ;;  %v4167_v60 = vadd.f32 %v4166_v35, %v9492_v22  ;;  %v4279_v27 = vpop.f32.mrb[43].mxu1  ;;  %5388 = vmatprep.subr.bf16.mxu0 %v5061_v18 }
 0x377   : > { %v4820_v53 = vpack.c.bf16 %v4165_v21, %v4161_v19  ;;  %v4280_v61 = vadd.f32 %v4279_v27, %v9492_v22  ;;  %5461 = vmatprep.subr.bf16.mxu1 %v5063_v59  ;;  %5389 = vmatpush1.bf16.msra.mxu0 %v5060_v15 }
 0x378   : > { %v4822_v38 = vpack.c.bf16 %v4278_v25, %v4274_v11  ;;  %v4821_v58 = vpack.c.bf16 %v4167_v60, %v4163_v17  ;;  %5462 = vmatpush1.bf16.msra.mxu1 %v5062_v48 }
 0x379   : > { %v4948_v24 = vmul.bf16 1017396388, %v4820_v53  ;;  %v4823_v46 = vpack.c.bf16 %v4280_v61, %v4276_v30 }
 0x37a   : > { %v4950_v20 = vmul.bf16 1017396388, %v4822_v38  ;;  %v4949_v12 = vmul.bf16 1017396388, %v4821_v58  ;;  %v4170_v4 = vpop.f32.mrb[44].mxu0  ;;  %5293 = vmatmul.mubr.bf16.gmra.mrb[136].mxu0 %v9621_v34 }
 0x37b   : > { %v4951_v8 = vmul.bf16 1017396388, %v4823_v46  ;;  %v4283_v42 = vpop.f32.mrb[44].mxu1  ;;  %5366 = vmatmul.mubr.bf16.gmra.mrb[136].mxu1 %v9621_v34  ;;  %v4172_v54 = vpop.f32.mrb[45].mxu0  ;;  %5302 = vmatprep.mubr.bf16.mxu0 %v7735_v0  ;;  %v5076_v63 = vmax.bf16 %v4948_v24, %v4820_v53  ;;  %v4171_v40 = vadd.f32 %v4170_v4, %v9511_v45 }
 0x37c   : > { %v4285_v47 = vpop.f32.mrb[45].mxu1  ;;  %v4174_v23 = vpop.f32.mrb[46].mxu0  ;;  %v5077_v33 = vmax.bf16 %v4949_v12, %v4821_v58  ;;  %5375 = vmatprep.mubr.bf16.mxu1 %v7735_v0  ;;  %v5078_v13 = vmax.bf16 %v4950_v20, %v4822_v38  ;;  %v4284_v26 = vadd.f32 %v4283_v42, %v9511_v45  ;;  %v4173_v7 = vadd.f32 %v4172_v54, %v9511_v45 }
 0x37d   : > { %v4175_v16 = vadd.f32 %v4174_v23, %v9508_v31  ;;  %v4287_v62 = vpop.f32.mrb[46].mxu1  ;;  %v4176_v2 = vpop.f32.mrb[47].mxu0  ;;  %v5079_v14 = vmax.bf16 %v4951_v8, %v4823_v46  ;;  %v4286_v15 = vadd.f32 %v4285_v47, %v9511_v45 }
 0x37e   : > { %v4288_v49 = vadd.f32 %v4287_v62, %v9508_v31  ;;  %v4177_v43 = vadd.f32 %v4176_v2, %v9508_v31  ;;  %v4289_v32 = vpop.f32.mrb[47].mxu1  ;;  %5390 = vmatprep.subr.bf16.mxu0 %v5077_v33 }
 0x37f   : > { %v4836_v39 = vpack.c.bf16 %v4175_v16, %v4171_v40  ;;  %v4290_v28 = vadd.f32 %v4289_v32, %v9508_v31  ;;  %5463 = vmatprep.subr.bf16.mxu1 %v5079_v14  ;;  %5391 = vmatpush1.bf16.msra.mxu0 %v5076_v63 }
 0x380   : > { %v4838_v18 = vpack.c.bf16 %v4288_v49, %v4284_v26  ;;  %v4837_v48 = vpack.c.bf16 %v4177_v43, %v4173_v7  ;;  %5464 = vmatpush1.bf16.msra.mxu1 %v5078_v13 }
 0x381   : > { %v4964_v19 = vmul.bf16 1017396388, %v4836_v39  ;;  %v4839_v21 = vpack.c.bf16 %v4290_v28, %v4286_v15 }
 0x382   : > { %v4966_v5 = vmul.bf16 1017396388, %v4838_v18  ;;  %v4965_v35 = vmul.bf16 1017396388, %v4837_v48  ;;  %v4180_v59 = vpop.f32.mrb[48].mxu0  ;;  %5303 = vmatmul.mubr.bf16.gmra.mrb[140].mxu0 %v9638_v10 }
 0x383   : > { %v4967_v11 = vmul.bf16 1017396388, %v4839_v21  ;;  %v4293_v17 = vpop.f32.mrb[48].mxu1  ;;  %5376 = vmatmul.mubr.bf16.gmra.mrb[140].mxu1 %v9638_v10  ;;  %v4182_v25 = vpop.f32.mrb[49].mxu0  ;;  %5418 = vmatprep.mubr.bf16.mxu0 %v7735_v0  ;;  %v5092_v60 = vmax.bf16 %v4964_v19, %v4836_v39  ;;  %v4181_v38 = vadd.f32 %v4180_v59, %v9527_v51 }
 0x384   : > { %v4295_v27 = vpop.f32.mrb[49].mxu1  ;;  %v4184_v30 = vpop.f32.mrb[50].mxu0  ;;  %v5093_v53 = vmax.bf16 %v4965_v35, %v4837_v48  ;;  %5491 = vmatprep.mubr.bf16.mxu1 %v7735_v0  ;;  %v5094_v61 = vmax.bf16 %v4966_v5, %v4838_v18  ;;  %v4294_v12 = vadd.f32 %v4293_v17, %v9527_v51  ;;  %v4183_v4 = vadd.f32 %v4182_v25, %v9527_v51 }
 0x385   : > { %v4185_v58 = vadd.f32 %v4184_v30, %v9524_v44  ;;  %v4297_v24 = vpop.f32.mrb[50].mxu1  ;;  %v4186_v46 = vpop.f32.mrb[51].mxu0  ;;  %v5095_v20 = vmax.bf16 %v4967_v11, %v4839_v21  ;;  %v4296_v63 = vadd.f32 %v4295_v27, %v9527_v51 }
 0x386   : > { %v4298_v8 = vadd.f32 %v4297_v24, %v9524_v44  ;;  %v4187_v42 = vadd.f32 %v4186_v46, %v9524_v44  ;;  %v4299_v54 = vpop.f32.mrb[51].mxu1  ;;  %5392 = vmatprep.subr.bf16.mxu0 %v5093_v53 }
 0x387   : > { %v4852_v47 = vpack.c.bf16 %v4185_v58, %v4181_v38  ;;  %v4300_v23 = vadd.f32 %v4299_v54, %v9524_v44  ;;  %5465 = vmatprep.subr.bf16.mxu1 %v5095_v20  ;;  %5393 = vmatpush1.bf16.msra.mxu0 %v5092_v60 }
 0x388   : > { %v4854_v33 = vpack.c.bf16 %v4298_v8, %v4294_v12  ;;  %v4853_v13 = vpack.c.bf16 %v4187_v42, %v4183_v4  ;;  %5466 = vmatpush1.bf16.msra.mxu1 %v5094_v61 }
 0x389   : > { %v4980_v40 = vmul.bf16 1017396388, %v4852_v47  ;;  %v4855_v16 = vpack.c.bf16 %v4300_v23, %v4296_v63 }
 0x38a   : > { %v4982_v62 = vmul.bf16 1017396388, %v4854_v33  ;;  %v4981_v2 = vmul.bf16 1017396388, %v4853_v13  ;;  %v4190_v14 = vpop.f32.mrb[52].mxu0 }
 0x38b   : > { %v4983_v26 = vmul.bf16 1017396388, %v4855_v16  ;;  %v4303_v7 = vpop.f32.mrb[52].mxu1  ;;  %v4192_v49 = vpop.f32.mrb[53].mxu0  ;;  %v5108_v43 = vmax.bf16 %v4980_v40, %v4852_v47  ;;  %v4191_v18 = vadd.f32 %v4190_v14, %v9543_v1 }
 0x38c   : > { %v4305_v32 = vpop.f32.mrb[53].mxu1  ;;  %v4194_v15 = vpop.f32.mrb[54].mxu0  ;;  %v5109_v39 = vmax.bf16 %v4981_v2, %v4853_v13  ;;  %v5110_v28 = vmax.bf16 %v4982_v62, %v4854_v33  ;;  %v4304_v35 = vadd.f32 %v4303_v7, %v9543_v1  ;;  %v4193_v59 = vadd.f32 %v4192_v49, %v9543_v1 }
 0x38d   : > { %v4195_v48 = vadd.f32 %v4194_v15, %v9540_v3  ;;  %v4307_v19 = vpop.f32.mrb[54].mxu1  ;;  %v4196_v21 = vpop.f32.mrb[55].mxu0  ;;  %v5111_v5 = vmax.bf16 %v4983_v26, %v4855_v16  ;;  %v4306_v60 = vadd.f32 %v4305_v32, %v9543_v1 }
 0x38e   : > { %v4308_v11 = vadd.f32 %v4307_v19, %v9540_v3  ;;  %v4197_v17 = vadd.f32 %v4196_v21, %v9540_v3  ;;  %v4309_v25 = vpop.f32.mrb[55].mxu1  ;;  %5394 = vmatprep.subr.bf16.mxu0 %v5109_v39 }
 0x38f   : > { %v4868_v27 = vpack.c.bf16 %v4195_v48, %v4191_v18  ;;  %v4310_v30 = vadd.f32 %v4309_v25, %v9540_v3  ;;  %5467 = vmatprep.subr.bf16.mxu1 %v5111_v5  ;;  %5395 = vmatpush1.bf16.msra.mxu0 %v5108_v43 }
 0x390   : > { %v4870_v53 = vpack.c.bf16 %v4308_v11, %v4304_v35  ;;  %v4869_v61 = vpack.c.bf16 %v4197_v17, %v4193_v59  ;;  %5468 = vmatpush1.bf16.msra.mxu1 %v5110_v28 }
 0x391   : > { %v4996_v38 = vmul.bf16 1017396388, %v4868_v27  ;;  %v4871_v58 = vpack.c.bf16 %v4310_v30, %v4306_v60 }
 0x392   : > { %v4998_v24 = vmul.bf16 1017396388, %v4870_v53  ;;  %v4997_v46 = vmul.bf16 1017396388, %v4869_v61  ;;  %v4200_v20 = vpop.f32.mrb[56].mxu0 }
 0x393   : > { %v4999_v12 = vmul.bf16 1017396388, %v4871_v58  ;;  %v4313_v4 = vpop.f32.mrb[56].mxu1  ;;  %v4202_v8 = vpop.f32.mrb[57].mxu0  ;;  %v5124_v42 = vmax.bf16 %v4996_v38, %v4868_v27  ;;  %v4201_v33 = vadd.f32 %v4200_v20, %v9556_v6 }
 0x394   : > { %v4315_v54 = vpop.f32.mrb[57].mxu1  ;;  %v4204_v63 = vpop.f32.mrb[58].mxu0  ;;  %v5125_v47 = vmax.bf16 %v4997_v46, %v4869_v61  ;;  %v5126_v23 = vmax.bf16 %v4998_v24, %v4870_v53  ;;  %v4314_v2 = vadd.f32 %v4313_v4, %v9556_v6  ;;  %v4203_v14 = vadd.f32 %v4202_v8, %v9556_v6 }
 0x395   : > { %v4205_v13 = vadd.f32 %v4204_v63, %v9554_v9  ;;  %v4317_v40 = vpop.f32.mrb[58].mxu1  ;;  %v4206_v16 = vpop.f32.mrb[59].mxu0  ;;  %v5127_v62 = vmax.bf16 %v4999_v12, %v4871_v58  ;;  %v4316_v43 = vadd.f32 %v4315_v54, %v9556_v6 }
 0x396   : > { %v4318_v26 = vadd.f32 %v4317_v40, %v9554_v9  ;;  %v4207_v7 = vadd.f32 %v4206_v16, %v9554_v9  ;;  %v4319_v49 = vpop.f32.mrb[59].mxu1  ;;  %5396 = vmatprep.subr.bf16.mxu0 %v5125_v47 }
 0x397   : > { %v4884_v32 = vpack.c.bf16 %v4205_v13, %v4201_v33  ;;  %v4320_v15 = vadd.f32 %v4319_v49, %v9554_v9  ;;  %5469 = vmatprep.subr.bf16.mxu1 %v5127_v62  ;;  %5397 = vmatpush1.bf16.msra.mxu0 %v5124_v42 }
 0x398   : > { %v4886_v39 = vpack.c.bf16 %v4318_v26, %v4314_v2  ;;  %v4885_v28 = vpack.c.bf16 %v4207_v7, %v4203_v14  ;;  %5470 = vmatpush1.bf16.msra.mxu1 %v5126_v23 }
 0x399   : > { %v5012_v18 = vmul.bf16 1017396388, %v4884_v32  ;;  %v4887_v48 = vpack.c.bf16 %v4320_v15, %v4316_v43 }
 0x39a   : > { %v5014_v19 = vmul.bf16 1017396388, %v4886_v39  ;;  %v5013_v21 = vmul.bf16 1017396388, %v4885_v28  ;;  %v4210_v5 = vpop.f32.mrb[60].mxu0 }
 0x39b   : > { %v5015_v35 = vmul.bf16 1017396388, %v4887_v48  ;;  %v4323_v59 = vpop.f32.mrb[60].mxu1  ;;  %v4212_v11 = vpop.f32.mrb[61].mxu0  ;;  %v5140_v17 = vmax.bf16 %v5012_v18, %v4884_v32  ;;  %v4211_v53 = vadd.f32 %v4210_v5, %v9568_v36 }
 0x39c   : > { %v4325_v25 = vpop.f32.mrb[61].mxu1  ;;  %v4214_v60 = vpop.f32.mrb[62].mxu0  ;;  %v5141_v27 = vmax.bf16 %v5013_v21, %v4885_v28  ;;  %v5142_v30 = vmax.bf16 %v5014_v19, %v4886_v39  ;;  %v4324_v46 = vadd.f32 %v4323_v59, %v9568_v36  ;;  %v4213_v20 = vadd.f32 %v4212_v11, %v9568_v36 }
 0x39d   : > { %v4215_v61 = vadd.f32 %v4214_v60, %v9566_v37  ;;  %v4327_v38 = vpop.f32.mrb[62].mxu1  ;;  %v4216_v58 = vpop.f32.mrb[63].mxu0  ;;  %v5143_v24 = vmax.bf16 %v5015_v35, %v4887_v48  ;;  %v4326_v42 = vadd.f32 %v4325_v25, %v9568_v36 }
 0x39e   : > { %v4328_v12 = vadd.f32 %v4327_v38, %v9566_v37  ;;  %v4217_v4 = vadd.f32 %v4216_v58, %v9566_v37  ;;  %v4329_v8 = vpop.f32.mrb[63].mxu1  ;;  %5398 = vmatprep.subr.bf16.mxu0 %v5141_v27 }
 0x39f   : > { %v4900_v54 = vpack.c.bf16 %v4215_v61, %v4211_v53  ;;  %v4330_v63 = vadd.f32 %v4329_v8, %v9566_v37  ;;  %5471 = vmatprep.subr.bf16.mxu1 %v5143_v24  ;;  %5399 = vmatpush1.bf16.msra.mxu0 %v5140_v17 }
 0x3a0   : > { %v4902_v47 = vpack.c.bf16 %v4328_v12, %v4324_v46  ;;  %v4901_v23 = vpack.c.bf16 %v4217_v4, %v4213_v20  ;;  %5472 = vmatpush1.bf16.msra.mxu1 %v5142_v30 }
 0x3a1   : > { %v5028_v33 = vmul.bf16 1017396388, %v4900_v54  ;;  %v4903_v13 = vpack.c.bf16 %v4330_v63, %v4326_v42 }
 0x3a2   : > { %v5030_v40 = vmul.bf16 1017396388, %v4902_v47  ;;  %v5029_v16 = vmul.bf16 1017396388, %v4901_v23  ;;  %v4366_v62 = vpop.f32.mrb[64].mxu0 }
 0x3a3   : > { %v5031_v2 = vmul.bf16 1017396388, %v4903_v13  ;;  %v4479_v14 = vpop.f32.mrb[64].mxu1  ;;  %v4368_v26 = vpop.f32.mrb[65].mxu0  ;;  %v5156_v7 = vmax.bf16 %v5028_v33, %v4900_v54  ;;  %v4367_v39 = vadd.f32 %v4366_v62, %v9464_v41 }
 0x3a4   : > { %v4481_v49 = vpop.f32.mrb[65].mxu1  ;;  %v4370_v43 = vpop.f32.mrb[66].mxu0  ;;  %v5157_v32 = vmax.bf16 %v5029_v16, %v4901_v23  ;;  %v5158_v15 = vmax.bf16 %v5030_v40, %v4902_v47  ;;  %v4480_v21 = vadd.f32 %v4479_v14, %v9464_v41  ;;  %v4369_v5 = vadd.f32 %v4368_v26, %v9464_v41 }
 0x3a5   : > { %v4371_v28 = vadd.f32 %v4370_v43, %v9461_v29  ;;  %v4483_v18 = vpop.f32.mrb[66].mxu1  ;;  %v4372_v48 = vpop.f32.mrb[67].mxu0  ;;  %v5159_v19 = vmax.bf16 %v5031_v2, %v4903_v13  ;;  %v4482_v17 = vadd.f32 %v4481_v49, %v9464_v41 }
 0x3a6   : > { %v4484_v35 = vadd.f32 %v4483_v18, %v9461_v29  ;;  %v4373_v59 = vadd.f32 %v4372_v48, %v9461_v29  ;;  %v4485_v11 = vpop.f32.mrb[67].mxu1  ;;  %5400 = vmatprep.subr.bf16.mxu0 %v5157_v32 }
 0x3a7   : > { %v4792_v25 = vpack.c.bf16 %v4371_v28, %v4367_v39  ;;  %v4486_v60 = vadd.f32 %v4485_v11, %v9461_v29  ;;  %5473 = vmatprep.subr.bf16.mxu1 %v5159_v19  ;;  %5401 = vmatpush1.bf16.msra.mxu0 %v5156_v7 }
 0x3a8   : > { %v4794_v27 = vpack.c.bf16 %v4484_v35, %v4480_v21  ;;  %v4793_v30 = vpack.c.bf16 %v4373_v59, %v4369_v5  ;;  %5474 = vmatpush1.bf16.msra.mxu1 %v5158_v15 }
 0x3a9   : > { %v4920_v53 = vmul.bf16 1017396388, %v4792_v25  ;;  %v4795_v61 = vpack.c.bf16 %v4486_v60, %v4482_v17 }
 0x3aa   : > { %v4922_v38 = vmul.bf16 1017396388, %v4794_v27  ;;  %v4921_v58 = vmul.bf16 1017396388, %v4793_v30  ;;  %v4376_v24 = vpop.f32.mrb[68].mxu0  ;;  %5419 = vmatmul.mubr.bf16.vlgmr.msra.gmra.mrb[144].mxu0 %v9587_v52 }
 0x3ab   : > { %v4923_v46 = vmul.bf16 1017396388, %v4795_v61  ;;  %v4489_v20 = vpop.f32.mrb[68].mxu1  ;;  %5492 = vmatmul.mubr.bf16.vlgmr.msra.gmra.mrb[144].mxu1 %v9587_v52  ;;  %v4378_v12 = vpop.f32.mrb[69].mxu0  ;;  %5428 = vmatprep.mubr.bf16.mxu0 %v7735_v0  ;;  %v5048_v4 = vmax.bf16 %v4920_v53, %v4792_v25  ;;  %v4377_v47 = vadd.f32 %v4376_v24, %v9480_v50 }
 0x3ac   : > { %v4491_v8 = vpop.f32.mrb[69].mxu1  ;;  %v4380_v42 = vpop.f32.mrb[70].mxu0  ;;  %v5049_v54 = vmax.bf16 %v4921_v58, %v4793_v30  ;;  %5501 = vmatprep.mubr.bf16.mxu1 %v7735_v0  ;;  %v5050_v63 = vmax.bf16 %v4922_v38, %v4794_v27  ;;  %v4490_v16 = vadd.f32 %v4489_v20, %v9480_v50  ;;  %v4379_v52 = vadd.f32 %v4378_v12, %v9480_v50 }
 0x3ad   : > { %v4381_v23 = vadd.f32 %v4380_v42, %v9477_v56  ;;  %v4493_v33 = vpop.f32.mrb[70].mxu1  ;;  %v4382_v13 = vpop.f32.mrb[71].mxu0  ;;  %v5051_v40 = vmax.bf16 %v4923_v46, %v4795_v61  ;;  %v4492_v26 = vadd.f32 %v4491_v8, %v9480_v50 }
 0x3ae   : > { %v4494_v62 = vadd.f32 %v4493_v33, %v9477_v56  ;;  %v4383_v2 = vadd.f32 %v4382_v13, %v9477_v56  ;;  %v4495_v14 = vpop.f32.mrb[71].mxu1  ;;  %5532 = vmatprep.subr.bf16.mxu0 %v5049_v54 }
 0x3af   : > { %v4808_v7 = vpack.c.bf16 %v4381_v23, %v4377_v47  ;;  %v4496_v49 = vadd.f32 %v4495_v14, %v9477_v56  ;;  %5605 = vmatprep.subr.bf16.mxu1 %v5051_v40  ;;  %5533 = vmatpush1.bf16.msra.mxu0 %v5048_v4 }
 0x3b0   : > { %v4810_v43 = vpack.c.bf16 %v4494_v62, %v4490_v16  ;;  %v4809_v32 = vpack.c.bf16 %v4383_v2, %v4379_v52  ;;  %5606 = vmatpush1.bf16.msra.mxu1 %v5050_v63 }
 0x3b1   : > { %v4936_v15 = vmul.bf16 1017396388, %v4808_v7  ;;  %v4811_v39 = vpack.c.bf16 %v4496_v49, %v4492_v26 }
 0x3b2   : > { %v4938_v28 = vmul.bf16 1017396388, %v4810_v43  ;;  %v4937_v18 = vmul.bf16 1017396388, %v4809_v32  ;;  %v4386_v48 = vpop.f32.mrb[72].mxu0  ;;  %5429 = vmatmul.mubr.bf16.gmra.mrb[148].mxu0 %v9604_v57 }
 0x3b3   : > { %v4939_v19 = vmul.bf16 1017396388, %v4811_v39  ;;  %v4499_v21 = vpop.f32.mrb[72].mxu1  ;;  %5502 = vmatmul.mubr.bf16.gmra.mrb[148].mxu1 %v9604_v57  ;;  %v4388_v5 = vpop.f32.mrb[73].mxu0  ;;  %5438 = vmatprep.mubr.bf16.mxu0 %v7735_v0  ;;  %v5064_v35 = vmax.bf16 %v4936_v15, %v4808_v7  ;;  %v4387_v60 = vadd.f32 %v4386_v48, %v9495_v55 }
 0x3b4   : > { %v4501_v59 = vpop.f32.mrb[73].mxu1  ;;  %v4390_v11 = vpop.f32.mrb[74].mxu0  ;;  %v5065_v17 = vmax.bf16 %v4937_v18, %v4809_v32  ;;  %5511 = vmatprep.mubr.bf16.mxu1 %v7735_v0  ;;  %v5066_v25 = vmax.bf16 %v4938_v28, %v4810_v43  ;;  %v4500_v38 = vadd.f32 %v4499_v21, %v9495_v55  ;;  %v4389_v57 = vadd.f32 %v4388_v5, %v9495_v55 }
 0x3b5   : > { %v4391_v27 = vadd.f32 %v4390_v11, %v9492_v22  ;;  %v4503_v30 = vpop.f32.mrb[74].mxu1  ;;  %v4392_v53 = vpop.f32.mrb[75].mxu0  ;;  %v5067_v61 = vmax.bf16 %v4939_v19, %v4811_v39  ;;  %v4502_v20 = vadd.f32 %v4501_v59, %v9495_v55 }
 0x3b6   : > { %v4504_v58 = vadd.f32 %v4503_v30, %v9492_v22  ;;  %v4393_v24 = vadd.f32 %v4392_v53, %v9492_v22  ;;  %v4505_v46 = vpop.f32.mrb[75].mxu1  ;;  %5534 = vmatprep.subr.bf16.mxu0 %v5065_v17 }
 0x3b7   : > { %v4824_v12 = vpack.c.bf16 %v4391_v27, %v4387_v60  ;;  %v4506_v4 = vadd.f32 %v4505_v46, %v9492_v22  ;;  %5607 = vmatprep.subr.bf16.mxu1 %v5067_v61  ;;  %5535 = vmatpush1.bf16.msra.mxu0 %v5064_v35 }
 0x3b8   : > { %v4826_v8 = vpack.c.bf16 %v4504_v58, %v4500_v38  ;;  %v4825_v42 = vpack.c.bf16 %v4393_v24, %v4389_v57  ;;  %5608 = vmatpush1.bf16.msra.mxu1 %v5066_v25 }
 0x3b9   : > { %v4952_v54 = vmul.bf16 1017396388, %v4824_v12  ;;  %v4827_v63 = vpack.c.bf16 %v4506_v4, %v4502_v20 }
 0x3ba   : > { %v4954_v47 = vmul.bf16 1017396388, %v4826_v8  ;;  %v4953_v23 = vmul.bf16 1017396388, %v4825_v42  ;;  %v4396_v33 = vpop.f32.mrb[76].mxu0  ;;  %5439 = vmatmul.mubr.bf16.gmra.mrb[152].mxu0 %v9621_v34 }
 0x3bb   : > { %v4955_v13 = vmul.bf16 1017396388, %v4827_v63  ;;  %v4509_v40 = vpop.f32.mrb[76].mxu1  ;;  %5512 = vmatmul.mubr.bf16.gmra.mrb[152].mxu1 %v9621_v34  ;;  %v4398_v16 = vpop.f32.mrb[77].mxu0  ;;  %5448 = vmatprep.mubr.bf16.mxu0 %v7735_v0  ;;  %v5080_v52 = vmax.bf16 %v4952_v54, %v4824_v12  ;;  %v4397_v7 = vadd.f32 %v4396_v33, %v9511_v45 }
 0x3bc   : > { %v4511_v62 = vpop.f32.mrb[77].mxu1  ;;  %v4400_v2 = vpop.f32.mrb[78].mxu0  ;;  %v5081_v14 = vmax.bf16 %v4953_v23, %v4825_v42  ;;  %5521 = vmatprep.mubr.bf16.mxu1 %v7735_v0  ;;  %v5082_v26 = vmax.bf16 %v4954_v47, %v4826_v8  ;;  %v4510_v39 = vadd.f32 %v4509_v40, %v9511_v45  ;;  %v4399_v34 = vadd.f32 %v4398_v16, %v9511_v45 }
 0x3bd   : > { %v4401_v49 = vadd.f32 %v4400_v2, %v9508_v31  ;;  %v4513_v43 = vpop.f32.mrb[78].mxu1  ;;  %v4402_v32 = vpop.f32.mrb[79].mxu0  ;;  %v5083_v15 = vmax.bf16 %v4955_v13, %v4827_v63  ;;  %v4512_v19 = vadd.f32 %v4511_v62, %v9511_v45 }
 0x3be   : > { %v4514_v28 = vadd.f32 %v4513_v43, %v9508_v31  ;;  %v4403_v18 = vadd.f32 %v4402_v32, %v9508_v31  ;;  %v4515_v48 = vpop.f32.mrb[79].mxu1  ;;  %5536 = vmatprep.subr.bf16.mxu0 %v5081_v14 }
 0x3bf   : > { %v4840_v21 = vpack.c.bf16 %v4401_v49, %v4397_v7  ;;  %v4516_v5 = vadd.f32 %v4515_v48, %v9508_v31  ;;  %5609 = vmatprep.subr.bf16.mxu1 %v5083_v15  ;;  %5537 = vmatpush1.bf16.msra.mxu0 %v5080_v52 }
 0x3c0   : > { %v4842_v35 = vpack.c.bf16 %v4514_v28, %v4510_v39  ;;  %v4841_v59 = vpack.c.bf16 %v4403_v18, %v4399_v34  ;;  %5610 = vmatpush1.bf16.msra.mxu1 %v5082_v26 }
 0x3c1   : > { %v4968_v11 = vmul.bf16 1017396388, %v4840_v21  ;;  %v4843_v17 = vpack.c.bf16 %v4516_v5, %v4512_v19 }
 0x3c2   : > { %v4970_v25 = vmul.bf16 1017396388, %v4842_v35  ;;  %v4969_v60 = vmul.bf16 1017396388, %v4841_v59  ;;  %v4406_v27 = vpop.f32.mrb[80].mxu0  ;;  %5449 = vmatmul.mubr.bf16.gmra.mrb[156].mxu0 %v9638_v10 }
 0x3c3   : > { %v4971_v30 = vmul.bf16 1017396388, %v4843_v17  ;;  %v4519_v53 = vpop.f32.mrb[80].mxu1  ;;  %5522 = vmatmul.mubr.bf16.gmra.mrb[156].mxu1 %v9638_v10  ;;  %v4408_v61 = vpop.f32.mrb[81].mxu0  ;;  %5564 = vmatprep.mubr.bf16.mxu0 %v7735_v0  ;;  %v5096_v38 = vmax.bf16 %v4968_v11, %v4840_v21  ;;  %v4407_v20 = vadd.f32 %v4406_v27, %v9527_v51 }
 0x3c4   : > { %v4521_v57 = vpop.f32.mrb[81].mxu1  ;;  %v4410_v58 = vpop.f32.mrb[82].mxu0  ;;  %v5097_v24 = vmax.bf16 %v4969_v60, %v4841_v59  ;;  %5637 = vmatprep.mubr.bf16.mxu1 %v7735_v0  ;;  %v5098_v46 = vmax.bf16 %v4970_v25, %v4842_v35  ;;  %v4520_v54 = vadd.f32 %v4519_v53, %v9527_v51  ;;  %v4409_v10 = vadd.f32 %v4408_v61, %v9527_v51 }
 0x3c5   : > { %v4411_v12 = vadd.f32 %v4410_v58, %v9524_v44  ;;  %v4523_v4 = vpop.f32.mrb[82].mxu1  ;;  %v4412_v8 = vpop.f32.mrb[83].mxu0  ;;  %v5099_v42 = vmax.bf16 %v4971_v30, %v4843_v17  ;;  %v4522_v33 = vadd.f32 %v4521_v57, %v9527_v51 }
 0x3c6   : > { %v4524_v63 = vadd.f32 %v4523_v4, %v9524_v44  ;;  %v4413_v47 = vadd.f32 %v4412_v8, %v9524_v44  ;;  %v4525_v23 = vpop.f32.mrb[83].mxu1  ;;  %5538 = vmatprep.subr.bf16.mxu0 %v5097_v24 }
 0x3c7   : > { %v4856_v13 = vpack.c.bf16 %v4411_v12, %v4407_v20  ;;  %v4526_v40 = vadd.f32 %v4525_v23, %v9524_v44  ;;  %5611 = vmatprep.subr.bf16.mxu1 %v5099_v42  ;;  %5539 = vmatpush1.bf16.msra.mxu0 %v5096_v38 }
 0x3c8   : > { %v4858_v16 = vpack.c.bf16 %v4524_v63, %v4520_v54  ;;  %v4857_v52 = vpack.c.bf16 %v4413_v47, %v4409_v10  ;;  %5612 = vmatpush1.bf16.msra.mxu1 %v5098_v46 }
 0x3c9   : > { %v4984_v62 = vmul.bf16 1017396388, %v4856_v13  ;;  %v4859_v2 = vpack.c.bf16 %v4526_v40, %v4522_v33 }
 0x3ca   : > { %v4986_v14 = vmul.bf16 1017396388, %v4858_v16  ;;  %v4985_v26 = vmul.bf16 1017396388, %v4857_v52  ;;  %v4416_v7 = vpop.f32.mrb[84].mxu0 }
 0x3cb   : > { %v4987_v49 = vmul.bf16 1017396388, %v4859_v2  ;;  %v4529_v43 = vpop.f32.mrb[84].mxu1  ;;  %v4418_v32 = vpop.f32.mrb[85].mxu0  ;;  %v5112_v15 = vmax.bf16 %v4984_v62, %v4856_v13  ;;  %v4417_v48 = vadd.f32 %v4416_v7, %v9543_v1 }
 0x3cc   : > { %v4531_v39 = vpop.f32.mrb[85].mxu1  ;;  %v4420_v34 = vpop.f32.mrb[86].mxu0  ;;  %v5113_v28 = vmax.bf16 %v4985_v26, %v4857_v52  ;;  %v5114_v18 = vmax.bf16 %v4986_v14, %v4858_v16  ;;  %v4530_v59 = vadd.f32 %v4529_v43, %v9543_v1  ;;  %v4419_v11 = vadd.f32 %v4418_v32, %v9543_v1 }
 0x3cd   : > { %v4421_v19 = vadd.f32 %v4420_v34, %v9540_v3  ;;  %v4533_v21 = vpop.f32.mrb[86].mxu1  ;;  %v4422_v5 = vpop.f32.mrb[87].mxu0  ;;  %v5115_v35 = vmax.bf16 %v4987_v49, %v4859_v2  ;;  %v4532_v27 = vadd.f32 %v4531_v39, %v9543_v1 }
 0x3ce   : > { %v4534_v17 = vadd.f32 %v4533_v21, %v9540_v3  ;;  %v4423_v25 = vadd.f32 %v4422_v5, %v9540_v3  ;;  %v4535_v60 = vpop.f32.mrb[87].mxu1  ;;  %5540 = vmatprep.subr.bf16.mxu0 %v5113_v28 }
 0x3cf   : > { %v4872_v30 = vpack.c.bf16 %v4421_v19, %v4417_v48  ;;  %v4536_v53 = vadd.f32 %v4535_v60, %v9540_v3  ;;  %5613 = vmatprep.subr.bf16.mxu1 %v5115_v35  ;;  %5541 = vmatpush1.bf16.msra.mxu0 %v5112_v15 }
 0x3d0   : > { %v4874_v61 = vpack.c.bf16 %v4534_v17, %v4530_v59  ;;  %v4873_v38 = vpack.c.bf16 %v4423_v25, %v4419_v11  ;;  %5614 = vmatpush1.bf16.msra.mxu1 %v5114_v18 }
 0x3d1   : > { %v5000_v57 = vmul.bf16 1017396388, %v4872_v30  ;;  %v4875_v58 = vpack.c.bf16 %v4536_v53, %v4532_v27 }
 0x3d2   : > { %v5002_v24 = vmul.bf16 1017396388, %v4874_v61  ;;  %v5001_v46 = vmul.bf16 1017396388, %v4873_v38  ;;  %v4426_v20 = vpop.f32.mrb[88].mxu0 }
 0x3d3   : > { %v5003_v12 = vmul.bf16 1017396388, %v4875_v58  ;;  %v4539_v4 = vpop.f32.mrb[88].mxu1  ;;  %v4428_v8 = vpop.f32.mrb[89].mxu0  ;;  %v5128_v42 = vmax.bf16 %v5000_v57, %v4872_v30  ;;  %v4427_v23 = vadd.f32 %v4426_v20, %v9556_v6 }
 0x3d4   : > { %v4541_v54 = vpop.f32.mrb[89].mxu1  ;;  %v4430_v10 = vpop.f32.mrb[90].mxu0  ;;  %v5129_v63 = vmax.bf16 %v5001_v46, %v4873_v38  ;;  %v5130_v47 = vmax.bf16 %v5002_v24, %v4874_v61  ;;  %v4540_v52 = vadd.f32 %v4539_v4, %v9556_v6  ;;  %v4429_v62 = vadd.f32 %v4428_v8, %v9556_v6 }
 0x3d5   : > { %v4431_v33 = vadd.f32 %v4430_v10, %v9554_v9  ;;  %v4543_v13 = vpop.f32.mrb[90].mxu1  ;;  %v4432_v40 = vpop.f32.mrb[91].mxu0  ;;  %v5131_v16 = vmax.bf16 %v5003_v12, %v4875_v58  ;;  %v4542_v7 = vadd.f32 %v4541_v54, %v9556_v6 }
 0x3d6   : > { %v4544_v2 = vadd.f32 %v4543_v13, %v9554_v9  ;;  %v4433_v14 = vadd.f32 %v4432_v40, %v9554_v9  ;;  %v4545_v26 = vpop.f32.mrb[91].mxu1  ;;  %5542 = vmatprep.subr.bf16.mxu0 %v5129_v63 }
 0x3d7   : > { %v4888_v49 = vpack.c.bf16 %v4431_v33, %v4427_v23  ;;  %v4546_v43 = vadd.f32 %v4545_v26, %v9554_v9  ;;  %5615 = vmatprep.subr.bf16.mxu1 %v5131_v16  ;;  %5543 = vmatpush1.bf16.msra.mxu0 %v5128_v42 }
 0x3d8   : > { %v4890_v32 = vpack.c.bf16 %v4544_v2, %v4540_v52  ;;  %v4889_v15 = vpack.c.bf16 %v4433_v14, %v4429_v62  ;;  %5616 = vmatpush1.bf16.msra.mxu1 %v5130_v47 }
 0x3d9   : > { %v5016_v39 = vmul.bf16 1017396388, %v4888_v49  ;;  %v4891_v34 = vpack.c.bf16 %v4546_v43, %v4542_v7 }
 0x3da   : > { %v5018_v28 = vmul.bf16 1017396388, %v4890_v32  ;;  %v5017_v18 = vmul.bf16 1017396388, %v4889_v15  ;;  %v4436_v48 = vpop.f32.mrb[92].mxu0 }
 0x3db   : > { %v5019_v19 = vmul.bf16 1017396388, %v4891_v34  ;;  %v4549_v21 = vpop.f32.mrb[92].mxu1  ;;  %v4438_v5 = vpop.f32.mrb[93].mxu0  ;;  %v5144_v35 = vmax.bf16 %v5016_v39, %v4888_v49  ;;  %v4437_v60 = vadd.f32 %v4436_v48, %v9568_v36 }
 0x3dc   : > { %v4551_v59 = vpop.f32.mrb[93].mxu1  ;;  %v4440_v11 = vpop.f32.mrb[94].mxu0  ;;  %v5145_v17 = vmax.bf16 %v5017_v18, %v4889_v15  ;;  %v5146_v25 = vmax.bf16 %v5018_v28, %v4890_v32  ;;  %v4550_v38 = vadd.f32 %v4549_v21, %v9568_v36  ;;  %v4439_v57 = vadd.f32 %v4438_v5, %v9568_v36 }
 0x3dd   : > { %v4441_v27 = vadd.f32 %v4440_v11, %v9566_v37  ;;  %v4553_v30 = vpop.f32.mrb[94].mxu1  ;;  %v4442_v53 = vpop.f32.mrb[95].mxu0  ;;  %v5147_v61 = vmax.bf16 %v5019_v19, %v4891_v34  ;;  %v4552_v20 = vadd.f32 %v4551_v59, %v9568_v36 }
 0x3de   : > { %v4554_v58 = vadd.f32 %v4553_v30, %v9566_v37  ;;  %v4443_v24 = vadd.f32 %v4442_v53, %v9566_v37  ;;  %v4555_v46 = vpop.f32.mrb[95].mxu1  ;;  %5544 = vmatprep.subr.bf16.mxu0 %v5145_v17 }
 0x3df   : > { %v4904_v12 = vpack.c.bf16 %v4441_v27, %v4437_v60  ;;  %v4556_v4 = vadd.f32 %v4555_v46, %v9566_v37  ;;  %5617 = vmatprep.subr.bf16.mxu1 %v5147_v61  ;;  %5545 = vmatpush1.bf16.msra.mxu0 %v5144_v35  ;;  %v9769_v27 = vld [vmem:[%s10318_s4] sm:$0xff]  }
 0x3e0   : > { %v4906_v8 = vpack.c.bf16 %v4554_v58, %v4550_v38  ;;  %v4905_v42 = vpack.c.bf16 %v4443_v24, %v4439_v57  ;;  %5618 = vmatpush1.bf16.msra.mxu1 %v5146_v25 }
 0x3e1   : > { %v5032_v54 = vmul.bf16 1017396388, %v4904_v12  ;;  %v4907_v10 = vpack.c.bf16 %v4556_v4, %v4552_v20 }
 0x3e2   : > { %v5034_v63 = vmul.bf16 1017396388, %v4906_v8  ;;  %v5033_v47 = vmul.bf16 1017396388, %v4905_v42  ;;  %v4592_v23 = vpop.f32.mrb[96].mxu0 }
 0x3e3   : > { %v5035_v33 = vmul.bf16 1017396388, %v4907_v10  ;;  %v4705_v13 = vpop.f32.mrb[96].mxu1  ;;  %v4594_v40 = vpop.f32.mrb[97].mxu0  ;;  %v5160_v16 = vmax.bf16 %v5032_v54, %v4904_v12  ;;  %v4593_v26 = vadd.f32 %v4592_v23, %v9464_v41 }
 0x3e4   : > { %v4707_v52 = vpop.f32.mrb[97].mxu1  ;;  %v4596_v62 = vpop.f32.mrb[98].mxu0  ;;  %v5161_v2 = vmax.bf16 %v5033_v47, %v4905_v42  ;;  %v5162_v14 = vmax.bf16 %v5034_v63, %v4906_v8  ;;  %v4706_v15 = vadd.f32 %v4705_v13, %v9464_v41  ;;  %v4595_v39 = vadd.f32 %v4594_v40, %v9464_v41 }
 0x3e5   : > { %v4597_v7 = vadd.f32 %v4596_v62, %v9461_v29  ;;  %v4709_v49 = vpop.f32.mrb[98].mxu1  ;;  %v4598_v43 = vpop.f32.mrb[99].mxu0  ;;  %v5163_v32 = vmax.bf16 %v5035_v33, %v4907_v10  ;;  %v4708_v48 = vadd.f32 %v4707_v52, %v9464_v41 }
 0x3e6   : > { %v4710_v34 = vadd.f32 %v4709_v49, %v9461_v29  ;;  %v4599_v28 = vadd.f32 %v4598_v43, %v9461_v29  ;;  %v4711_v18 = vpop.f32.mrb[99].mxu1  ;;  %5546 = vmatprep.subr.bf16.mxu0 %v5161_v2 }
 0x3e7   : > { %v4796_v19 = vpack.c.bf16 %v4597_v7, %v4593_v26  ;;  %v4712_v21 = vadd.f32 %v4711_v18, %v9461_v29  ;;  %5619 = vmatprep.subr.bf16.mxu1 %v5163_v32  ;;  %5547 = vmatpush1.bf16.msra.mxu0 %v5160_v16  ;;  %v9786_v26 = vld [vmem:[%s10318_s4 + $0x8] sm:$0xff]  }
 0x3e8   : > { %v4798_v5 = vpack.c.bf16 %v4710_v34, %v4706_v15  ;;  %v4797_v35 = vpack.c.bf16 %v4599_v28, %v4595_v39  ;;  %5620 = vmatpush1.bf16.msra.mxu1 %v5162_v14 }
 0x3e9   : > { %v4924_v59 = vmul.bf16 1017396388, %v4796_v19  ;;  %v4799_v11 = vpack.c.bf16 %v4712_v21, %v4708_v48 }
 0x3ea   : > { %v4926_v17 = vmul.bf16 1017396388, %v4798_v5  ;;  %v4925_v25 = vmul.bf16 1017396388, %v4797_v35  ;;  %v4602_v60 = vpop.f32.mrb[100].mxu0  ;;  %5565 = vmatmul.mubr.bf16.vlgmr.msra.gmra.mrb[160].mxu0 %v9769_v27 }
 0x3eb   : > { %v4927_v41 = vmul.bf16 1017396388, %v4799_v11  ;;  %v4715_v30 = vpop.f32.mrb[100].mxu1  ;;  %5638 = vmatmul.mubr.bf16.vlgmr.msra.gmra.mrb[160].mxu1 %v9769_v27  ;;  %v4604_v29 = vpop.f32.mrb[101].mxu0  ;;  %5574 = vmatprep.mubr.bf16.mxu0 %v7735_v0  ;;  %v5052_v53 = vmax.bf16 %v4924_v59, %v4796_v19  ;;  %v4603_v24 = vadd.f32 %v4602_v60, %v9480_v50 }
 0x3ec   : > { %v4717_v61 = vpop.f32.mrb[101].mxu1  ;;  %v4606_v38 = vpop.f32.mrb[102].mxu0  ;;  %v5053_v57 = vmax.bf16 %v4925_v25, %v4797_v35  ;;  %5647 = vmatprep.mubr.bf16.mxu1 %v7735_v0  ;;  %v5054_v58 = vmax.bf16 %v4926_v17, %v4798_v5  ;;  %v4716_v8 = vadd.f32 %v4715_v30, %v9480_v50  ;;  %v4605_v42 = vadd.f32 %v4604_v29, %v9480_v50 }
 0x3ed   : > { %v4607_v46 = vadd.f32 %v4606_v38, %v9477_v56  ;;  %v4719_v20 = vpop.f32.mrb[102].mxu1  ;;  %v4608_v12 = vpop.f32.mrb[103].mxu0  ;;  %v5055_v4 = vmax.bf16 %v4927_v41, %v4799_v11  ;;  %v4718_v47 = vadd.f32 %v4717_v61, %v9480_v50 }
 0x3ee   : > { %v4720_v54 = vadd.f32 %v4719_v20, %v9477_v56  ;;  %v4609_v10 = vadd.f32 %v4608_v12, %v9477_v56  ;;  %v4721_v63 = vpop.f32.mrb[103].mxu1  ;;  %5678 = vmatprep.subr.bf16.mxu0 %v5053_v57 }
 0x3ef   : > { %v4812_v23 = vpack.c.bf16 %v4607_v46, %v4603_v24  ;;  %v4722_v33 = vadd.f32 %v4721_v63, %v9477_v56  ;;  %5751 = vmatprep.subr.bf16.mxu1 %v5055_v4  ;;  %5679 = vmatpush1.bf16.msra.mxu0 %v5052_v53 }
 0x3f0   : > { %v4814_v13 = vpack.c.bf16 %v4720_v54, %v4716_v8  ;;  %v4813_v40 = vpack.c.bf16 %v4609_v10, %v4605_v42  ;;  %5752 = vmatpush1.bf16.msra.mxu1 %v5054_v58  ;;  %v9803_v58 = vld [vmem:[%s10318_s4 + $0x10] sm:$0xff]  }
 0x3f1   : > { %v4940_v16 = vmul.bf16 1017396388, %v4812_v23  ;;  %v4815_v52 = vpack.c.bf16 %v4722_v33, %v4718_v47 }
 0x3f2   : > { %v4942_v62 = vmul.bf16 1017396388, %v4814_v13  ;;  %v4941_v2 = vmul.bf16 1017396388, %v4813_v40  ;;  %v4612_v14 = vpop.f32.mrb[104].mxu0  ;;  %5575 = vmatmul.mubr.bf16.gmra.mrb[164].mxu0 %v9786_v26 }
 0x3f3   : > { %v4943_v50 = vmul.bf16 1017396388, %v4815_v52  ;;  %v4725_v7 = vpop.f32.mrb[104].mxu1  ;;  %5648 = vmatmul.mubr.bf16.gmra.mrb[164].mxu1 %v9786_v26  ;;  %v4614_v56 = vpop.f32.mrb[105].mxu0  ;;  %5584 = vmatprep.mubr.bf16.mxu0 %v7735_v0  ;;  %v5068_v49 = vmax.bf16 %v4940_v16, %v4812_v23  ;;  %v4613_v34 = vadd.f32 %v4612_v14, %v9495_v55 }
 0x3f4   : > { %v4727_v43 = vpop.f32.mrb[105].mxu1  ;;  %v4616_v32 = vpop.f32.mrb[106].mxu0  ;;  %v5069_v15 = vmax.bf16 %v4941_v2, %v4813_v40  ;;  %5657 = vmatprep.mubr.bf16.mxu1 %v7735_v0  ;;  %v5070_v39 = vmax.bf16 %v4942_v62, %v4814_v13  ;;  %v4726_v21 = vadd.f32 %v4725_v7, %v9495_v55  ;;  %v4615_v5 = vadd.f32 %v4614_v56, %v9495_v55 }
 0x3f5   : > { %v4617_v28 = vadd.f32 %v4616_v32, %v9492_v22  ;;  %v4729_v18 = vpop.f32.mrb[106].mxu1  ;;  %v4618_v48 = vpop.f32.mrb[107].mxu0  ;;  %v5071_v19 = vmax.bf16 %v4943_v50, %v4815_v52  ;;  %v4728_v17 = vadd.f32 %v4727_v43, %v9495_v55 }
 0x3f6   : > { %v4730_v35 = vadd.f32 %v4729_v18, %v9492_v22  ;;  %v4619_v59 = vadd.f32 %v4618_v48, %v9492_v22  ;;  %v4731_v11 = vpop.f32.mrb[107].mxu1  ;;  %5680 = vmatprep.subr.bf16.mxu0 %v5069_v15  ;;  %v9820_v15 = vld [vmem:[%s10318_s4 + $0x18] sm:$0xff]  }
 0x3f7   : > { %v4828_v25 = vpack.c.bf16 %v4617_v28, %v4613_v34  ;;  %v4732_v60 = vadd.f32 %v4731_v11, %v9492_v22  ;;  %5753 = vmatprep.subr.bf16.mxu1 %v5071_v19  ;;  %5681 = vmatpush1.bf16.msra.mxu0 %v5068_v49 }
 0x3f8   : > { %v4830_v41 = vpack.c.bf16 %v4730_v35, %v4726_v21  ;;  %v4829_v30 = vpack.c.bf16 %v4619_v59, %v4615_v5  ;;  %5754 = vmatpush1.bf16.msra.mxu1 %v5070_v39 }
 0x3f9   : > { %v4956_v29 = vmul.bf16 1017396388, %v4828_v25  ;;  %v4831_v53 = vpack.c.bf16 %v4732_v60, %v4728_v17 }
 0x3fa   : > { %v4958_v61 = vmul.bf16 1017396388, %v4830_v41  ;;  %v4957_v38 = vmul.bf16 1017396388, %v4829_v30  ;;  %v4622_v57 = vpop.f32.mrb[108].mxu0  ;;  %5585 = vmatmul.mubr.bf16.gmra.mrb[168].mxu0 %v9803_v58 }
 0x3fb   : > { %v4959_v55 = vmul.bf16 1017396388, %v4831_v53  ;;  %v4735_v24 = vpop.f32.mrb[108].mxu1  ;;  %5658 = vmatmul.mubr.bf16.gmra.mrb[168].mxu1 %v9803_v58  ;;  %v4624_v22 = vpop.f32.mrb[109].mxu0  ;;  %5594 = vmatprep.mubr.bf16.mxu0 %v7735_v0  ;;  %v5084_v46 = vmax.bf16 %v4956_v29, %v4828_v25  ;;  %v4623_v42 = vadd.f32 %v4622_v57, %v9511_v45 }
 0x3fc   : > { %v4737_v20 = vpop.f32.mrb[109].mxu1  ;;  %v4626_v12 = vpop.f32.mrb[110].mxu0  ;;  %v5085_v4 = vmax.bf16 %v4957_v38, %v4829_v30  ;;  %5667 = vmatprep.mubr.bf16.mxu1 %v7735_v0  ;;  %v5086_v8 = vmax.bf16 %v4958_v61, %v4830_v41  ;;  %v4736_v23 = vadd.f32 %v4735_v24, %v9511_v45  ;;  %v4625_v33 = vadd.f32 %v4624_v22, %v9511_v45 }
 0x3fd   : > { %v4627_v54 = vadd.f32 %v4626_v12, %v9508_v31  ;;  %v4739_v10 = vpop.f32.mrb[110].mxu1  ;;  %v4628_v63 = vpop.f32.mrb[111].mxu0  ;;  %v5087_v47 = vmax.bf16 %v4959_v55, %v4831_v53  ;;  %v4738_v52 = vadd.f32 %v4737_v20, %v9511_v45 }
 0x3fe   : > { %v4740_v13 = vadd.f32 %v4739_v10, %v9508_v31  ;;  %v4629_v40 = vadd.f32 %v4628_v63, %v9508_v31  ;;  %v4741_v16 = vpop.f32.mrb[111].mxu1  ;;  %5682 = vmatprep.subr.bf16.mxu0 %v5085_v4 }
 0x3ff   : > { %v4844_v62 = vpack.c.bf16 %v4627_v54, %v4623_v42  ;;  %v4742_v2 = vadd.f32 %v4741_v16, %v9508_v31  ;;  %5755 = vmatprep.subr.bf16.mxu1 %v5087_v47  ;;  %5683 = vmatpush1.bf16.msra.mxu0 %v5084_v46 }
 0x400   : > { %v4846_v14 = vpack.c.bf16 %v4740_v13, %v4736_v23  ;;  %v4845_v50 = vpack.c.bf16 %v4629_v40, %v4625_v33  ;;  %5756 = vmatpush1.bf16.msra.mxu1 %v5086_v8 }
 0x401   : > { %v4972_v7 = vmul.bf16 1017396388, %v4844_v62  ;;  %v4847_v56 = vpack.c.bf16 %v4742_v2, %v4738_v52 }
 0x402   : > { %v4974_v49 = vmul.bf16 1017396388, %v4846_v14  ;;  %v4973_v43 = vmul.bf16 1017396388, %v4845_v50  ;;  %v4632_v32 = vpop.f32.mrb[112].mxu0  ;;  %5595 = vmatmul.mubr.bf16.gmra.mrb[172].mxu0 %v9820_v15 }
 0x403   : > { %v4975_v45 = vmul.bf16 1017396388, %v4847_v56  ;;  %v4745_v39 = vpop.f32.mrb[112].mxu1  ;;  %5668 = vmatmul.mubr.bf16.gmra.mrb[172].mxu1 %v9820_v15  ;;  %v4634_v31 = vpop.f32.mrb[113].mxu0  ;;  %5710 = vmatprep.mubr.bf16.mxu0 %v7735_v0  ;;  %v5100_v34 = vmax.bf16 %v4972_v7, %v4844_v62  ;;  %v4633_v21 = vadd.f32 %v4632_v32, %v9527_v51 }
 0x404   : > { %v4747_v28 = vpop.f32.mrb[113].mxu1  ;;  %v4636_v18 = vpop.f32.mrb[114].mxu0  ;;  %v5101_v48 = vmax.bf16 %v4973_v43, %v4845_v50  ;;  %5783 = vmatprep.mubr.bf16.mxu1 %v7735_v0  ;;  %v5102_v19 = vmax.bf16 %v4974_v49, %v4846_v14  ;;  %v4746_v17 = vadd.f32 %v4745_v39, %v9527_v51  ;;  %v4635_v25 = vadd.f32 %v4634_v31, %v9527_v51 }
 0x405   : > { %v4637_v5 = vadd.f32 %v4636_v18, %v9524_v44  ;;  %v4749_v35 = vpop.f32.mrb[114].mxu1  ;;  %v4638_v59 = vpop.f32.mrb[115].mxu0  ;;  %v5103_v11 = vmax.bf16 %v4975_v45, %v4847_v56  ;;  %v4748_v29 = vadd.f32 %v4747_v28, %v9527_v51 }
 0x406   : > { %v4750_v60 = vadd.f32 %v4749_v35, %v9524_v44  ;;  %v4639_v41 = vadd.f32 %v4638_v59, %v9524_v44  ;;  %v4751_v30 = vpop.f32.mrb[115].mxu1  ;;  %5684 = vmatprep.subr.bf16.mxu0 %v5101_v48 }
 0x407   : > { %v4860_v53 = vpack.c.bf16 %v4637_v5, %v4633_v21  ;;  %v4752_v61 = vadd.f32 %v4751_v30, %v9524_v44  ;;  %5757 = vmatprep.subr.bf16.mxu1 %v5103_v11  ;;  %5685 = vmatpush1.bf16.msra.mxu0 %v5100_v34 }
 0x408   : > { %v4862_v38 = vpack.c.bf16 %v4750_v60, %v4746_v17  ;;  %v4861_v57 = vpack.c.bf16 %v4639_v41, %v4635_v25  ;;  %5758 = vmatpush1.bf16.msra.mxu1 %v5102_v19 }
 0x409   : > { %v4988_v55 = vmul.bf16 1017396388, %v4860_v53  ;;  %v4863_v24 = vpack.c.bf16 %v4752_v61, %v4748_v29 }
 0x40a   : > { %v4990_v22 = vmul.bf16 1017396388, %v4862_v38  ;;  %v4989_v46 = vmul.bf16 1017396388, %v4861_v57  ;;  %v4642_v20 = vpop.f32.mrb[116].mxu0 }
 0x40b   : > { %v4991_v12 = vmul.bf16 1017396388, %v4863_v24  ;;  %v4755_v4 = vpop.f32.mrb[116].mxu1  ;;  %v4644_v8 = vpop.f32.mrb[117].mxu0  ;;  %v5116_v42 = vmax.bf16 %v4988_v55, %v4860_v53  ;;  %v4643_v44 = vadd.f32 %v4642_v20, %v9543_v1 }
 0x40c   : > { %v4757_v54 = vpop.f32.mrb[117].mxu1  ;;  %v4646_v10 = vpop.f32.mrb[118].mxu0  ;;  %v5117_v51 = vmax.bf16 %v4989_v46, %v4861_v57  ;;  %v5118_v63 = vmax.bf16 %v4990_v22, %v4862_v38  ;;  %v4756_v40 = vadd.f32 %v4755_v4, %v9543_v1  ;;  %v4645_v16 = vadd.f32 %v4644_v8, %v9543_v1 }
 0x40d   : > { %v4647_v47 = vadd.f32 %v4646_v10, %v9540_v3  ;;  %v4759_v23 = vpop.f32.mrb[118].mxu1  ;;  %v4648_v33 = vpop.f32.mrb[119].mxu0  ;;  %v5119_v13 = vmax.bf16 %v4991_v12, %v4863_v24  ;;  %v4758_v14 = vadd.f32 %v4757_v54, %v9543_v1 }
 0x40e   : > { %v4760_v52 = vadd.f32 %v4759_v23, %v9540_v3  ;;  %v4649_v62 = vadd.f32 %v4648_v33, %v9540_v3  ;;  %v4761_v2 = vpop.f32.mrb[119].mxu1  ;;  %5686 = vmatprep.subr.bf16.mxu0 %v5117_v51 }
 0x40f   : > { %v4876_v50 = vpack.c.bf16 %v4647_v47, %v4643_v44  ;;  %v4762_v7 = vadd.f32 %v4761_v2, %v9540_v3  ;;  %5759 = vmatprep.subr.bf16.mxu1 %v5119_v13  ;;  %5687 = vmatpush1.bf16.msra.mxu0 %v5116_v42 }
 0x410   : > { %v4878_v56 = vpack.c.bf16 %v4760_v52, %v4756_v40  ;;  %v4877_v49 = vpack.c.bf16 %v4649_v62, %v4645_v16  ;;  %5760 = vmatpush1.bf16.msra.mxu1 %v5118_v63 }
 0x411   : > { %v5004_v43 = vmul.bf16 1017396388, %v4876_v50  ;;  %v4879_v32 = vpack.c.bf16 %v4762_v7, %v4758_v14 }
 0x412   : > { %v5006_v45 = vmul.bf16 1017396388, %v4878_v56  ;;  %v5005_v39 = vmul.bf16 1017396388, %v4877_v49  ;;  %v4652_v31 = vpop.f32.mrb[120].mxu0 }
 0x413   : > { %v5007_v34 = vmul.bf16 1017396388, %v4879_v32  ;;  %v4765_v28 = vpop.f32.mrb[120].mxu1  ;;  %v4654_v18 = vpop.f32.mrb[121].mxu0  ;;  %v5132_v48 = vmax.bf16 %v5004_v43, %v4876_v50  ;;  %v4653_v3 = vadd.f32 %v4652_v31, %v9556_v6 }
 0x414   : > { %v4767_v19 = vpop.f32.mrb[121].mxu1  ;;  %v4656_v21 = vpop.f32.mrb[122].mxu0  ;;  %v5133_v1 = vmax.bf16 %v5005_v39, %v4877_v49  ;;  %v5134_v5 = vmax.bf16 %v5006_v45, %v4878_v56  ;;  %v4766_v25 = vadd.f32 %v4765_v28, %v9556_v6  ;;  %v4655_v60 = vadd.f32 %v4654_v18, %v9556_v6 }
 0x415   : > { %v4657_v35 = vadd.f32 %v4656_v21, %v9554_v9  ;;  %v4769_v59 = vpop.f32.mrb[122].mxu1  ;;  %v4658_v11 = vpop.f32.mrb[123].mxu0  ;;  %v5135_v17 = vmax.bf16 %v5007_v34, %v4879_v32  ;;  %v4768_v53 = vadd.f32 %v4767_v19, %v9556_v6 }
 0x416   : > { %v4770_v41 = vadd.f32 %v4769_v59, %v9554_v9  ;;  %v4659_v30 = vadd.f32 %v4658_v11, %v9554_v9  ;;  %v4771_v29 = vpop.f32.mrb[123].mxu1  ;;  %5688 = vmatprep.subr.bf16.mxu0 %v5133_v1 }
 0x417   : > { %v4892_v61 = vpack.c.bf16 %v4657_v35, %v4653_v3  ;;  %v4772_v38 = vadd.f32 %v4771_v29, %v9554_v9  ;;  %5761 = vmatprep.subr.bf16.mxu1 %v5135_v17  ;;  %5689 = vmatpush1.bf16.msra.mxu0 %v5132_v48 }
 0x418   : > { %v4894_v57 = vpack.c.bf16 %v4770_v41, %v4766_v25  ;;  %v4893_v55 = vpack.c.bf16 %v4659_v30, %v4655_v60  ;;  %5762 = vmatpush1.bf16.msra.mxu1 %v5134_v5 }
 0x419   : > { %v5020_v24 = vmul.bf16 1017396388, %v4892_v61  ;;  %v4895_v22 = vpack.c.bf16 %v4772_v38, %v4768_v53 }
 0x41a   : > { %v5022_v46 = vmul.bf16 1017396388, %v4894_v57  ;;  %v5021_v20 = vmul.bf16 1017396388, %v4893_v55  ;;  %v4662_v12 = vpop.f32.mrb[124].mxu0 }
 0x41b   : > { %v5023_v4 = vmul.bf16 1017396388, %v4895_v22  ;;  %v4775_v8 = vpop.f32.mrb[124].mxu1  ;;  %v4664_v42 = vpop.f32.mrb[125].mxu0  ;;  %v5148_v54 = vmax.bf16 %v5020_v24, %v4892_v61  ;;  %v4663_v9 = vadd.f32 %v4662_v12, %v9568_v36 }
 0x41c   : > { %v4777_v10 = vpop.f32.mrb[125].mxu1  ;;  %v4666_v51 = vpop.f32.mrb[126].mxu0  ;;  %v5149_v6 = vmax.bf16 %v5021_v20, %v4893_v55  ;;  %v5150_v63 = vmax.bf16 %v5022_v46, %v4894_v57  ;;  %v4776_v13 = vadd.f32 %v4775_v8, %v9568_v36  ;;  %v4665_v40 = vadd.f32 %v4664_v42, %v9568_v36 }
 0x41d   : > { %v4667_v44 = vadd.f32 %v4666_v51, %v9566_v37  ;;  %v4779_v47 = vpop.f32.mrb[126].mxu1  ;;  %v4668_v23 = vpop.f32.mrb[127].mxu0  ;;  %v5151_v33 = vmax.bf16 %v5023_v4, %v4895_v22  ;;  %v4778_v2 = vadd.f32 %v4777_v10, %v9568_v36 }
 0x41e   : > { %v4780_v16 = vadd.f32 %v4779_v47, %v9566_v37  ;;  %v4669_v52 = vadd.f32 %v4668_v23, %v9566_v37  ;;  %v4781_v62 = vpop.f32.mrb[127].mxu1  ;;  %5690 = vmatprep.subr.bf16.mxu0 %v5149_v6  ;;  %v9872_v36 = vpop.permute.xlu0 %5178 }
 0x41f   : > { %v4908_v14 = vpack.c.bf16 %v4667_v44, %v4663_v9  ;;  %v4782_v50 = vadd.f32 %v4781_v62, %v9566_v37  ;;  %5763 = vmatprep.subr.bf16.mxu1 %v5151_v33  ;;  %5691 = vmatpush1.bf16.msra.mxu0 %v5148_v54  ;;  %v9869_v37 = vpop.permute.xlu1 %5183 }
 0x420   : > { %v4910_v7 = vpack.c.bf16 %v4780_v16, %v4776_v13  ;;  %v4909_v56 = vpack.c.bf16 %v4669_v52, %v4665_v40  ;;  %5764 = vmatpush1.bf16.msra.mxu1 %v5150_v63 }
 0x421   : > { %v5036_v49 = vmul.bf16 1017396388, %v4908_v14  ;;  %v4911_v43 = vpack.c.bf16 %v4782_v50, %v4778_v2 }
 0x422   : > { %v5038_v32 = vmul.bf16 1017396388, %v4910_v7  ;;  %v5037_v45 = vmul.bf16 1017396388, %v4909_v56  ;;  %v9888_v55 = vpop.permute.xlu0 %5188 }
 0x423   : > { %v5039_v39 = vmul.bf16 1017396388, %v4911_v43  ;;  %v5164_v34 = vmax.bf16 %v5036_v49, %v4908_v14  ;;  %v9885_v61 = vpop.permute.xlu1 %5193 }
 0x424   : > { %v5165_v31 = vmax.bf16 %v5037_v45, %v4909_v56  ;;  %v5166_v18 = vmax.bf16 %v5038_v32, %v4910_v7 }
 0x425   : > { %v5167_v28 = vmax.bf16 %v5039_v39, %v4911_v43 }
 0x426   : > { %5692 = vmatprep.subr.bf16.mxu0 %v5165_v31  ;;  %v9900_v49 = vpop.permute.xlu0 %5198 }
 0x427   : > { %5765 = vmatprep.subr.bf16.mxu1 %v5167_v28  ;;  %5693 = vmatpush1.bf16.msra.mxu0 %v5164_v34  ;;  %v9898_v50 = vpop.permute.xlu1 %5203 }
 0x428   : > { %5766 = vmatpush1.bf16.msra.mxu1 %v5166_v18 }
 0x42a   : > { %5711 = vmatmul.mubr.bf16.vlgmr.msra.gmra.mrb[176].mxu0 %v9769_v27 }
 0x42b   : > { %5784 = vmatmul.mubr.bf16.vlgmr.msra.gmra.mrb[176].mxu1 %v9769_v27  ;;  %5720 = vmatprep.mubr.bf16.mxu0 %v7735_v0 }
 0x42c   : > { %5793 = vmatprep.mubr.bf16.mxu1 %v7735_v0 }
 0x432   : > { %5721 = vmatmul.mubr.bf16.gmra.mrb[180].mxu0 %v9786_v26 }
 0x433   : > { %5794 = vmatmul.mubr.bf16.gmra.mrb[180].mxu1 %v9786_v26  ;;  %5730 = vmatprep.mubr.bf16.mxu0 %v7735_v0 }
 0x434   : > { %5803 = vmatprep.mubr.bf16.mxu1 %v7735_v0 }
 0x43a   : > { %5731 = vmatmul.mubr.bf16.gmra.mrb[184].mxu0 %v9803_v58 }
 0x43b   : > { %5804 = vmatmul.mubr.bf16.gmra.mrb[184].mxu1 %v9803_v58  ;;  %5740 = vmatprep.mubr.bf16.mxu0 %v7735_v0 }
 0x43c   : > { %5813 = vmatprep.mubr.bf16.mxu1 %v7735_v0 }
 0x43d   : > { %v5274_v27 = vpop.f32.mrb[128].mxu0 }
 0x43e   : > { %v5347_v48 = vpop.f32.mrb[128].mxu1  ;;  %v5276_v19 = vpop.f32.mrb[129].mxu0  ;;  %v5275_v1 = vadd.f32 %v5274_v27, %v9872_v36 }
 0x43f   : > { %v5349_v26 = vpop.f32.mrb[129].mxu1  ;;  %v5278_v21 = vpop.f32.mrb[130].mxu0  ;;  %v5348_v58 = vadd.f32 %v5347_v48, %v9872_v36  ;;  %v5277_v59 = vadd.f32 %v5276_v19, %v9872_v36 }
 0x440   : > { %v5279_v5 = vadd.f32 %v5278_v21, %v9869_v37  ;;  %v5351_v3 = vpop.f32.mrb[130].mxu1  ;;  %v5280_v35 = vpop.f32.mrb[131].mxu0  ;;  %v5350_v60 = vadd.f32 %v5349_v26, %v9872_v36 }
 0x441   : > { %v5352_v11 = vadd.f32 %v5351_v3, %v9869_v37  ;;  %v5281_v17 = vadd.f32 %v5280_v35, %v9869_v37  ;;  %v5353_v25 = vpop.f32.mrb[131].mxu1 }
 0x442   : > { %v5824_v41 = vpack.c.bf16 %v5279_v5, %v5275_v1  ;;  %v5354_v30 = vadd.f32 %v5353_v25, %v9869_v37  ;;  %5741 = vmatmul.mubr.bf16.gmra.mrb[188].mxu0 %v9820_v15 }
 0x443   : > { %v5826_v29 = vpack.c.bf16 %v5352_v11, %v5348_v58  ;;  %v5825_v53 = vpack.c.bf16 %v5281_v17, %v5277_v59  ;;  %5814 = vmatmul.mubr.bf16.gmra.mrb[188].mxu1 %v9820_v15  ;;  %6089 = vmatprep.mubr.bf16.mxu0 %v7735_v0 }
 0x444   : > { %v5888_v38 = vmul.bf16 1017396388, %v5824_v41  ;;  %v5827_v57 = vpack.c.bf16 %v5354_v30, %v5350_v60  ;;  %6142 = vmatprep.mubr.bf16.mxu1 %v7735_v0 }
 0x445   : > { %v5890_v24 = vmul.bf16 1017396388, %v5826_v29  ;;  %v5889_v22 = vmul.bf16 1017396388, %v5825_v53  ;;  %v5284_v46 = vpop.f32.mrb[132].mxu0 }
 0x446   : > { %v5891_v20 = vmul.bf16 1017396388, %v5827_v57  ;;  %v5357_v12 = vpop.f32.mrb[132].mxu1  ;;  %v5286_v4 = vpop.f32.mrb[133].mxu0  ;;  %v5952_v8 = vmax.bf16 %v5888_v38, %v5824_v41  ;;  %v5285_v51 = vadd.f32 %v5284_v46, %v9888_v55 }
 0x447   : > { %v5359_v42 = vpop.f32.mrb[133].mxu1  ;;  %v5288_v54 = vpop.f32.mrb[134].mxu0  ;;  %v5953_v15 = vmax.bf16 %v5889_v22, %v5825_v53  ;;  %v5954_v10 = vmax.bf16 %v5890_v24, %v5826_v29  ;;  %v5358_v47 = vadd.f32 %v5357_v12, %v9888_v55  ;;  %v5287_v23 = vadd.f32 %v5286_v4, %v9888_v55 }
 0x448   : > { %v5289_v6 = vadd.f32 %v5288_v54, %v9885_v61  ;;  %v5361_v63 = vpop.f32.mrb[134].mxu1  ;;  %v5290_v9 = vpop.f32.mrb[135].mxu0  ;;  %v5955_v44 = vmax.bf16 %v5891_v20, %v5827_v57  ;;  %v5360_v16 = vadd.f32 %v5359_v42, %v9888_v55 }
 0x449   : > { %v5362_v33 = vadd.f32 %v5361_v63, %v9885_v61  ;;  %v5291_v13 = vadd.f32 %v5290_v9, %v9885_v61  ;;  %v5363_v40 = vpop.f32.mrb[135].mxu1  ;;  %6057 = vmatprep.subr.bf16.mxu0 %v5953_v15  ;;  %v9910_v53 = vpop.permute.xlu1 %5213 }
 0x44a   : > { %v5840_v52 = vpack.c.bf16 %v5289_v6, %v5285_v51  ;;  %v5364_v62 = vadd.f32 %v5363_v40, %v9885_v61  ;;  %6110 = vmatprep.subr.bf16.mxu1 %v5955_v44  ;;  %6058 = vmatpush1.bf16.msra.mxu0 %v5952_v8  ;;  %v9912_v24 = vpop.permute.xlu0 %5208 }
 0x44b   : > { %v5842_v2 = vpack.c.bf16 %v5362_v33, %v5358_v47  ;;  %v5841_v14 = vpack.c.bf16 %v5291_v13, %v5287_v23  ;;  %6111 = vmatpush1.bf16.msra.mxu1 %v5954_v10 }
 0x44c   : > { %v5904_v7 = vmul.bf16 1017396388, %v5840_v52  ;;  %v5843_v56 = vpack.c.bf16 %v5364_v62, %v5360_v16 }
 0x44d   : > { %v5906_v43 = vmul.bf16 1017396388, %v5842_v2  ;;  %v5905_v32 = vmul.bf16 1017396388, %v5841_v14  ;;  %v5294_v45 = vpop.f32.mrb[136].mxu0 }
 0x44e   : > { %v5907_v39 = vmul.bf16 1017396388, %v5843_v56  ;;  %v5367_v31 = vpop.f32.mrb[136].mxu1  ;;  %v5296_v34 = vpop.f32.mrb[137].mxu0  ;;  %v5968_v28 = vmax.bf16 %v5904_v7, %v5840_v52  ;;  %v5295_v26 = vadd.f32 %v5294_v45, %v9900_v49 }
 0x44f   : > { %v5369_v18 = vpop.f32.mrb[137].mxu1  ;;  %v5298_v27 = vpop.f32.mrb[138].mxu0  ;;  %v5969_v48 = vmax.bf16 %v5905_v32, %v5841_v14  ;;  %v5970_v19 = vmax.bf16 %v5906_v43, %v5842_v2  ;;  %v5368_v35 = vadd.f32 %v5367_v31, %v9900_v49  ;;  %v5297_v58 = vadd.f32 %v5296_v34, %v9900_v49 }
 0x450   : > { %v5299_v21 = vadd.f32 %v5298_v27, %v9898_v50  ;;  %v5371_v1 = vpop.f32.mrb[138].mxu1  ;;  %v5300_v5 = vpop.f32.mrb[139].mxu0  ;;  %v5971_v3 = vmax.bf16 %v5907_v39, %v5843_v56  ;;  %v5370_v25 = vadd.f32 %v5369_v18, %v9900_v49  ;;  %v9925_v27 = vld [vmem:[%s10319_s5] sm:$0xff]  }
 0x451   : > { %v5372_v59 = vadd.f32 %v5371_v1, %v9898_v50  ;;  %v5301_v11 = vadd.f32 %v5300_v5, %v9898_v50  ;;  %v5373_v17 = vpop.f32.mrb[139].mxu1  ;;  %6059 = vmatprep.subr.bf16.mxu0 %v5969_v48  ;;  %v9936_v48 = vld [vmem:[%s10319_s5 + $0x8] sm:$0xff]  }
 0x452   : > { %v5856_v60 = vpack.c.bf16 %v5299_v21, %v5295_v26  ;;  %v5374_v41 = vadd.f32 %v5373_v17, %v9898_v50  ;;  %6112 = vmatprep.subr.bf16.mxu1 %v5971_v3  ;;  %6060 = vmatpush1.bf16.msra.mxu0 %v5968_v28 }
 0x453   : > { %v5858_v30 = vpack.c.bf16 %v5372_v59, %v5368_v35  ;;  %v5857_v29 = vpack.c.bf16 %v5301_v11, %v5297_v58  ;;  %6113 = vmatpush1.bf16.msra.mxu1 %v5970_v19 }
 0x454   : > { %v5920_v38 = vmul.bf16 1017396388, %v5856_v60  ;;  %v5859_v57 = vpack.c.bf16 %v5374_v41, %v5370_v25 }
 0x455   : > { %v5922_v22 = vmul.bf16 1017396388, %v5858_v30  ;;  %v5921_v46 = vmul.bf16 1017396388, %v5857_v29  ;;  %v5304_v20 = vpop.f32.mrb[140].mxu0 }
 0x456   : > { %v5923_v12 = vmul.bf16 1017396388, %v5859_v57  ;;  %v5377_v4 = vpop.f32.mrb[140].mxu1  ;;  %v5306_v8 = vpop.f32.mrb[141].mxu0  ;;  %v5984_v42 = vmax.bf16 %v5920_v38, %v5856_v60  ;;  %v5305_v6 = vadd.f32 %v5304_v20, %v9912_v24 }
 0x457   : > { %v5379_v54 = vpop.f32.mrb[141].mxu1  ;;  %v5308_v15 = vpop.f32.mrb[142].mxu0  ;;  %v5985_v10 = vmax.bf16 %v5921_v46, %v5857_v29  ;;  %v5986_v51 = vmax.bf16 %v5922_v22, %v5858_v30  ;;  %v5378_v23 = vadd.f32 %v5377_v4, %v9912_v24  ;;  %v5307_v33 = vadd.f32 %v5306_v8, %v9912_v24 }
 0x458   : > { %v5309_v63 = vadd.f32 %v5308_v15, %v9910_v53  ;;  %v5381_v9 = vpop.f32.mrb[142].mxu1  ;;  %v5310_v44 = vpop.f32.mrb[143].mxu0  ;;  %v5987_v47 = vmax.bf16 %v5923_v12, %v5859_v57  ;;  %v5380_v52 = vadd.f32 %v5379_v54, %v9912_v24 }
 0x459   : > { %v5382_v13 = vadd.f32 %v5381_v9, %v9910_v53  ;;  %v5311_v40 = vadd.f32 %v5310_v44, %v9910_v53  ;;  %v5383_v16 = vpop.f32.mrb[143].mxu1  ;;  %6061 = vmatprep.subr.bf16.mxu0 %v5985_v10 }
 0x45a   : > { %v5872_v62 = vpack.c.bf16 %v5309_v63, %v5305_v6  ;;  %v5384_v2 = vadd.f32 %v5383_v16, %v9910_v53  ;;  %6114 = vmatprep.subr.bf16.mxu1 %v5987_v47  ;;  %6062 = vmatpush1.bf16.msra.mxu0 %v5984_v42 }
 0x45b   : > { %v5874_v14 = vpack.c.bf16 %v5382_v13, %v5378_v23  ;;  %v5873_v7 = vpack.c.bf16 %v5311_v40, %v5307_v33  ;;  %6115 = vmatpush1.bf16.msra.mxu1 %v5986_v51 }
 0x45c   : > { %v5936_v56 = vmul.bf16 1017396388, %v5872_v62  ;;  %v5875_v43 = vpack.c.bf16 %v5384_v2, %v5380_v52 }
 0x45d   : > { %v5938_v32 = vmul.bf16 1017396388, %v5874_v14  ;;  %v5937_v45 = vmul.bf16 1017396388, %v5873_v7 }
 0x45e   : > { %v5939_v39 = vmul.bf16 1017396388, %v5875_v43  ;;  %v6000_v34 = vmax.bf16 %v5936_v56, %v5872_v62 }
 0x45f   : > { %v6001_v31 = vmax.bf16 %v5937_v45, %v5873_v7  ;;  %v6002_v18 = vmax.bf16 %v5938_v32, %v5874_v14 }
 0x460   : > { %v6003_v28 = vmax.bf16 %v5939_v39, %v5875_v43 }
 0x461   : > { %6063 = vmatprep.subr.bf16.mxu0 %v6001_v31 }
 0x462   : > { %6116 = vmatprep.subr.bf16.mxu1 %v6003_v28  ;;  %6064 = vmatpush1.bf16.msra.mxu0 %v6000_v34 }
 0x463   : > { %6117 = vmatpush1.bf16.msra.mxu1 %v6002_v18 }
 0x465   : > { %7602 = vmatmul.mubr.msk.bf16.vlgmr.msra.gmra.mrb[192].mxu0 %vm6050_vm2, %v9925_v27 }
 0x466   : > { %7604 = vmatmul.mubr.msk.bf16.vlgmr.msra.gmra.mrb[192].mxu1 %vm6050_vm2, %v9925_v27  ;;  %6099 = vmatprep.mubr.bf16.mxu0 %v7735_v0 }
 0x467   : > { %6152 = vmatprep.mubr.bf16.mxu1 %v7735_v0 }
 0x46d   : > { %7603 = vmatmul.mubr.msk.bf16.gmra.mrb[196].mxu0 %vm6050_vm2, %v9936_v48 }
 0x46e   : > { %7605 = vmatmul.mubr.msk.bf16.gmra.mrb[196].mxu1 %vm6050_vm2, %v9936_v48  ;;  %6195 = vmatprep.mubr.bf16.mxu0 %v7735_v0 }
 0x46f   : > { %6248 = vmatprep.mubr.bf16.mxu1 %v7735_v0 }
 0x47d   : > { %v5420_v19 = vpop.f32.mrb[144].mxu0 }
 0x47e   : > { %v5493_v26 = vpop.f32.mrb[144].mxu1  ;;  %v5422_v21 = vpop.f32.mrb[145].mxu0  ;;  %v5421_v3 = vadd.f32 %v5420_v19, %v9872_v36 }
 0x47f   : > { %v5495_v1 = vpop.f32.mrb[145].mxu1  ;;  %v5424_v5 = vpop.f32.mrb[146].mxu0  ;;  %v5494_v11 = vadd.f32 %v5493_v26, %v9872_v36  ;;  %v5423_v17 = vadd.f32 %v5422_v21, %v9872_v36 }
 0x480   : > { %v5425_v35 = vadd.f32 %v5424_v5, %v9869_v37  ;;  %v5497_v58 = vpop.f32.mrb[146].mxu1  ;;  %v5426_v59 = vpop.f32.mrb[147].mxu0  ;;  %v5496_v30 = vadd.f32 %v5495_v1, %v9872_v36 }
 0x481   : > { %v5498_v25 = vadd.f32 %v5497_v58, %v9869_v37  ;;  %v5427_v60 = vadd.f32 %v5426_v59, %v9869_v37  ;;  %v5499_v41 = vpop.f32.mrb[147].mxu1 }
 0x482   : > { %v5828_v29 = vpack.c.bf16 %v5425_v35, %v5421_v3  ;;  %v5500_v38 = vadd.f32 %v5499_v41, %v9869_v37 }
 0x483   : > { %v5830_v57 = vpack.c.bf16 %v5498_v25, %v5494_v11  ;;  %v5829_v22 = vpack.c.bf16 %v5427_v60, %v5423_v17 }
 0x484   : > { %v5892_v46 = vmul.bf16 1017396388, %v5828_v29  ;;  %v5831_v20 = vpack.c.bf16 %v5500_v38, %v5496_v30 }
 0x485   : > { %v5894_v12 = vmul.bf16 1017396388, %v5830_v57  ;;  %v5893_v4 = vmul.bf16 1017396388, %v5829_v22  ;;  %v5430_v8 = vpop.f32.mrb[148].mxu0 }
 0x486   : > { %v5895_v42 = vmul.bf16 1017396388, %v5831_v20  ;;  %v5503_v54 = vpop.f32.mrb[148].mxu1  ;;  %v5432_v15 = vpop.f32.mrb[149].mxu0  ;;  %v5956_v10 = vmax.bf16 %v5892_v46, %v5828_v29  ;;  %v5431_v44 = vadd.f32 %v5430_v8, %v9888_v55 }
 0x487   : > { %v5505_v51 = vpop.f32.mrb[149].mxu1  ;;  %v5434_v6 = vpop.f32.mrb[150].mxu0  ;;  %v5957_v63 = vmax.bf16 %v5893_v4, %v5829_v22  ;;  %v5958_v9 = vmax.bf16 %v5894_v12, %v5830_v57  ;;  %v5504_v40 = vadd.f32 %v5503_v54, %v9888_v55  ;;  %v5433_v16 = vadd.f32 %v5432_v15, %v9888_v55 }
 0x488   : > { %v5435_v47 = vadd.f32 %v5434_v6, %v9885_v61  ;;  %v5507_v23 = vpop.f32.mrb[150].mxu1  ;;  %v5436_v33 = vpop.f32.mrb[151].mxu0  ;;  %v5959_v13 = vmax.bf16 %v5895_v42, %v5831_v20  ;;  %v5506_v14 = vadd.f32 %v5505_v51, %v9888_v55 }
 0x489   : > { %v5508_v52 = vadd.f32 %v5507_v23, %v9885_v61  ;;  %v5437_v62 = vadd.f32 %v5436_v33, %v9885_v61  ;;  %v5509_v2 = vpop.f32.mrb[151].mxu1  ;;  %6163 = vmatprep.subr.bf16.mxu0 %v5957_v63 }
 0x48a   : > { %v5844_v7 = vpack.c.bf16 %v5435_v47, %v5431_v44  ;;  %v5510_v56 = vadd.f32 %v5509_v2, %v9885_v61  ;;  %6216 = vmatprep.subr.bf16.mxu1 %v5959_v13  ;;  %6164 = vmatpush1.bf16.msra.mxu0 %v5956_v10 }
 0x48b   : > { %v5846_v43 = vpack.c.bf16 %v5508_v52, %v5504_v40  ;;  %v5845_v32 = vpack.c.bf16 %v5437_v62, %v5433_v16  ;;  %6217 = vmatpush1.bf16.msra.mxu1 %v5958_v9 }
 0x48c   : > { %v5908_v45 = vmul.bf16 1017396388, %v5844_v7  ;;  %v5847_v39 = vpack.c.bf16 %v5510_v56, %v5506_v14 }
 0x48d   : > { %v5910_v31 = vmul.bf16 1017396388, %v5846_v43  ;;  %v5909_v34 = vmul.bf16 1017396388, %v5845_v32  ;;  %v5440_v28 = vpop.f32.mrb[152].mxu0 }
 0x48e   : > { %v5911_v18 = vmul.bf16 1017396388, %v5847_v39  ;;  %v5513_v19 = vpop.f32.mrb[152].mxu1  ;;  %v5442_v26 = vpop.f32.mrb[153].mxu0  ;;  %v5972_v21 = vmax.bf16 %v5908_v45, %v5844_v7  ;;  %v5441_v58 = vadd.f32 %v5440_v28, %v9900_v49 }
 0x48f   : > { %v5515_v1 = vpop.f32.mrb[153].mxu1  ;;  %v5444_v5 = vpop.f32.mrb[154].mxu0  ;;  %v5973_v3 = vmax.bf16 %v5909_v34, %v5845_v32  ;;  %v5974_v35 = vmax.bf16 %v5910_v31, %v5846_v43  ;;  %v5514_v60 = vadd.f32 %v5513_v19, %v9900_v49  ;;  %v5443_v41 = vadd.f32 %v5442_v26, %v9900_v49 }
 0x490   : > { %v5445_v59 = vadd.f32 %v5444_v5, %v9898_v50  ;;  %v5517_v11 = vpop.f32.mrb[154].mxu1  ;;  %v5446_v17 = vpop.f32.mrb[155].mxu0  ;;  %v5975_v25 = vmax.bf16 %v5911_v18, %v5847_v39  ;;  %v5516_v57 = vadd.f32 %v5515_v1, %v9900_v49 }
 0x491   : > { %v5518_v30 = vadd.f32 %v5517_v11, %v9898_v50  ;;  %v5447_v29 = vadd.f32 %v5446_v17, %v9898_v50  ;;  %v5519_v38 = vpop.f32.mrb[155].mxu1  ;;  %6165 = vmatprep.subr.bf16.mxu0 %v5973_v3 }
 0x492   : > { %v5860_v22 = vpack.c.bf16 %v5445_v59, %v5441_v58  ;;  %v5520_v46 = vadd.f32 %v5519_v38, %v9898_v50  ;;  %6218 = vmatprep.subr.bf16.mxu1 %v5975_v25  ;;  %6166 = vmatpush1.bf16.msra.mxu0 %v5972_v21 }
 0x493   : > { %v5862_v20 = vpack.c.bf16 %v5518_v30, %v5514_v60  ;;  %v5861_v12 = vpack.c.bf16 %v5447_v29, %v5443_v41  ;;  %6219 = vmatpush1.bf16.msra.mxu1 %v5974_v35 }
 0x494   : > { %v5924_v4 = vmul.bf16 1017396388, %v5860_v22  ;;  %v5863_v8 = vpack.c.bf16 %v5520_v46, %v5516_v57 }
 0x495   : > { %v5926_v42 = vmul.bf16 1017396388, %v5862_v20  ;;  %v5925_v54 = vmul.bf16 1017396388, %v5861_v12  ;;  %v5450_v15 = vpop.f32.mrb[156].mxu0 }
 0x496   : > { %v5927_v10 = vmul.bf16 1017396388, %v5863_v8  ;;  %v5523_v51 = vpop.f32.mrb[156].mxu1  ;;  %v5452_v6 = vpop.f32.mrb[157].mxu0  ;;  %v5988_v63 = vmax.bf16 %v5924_v4, %v5860_v22  ;;  %v5451_v33 = vadd.f32 %v5450_v15, %v9912_v24 }
 0x497   : > { %v5525_v9 = vpop.f32.mrb[157].mxu1  ;;  %v5454_v44 = vpop.f32.mrb[158].mxu0  ;;  %v5989_v47 = vmax.bf16 %v5925_v54, %v5861_v12  ;;  %v5990_v23 = vmax.bf16 %v5926_v42, %v5862_v20  ;;  %v5524_v62 = vadd.f32 %v5523_v51, %v9912_v24  ;;  %v5453_v2 = vadd.f32 %v5452_v6, %v9912_v24 }
 0x498   : > { %v5455_v13 = vadd.f32 %v5454_v44, %v9910_v53  ;;  %v5527_v40 = vpop.f32.mrb[158].mxu1  ;;  %v5456_v16 = vpop.f32.mrb[159].mxu0  ;;  %v5991_v52 = vmax.bf16 %v5927_v10, %v5863_v8  ;;  %v5526_v43 = vadd.f32 %v5525_v9, %v9912_v24 }
 0x499   : > { %v5528_v14 = vadd.f32 %v5527_v40, %v9910_v53  ;;  %v5457_v7 = vadd.f32 %v5456_v16, %v9910_v53  ;;  %v5529_v56 = vpop.f32.mrb[159].mxu1  ;;  %6167 = vmatprep.subr.bf16.mxu0 %v5989_v47 }
 0x49a   : > { %v5876_v32 = vpack.c.bf16 %v5455_v13, %v5451_v33  ;;  %v5530_v45 = vadd.f32 %v5529_v56, %v9910_v53  ;;  %6220 = vmatprep.subr.bf16.mxu1 %v5991_v52  ;;  %6168 = vmatpush1.bf16.msra.mxu0 %v5988_v63 }
 0x49b   : > { %v5878_v39 = vpack.c.bf16 %v5528_v14, %v5524_v62  ;;  %v5877_v31 = vpack.c.bf16 %v5457_v7, %v5453_v2  ;;  %6221 = vmatpush1.bf16.msra.mxu1 %v5990_v23 }
 0x49c   : > { %v5940_v34 = vmul.bf16 1017396388, %v5876_v32  ;;  %v5879_v28 = vpack.c.bf16 %v5530_v45, %v5526_v43 }
 0x49d   : > { %v5942_v18 = vmul.bf16 1017396388, %v5878_v39  ;;  %v5941_v19 = vmul.bf16 1017396388, %v5877_v31 }
 0x49e   : > { %v5943_v26 = vmul.bf16 1017396388, %v5879_v28  ;;  %v6004_v1 = vmax.bf16 %v5940_v34, %v5876_v32 }
 0x49f   : > { %v6005_v21 = vmax.bf16 %v5941_v19, %v5877_v31  ;;  %v6006_v3 = vmax.bf16 %v5942_v18, %v5878_v39 }
 0x4a0   : > { %v6007_v5 = vmax.bf16 %v5943_v26, %v5879_v28 }
 0x4a1   : > { %6169 = vmatprep.subr.bf16.mxu0 %v6005_v21 }
 0x4a2   : > { %6222 = vmatprep.subr.bf16.mxu1 %v6007_v5  ;;  %6170 = vmatpush1.bf16.msra.mxu0 %v6004_v1 }
 0x4a3   : > { %6223 = vmatpush1.bf16.msra.mxu1 %v6006_v3 }
 0x4a5   : > { %7606 = vmatmul.mubr.msk.bf16.vlgmr.msra.gmra.mrb[200].mxu0 %vm6050_vm2, %v9925_v27 }
 0x4a6   : > { %7608 = vmatmul.mubr.msk.bf16.vlgmr.msra.gmra.mrb[200].mxu1 %vm6050_vm2, %v9925_v27  ;;  %6205 = vmatprep.mubr.bf16.mxu0 %v7735_v0 }
 0x4a7   : > { %6258 = vmatprep.mubr.bf16.mxu1 %v7735_v0 }
 0x4ad   : > { %7607 = vmatmul.mubr.msk.bf16.gmra.mrb[204].mxu0 %vm6050_vm2, %v9936_v48 }
 0x4ae   : > { %7609 = vmatmul.mubr.msk.bf16.gmra.mrb[204].mxu1 %vm6050_vm2, %v9936_v48  ;;  %6301 = vmatprep.mubr.bf16.mxu0 %v7735_v0 }
 0x4af   : > { %6354 = vmatprep.mubr.bf16.mxu1 %v7735_v0 }
 0x4bd   : > { %v5566_v35 = vpop.f32.mrb[160].mxu0 }
 0x4be   : > { %v5639_v58 = vpop.f32.mrb[160].mxu1  ;;  %v5568_v59 = vpop.f32.mrb[161].mxu0  ;;  %v5567_v25 = vadd.f32 %v5566_v35, %v9872_v36 }
 0x4bf   : > { %v5641_v11 = vpop.f32.mrb[161].mxu1  ;;  %v5570_v17 = vpop.f32.mrb[162].mxu0  ;;  %v5640_v29 = vadd.f32 %v5639_v58, %v9872_v36  ;;  %v5569_v38 = vadd.f32 %v5568_v59, %v9872_v36 }
 0x4c0   : > { %v5571_v60 = vadd.f32 %v5570_v17, %v9869_v37  ;;  %v5643_v41 = vpop.f32.mrb[162].mxu1  ;;  %v5572_v30 = vpop.f32.mrb[163].mxu0  ;;  %v5642_v20 = vadd.f32 %v5641_v11, %v9872_v36 }
 0x4c1   : > { %v5644_v57 = vadd.f32 %v5643_v41, %v9869_v37  ;;  %v5573_v22 = vadd.f32 %v5572_v30, %v9869_v37  ;;  %v5645_v46 = vpop.f32.mrb[163].mxu1 }
 0x4c2   : > { %v5832_v12 = vpack.c.bf16 %v5571_v60, %v5567_v25  ;;  %v5646_v4 = vadd.f32 %v5645_v46, %v9869_v37 }
 0x4c3   : > { %v5834_v8 = vpack.c.bf16 %v5644_v57, %v5640_v29  ;;  %v5833_v42 = vpack.c.bf16 %v5573_v22, %v5569_v38 }
 0x4c4   : > { %v5896_v54 = vmul.bf16 1017396388, %v5832_v12  ;;  %v5835_v15 = vpack.c.bf16 %v5646_v4, %v5642_v20 }
 0x4c5   : > { %v5898_v10 = vmul.bf16 1017396388, %v5834_v8  ;;  %v5897_v51 = vmul.bf16 1017396388, %v5833_v42  ;;  %v5576_v6 = vpop.f32.mrb[164].mxu0 }
 0x4c6   : > { %v5899_v63 = vmul.bf16 1017396388, %v5835_v15  ;;  %v5649_v9 = vpop.f32.mrb[164].mxu1  ;;  %v5578_v44 = vpop.f32.mrb[165].mxu0  ;;  %v5960_v47 = vmax.bf16 %v5896_v54, %v5832_v12  ;;  %v5577_v16 = vadd.f32 %v5576_v6, %v9888_v55 }
 0x4c7   : > { %v5651_v23 = vpop.f32.mrb[165].mxu1  ;;  %v5580_v33 = vpop.f32.mrb[166].mxu0  ;;  %v5961_v13 = vmax.bf16 %v5897_v51, %v5833_v42  ;;  %v5962_v40 = vmax.bf16 %v5898_v10, %v5834_v8  ;;  %v5650_v7 = vadd.f32 %v5649_v9, %v9888_v55  ;;  %v5579_v56 = vadd.f32 %v5578_v44, %v9888_v55 }
 0x4c8   : > { %v5581_v52 = vadd.f32 %v5580_v33, %v9885_v61  ;;  %v5653_v62 = vpop.f32.mrb[166].mxu1  ;;  %v5582_v2 = vpop.f32.mrb[167].mxu0  ;;  %v5963_v14 = vmax.bf16 %v5899_v63, %v5835_v15  ;;  %v5652_v39 = vadd.f32 %v5651_v23, %v9888_v55 }
 0x4c9   : > { %v5654_v43 = vadd.f32 %v5653_v62, %v9885_v61  ;;  %v5583_v32 = vadd.f32 %v5582_v2, %v9885_v61  ;;  %v5655_v45 = vpop.f32.mrb[167].mxu1  ;;  %6269 = vmatprep.subr.bf16.mxu0 %v5961_v13 }
 0x4ca   : > { %v5848_v31 = vpack.c.bf16 %v5581_v52, %v5577_v16  ;;  %v5656_v34 = vadd.f32 %v5655_v45, %v9885_v61  ;;  %6322 = vmatprep.subr.bf16.mxu1 %v5963_v14  ;;  %6270 = vmatpush1.bf16.msra.mxu0 %v5960_v47 }
 0x4cb   : > { %v5850_v28 = vpack.c.bf16 %v5654_v43, %v5650_v7  ;;  %v5849_v18 = vpack.c.bf16 %v5583_v32, %v5579_v56  ;;  %6323 = vmatpush1.bf16.msra.mxu1 %v5962_v40 }
 0x4cc   : > { %v5912_v19 = vmul.bf16 1017396388, %v5848_v31  ;;  %v5851_v26 = vpack.c.bf16 %v5656_v34, %v5652_v39 }
 0x4cd   : > { %v5914_v21 = vmul.bf16 1017396388, %v5850_v28  ;;  %v5913_v1 = vmul.bf16 1017396388, %v5849_v18  ;;  %v5586_v5 = vpop.f32.mrb[168].mxu0 }
 0x4ce   : > { %v5915_v3 = vmul.bf16 1017396388, %v5851_v26  ;;  %v5659_v35 = vpop.f32.mrb[168].mxu1  ;;  %v5588_v58 = vpop.f32.mrb[169].mxu0  ;;  %v5976_v59 = vmax.bf16 %v5912_v19, %v5848_v31  ;;  %v5587_v41 = vadd.f32 %v5586_v5, %v9900_v49 }
 0x4cf   : > { %v5661_v11 = vpop.f32.mrb[169].mxu1  ;;  %v5590_v17 = vpop.f32.mrb[170].mxu0  ;;  %v5977_v25 = vmax.bf16 %v5913_v1, %v5849_v18  ;;  %v5978_v60 = vmax.bf16 %v5914_v21, %v5850_v28  ;;  %v5660_v22 = vadd.f32 %v5659_v35, %v9900_v49  ;;  %v5589_v46 = vadd.f32 %v5588_v58, %v9900_v49 }
 0x4d0   : > { %v5591_v30 = vadd.f32 %v5590_v17, %v9898_v50  ;;  %v5663_v29 = vpop.f32.mrb[170].mxu1  ;;  %v5592_v38 = vpop.f32.mrb[171].mxu0  ;;  %v5979_v57 = vmax.bf16 %v5915_v3, %v5851_v26  ;;  %v5662_v8 = vadd.f32 %v5661_v11, %v9900_v49 }
 0x4d1   : > { %v5664_v20 = vadd.f32 %v5663_v29, %v9898_v50  ;;  %v5593_v12 = vadd.f32 %v5592_v38, %v9898_v50  ;;  %v5665_v4 = vpop.f32.mrb[171].mxu1  ;;  %6271 = vmatprep.subr.bf16.mxu0 %v5977_v25 }
 0x4d2   : > { %v5864_v42 = vpack.c.bf16 %v5591_v30, %v5587_v41  ;;  %v5666_v54 = vadd.f32 %v5665_v4, %v9898_v50  ;;  %6324 = vmatprep.subr.bf16.mxu1 %v5979_v57  ;;  %6272 = vmatpush1.bf16.msra.mxu0 %v5976_v59 }
 0x4d3   : > { %v5866_v15 = vpack.c.bf16 %v5664_v20, %v5660_v22  ;;  %v5865_v10 = vpack.c.bf16 %v5593_v12, %v5589_v46  ;;  %6325 = vmatpush1.bf16.msra.mxu1 %v5978_v60 }
 0x4d4   : > { %v5928_v51 = vmul.bf16 1017396388, %v5864_v42  ;;  %v5867_v6 = vpack.c.bf16 %v5666_v54, %v5662_v8 }
 0x4d5   : > { %v5930_v63 = vmul.bf16 1017396388, %v5866_v15  ;;  %v5929_v9 = vmul.bf16 1017396388, %v5865_v10  ;;  %v5596_v44 = vpop.f32.mrb[172].mxu0 }
 0x4d6   : > { %v5931_v47 = vmul.bf16 1017396388, %v5867_v6  ;;  %v5669_v23 = vpop.f32.mrb[172].mxu1  ;;  %v5598_v33 = vpop.f32.mrb[173].mxu0  ;;  %v5992_v13 = vmax.bf16 %v5928_v51, %v5864_v42  ;;  %v5597_v2 = vadd.f32 %v5596_v44, %v9912_v24 }
 0x4d7   : > { %v5671_v40 = vpop.f32.mrb[173].mxu1  ;;  %v5600_v16 = vpop.f32.mrb[174].mxu0  ;;  %v5993_v52 = vmax.bf16 %v5929_v9, %v5865_v10  ;;  %v5994_v62 = vmax.bf16 %v5930_v63, %v5866_v15  ;;  %v5670_v32 = vadd.f32 %v5669_v23, %v9912_v24  ;;  %v5599_v45 = vadd.f32 %v5598_v33, %v9912_v24 }
 0x4d8   : > { %v5601_v14 = vadd.f32 %v5600_v16, %v9910_v53  ;;  %v5673_v7 = vpop.f32.mrb[174].mxu1  ;;  %v5602_v56 = vpop.f32.mrb[175].mxu0  ;;  %v5995_v43 = vmax.bf16 %v5931_v47, %v5867_v6  ;;  %v5672_v28 = vadd.f32 %v5671_v40, %v9912_v24 }
 0x4d9   : > { %v5674_v39 = vadd.f32 %v5673_v7, %v9910_v53  ;;  %v5603_v31 = vadd.f32 %v5602_v56, %v9910_v53  ;;  %v5675_v34 = vpop.f32.mrb[175].mxu1  ;;  %6273 = vmatprep.subr.bf16.mxu0 %v5993_v52 }
 0x4da   : > { %v5880_v18 = vpack.c.bf16 %v5601_v14, %v5597_v2  ;;  %v5676_v19 = vadd.f32 %v5675_v34, %v9910_v53  ;;  %6326 = vmatprep.subr.bf16.mxu1 %v5995_v43  ;;  %6274 = vmatpush1.bf16.msra.mxu0 %v5992_v13 }
 0x4db   : > { %v5882_v26 = vpack.c.bf16 %v5674_v39, %v5670_v32  ;;  %v5881_v21 = vpack.c.bf16 %v5603_v31, %v5599_v45  ;;  %6327 = vmatpush1.bf16.msra.mxu1 %v5994_v62 }
 0x4dc   : > { %v5944_v1 = vmul.bf16 1017396388, %v5880_v18  ;;  %v5883_v5 = vpack.c.bf16 %v5676_v19, %v5672_v28 }
 0x4dd   : > { %v5946_v3 = vmul.bf16 1017396388, %v5882_v26  ;;  %v5945_v35 = vmul.bf16 1017396388, %v5881_v21 }
 0x4de   : > { %v5947_v58 = vmul.bf16 1017396388, %v5883_v5  ;;  %v6008_v11 = vmax.bf16 %v5944_v1, %v5880_v18 }
 0x4df   : > { %v6009_v59 = vmax.bf16 %v5945_v35, %v5881_v21  ;;  %v6010_v25 = vmax.bf16 %v5946_v3, %v5882_v26 }
 0x4e0   : > { %v6011_v17 = vmax.bf16 %v5947_v58, %v5883_v5 }
 0x4e1   : > { %6275 = vmatprep.subr.bf16.mxu0 %v6009_v59 }
 0x4e2   : > { %6328 = vmatprep.subr.bf16.mxu1 %v6011_v17  ;;  %6276 = vmatpush1.bf16.msra.mxu0 %v6008_v11 }
 0x4e3   : > { %6329 = vmatpush1.bf16.msra.mxu1 %v6010_v25 }
 0x4e5   : > { %7610 = vmatmul.mubr.msk.bf16.vlgmr.msra.gmra.mrb[208].mxu0 %vm6050_vm2, %v9925_v27 }
 0x4e6   : > { %7612 = vmatmul.mubr.msk.bf16.vlgmr.msra.gmra.mrb[208].mxu1 %vm6050_vm2, %v9925_v27  ;;  %6311 = vmatprep.mubr.bf16.mxu0 %v7735_v0 }
 0x4e7   : > { %6364 = vmatprep.mubr.bf16.mxu1 %v7735_v0 }
 0x4ed   : > { %7611 = vmatmul.mubr.msk.bf16.gmra.mrb[212].mxu0 %vm6050_vm2, %v9936_v48 }
 0x4ee   : > { %7613 = vmatmul.mubr.msk.bf16.gmra.mrb[212].mxu1 %vm6050_vm2, %v9936_v48  ;;  %6407 = vmatprep.mubr.bf16.mxu0 %v7735_v0 }
 0x4ef   : > { %6460 = vmatprep.mubr.bf16.mxu1 %v7735_v0 }
 0x4fd   : > { %v5712_v60 = vpop.f32.mrb[176].mxu0 }
 0x4fe   : > { %v5785_v41 = vpop.f32.mrb[176].mxu1  ;;  %v5714_v30 = vpop.f32.mrb[177].mxu0  ;;  %v5713_v57 = vadd.f32 %v5712_v60, %v9872_v36 }
 0x4ff   : > { %v5787_v29 = vpop.f32.mrb[177].mxu1  ;;  %v5716_v38 = vpop.f32.mrb[178].mxu0  ;;  %v5786_v12 = vadd.f32 %v5785_v41, %v9872_v36  ;;  %v5715_v4 = vadd.f32 %v5714_v30, %v9872_v36 }
 0x500   : > { %v5717_v22 = vadd.f32 %v5716_v38, %v9869_v37  ;;  %v5789_v46 = vpop.f32.mrb[178].mxu1  ;;  %v5718_v20 = vpop.f32.mrb[179].mxu0  ;;  %v5788_v15 = vadd.f32 %v5787_v29, %v9872_v36 }
 0x501   : > { %v5790_v8 = vadd.f32 %v5789_v46, %v9869_v37  ;;  %v5719_v42 = vadd.f32 %v5718_v20, %v9869_v37  ;;  %v5791_v54 = vpop.f32.mrb[179].mxu1 }
 0x502   : > { %v5836_v10 = vpack.c.bf16 %v5717_v22, %v5713_v57  ;;  %v5792_v51 = vadd.f32 %v5791_v54, %v9869_v37 }
 0x503   : > { %v5838_v6 = vpack.c.bf16 %v5790_v8, %v5786_v12  ;;  %v5837_v63 = vpack.c.bf16 %v5719_v42, %v5715_v4 }
 0x504   : > { %v5900_v9 = vmul.bf16 1017396388, %v5836_v10  ;;  %v5839_v44 = vpack.c.bf16 %v5792_v51, %v5788_v15 }
 0x505   : > { %v5902_v47 = vmul.bf16 1017396388, %v5838_v6  ;;  %v5901_v23 = vmul.bf16 1017396388, %v5837_v63  ;;  %v5722_v33 = vpop.f32.mrb[180].mxu0 }
 0x506   : > { %v5903_v13 = vmul.bf16 1017396388, %v5839_v44  ;;  %v5795_v40 = vpop.f32.mrb[180].mxu1  ;;  %v5724_v16 = vpop.f32.mrb[181].mxu0  ;;  %v5964_v52 = vmax.bf16 %v5900_v9, %v5836_v10  ;;  %v5723_v36 = vadd.f32 %v5722_v33, %v9888_v55 }
 0x507   : > { %v5797_v62 = vpop.f32.mrb[181].mxu1  ;;  %v5726_v2 = vpop.f32.mrb[182].mxu0  ;;  %v5965_v14 = vmax.bf16 %v5901_v23, %v5837_v63  ;;  %v5966_v7 = vmax.bf16 %v5902_v47, %v5838_v6  ;;  %v5796_v45 = vadd.f32 %v5795_v40, %v9888_v55  ;;  %v5725_v39 = vadd.f32 %v5724_v16, %v9888_v55 }
 0x508   : > { %v5727_v56 = vadd.f32 %v5726_v2, %v9885_v61  ;;  %v5799_v37 = vpop.f32.mrb[182].mxu1  ;;  %v5728_v43 = vpop.f32.mrb[183].mxu0  ;;  %v5967_v32 = vmax.bf16 %v5903_v13, %v5839_v44  ;;  %v5798_v18 = vadd.f32 %v5797_v62, %v9888_v55 }
 0x509   : > { %v5800_v31 = vadd.f32 %v5799_v37, %v9885_v61  ;;  %v5729_v34 = vadd.f32 %v5728_v43, %v9885_v61  ;;  %v5801_v28 = vpop.f32.mrb[183].mxu1  ;;  %6375 = vmatprep.subr.bf16.mxu0 %v5965_v14 }
 0x50a   : > { %v5852_v19 = vpack.c.bf16 %v5727_v56, %v5723_v36  ;;  %v5802_v26 = vadd.f32 %v5801_v28, %v9885_v61  ;;  %6428 = vmatprep.subr.bf16.mxu1 %v5967_v32  ;;  %6376 = vmatpush1.bf16.msra.mxu0 %v5964_v52 }
 0x50b   : > { %v5854_v21 = vpack.c.bf16 %v5800_v31, %v5796_v45  ;;  %v5853_v1 = vpack.c.bf16 %v5729_v34, %v5725_v39  ;;  %6429 = vmatpush1.bf16.msra.mxu1 %v5966_v7 }
 0x50c   : > { %v5916_v5 = vmul.bf16 1017396388, %v5852_v19  ;;  %v5855_v3 = vpack.c.bf16 %v5802_v26, %v5798_v18 }
 0x50d   : > { %v5918_v35 = vmul.bf16 1017396388, %v5854_v21  ;;  %v5917_v58 = vmul.bf16 1017396388, %v5853_v1  ;;  %v5732_v59 = vpop.f32.mrb[184].mxu0 }
 0x50e   : > { %v5919_v11 = vmul.bf16 1017396388, %v5855_v3  ;;  %v5805_v17 = vpop.f32.mrb[184].mxu1  ;;  %v5734_v25 = vpop.f32.mrb[185].mxu0  ;;  %v5980_v60 = vmax.bf16 %v5916_v5, %v5852_v19  ;;  %v5733_v61 = vadd.f32 %v5732_v59, %v9900_v49 }
 0x50f   : > { %v5807_v41 = vpop.f32.mrb[185].mxu1  ;;  %v5736_v30 = vpop.f32.mrb[186].mxu0  ;;  %v5981_v55 = vmax.bf16 %v5917_v58, %v5853_v1  ;;  %v5982_v29 = vmax.bf16 %v5918_v35, %v5854_v21  ;;  %v5806_v20 = vadd.f32 %v5805_v17, %v9900_v49  ;;  %v5735_v12 = vadd.f32 %v5734_v25, %v9900_v49 }
 0x510   : > { %v5737_v38 = vadd.f32 %v5736_v30, %v9898_v50  ;;  %v5809_v57 = vpop.f32.mrb[186].mxu1  ;;  %v5738_v22 = vpop.f32.mrb[187].mxu0  ;;  %v5983_v46 = vmax.bf16 %v5919_v11, %v5855_v3  ;;  %v5808_v54 = vadd.f32 %v5807_v41, %v9900_v49 }
 0x511   : > { %v5810_v4 = vadd.f32 %v5809_v57, %v9898_v50  ;;  %v5739_v8 = vadd.f32 %v5738_v22, %v9898_v50  ;;  %v5811_v42 = vpop.f32.mrb[187].mxu1  ;;  %6377 = vmatprep.subr.bf16.mxu0 %v5981_v55 }
 0x512   : > { %v5868_v15 = vpack.c.bf16 %v5737_v38, %v5733_v61  ;;  %v5812_v10 = vadd.f32 %v5811_v42, %v9898_v50  ;;  %6430 = vmatprep.subr.bf16.mxu1 %v5983_v46  ;;  %6378 = vmatpush1.bf16.msra.mxu0 %v5980_v60 }
 0x513   : > { %v5870_v51 = vpack.c.bf16 %v5810_v4, %v5806_v20  ;;  %v5869_v6 = vpack.c.bf16 %v5739_v8, %v5735_v12  ;;  %6431 = vmatpush1.bf16.msra.mxu1 %v5982_v29 }
 0x514   : > { %v5932_v63 = vmul.bf16 1017396388, %v5868_v15  ;;  %v5871_v9 = vpack.c.bf16 %v5812_v10, %v5808_v54 }
 0x515   : > { %v5934_v44 = vmul.bf16 1017396388, %v5870_v51  ;;  %v5933_v47 = vmul.bf16 1017396388, %v5869_v6  ;;  %v5742_v23 = vpop.f32.mrb[188].mxu0 }
 0x516   : > { %v5935_v33 = vmul.bf16 1017396388, %v5871_v9  ;;  %v5815_v13 = vpop.f32.mrb[188].mxu1  ;;  %v5744_v40 = vpop.f32.mrb[189].mxu0  ;;  %v5996_v16 = vmax.bf16 %v5932_v63, %v5868_v15  ;;  %v5743_v50 = vadd.f32 %v5742_v23, %v9912_v24 }
 0x517   : > { %v5817_v52 = vpop.f32.mrb[189].mxu1  ;;  %v5746_v62 = vpop.f32.mrb[190].mxu0  ;;  %v5997_v49 = vmax.bf16 %v5933_v47, %v5869_v6  ;;  %v5998_v2 = vmax.bf16 %v5934_v44, %v5870_v51  ;;  %v5816_v37 = vadd.f32 %v5815_v13, %v9912_v24  ;;  %v5745_v43 = vadd.f32 %v5744_v40, %v9912_v24 }
 0x518   : > { %v5747_v14 = vadd.f32 %v5746_v62, %v9910_v53  ;;  %v5819_v7 = vpop.f32.mrb[190].mxu1  ;;  %v5748_v36 = vpop.f32.mrb[191].mxu0  ;;  %v5999_v56 = vmax.bf16 %v5935_v33, %v5871_v9  ;;  %v5818_v31 = vadd.f32 %v5817_v52, %v9912_v24 }
 0x519   : > { %v5820_v32 = vadd.f32 %v5819_v7, %v9910_v53  ;;  %v5749_v45 = vadd.f32 %v5748_v36, %v9910_v53  ;;  %v5821_v39 = vpop.f32.mrb[191].mxu1  ;;  %6379 = vmatprep.subr.bf16.mxu0 %v5997_v49  ;;  %v10078_v24 = vpop.permute.xlu0 %6022 }
 0x51a   : > { %v5884_v34 = vpack.c.bf16 %v5747_v14, %v5743_v50  ;;  %v5822_v28 = vadd.f32 %v5821_v39, %v9910_v53  ;;  %6432 = vmatprep.subr.bf16.mxu1 %v5999_v56  ;;  %6380 = vmatpush1.bf16.msra.mxu0 %v5996_v16  ;;  %v10076_v53 = vpop.permute.xlu1 %6027 }
 0x51b   : > { %v5886_v18 = vpack.c.bf16 %v5820_v32, %v5816_v37  ;;  %v5885_v19 = vpack.c.bf16 %v5749_v45, %v5745_v43  ;;  %6433 = vmatpush1.bf16.msra.mxu1 %v5998_v2 }
 0x51c   : > { %v5948_v26 = vmul.bf16 1017396388, %v5884_v34  ;;  %v5887_v21 = vpack.c.bf16 %v5822_v28, %v5818_v31 }
 0x51d   : > { %v5950_v1 = vmul.bf16 1017396388, %v5886_v18  ;;  %v5949_v5 = vmul.bf16 1017396388, %v5885_v19  ;;  %v10090_v51 = vpop.permute.xlu0 %6032 }
 0x51e   : > { %v5951_v3 = vmul.bf16 1017396388, %v5887_v21  ;;  %v6012_v58 = vmax.bf16 %v5948_v26, %v5884_v34  ;;  %v10088_v54 = vpop.permute.xlu1 %6037 }
 0x51f   : > { %v6013_v35 = vmax.bf16 %v5949_v5, %v5885_v19  ;;  %v6014_v11 = vmax.bf16 %v5950_v1, %v5886_v18 }
 0x520   : > { %v6015_v59 = vmax.bf16 %v5951_v3, %v5887_v21 }
 0x521   : > { %6381 = vmatprep.subr.bf16.mxu0 %v6013_v35 }
 0x522   : > { %6434 = vmatprep.subr.bf16.mxu1 %v6015_v59  ;;  %6382 = vmatpush1.bf16.msra.mxu0 %v6012_v58  ;;  %v10103_v58 = vld [vmem:[%s10320_s6] sm:$0xff]  }
 0x523   : > { %6435 = vmatpush1.bf16.msra.mxu1 %v6014_v11 }
 0x525   : > { %7614 = vmatmul.mubr.msk.bf16.vlgmr.msra.gmra.mrb[216].mxu0 %vm6050_vm2, %v9925_v27 }
 0x526   : > { %7616 = vmatmul.mubr.msk.bf16.vlgmr.msra.gmra.mrb[216].mxu1 %vm6050_vm2, %v9925_v27  ;;  %6417 = vmatprep.mubr.bf16.mxu0 %v7735_v0 }
 0x527   : > { %6470 = vmatprep.mubr.bf16.mxu1 %v7735_v0 }
 0x52d   : > { %7615 = vmatmul.mubr.msk.bf16.gmra.mrb[220].mxu0 %vm6050_vm2, %v9936_v48 }
 0x52e   : > { %7617 = vmatmul.mubr.msk.bf16.gmra.mrb[220].mxu1 %vm6050_vm2, %v9936_v48  ;;  %6630 = vmatprep.mubr.bf16.mxu0 %v7735_v0 }
 0x52f   : > { %6673 = vmatprep.mubr.bf16.mxu1 %v7735_v0 }
 0x538   : > { %v6091_v17 = vpop.f32.mrb[192].mxu0 }
 0x539   : > { %v6144_v27 = vpop.f32.mrb[192].mxu1  ;;  %v6093_v25 = vpop.f32.mrb[193].mxu0  ;;  %v6092_v30 = vadd.f32 %v6091_v17, %v10078_v24 }
 0x53a   : > { %v6146_v60 = vpop.f32.mrb[193].mxu1  ;;  %v6095_v41 = vpop.f32.mrb[194].mxu0  ;;  %v6145_v48 = vadd.f32 %v6144_v27, %v10078_v24  ;;  %v6094_v38 = vadd.f32 %v6093_v25, %v10078_v24 }
 0x53b   : > { %v6096_v55 = vadd.f32 %v6095_v41, %v10076_v53  ;;  %v6148_v29 = vpop.f32.mrb[194].mxu1  ;;  %v6097_v61 = vpop.f32.mrb[195].mxu0  ;;  %v6147_v20 = vadd.f32 %v6146_v60, %v10078_v24 }
 0x53c   : > { %v6149_v57 = vadd.f32 %v6148_v29, %v10076_v53  ;;  %v6098_v22 = vadd.f32 %v6097_v61, %v10076_v53  ;;  %v6150_v46 = vpop.f32.mrb[195].mxu1 }
 0x53d   : > { %v6481_v12 = vpack.c.bf16 %v6096_v55, %v6092_v30  ;;  %v6151_v4 = vadd.f32 %v6150_v46, %v10076_v53 }
 0x53e   : > { %v6483_v8 = vpack.c.bf16 %v6149_v57, %v6145_v48  ;;  %v6482_v42 = vpack.c.bf16 %v6098_v22, %v6094_v38 }
 0x53f   : > { %v6513_v15 = vmul.bf16 1017396388, %v6481_v12  ;;  %v6484_v10 = vpack.c.bf16 %v6151_v4, %v6147_v20 }
 0x540   : > { %v6515_v6 = vmul.bf16 1017396388, %v6483_v8  ;;  %v6514_v63 = vmul.bf16 1017396388, %v6482_v42  ;;  %v6101_v9 = vpop.f32.mrb[196].mxu0 }
 0x541   : > { %v6516_v44 = vmul.bf16 1017396388, %v6484_v10  ;;  %v6154_v47 = vpop.f32.mrb[196].mxu1  ;;  %v6103_v23 = vpop.f32.mrb[197].mxu0  ;;  %v6545_v33 = vmax.bf16 %v6513_v15, %v6481_v12  ;;  %v6102_v62 = vadd.f32 %v6101_v9, %v10090_v51 }
 0x542   : > { %v6156_v13 = vpop.f32.mrb[197].mxu1  ;;  %v6105_v40 = vpop.f32.mrb[198].mxu0  ;;  %v6546_v16 = vmax.bf16 %v6514_v63, %v6482_v42  ;;  %v6547_v52 = vmax.bf16 %v6515_v6, %v6483_v8  ;;  %v6155_v7 = vadd.f32 %v6154_v47, %v10090_v51  ;;  %v6104_v36 = vadd.f32 %v6103_v23, %v10090_v51 }
 0x543   : > { %v6106_v49 = vadd.f32 %v6105_v40, %v10088_v54  ;;  %v6158_v2 = vpop.f32.mrb[198].mxu1  ;;  %v6107_v50 = vpop.f32.mrb[199].mxu0  ;;  %v6548_v14 = vmax.bf16 %v6516_v44, %v6484_v10  ;;  %v6157_v32 = vadd.f32 %v6156_v13, %v10090_v51 }
 0x544   : > { %v6159_v56 = vadd.f32 %v6158_v2, %v10088_v54  ;;  %v6108_v37 = vadd.f32 %v6107_v50, %v10088_v54  ;;  %v6160_v43 = vpop.f32.mrb[199].mxu1  ;;  %6598 = vmatprep.subr.bf16.mxu0 %v6546_v16 }
 0x545   : > { %v6497_v45 = vpack.c.bf16 %v6106_v49, %v6102_v62  ;;  %v6161_v39 = vadd.f32 %v6160_v43, %v10088_v54  ;;  %6641 = vmatprep.subr.bf16.mxu1 %v6548_v14  ;;  %6599 = vmatpush1.bf16.msra.mxu0 %v6545_v33 }
 0x546   : > { %v6499_v31 = vpack.c.bf16 %v6159_v56, %v6155_v7  ;;  %v6498_v34 = vpack.c.bf16 %v6108_v37, %v6104_v36  ;;  %6642 = vmatpush1.bf16.msra.mxu1 %v6547_v52 }
 0x547   : > { %v6529_v28 = vmul.bf16 1017396388, %v6497_v45  ;;  %v6500_v18 = vpack.c.bf16 %v6161_v39, %v6157_v32 }
 0x548   : > { %v6531_v19 = vmul.bf16 1017396388, %v6499_v31  ;;  %v6530_v26 = vmul.bf16 1017396388, %v6498_v34 }
 0x549   : > { %v6532_v21 = vmul.bf16 1017396388, %v6500_v18  ;;  %v6561_v5 = vmax.bf16 %v6529_v28, %v6497_v45 }
 0x54a   : > { %v6562_v1 = vmax.bf16 %v6530_v26, %v6498_v34  ;;  %v6563_v35 = vmax.bf16 %v6531_v19, %v6499_v31 }
 0x54b   : > { %v6564_v3 = vmax.bf16 %v6532_v21, %v6500_v18 }
 0x54c   : > { %6600 = vmatprep.subr.bf16.mxu0 %v6562_v1 }
 0x54d   : > { %6643 = vmatprep.subr.bf16.mxu1 %v6564_v3  ;;  %6601 = vmatpush1.bf16.msra.mxu0 %v6561_v5 }
 0x54e   : > { %6644 = vmatpush1.bf16.msra.mxu1 %v6563_v35 }
 0x550   : > { %7619 = vmatmul.mubr.msk.bf16.vlgmr.msra.gmra.mrb[224].mxu0 %vm6594_vm3, %v10103_v58 }
 0x551   : > { %7620 = vmatmul.mubr.msk.bf16.vlgmr.msra.gmra.mrb[224].mxu1 %vm6594_vm3, %v10103_v58  ;;  %6716 = vmatprep.mubr.bf16.mxu0 %v7735_v0 }
 0x552   : > { %6759 = vmatprep.mubr.bf16.mxu1 %v7735_v0 }
 0x578   : > { %v6197_v59 = vpop.f32.mrb[200].mxu0 }
 0x579   : > { %v6250_v11 = vpop.f32.mrb[200].mxu1  ;;  %v6199_v17 = vpop.f32.mrb[201].mxu0  ;;  %v6198_v60 = vadd.f32 %v6197_v59, %v10078_v24 }
 0x57a   : > { %v6252_v27 = vpop.f32.mrb[201].mxu1  ;;  %v6201_v25 = vpop.f32.mrb[202].mxu0  ;;  %v6251_v29 = vadd.f32 %v6250_v11, %v10078_v24  ;;  %v6200_v61 = vadd.f32 %v6199_v17, %v10078_v24 }
 0x57b   : > { %v6202_v41 = vadd.f32 %v6201_v25, %v10076_v53  ;;  %v6254_v30 = vpop.f32.mrb[202].mxu1  ;;  %v6203_v55 = vpop.f32.mrb[203].mxu0  ;;  %v6253_v22 = vadd.f32 %v6252_v27, %v10078_v24 }
 0x57c   : > { %v6255_v48 = vadd.f32 %v6254_v30, %v10076_v53  ;;  %v6204_v38 = vadd.f32 %v6203_v55, %v10076_v53  ;;  %v6256_v57 = vpop.f32.mrb[203].mxu1 }
 0x57d   : > { %v6485_v46 = vpack.c.bf16 %v6202_v41, %v6198_v60  ;;  %v6257_v20 = vadd.f32 %v6256_v57, %v10076_v53 }
 0x57e   : > { %v6487_v12 = vpack.c.bf16 %v6255_v48, %v6251_v29  ;;  %v6486_v4 = vpack.c.bf16 %v6204_v38, %v6200_v61 }
 0x57f   : > { %v6517_v8 = vmul.bf16 1017396388, %v6485_v46  ;;  %v6488_v42 = vpack.c.bf16 %v6257_v20, %v6253_v22 }
 0x580   : > { %v6519_v15 = vmul.bf16 1017396388, %v6487_v12  ;;  %v6518_v10 = vmul.bf16 1017396388, %v6486_v4  ;;  %v6207_v6 = vpop.f32.mrb[204].mxu0 }
 0x581   : > { %v6520_v63 = vmul.bf16 1017396388, %v6488_v42  ;;  %v6260_v9 = vpop.f32.mrb[204].mxu1  ;;  %v6209_v44 = vpop.f32.mrb[205].mxu0  ;;  %v6549_v47 = vmax.bf16 %v6517_v8, %v6485_v46  ;;  %v6208_v16 = vadd.f32 %v6207_v6, %v10090_v51 }
 0x582   : > { %v6262_v23 = vpop.f32.mrb[205].mxu1  ;;  %v6211_v33 = vpop.f32.mrb[206].mxu0  ;;  %v6550_v13 = vmax.bf16 %v6518_v10, %v6486_v4  ;;  %v6551_v40 = vmax.bf16 %v6519_v15, %v6487_v12  ;;  %v6261_v50 = vadd.f32 %v6260_v9, %v10090_v51  ;;  %v6210_v14 = vadd.f32 %v6209_v44, %v10090_v51 }
 0x583   : > { %v6212_v52 = vadd.f32 %v6211_v33, %v10088_v54  ;;  %v6264_v62 = vpop.f32.mrb[206].mxu1  ;;  %v6213_v49 = vpop.f32.mrb[207].mxu0  ;;  %v6552_v2 = vmax.bf16 %v6520_v63, %v6488_v42  ;;  %v6263_v37 = vadd.f32 %v6262_v23, %v10090_v51 }
 0x584   : > { %v6265_v7 = vadd.f32 %v6264_v62, %v10088_v54  ;;  %v6214_v36 = vadd.f32 %v6213_v49, %v10088_v54  ;;  %v6266_v56 = vpop.f32.mrb[207].mxu1  ;;  %6684 = vmatprep.subr.bf16.mxu0 %v6550_v13 }
 0x585   : > { %v6501_v43 = vpack.c.bf16 %v6212_v52, %v6208_v16  ;;  %v6267_v32 = vadd.f32 %v6266_v56, %v10088_v54  ;;  %6727 = vmatprep.subr.bf16.mxu1 %v6552_v2  ;;  %6685 = vmatpush1.bf16.msra.mxu0 %v6549_v47 }
 0x586   : > { %v6503_v45 = vpack.c.bf16 %v6265_v7, %v6261_v50  ;;  %v6502_v39 = vpack.c.bf16 %v6214_v36, %v6210_v14  ;;  %6728 = vmatpush1.bf16.msra.mxu1 %v6551_v40 }
 0x587   : > { %v6533_v31 = vmul.bf16 1017396388, %v6501_v43  ;;  %v6504_v34 = vpack.c.bf16 %v6267_v32, %v6263_v37 }
 0x588   : > { %v6535_v28 = vmul.bf16 1017396388, %v6503_v45  ;;  %v6534_v18 = vmul.bf16 1017396388, %v6502_v39 }
 0x589   : > { %v6536_v19 = vmul.bf16 1017396388, %v6504_v34  ;;  %v6565_v21 = vmax.bf16 %v6533_v31, %v6501_v43 }
 0x58a   : > { %v6566_v26 = vmax.bf16 %v6534_v18, %v6502_v39  ;;  %v6567_v5 = vmax.bf16 %v6535_v28, %v6503_v45 }
 0x58b   : > { %v6568_v1 = vmax.bf16 %v6536_v19, %v6504_v34 }
 0x58c   : > { %6686 = vmatprep.subr.bf16.mxu0 %v6566_v26 }
 0x58d   : > { %6729 = vmatprep.subr.bf16.mxu1 %v6568_v1  ;;  %6687 = vmatpush1.bf16.msra.mxu0 %v6565_v21 }
 0x58e   : > { %6730 = vmatpush1.bf16.msra.mxu1 %v6567_v5 }
 0x590   : > { %7621 = vmatmul.mubr.msk.bf16.vlgmr.msra.gmra.mrb[228].mxu0 %vm6594_vm3, %v10103_v58 }
 0x591   : > { %7622 = vmatmul.mubr.msk.bf16.vlgmr.msra.gmra.mrb[228].mxu1 %vm6594_vm3, %v10103_v58  ;;  %6802 = vmatprep.mubr.bf16.mxu0 %v7735_v0 }
 0x592   : > { %6845 = vmatprep.mubr.bf16.mxu1 %v7735_v0 }
 0x5b8   : > { %v6303_v3 = vpop.f32.mrb[208].mxu0 }
 0x5b9   : > { %v6356_v35 = vpop.f32.mrb[208].mxu1  ;;  %v6305_v59 = vpop.f32.mrb[209].mxu0  ;;  %v6304_v27 = vadd.f32 %v6303_v3, %v10078_v24 }
 0x5ba   : > { %v6358_v11 = vpop.f32.mrb[209].mxu1  ;;  %v6307_v17 = vpop.f32.mrb[210].mxu0  ;;  %v6357_v30 = vadd.f32 %v6356_v35, %v10078_v24  ;;  %v6306_v55 = vadd.f32 %v6305_v59, %v10078_v24 }
 0x5bb   : > { %v6308_v25 = vadd.f32 %v6307_v17, %v10076_v53  ;;  %v6360_v60 = vpop.f32.mrb[210].mxu1  ;;  %v6309_v41 = vpop.f32.mrb[211].mxu0  ;;  %v6359_v38 = vadd.f32 %v6358_v11, %v10078_v24 }
 0x5bc   : > { %v6361_v29 = vadd.f32 %v6360_v60, %v10076_v53  ;;  %v6310_v61 = vadd.f32 %v6309_v41, %v10076_v53  ;;  %v6362_v48 = vpop.f32.mrb[211].mxu1 }
 0x5bd   : > { %v6489_v57 = vpack.c.bf16 %v6308_v25, %v6304_v27  ;;  %v6363_v22 = vadd.f32 %v6362_v48, %v10076_v53 }
 0x5be   : > { %v6491_v46 = vpack.c.bf16 %v6361_v29, %v6357_v30  ;;  %v6490_v20 = vpack.c.bf16 %v6310_v61, %v6306_v55 }
 0x5bf   : > { %v6521_v12 = vmul.bf16 1017396388, %v6489_v57  ;;  %v6492_v4 = vpack.c.bf16 %v6363_v22, %v6359_v38 }
 0x5c0   : > { %v6523_v8 = vmul.bf16 1017396388, %v6491_v46  ;;  %v6522_v42 = vmul.bf16 1017396388, %v6490_v20  ;;  %v6313_v15 = vpop.f32.mrb[212].mxu0 }
 0x5c1   : > { %v6524_v10 = vmul.bf16 1017396388, %v6492_v4  ;;  %v6366_v6 = vpop.f32.mrb[212].mxu1  ;;  %v6315_v63 = vpop.f32.mrb[213].mxu0  ;;  %v6553_v9 = vmax.bf16 %v6521_v12, %v6489_v57  ;;  %v6314_v13 = vadd.f32 %v6313_v15, %v10090_v51 }
 0x5c2   : > { %v6368_v44 = vpop.f32.mrb[213].mxu1  ;;  %v6317_v47 = vpop.f32.mrb[214].mxu0  ;;  %v6554_v23 = vmax.bf16 %v6522_v42, %v6490_v20  ;;  %v6555_v33 = vmax.bf16 %v6523_v8, %v6491_v46  ;;  %v6367_v49 = vadd.f32 %v6366_v6, %v10090_v51  ;;  %v6316_v2 = vadd.f32 %v6315_v63, %v10090_v51 }
 0x5c3   : > { %v6318_v40 = vadd.f32 %v6317_v47, %v10088_v54  ;;  %v6370_v16 = vpop.f32.mrb[214].mxu1  ;;  %v6319_v52 = vpop.f32.mrb[215].mxu0  ;;  %v6556_v62 = vmax.bf16 %v6524_v10, %v6492_v4  ;;  %v6369_v36 = vadd.f32 %v6368_v44, %v10090_v51 }
 0x5c4   : > { %v6371_v50 = vadd.f32 %v6370_v16, %v10088_v54  ;;  %v6320_v14 = vadd.f32 %v6319_v52, %v10088_v54  ;;  %v6372_v7 = vpop.f32.mrb[215].mxu1  ;;  %6770 = vmatprep.subr.bf16.mxu0 %v6554_v23 }
 0x5c5   : > { %v6505_v56 = vpack.c.bf16 %v6318_v40, %v6314_v13  ;;  %v6373_v37 = vadd.f32 %v6372_v7, %v10088_v54  ;;  %6813 = vmatprep.subr.bf16.mxu1 %v6556_v62  ;;  %6771 = vmatpush1.bf16.msra.mxu0 %v6553_v9 }
 0x5c6   : > { %v6507_v43 = vpack.c.bf16 %v6371_v50, %v6367_v49  ;;  %v6506_v32 = vpack.c.bf16 %v6320_v14, %v6316_v2  ;;  %6814 = vmatpush1.bf16.msra.mxu1 %v6555_v33 }
 0x5c7   : > { %v6537_v45 = vmul.bf16 1017396388, %v6505_v56  ;;  %v6508_v39 = vpack.c.bf16 %v6373_v37, %v6369_v36 }
 0x5c8   : > { %v6539_v31 = vmul.bf16 1017396388, %v6507_v43  ;;  %v6538_v34 = vmul.bf16 1017396388, %v6506_v32 }
 0x5c9   : > { %v6540_v28 = vmul.bf16 1017396388, %v6508_v39  ;;  %v6569_v19 = vmax.bf16 %v6537_v45, %v6505_v56 }
 0x5ca   : > { %v6570_v18 = vmax.bf16 %v6538_v34, %v6506_v32  ;;  %v6571_v21 = vmax.bf16 %v6539_v31, %v6507_v43 }
 0x5cb   : > { %v6572_v26 = vmax.bf16 %v6540_v28, %v6508_v39 }
 0x5cc   : > { %6772 = vmatprep.subr.bf16.mxu0 %v6570_v18 }
 0x5cd   : > { %6815 = vmatprep.subr.bf16.mxu1 %v6572_v26  ;;  %6773 = vmatpush1.bf16.msra.mxu0 %v6569_v19 }
 0x5ce   : > { %6816 = vmatpush1.bf16.msra.mxu1 %v6571_v21 }
 0x5d0   : > { %7623 = vmatmul.mubr.msk.bf16.vlgmr.msra.gmra.mrb[232].mxu0 %vm6594_vm3, %v10103_v58 }
 0x5d1   : > { %7624 = vmatmul.mubr.msk.bf16.vlgmr.msra.gmra.mrb[232].mxu1 %vm6594_vm3, %v10103_v58  ;;  %6888 = vmatprep.mubr.bf16.mxu0 %v7735_v0 }
 0x5d2   : > { %6931 = vmatprep.mubr.bf16.mxu1 %v7735_v0 }
 0x5f8   : > { %v6409_v1 = vpop.f32.mrb[216].mxu0 }
 0x5f9   : > { %v6462_v5 = vpop.f32.mrb[216].mxu1  ;;  %v6411_v3 = vpop.f32.mrb[217].mxu0  ;;  %v6410_v11 = vadd.f32 %v6409_v1, %v10078_v24 }
 0x5fa   : > { %v6464_v35 = vpop.f32.mrb[217].mxu1  ;;  %v6413_v59 = vpop.f32.mrb[218].mxu0  ;;  %v6463_v60 = vadd.f32 %v6462_v5, %v10078_v24  ;;  %v6412_v41 = vadd.f32 %v6411_v3, %v10078_v24 }
 0x5fb   : > { %v6414_v17 = vadd.f32 %v6413_v59, %v10076_v53  ;;  %v6466_v27 = vpop.f32.mrb[218].mxu1  ;;  %v6415_v25 = vpop.f32.mrb[219].mxu0  ;;  %v6465_v29 = vadd.f32 %v6464_v35, %v10078_v24 }
 0x5fc   : > { %v6467_v30 = vadd.f32 %v6466_v27, %v10076_v53  ;;  %v6416_v55 = vadd.f32 %v6415_v25, %v10076_v53  ;;  %v6468_v0 = vpop.f32.mrb[219].mxu1 }
 0x5fd   : > { %v6493_v61 = vpack.c.bf16 %v6414_v17, %v6410_v11  ;;  %v6469_v48 = vadd.f32 %v6468_v0, %v10076_v53 }
 0x5fe   : > { %v6495_v38 = vpack.c.bf16 %v6467_v30, %v6463_v60  ;;  %v6494_v57 = vpack.c.bf16 %v6416_v55, %v6412_v41 }
 0x5ff   : > { %v6525_v22 = vmul.bf16 1017396388, %v6493_v61  ;;  %v6496_v46 = vpack.c.bf16 %v6469_v48, %v6465_v29 }
 0x600   : > { %v6527_v20 = vmul.bf16 1017396388, %v6495_v38  ;;  %v6526_v12 = vmul.bf16 1017396388, %v6494_v57  ;;  %v6419_v4 = vpop.f32.mrb[220].mxu0 }
 0x601   : > { %v6528_v8 = vmul.bf16 1017396388, %v6496_v46  ;;  %v6472_v42 = vpop.f32.mrb[220].mxu1  ;;  %v6421_v15 = vpop.f32.mrb[221].mxu0  ;;  %v6557_v10 = vmax.bf16 %v6525_v22, %v6493_v61  ;;  %v6420_v24 = vadd.f32 %v6419_v4, %v10090_v51 }
 0x602   : > { %v6474_v6 = vpop.f32.mrb[221].mxu1  ;;  %v6423_v63 = vpop.f32.mrb[222].mxu0  ;;  %v6558_v9 = vmax.bf16 %v6526_v12, %v6494_v57  ;;  %v6559_v44 = vmax.bf16 %v6527_v20, %v6495_v38  ;;  %v6473_v13 = vadd.f32 %v6472_v42, %v10090_v51  ;;  %v6422_v40 = vadd.f32 %v6421_v15, %v10090_v51 }
 0x603   : > { %v6424_v47 = vadd.f32 %v6423_v63, %v10088_v54  ;;  %v6476_v53 = vpop.f32.mrb[222].mxu1  ;;  %v6425_v23 = vpop.f32.mrb[223].mxu0  ;;  %v6560_v33 = vmax.bf16 %v6528_v8, %v6496_v46  ;;  %v6475_v49 = vadd.f32 %v6474_v6, %v10090_v51 }
 0x604   : > { %v6477_v16 = vadd.f32 %v6476_v53, %v10088_v54  ;;  %v6426_v52 = vadd.f32 %v6425_v23, %v10088_v54  ;;  %v6478_v62 = vpop.f32.mrb[223].mxu1  ;;  %6856 = vmatprep.subr.bf16.mxu0 %v6558_v9  ;;  %v10177_v51 = vpop.permute.xlu0 %6581 }
 0x605   : > { %v6509_v2 = vpack.c.bf16 %v6424_v47, %v6420_v24  ;;  %v6479_v50 = vadd.f32 %v6478_v62, %v10088_v54  ;;  %6899 = vmatprep.subr.bf16.mxu1 %v6560_v33  ;;  %6857 = vmatpush1.bf16.msra.mxu0 %v6557_v10  ;;  %v10175_v54 = vpop.permute.xlu1 %6586 }
 0x606   : > { %v6511_v14 = vpack.c.bf16 %v6477_v16, %v6473_v13  ;;  %v6510_v7 = vpack.c.bf16 %v6426_v52, %v6422_v40  ;;  %6900 = vmatpush1.bf16.msra.mxu1 %v6559_v44 }
 0x607   : > { %v6541_v36 = vmul.bf16 1017396388, %v6509_v2  ;;  %v6512_v56 = vpack.c.bf16 %v6479_v50, %v6475_v49 }
 0x608   : > { %v6543_v37 = vmul.bf16 1017396388, %v6511_v14  ;;  %v6542_v43 = vmul.bf16 1017396388, %v6510_v7  ;;  %v10189_v42 = vpop.permute.xlu0 %7024 }
 0x609   : > { %v6544_v32 = vmul.bf16 1017396388, %v6512_v56  ;;  %v6573_v39 = vmax.bf16 %v6541_v36, %v6509_v2  ;;  %v10187_v8 = vpop.permute.xlu1 %7029 }
 0x60a   : > { %v6574_v45 = vmax.bf16 %v6542_v43, %v6510_v7  ;;  %v6575_v34 = vmax.bf16 %v6543_v37, %v6511_v14 }
 0x60b   : > { %v6576_v31 = vmax.bf16 %v6544_v32, %v6512_v56 }
 0x60c   : > { %6858 = vmatprep.subr.bf16.mxu0 %v6574_v45 }
 0x60d   : > { %6901 = vmatprep.subr.bf16.mxu1 %v6576_v31  ;;  %6859 = vmatpush1.bf16.msra.mxu0 %v6573_v39 }
 0x60e   : > { %6902 = vmatpush1.bf16.msra.mxu1 %v6575_v34  ;;  %v7737_v34 = vmov 1966171168  }
 0x610   : > { %7625 = vmatmul.mubr.msk.bf16.vlgmr.msra.gmra.mrb[236].mxu0 %vm6594_vm3, %v10103_v58 }
 0x611   : > { %7626 = vmatmul.mubr.msk.bf16.vlgmr.msra.gmra.mrb[236].mxu1 %vm6594_vm3, %v10103_v58 }
 0x623   : > { %v6632_v28 = vpop.f32.mrb[224].mxu0 }
 0x624   : > { %v6675_v18 = vpop.f32.mrb[224].mxu1  ;;  %v6634_v19 = vpop.f32.mrb[225].mxu0  ;;  %v6633_v1 = vadd.f32 %v6632_v28, %v10177_v51  ;;  %v7218_v28 = vunpack.c.l.s4 %v7737_v34 }
 0x625   : > { %v6677_v26 = vpop.f32.mrb[225].mxu1  ;;  %v6636_v21 = vpop.f32.mrb[226].mxu0  ;;  %v6676_v59 = vadd.f32 %v6675_v18, %v10177_v51  ;;  %v6635_v11 = vadd.f32 %v6634_v19, %v10177_v51  ;;  %v7220_v18 = vlaneseq }
 0x626   : > { %v6637_v5 = vadd.f32 %v6636_v21, %v10175_v54  ;;  %v6679_v3 = vpop.f32.mrb[226].mxu1  ;;  %v6638_v35 = vpop.f32.mrb[227].mxu0  ;;  %v6678_v25 = vadd.f32 %v6677_v26, %v10177_v51 }
 0x627   : > { %v6680_v58 = vadd.f32 %v6679_v3, %v10175_v54  ;;  %v6639_v17 = vadd.f32 %v6638_v35, %v10175_v54  ;;  %v6681_v27 = vpop.f32.mrb[227].mxu1 }
 0x628   : > { %v6942_v60 = vpack.c.bf16 %v6637_v5, %v6633_v1  ;;  %v6682_v41 = vadd.f32 %v6681_v27, %v10175_v54 }
 0x629   : > { %v6944_v30 = vpack.c.bf16 %v6680_v58, %v6676_v59  ;;  %v6943_v55 = vpack.c.bf16 %v6639_v17, %v6635_v11  ;;  %v7219_v11 = vunpack.c.0.s8 %v7218_v28  ;;  %v7221_v58 = vshrl.u32 %v7220_v18, 7 }
 0x62a   : > { %v6958_v0 = vmul.bf16 1017396388, %v6942_v60  ;;  %v6945_v29 = vpack.c.bf16 %v6682_v41, %v6678_v25  ;;  %v10199_v25 = vpop.permute.xlu0 %7178 }
 0x62b   : > { %v6960_v61 = vmul.bf16 1017396388, %v6944_v30  ;;  %v6959_v48 = vmul.bf16 1017396388, %v6943_v55 }
 0x62c   : > { %v6974_v38 = vmax.bf16 %v6958_v0, %v6942_v60  ;;  %v6961_v57 = vmul.bf16 1017396388, %v6945_v29 }
 0x62d   : > { %v6976_v22 = vmax.bf16 %v6960_v61, %v6944_v30  ;;  %v6975_v46 = vmax.bf16 %v6959_v48, %v6943_v55  ;;  %v10204_v61 = vsub.s32 %v7219_v11, %v7221_v58 }
 0x62e   : > { %v6990_v20 = vunpack.c.l.bf16 %v6974_v38  ;;  %v7006_v12 = vunpack.c.h.bf16 %v6974_v38  ;;  %v6977_v4 = vmax.bf16 %v6961_v57, %v6945_v29 }
 0x62f   : > { %v6992_v15 = vunpack.c.l.bf16 %v6976_v22  ;;  %v7008_v10 = vunpack.c.h.bf16 %v6976_v22  ;;  %v6991_v6 = vunpack.c.l.bf16 %v6975_v46  ;;  %v7007_v63 = vunpack.c.h.bf16 %v6975_v46 }
 0x630   : > { %v7032_v9 = vmul.f32 %v10189_v42, %v6990_v20  ;;  %v7048_v44 = vmul.f32 %v10187_v8, %v7006_v12  ;;  %v6993_v24 = vunpack.c.l.bf16 %v6977_v4  ;;  %v7009_v47 = vunpack.c.h.bf16 %v6977_v4 }
 0x631   : > { %v7034_v53 = vmul.f32 %v10189_v42, %v6992_v15  ;;  %v7050_v23 = vmul.f32 %v10187_v8, %v7008_v10  ;;  %v7033_v33 = vmul.f32 %v10189_v42, %v6991_v6  ;;  %v7049_v13 = vmul.f32 %v10187_v8, %v7007_v63 }
 0x632   : > { %v7064_v40 = vadd.f32 %v7048_v44, %v7032_v9  ;;  %v7035_v16 = vmul.f32 %v10189_v42, %v6993_v24  ;;  %v7051_v52 = vmul.f32 %v10187_v8, %v7009_v47 }
 0x633   : > { %v7078_v62 = vadd.f32 %v7050_v23, %v7034_v53  ;;  %v7071_v49 = vadd.f32 %v7049_v13, %v7033_v33 }
 0x634   : > { %v7065_v2 = vrot.slane %v7064_v40, 4  ;;  %v7085_v50 = vadd.f32 %v7051_v52, %v7035_v16 }
 0x635   : > { %v7079_v14 = vrot.slane %v7078_v62, 4  ;;  %v7072_v7 = vrot.slane %v7071_v49, 4 }
 0x636   : > { %v7066_v36 = vadd.f32 %v7065_v2, %v7064_v40  ;;  %v7086_v56 = vrot.slane %v7085_v50, 4 }
 0x637   : > { %v7080_v37 = vadd.f32 %v7079_v14, %v7078_v62  ;;  %v7073_v43 = vadd.f32 %v7072_v7, %v7071_v49 }
 0x638   : > { %v7067_v32 = vrot.slane %v7066_v36, 2  ;;  %v7087_v45 = vadd.f32 %v7086_v56, %v7085_v50 }
 0x639   : > { %v7081_v39 = vrot.slane %v7080_v37, 2  ;;  %v7074_v31 = vrot.slane %v7073_v43, 2 }
 0x63a   : > { %v7068_v19 = vadd.f32 %v7067_v32, %v7066_v36  ;;  %v7088_v26 = vrot.slane %v7087_v45, 2 }
 0x63b   : > { %v7082_v21 = vadd.f32 %v7081_v39, %v7080_v37  ;;  %v7075_v1 = vadd.f32 %v7074_v31, %v7073_v43 }
 0x63c   : > { %v7069_v5 = vrot.slane %v7068_v19, 1  ;;  %v7089_v3 = vadd.f32 %v7088_v26, %v7087_v45 }
 0x63d   : > { %v7083_v35 = vrot.slane %v7082_v21, 1  ;;  %v7076_v59 = vrot.slane %v7075_v1, 1 }
 0x63e   : > { %v7070_v17 = vadd.f32 %v7069_v5, %v7068_v19  ;;  %v7090_v27 = vrot.slane %v7089_v3, 1 }
 0x63f   : > { %v7084_v60 = vadd.f32 %v7083_v35, %v7082_v21  ;;  %v7077_v41 = vadd.f32 %v7076_v59, %v7075_v1 }
 0x640   : > { %v7181_v30 = vadd.f32 %v10199_v25, %v7070_v17  ;;  %v7091_v55 = vadd.f32 %v7090_v27, %v7089_v3 }
 0x641   : > { %v7183_v0 = vadd.f32 %v10199_v25, %v7084_v60  ;;  %v7182_v29 = vadd.f32 %v10199_v25, %v7077_v41 }
 0x642   : > { %v7184_v48 = vadd.f32 %v10199_v25, %v7091_v55 }
 0x643   : > { %v7213_v38 = vcombine.low %v7181_v30, %v7182_v29 }
 0x644   : > { %v7214_v57 = vcombine.low %v7183_v0, %v7184_v48 }
 0x645   : > { %v10208_v22 = vrot.slane %v7213_v38, %v10204_v61 }
 0x646   : > { %v10211_v46 = vrot.slane %v7214_v57, %v10204_v61 }
 0x648   : > { %v7245_v20 = vcombine.low %v10208_v22, %v10211_v46 }
 0x663   : > { %v6718_v12 = vpop.f32.mrb[228].mxu0 }
 0x664   : > { %v6761_v4 = vpop.f32.mrb[228].mxu1  ;;  %v6720_v15 = vpop.f32.mrb[229].mxu0  ;;  %v6719_v63 = vadd.f32 %v6718_v12, %v10177_v51 }
 0x665   : > { %v6763_v10 = vpop.f32.mrb[229].mxu1  ;;  %v6722_v6 = vpop.f32.mrb[230].mxu0  ;;  %v6762_v47 = vadd.f32 %v6761_v4, %v10177_v51  ;;  %v6721_v53 = vadd.f32 %v6720_v15, %v10177_v51 }
 0x666   : > { %v6723_v9 = vadd.f32 %v6722_v6, %v10175_v54  ;;  %v6765_v44 = vpop.f32.mrb[230].mxu1  ;;  %v6724_v24 = vpop.f32.mrb[231].mxu0  ;;  %v6764_v40 = vadd.f32 %v6763_v10, %v10177_v51 }
 0x667   : > { %v6766_v23 = vadd.f32 %v6765_v44, %v10175_v54  ;;  %v6725_v33 = vadd.f32 %v6724_v24, %v10175_v54  ;;  %v6767_v13 = vpop.f32.mrb[231].mxu1 }
 0x668   : > { %v6946_v16 = vpack.c.bf16 %v6723_v9, %v6719_v63  ;;  %v6768_v52 = vadd.f32 %v6767_v13, %v10175_v54 }
 0x669   : > { %v6948_v62 = vpack.c.bf16 %v6766_v23, %v6762_v47  ;;  %v6947_v49 = vpack.c.bf16 %v6725_v33, %v6721_v53 }
 0x66a   : > { %v6962_v2 = vmul.bf16 1017396388, %v6946_v16  ;;  %v6949_v50 = vpack.c.bf16 %v6768_v52, %v6764_v40 }
 0x66b   : > { %v6964_v14 = vmul.bf16 1017396388, %v6948_v62  ;;  %v6963_v7 = vmul.bf16 1017396388, %v6947_v49 }
 0x66c   : > { %v6978_v36 = vmax.bf16 %v6962_v2, %v6946_v16  ;;  %v6965_v56 = vmul.bf16 1017396388, %v6949_v50 }
 0x66d   : > { %v6980_v37 = vmax.bf16 %v6964_v14, %v6948_v62  ;;  %v6979_v43 = vmax.bf16 %v6963_v7, %v6947_v49 }
 0x66e   : > { %v6994_v32 = vunpack.c.l.bf16 %v6978_v36  ;;  %v7010_v45 = vunpack.c.h.bf16 %v6978_v36  ;;  %v6981_v39 = vmax.bf16 %v6965_v56, %v6949_v50 }
 0x66f   : > { %v6996_v31 = vunpack.c.l.bf16 %v6980_v37  ;;  %v7012_v34 = vunpack.c.h.bf16 %v6980_v37  ;;  %v6995_v28 = vunpack.c.l.bf16 %v6979_v43  ;;  %v7011_v18 = vunpack.c.h.bf16 %v6979_v43 }
 0x670   : > { %v7036_v19 = vmul.f32 %v10189_v42, %v6994_v32  ;;  %v7052_v26 = vmul.f32 %v10187_v8, %v7010_v45  ;;  %v6997_v21 = vunpack.c.l.bf16 %v6981_v39  ;;  %v7013_v1 = vunpack.c.h.bf16 %v6981_v39 }
 0x671   : > { %v7038_v5 = vmul.f32 %v10189_v42, %v6996_v31  ;;  %v7054_v3 = vmul.f32 %v10187_v8, %v7012_v34  ;;  %v7037_v35 = vmul.f32 %v10189_v42, %v6995_v28  ;;  %v7053_v59 = vmul.f32 %v10187_v8, %v7011_v18 }
 0x672   : > { %v7092_v11 = vadd.f32 %v7052_v26, %v7036_v19  ;;  %v7039_v58 = vmul.f32 %v10189_v42, %v6997_v21  ;;  %v7055_v17 = vmul.f32 %v10187_v8, %v7013_v1  ;;  %v7253_v43 = vrot.slane %v7245_v20, %v10204_v61 }
 0x673   : > { %v7106_v27 = vadd.f32 %v7054_v3, %v7038_v5  ;;  %v7099_v60 = vadd.f32 %v7053_v59, %v7037_v35 }
 0x674   : > { %v7093_v41 = vrot.slane %v7092_v11, 4  ;;  %v7113_v30 = vadd.f32 %v7055_v17, %v7039_v58 }
 0x675   : > { %v7107_v55 = vrot.slane %v7106_v27, 4  ;;  %v7100_v0 = vrot.slane %v7099_v60, 4 }
 0x676   : > { %v7094_v29 = vadd.f32 %v7093_v41, %v7092_v11  ;;  %v7114_v48 = vrot.slane %v7113_v30, 4 }
 0x677   : > { %v7108_v38 = vadd.f32 %v7107_v55, %v7106_v27  ;;  %v7101_v57 = vadd.f32 %v7100_v0, %v7099_v60 }
 0x678   : > { %v7095_v12 = vrot.slane %v7094_v29, 2  ;;  %v7115_v4 = vadd.f32 %v7114_v48, %v7113_v30 }
 0x679   : > { %v7109_v15 = vrot.slane %v7108_v38, 2  ;;  %v7102_v10 = vrot.slane %v7101_v57, 2 }
 0x67a   : > { %v7096_v6 = vadd.f32 %v7095_v12, %v7094_v29  ;;  %v7116_v63 = vrot.slane %v7115_v4, 2 }
 0x67b   : > { %v7110_v9 = vadd.f32 %v7109_v15, %v7108_v38  ;;  %v7103_v44 = vadd.f32 %v7102_v10, %v7101_v57 }
 0x67c   : > { %v7097_v24 = vrot.slane %v7096_v6, 1  ;;  %v7117_v47 = vadd.f32 %v7116_v63, %v7115_v4 }
 0x67d   : > { %v7111_v53 = vrot.slane %v7110_v9, 1  ;;  %v7104_v23 = vrot.slane %v7103_v44, 1 }
 0x67e   : > { %v7098_v33 = vadd.f32 %v7097_v24, %v7096_v6  ;;  %v7118_v13 = vrot.slane %v7117_v47, 1 }
 0x67f   : > { %v7112_v40 = vadd.f32 %v7111_v53, %v7110_v9  ;;  %v7105_v16 = vadd.f32 %v7104_v23, %v7103_v44 }
 0x680   : > { %v7185_v52 = vadd.f32 %v10199_v25, %v7098_v33  ;;  %v7119_v62 = vadd.f32 %v7118_v13, %v7117_v47 }
 0x681   : > { %v7187_v49 = vadd.f32 %v10199_v25, %v7112_v40  ;;  %v7186_v2 = vadd.f32 %v10199_v25, %v7105_v16 }
 0x682   : > { %v7188_v50 = vadd.f32 %v10199_v25, %v7119_v62 }
 0x683   : > { %v7215_v14 = vcombine.low %v7185_v52, %v7186_v2 }
 0x684   : > { %v7216_v7 = vcombine.low %v7187_v49, %v7188_v50 }
 0x685   : > { %v7237_v36 = vrot.slane %v7215_v14, %v10204_v61 }
 0x686   : > { %v7244_v56 = vrot.slane %v7216_v7, %v10204_v61 }
 0x688   : > { %v7246_v37 = vcombine.low %v7237_v36, %v7244_v56 }
 0x68a   : > { %v7260_v32 = vrot.slane %v7246_v37, %v10204_v61 }
 0x68c   : > { %v7261_v45 = vcombine.low %v7253_v43, %v7260_v32 }
 0x68e   : > { %7313 = vst [vmem:[%s10246_s24] sm:$0xff] %v7261_v45 }
 0x6a3   : > { %v6804_v39 = vpop.f32.mrb[232].mxu0 }
 0x6a4   : > { %v6847_v31 = vpop.f32.mrb[232].mxu1  ;;  %v6806_v34 = vpop.f32.mrb[233].mxu0  ;;  %v6805_v19 = vadd.f32 %v6804_v39, %v10177_v51 }
 0x6a5   : > { %v6849_v28 = vpop.f32.mrb[233].mxu1  ;;  %v6808_v18 = vpop.f32.mrb[234].mxu0  ;;  %v6848_v26 = vadd.f32 %v6847_v31, %v10177_v51  ;;  %v6807_v21 = vadd.f32 %v6806_v34, %v10177_v51 }
 0x6a6   : > { %v6809_v22 = vadd.f32 %v6808_v18, %v10175_v54  ;;  %v6851_v46 = vpop.f32.mrb[234].mxu1  ;;  %v6810_v20 = vpop.f32.mrb[235].mxu0  ;;  %v6850_v35 = vadd.f32 %v6849_v28, %v10177_v51 }
 0x6a7   : > { %v6852_v1 = vadd.f32 %v6851_v46, %v10175_v54  ;;  %v6811_v5 = vadd.f32 %v6810_v20, %v10175_v54  ;;  %v6853_v3 = vpop.f32.mrb[235].mxu1 }
 0x6a8   : > { %v6950_v59 = vpack.c.bf16 %v6809_v22, %v6805_v19  ;;  %v6854_v11 = vadd.f32 %v6853_v3, %v10175_v54 }
 0x6a9   : > { %v6952_v58 = vpack.c.bf16 %v6852_v1, %v6848_v26  ;;  %v6951_v17 = vpack.c.bf16 %v6811_v5, %v6807_v21 }
 0x6aa   : > { %v6966_v27 = vmul.bf16 1017396388, %v6950_v59  ;;  %v6953_v60 = vpack.c.bf16 %v6854_v11, %v6850_v35 }
 0x6ab   : > { %v6968_v41 = vmul.bf16 1017396388, %v6952_v58  ;;  %v6967_v30 = vmul.bf16 1017396388, %v6951_v17 }
 0x6ac   : > { %v6982_v55 = vmax.bf16 %v6966_v27, %v6950_v59  ;;  %v6969_v0 = vmul.bf16 1017396388, %v6953_v60 }
 0x6ad   : > { %v6984_v29 = vmax.bf16 %v6968_v41, %v6952_v58  ;;  %v6983_v48 = vmax.bf16 %v6967_v30, %v6951_v17 }
 0x6ae   : > { %v6998_v38 = vunpack.c.l.bf16 %v6982_v55  ;;  %v7014_v57 = vunpack.c.h.bf16 %v6982_v55  ;;  %v6985_v12 = vmax.bf16 %v6969_v0, %v6953_v60 }
 0x6af   : > { %v7000_v4 = vunpack.c.l.bf16 %v6984_v29  ;;  %v7016_v15 = vunpack.c.h.bf16 %v6984_v29  ;;  %v6999_v10 = vunpack.c.l.bf16 %v6983_v48  ;;  %v7015_v6 = vunpack.c.h.bf16 %v6983_v48 }
 0x6b0   : > { %v7040_v63 = vmul.f32 %v10189_v42, %v6998_v38  ;;  %v7056_v9 = vmul.f32 %v10187_v8, %v7014_v57  ;;  %v7001_v44 = vunpack.c.l.bf16 %v6985_v12  ;;  %v7017_v24 = vunpack.c.h.bf16 %v6985_v12 }
 0x6b1   : > { %v7042_v47 = vmul.f32 %v10189_v42, %v7000_v4  ;;  %v7058_v53 = vmul.f32 %v10187_v8, %v7016_v15  ;;  %v7041_v23 = vmul.f32 %v10189_v42, %v6999_v10  ;;  %v7057_v33 = vmul.f32 %v10187_v8, %v7015_v6 }
 0x6b2   : > { %v7120_v13 = vadd.f32 %v7056_v9, %v7040_v63  ;;  %v7043_v40 = vmul.f32 %v10189_v42, %v7001_v44  ;;  %v7059_v16 = vmul.f32 %v10187_v8, %v7017_v24 }
 0x6b3   : > { %v7134_v52 = vadd.f32 %v7058_v53, %v7042_v47  ;;  %v7127_v62 = vadd.f32 %v7057_v33, %v7041_v23 }
 0x6b4   : > { %v7121_v49 = vrot.slane %v7120_v13, 4  ;;  %v7141_v2 = vadd.f32 %v7059_v16, %v7043_v40 }
 0x6b5   : > { %v7135_v50 = vrot.slane %v7134_v52, 4  ;;  %v7128_v14 = vrot.slane %v7127_v62, 4 }
 0x6b6   : > { %v7122_v7 = vadd.f32 %v7121_v49, %v7120_v13  ;;  %v7142_v36 = vrot.slane %v7141_v2, 4 }
 0x6b7   : > { %v7136_v56 = vadd.f32 %v7135_v50, %v7134_v52  ;;  %v7129_v37 = vadd.f32 %v7128_v14, %v7127_v62 }
 0x6b8   : > { %v7123_v43 = vrot.slane %v7122_v7, 2  ;;  %v7143_v32 = vadd.f32 %v7142_v36, %v7141_v2 }
 0x6b9   : > { %v7137_v45 = vrot.slane %v7136_v56, 2  ;;  %v7130_v39 = vrot.slane %v7129_v37, 2 }
 0x6ba   : > { %v7124_v31 = vadd.f32 %v7123_v43, %v7122_v7  ;;  %v7144_v34 = vrot.slane %v7143_v32, 2 }
 0x6bb   : > { %v7138_v28 = vadd.f32 %v7137_v45, %v7136_v56  ;;  %v7131_v18 = vadd.f32 %v7130_v39, %v7129_v37 }
 0x6bc   : > { %v7125_v19 = vrot.slane %v7124_v31, 1  ;;  %v7145_v22 = vadd.f32 %v7144_v34, %v7143_v32 }
 0x6bd   : > { %v7139_v46 = vrot.slane %v7138_v28, 1  ;;  %v7132_v20 = vrot.slane %v7131_v18, 1 }
 0x6be   : > { %v7126_v26 = vadd.f32 %v7125_v19, %v7124_v31  ;;  %v7146_v21 = vrot.slane %v7145_v22, 1 }
 0x6bf   : > { %v7140_v1 = vadd.f32 %v7139_v46, %v7138_v28  ;;  %v7133_v5 = vadd.f32 %v7132_v20, %v7131_v18 }
 0x6c0   : > { %v7189_v3 = vadd.f32 %v10199_v25, %v7126_v26  ;;  %v7147_v35 = vadd.f32 %v7146_v21, %v7145_v22 }
 0x6c1   : > { %v7191_v59 = vadd.f32 %v10199_v25, %v7140_v1  ;;  %v7190_v11 = vadd.f32 %v10199_v25, %v7133_v5 }
 0x6c2   : > { %v7192_v58 = vadd.f32 %v10199_v25, %v7147_v35 }
 0x6c3   : > { %v7262_v17 = vcombine.low %v7189_v3, %v7190_v11 }
 0x6c4   : > { %v7263_v27 = vcombine.low %v7191_v59, %v7192_v58 }
 0x6c5   : > { %v10270_v60 = vrot.slane %v7262_v17, %v10204_v61 }
 0x6c6   : > { %v10273_v41 = vrot.slane %v7263_v27, %v10204_v61 }
 0x6c8   : > { %v7294_v30 = vcombine.low %v10270_v60, %v10273_v41 }
 0x6e3   : > { %v6890_v55 = vpop.f32.mrb[236].mxu0 }
 0x6e4   : > { %v6933_v0 = vpop.f32.mrb[236].mxu1  ;;  %v6892_v29 = vpop.f32.mrb[237].mxu0  ;;  %v6891_v57 = vadd.f32 %v6890_v55, %v10177_v51 }
 0x6e5   : > { %v6935_v48 = vpop.f32.mrb[237].mxu1  ;;  %v6894_v38 = vpop.f32.mrb[238].mxu0  ;;  %v6934_v10 = vadd.f32 %v6933_v0, %v10177_v51  ;;  %v6893_v6 = vadd.f32 %v6892_v29, %v10177_v51 }
 0x6e6   : > { %v6895_v12 = vadd.f32 %v6894_v38, %v10175_v54  ;;  %v6937_v4 = vpop.f32.mrb[238].mxu1  ;;  %v6896_v15 = vpop.f32.mrb[239].mxu0  ;;  %v6936_v24 = vadd.f32 %v6935_v48, %v10177_v51 }
 0x6e7   : > { %v6938_v63 = vadd.f32 %v6937_v4, %v10175_v54  ;;  %v6897_v9 = vadd.f32 %v6896_v15, %v10175_v54  ;;  %v6939_v44 = vpop.f32.mrb[239].mxu1 }
 0x6e8   : > { %v6954_v47 = vpack.c.bf16 %v6895_v12, %v6891_v57  ;;  %v6940_v53 = vadd.f32 %v6939_v44, %v10175_v54 }
 0x6e9   : > { %v6956_v23 = vpack.c.bf16 %v6938_v63, %v6934_v10  ;;  %v6955_v33 = vpack.c.bf16 %v6897_v9, %v6893_v6 }
 0x6ea   : > { %v6970_v13 = vmul.bf16 1017396388, %v6954_v47  ;;  %v6957_v40 = vpack.c.bf16 %v6940_v53, %v6936_v24 }
 0x6eb   : > { %v6972_v16 = vmul.bf16 1017396388, %v6956_v23  ;;  %v6971_v52 = vmul.bf16 1017396388, %v6955_v33 }
 0x6ec   : > { %v6986_v62 = vmax.bf16 %v6970_v13, %v6954_v47  ;;  %v6973_v49 = vmul.bf16 1017396388, %v6957_v40 }
 0x6ed   : > { %v6988_v2 = vmax.bf16 %v6972_v16, %v6956_v23  ;;  %v6987_v50 = vmax.bf16 %v6971_v52, %v6955_v33  ;;  %v7302_v52 = vrot.slane %v7294_v30, %v10204_v61 }
 0x6ee   : > { %v7002_v14 = vunpack.c.l.bf16 %v6986_v62  ;;  %v7018_v7 = vunpack.c.h.bf16 %v6986_v62  ;;  %v6989_v36 = vmax.bf16 %v6973_v49, %v6957_v40 }
 0x6ef   : > { %v7004_v56 = vunpack.c.l.bf16 %v6988_v2  ;;  %v7020_v37 = vunpack.c.h.bf16 %v6988_v2  ;;  %v7003_v43 = vunpack.c.l.bf16 %v6987_v50  ;;  %v7019_v51 = vunpack.c.h.bf16 %v6987_v50 }
 0x6f0   : > { %v7044_v32 = vmul.f32 %v10189_v42, %v7002_v14  ;;  %v7060_v54 = vmul.f32 %v10187_v8, %v7018_v7  ;;  %v7005_v45 = vunpack.c.l.bf16 %v6989_v36  ;;  %v7021_v39 = vunpack.c.h.bf16 %v6989_v36 }
 0x6f1   : > { %v7046_v31 = vmul.f32 %v10189_v42, %v7004_v56  ;;  %v7062_v34 = vmul.f32 %v10187_v8, %v7020_v37  ;;  %v7045_v28 = vmul.f32 %v10189_v42, %v7003_v43  ;;  %v7061_v18 = vmul.f32 %v10187_v8, %v7019_v51 }
 0x6f2   : > { %v7148_v19 = vadd.f32 %v7060_v54, %v7044_v32  ;;  %v7047_v22 = vmul.f32 %v10189_v42, %v7005_v45  ;;  %v7063_v46 = vmul.f32 %v10187_v8, %v7021_v39 }
 0x6f3   : > { %v7162_v20 = vadd.f32 %v7062_v34, %v7046_v31  ;;  %v7155_v26 = vadd.f32 %v7061_v18, %v7045_v28 }
 0x6f4   : > { %v7149_v21 = vrot.slane %v7148_v19, 4  ;;  %v7169_v1 = vadd.f32 %v7063_v46, %v7047_v22 }
 0x6f5   : > { %v7163_v5 = vrot.slane %v7162_v20, 4  ;;  %v7156_v3 = vrot.slane %v7155_v26, 4 }
 0x6f6   : > { %v7150_v35 = vadd.f32 %v7149_v21, %v7148_v19  ;;  %v7170_v59 = vrot.slane %v7169_v1, 4 }
 0x6f7   : > { %v7164_v11 = vadd.f32 %v7163_v5, %v7162_v20  ;;  %v7157_v58 = vadd.f32 %v7156_v3, %v7155_v26 }
 0x6f8   : > { %v7151_v17 = vrot.slane %v7150_v35, 2  ;;  %v7171_v27 = vadd.f32 %v7170_v59, %v7169_v1 }
 0x6f9   : > { %v7165_v55 = vrot.slane %v7164_v11, 2  ;;  %v7158_v0 = vrot.slane %v7157_v58, 2 }
 0x6fa   : > { %v7152_v29 = vadd.f32 %v7151_v17, %v7150_v35  ;;  %v7172_v48 = vrot.slane %v7171_v27, 2 }
 0x6fb   : > { %v7166_v38 = vadd.f32 %v7165_v55, %v7164_v11  ;;  %v7159_v42 = vadd.f32 %v7158_v0, %v7157_v58 }
 0x6fc   : > { %v7153_v57 = vrot.slane %v7152_v29, 1  ;;  %v7173_v8 = vadd.f32 %v7172_v48, %v7171_v27 }
 0x6fd   : > { %v7167_v12 = vrot.slane %v7166_v38, 1  ;;  %v7160_v4 = vrot.slane %v7159_v42, 1 }
 0x6fe   : > { %v7154_v15 = vadd.f32 %v7153_v57, %v7152_v29  ;;  %v7174_v10 = vrot.slane %v7173_v8, 1 }
 0x6ff   : > { %v7168_v6 = vadd.f32 %v7167_v12, %v7166_v38  ;;  %v7161_v63 = vadd.f32 %v7160_v4, %v7159_v42 }
 0x700   : > { %v7193_v9 = vadd.f32 %v10199_v25, %v7154_v15  ;;  %v7175_v44 = vadd.f32 %v7174_v10, %v7173_v8 }
 0x701   : > { %v7195_v24 = vadd.f32 %v10199_v25, %v7168_v6  ;;  %v7194_v47 = vadd.f32 %v10199_v25, %v7161_v63 }
 0x702   : > { %v7196_v53 = vadd.f32 %v10199_v25, %v7175_v44 }
 0x703   : > { %v7264_v23 = vcombine.low %v7193_v9, %v7194_v47 }
 0x704   : > { %v7265_v33 = vcombine.low %v7195_v24, %v7196_v53 }
 0x705   : > { %v7286_v13 = vrot.slane %v7264_v23, %v10204_v61 }
 0x706   : > { %v7293_v40 = vrot.slane %v7265_v33, %v10204_v61 }
 0x708   : > { %v7295_v16 = vcombine.low %v7286_v13, %v7293_v40 }
 0x70a   : > { %v7309_v62 = vrot.slane %v7295_v16, %v10204_v61 }
 0x70c   : > { %v7310_v49 = vcombine.low %v7302_v52, %v7309_v62 }
 0x70e   : > { %7314 = vst [vmem:[%s10246_s24 + $0x8] sm:$0xff] %v7310_v49 }
 0x70f PF: > { %s18_s29 = sadd.s32 1, %s7733_s29   ;;  %s10323_s27 = smov %s7729_s28 }
 0x710   : > { %p15_p5 = scmp.ge.s32.totalorder %s18_s29, 4   ;;  %s10324_s28 = smov %s10326_s30 }
 0x712   :  { %17 = sbr.rel (!%p15_p5) target bundleno = 2 (0x2), region = 86 }

</bundles_post_ra>
